<compile_context>
chip_gen: v7x
topology: tpu7x:2x2x1
jax: 0.10.0
libtpu: 0.0.40
codegen_flags: <defaults>
</compile_context>

<pallas_src>
import functools

import jax
import jax.numpy as jnp
from jax.experimental import pallas as pl
from jax.experimental.pallas import tpu as pltpu

NUM_CONV = 2
BN_EPS = 1e-4


# ----------------------------------------------------------------------------
# Fused Pallas kernel: one grid step == one batch element, all activations in
# VMEM / vregs.
# ----------------------------------------------------------------------------
def _fused_head_kernel(x_ref, convw_ref, convb_ref, qkvw_ref, outw_ref,
                       decw_ref, decb_ref, predw_ref, predb_ref,
                       out_bb_ref, out_m_ref,
                       pbuf, xcol, xpix, r2d,
                       *, H, W, C, NC, scale):
    WC = W * C
    # Zero the padded conv scratch once per grid step; the 1-pixel border
    # stays zero while the interior is rewritten before every conv.
    pbuf[...] = jnp.zeros_like(pbuf)

    def conv3x3_relu(act2d, k):
        # act2d: (H, W*C) channels-last row layout. Padded scratch pbuf is
        # (H+2, (W+2)*C); write interior, then gather the 9 shifted slabs
        # into the im2col buffer (all static ref slices, stays in VMEM).
        pbuf[1:H + 1, C:C + WC] = act2d
        s = 0
        for dh in range(3):
            for dw in range(3):
                xcol[:, s * WC:(s + 1) * WC] = pbuf[dh:dh + H,
                                                    dw * C:dw * C + WC]
                s += 1
        y = jnp.dot(xcol[...], convw_ref[k],
                    preferred_element_type=jnp.float32)
        y = y + convb_ref[k]
        return jnp.maximum(y, 0.0)

    def attention(act2d, a):
        # (H, W*C) -> pixel-major (W*H, C). Pixel enumeration order does not
        # change softmax attention as long as it is applied consistently.
        for w in range(W):
            xpix[w * H:(w + 1) * H, :] = act2d[:, w * C:(w + 1) * C]
        xp = xpix[...]
        qkv = jnp.dot(xp, qkvw_ref[a], preferred_element_type=jnp.float32)
        q = qkv[:, 0:C]
        k = qkv[:, C:2 * C]
        v = qkv[:, 2 * C:3 * C]
        s = jax.lax.dot_general(q, k, (((1,), (1,)), ((), ())),
                                preferred_element_type=jnp.float32) * scale
        s = s - jnp.max(s, axis=-1, keepdims=True)
        p = jnp.exp(s)
        p = p * pl.reciprocal(jnp.sum(p, axis=-1, keepdims=True), approx=True)
        rel = jnp.dot(p, v, preferred_element_type=jnp.float32)
        # 1x1 output transform with eval-mode BatchNorm blocker folded in.
        # TODO(synk): training-mode BatchNorm (batch statistics) not implemented.
        rel = jnp.dot(rel, outw_ref[a], preferred_element_type=jnp.float32)
        for w in range(W):
            r2d[:, w * C:(w + 1) * C] = rel[w * H:(w + 1) * H, :]
        return act2d + r2d[...]

    def deconv_pred(act2d, pair):
        # Two deconvs sharing `act2d` fused into one matmul (folded weights),
        # then their two 1x1 predictors fused into one block-diag matmul.
        d = jnp.dot(act2d, decw_ref[pair], preferred_element_type=jnp.float32)
        d = jnp.maximum(d + decb_ref[pair], 0.0)
        y = jnp.dot(d, predw_ref[pair], preferred_element_type=jnp.float32)
        return y + predb_ref[pair]

    x0 = x_ref[0]                            # (H, W*C), original input

    # --- boundary branch ----------------------------------------------------
    xb = conv3x3_relu(x0, 0)                 # boundary_fcn1
    xb = conv3x3_relu(xb, 1)                 # boundary_fcn2
    xb = attention(xb, 0)                    # bound_bo attention + residual
    out_bb_ref[0] = deconv_pred(xb, 0)       # [boundary_bo | mask_bo] slab

    # --- mask branch (residual with original input) --------------------------
    xm = x0 + xb
    xm = conv3x3_relu(xm, 2)                 # mask_fcn1
    xm = conv3x3_relu(xm, 3)                 # mask_fcn2
    xm = attention(xm, 1)                    # bound attention + residual
    out_m_ref[0] = deconv_pred(xm, 1)        # [mask | boundary] slab


# ----------------------------------------------------------------------------
# Wrapper-side weight packing (block-diagonal folds, done once per call on
# tiny tensors; all the heavy lifting is inside the fused kernel).
# ----------------------------------------------------------------------------
def _conv_bd(w_oihw, b, W):
    """3x3 conv (OIHW) -> block-diag (9*W*Ci, W*Co) for the (H, W*C) layout."""
    Co, Ci, KH, KW = w_oihw.shape
    wmat = jnp.transpose(w_oihw, (2, 3, 1, 0))               # (3,3,Ci,Co)
    eye = jnp.eye(W, dtype=jnp.float32)
    bd = jnp.einsum('xy,hkio->hkxiyo', eye, wmat)            # (3,3,W,Ci,W,Co)
    bd = bd.reshape(KH * KW * W * Ci, W * Co)
    brow = jnp.tile(b, (W,)).reshape(1, W * Co)
    return bd, brow


def _deconv_bd(w_iohw, b, W):
    """ConvTranspose2d(k=2,s=2) weight (Ci,Co,2,2) -> (W*Ci, W*4*Co) fold."""
    Ci, Co, KH, KW = w_iohw.shape
    wmat = jnp.transpose(w_iohw, (2, 3, 0, 1)).reshape(KH * KW, Ci, Co)
    eye = jnp.eye(W, dtype=jnp.float32)
    bd = jnp.einsum('xy,dio->xiydo', eye, wmat)              # (W,Ci,W,4,Co)
    bd = bd.reshape(W * Ci, W * KH * KW * Co)
    brow = jnp.tile(b, (W * KH * KW,)).reshape(1, W * KH * KW * Co)
    return bd, brow


def _pred_bd(w_oi, b, W):
    """1x1 predictor (NC, Co) applied per (w, kh, kw) group -> block-diag."""
    NC, Co = w_oi.shape
    nG = W * 4
    eye = jnp.eye(nG, dtype=jnp.float32)
    bd = jnp.einsum('gh,mo->gohm', eye, w_oi)                # (nG,Co,nG,NC)
    bd = bd.reshape(nG * Co, nG * NC)
    brow = jnp.tile(b, (nG,)).reshape(1, nG * NC)
    return bd, brow


def _pair_dec_pred(p, dec_names, pred_names, W):
    """Fold a pair of deconvs (shared input) and their predictors."""
    d0w, d0b = _deconv_bd(p[dec_names[0] + "_w"], p[dec_names[0] + "_b"], W)
    d1w, d1b = _deconv_bd(p[dec_names[1] + "_w"], p[dec_names[1] + "_b"], W)
    dec_w = jnp.concatenate([d0w, d1w], axis=1)
    dec_b = jnp.concatenate([d0b, d1b], axis=1)

    p0w, p0b = _pred_bd(p[pred_names[0] + "_w"][:, :, 0, 0],
                        p[pred_names[0] + "_b"], W)
    p1w, p1b = _pred_bd(p[pred_names[1] + "_w"][:, :, 0, 0],
                        p[pred_names[1] + "_b"], W)
    r, c = p0w.shape
    pred_w = jnp.zeros((2 * r, 2 * c), jnp.float32)
    pred_w = pred_w.at[:r, :c].set(p0w).at[r:, c:].set(p1w)
    pred_b = jnp.concatenate([p0b, p1b], axis=1)
    return dec_w, dec_b, pred_w, pred_b


# ----------------------------------------------------------------------------
# Full forward (matches MaskRCNNConvUpsampleHead.forward)
# ----------------------------------------------------------------------------
def mask_head_forward(x_nchw, params, scale):
    B, C, H, W = x_nchw.shape
    NC = params["predictor_w"].shape[0]
    Co = params["deconv_w"].shape[1]
    assert Co == C, "this config uses conv_dims == input_channels"

    # NCHW -> (B, H, W*C) channels-last row layout (one tiny XLA transpose).
    x2d = jnp.transpose(x_nchw, (0, 2, 3, 1)).astype(jnp.float32)
    x2d = x2d.reshape(B, H, W * C)

    # conv block-diag weights: boundary_fcn1/2, mask_fcn1/2
    conv_w_l, conv_b_l = [], []
    for name in ("boundary_fcn1", "boundary_fcn2", "mask_fcn1", "mask_fcn2"):
        bd, brow = _conv_bd(params[name + "_w"], params[name + "_b"], W)
        conv_w_l.append(bd)
        conv_b_l.append(brow)
    conv_w = jnp.stack(conv_w_l, axis=0)             # (4, 9*W*C, W*C)
    conv_b = jnp.stack(conv_b_l, axis=0)             # (4, 1, W*C)

    # attention weights: [bound_bo, bound]; QKV concatenated along N.
    bn_scale = 1.0 / jnp.sqrt(jnp.float32(1.0 + BN_EPS))
    qkv_l, out_l = [], []
    for prefix in ("bound_bo", "bound"):
        wq = params[prefix + "_q"][:, :, 0, 0].T
        wk = params[prefix + "_k"][:, :, 0, 0].T
        wv = params[prefix + "_v"][:, :, 0, 0].T
        qkv_l.append(jnp.concatenate([wq, wk, wv], axis=1))
        out_l.append(params[prefix + "_out"][:, :, 0, 0].T * bn_scale)
    qkv_w = jnp.stack(qkv_l, axis=0)                 # (2, C, 3C)
    out_w = jnp.stack(out_l, axis=0)                 # (2, C, C)

    # deconv + predictor pairs (pair 0: boundary-branch input; pair 1: mask)
    d0w, d0b, p0w, p0b = _pair_dec_pred(
        params, ("boundary_deconv_bo", "bo_deconv"),
        ("boundary_predictor_bo", "predictor_bo"), W)
    d1w, d1b, p1w, p1b = _pair_dec_pred(
        params, ("deconv", "boundary_deconv"),
        ("predictor", "boundary_predictor"), W)
    dec_w = jnp.stack([d0w, d1w], axis=0)            # (2, W*C, 2*W*4*C)
    dec_b = jnp.stack([d0b, d1b], axis=0)            # (2, 1, 2*W*4*C)
    pred_w = jnp.stack([p0w, p1w], axis=0)           # (2, 2*W*4*C, 2*W*4*NC)
    pred_b = jnp.stack([p0b, p1b], axis=0)           # (2, 1, 2*W*4*NC)

    n_pred = 2 * W * 4 * NC                          # output slab width

    kernel = functools.partial(_fused_head_kernel,
                               H=H, W=W, C=C, NC=NC, scale=scale)

    # Advisory cost estimate (per full call).
    flops = 2 * B * (
        4 * H * (9 * W * C) * (W * C)                     # conv matmuls
        + 2 * ((H * W) * C * 3 * C + 2 * (H * W) * (H * W) * C
               + (H * W) * C * C)                         # attention
        + H * (W * C) * (2 * W * 4 * C)                   # deconv pairs
        + H * (2 * W * 4 * C) * n_pred)                   # predictor pairs
    bytes_accessed = 4 * (x2d.size + conv_w.size + conv_b.size + qkv_w.size
                          + out_w.size + dec_w.size + dec_b.size + pred_w.size
                          + pred_b.size + 2 * B * H * n_pred)
    cost = pl.CostEstimate(flops=int(flops),
                           transcendentals=int(2 * B * (H * W) * (H * W)),
                           bytes_accessed=int(bytes_accessed))

    out_bb, out_m = pl.pallas_call(
        kernel,
        out_shape=(jax.ShapeDtypeStruct((B, H, n_pred), jnp.float32),
                   jax.ShapeDtypeStruct((B, H, n_pred), jnp.float32)),
        grid_spec=pltpu.PrefetchScalarGridSpec(
            num_scalar_prefetch=0,
            grid=(B,),
            in_specs=[
                pl.BlockSpec((1, H, W * C), lambda b: (b, 0, 0)),
                pl.BlockSpec(conv_w.shape, lambda b: (0, 0, 0)),
                pl.BlockSpec(conv_b.shape, lambda b: (0, 0, 0)),
                pl.BlockSpec(qkv_w.shape, lambda b: (0, 0, 0)),
                pl.BlockSpec(out_w.shape, lambda b: (0, 0, 0)),
                pl.BlockSpec(dec_w.shape, lambda b: (0, 0, 0)),
                pl.BlockSpec(dec_b.shape, lambda b: (0, 0, 0)),
                pl.BlockSpec(pred_w.shape, lambda b: (0, 0, 0)),
                pl.BlockSpec(pred_b.shape, lambda b: (0, 0, 0)),
            ],
            out_specs=[
                pl.BlockSpec((1, H, n_pred), lambda b: (b, 0, 0)),
                pl.BlockSpec((1, H, n_pred), lambda b: (b, 0, 0)),
            ],
            scratch_shapes=[
                pltpu.VMEM((H + 2, (W + 2) * C), jnp.float32),  # padded conv tile
                pltpu.VMEM((H, 9 * W * C), jnp.float32),        # im2col buffer
                pltpu.VMEM((H * W, C), jnp.float32),            # pixel-major act
                pltpu.VMEM((H, W * C), jnp.float32),            # attention out
            ]),
        compiler_params=pltpu.CompilerParams(
            dimension_semantics=("parallel",),
            vmem_limit_bytes=32 * 1024 * 1024),
        cost_estimate=cost,
    )(x2d, conv_w, conv_b, qkv_w, out_w, dec_w, dec_b, pred_w, pred_b)

    half = W * 4 * NC

    def slab_to_nchw(slab):
        # slab[b, h, w*4*NC + (kh*2+kw)*NC + m] -> out[b, m, 2h+kh, 2w+kw]
        t = slab.reshape(B, H, W, 2, 2, NC)
        t = jnp.transpose(t, (0, 5, 1, 3, 2, 4))
        return t.reshape(B, NC, 2 * H, 2 * W)

    boundary_bo = slab_to_nchw(out_bb[:, :, :half])
    mask_bo = slab_to_nchw(out_bb[:, :, half:])
    mask = slab_to_nchw(out_m[:, :, :half])
    boundary = slab_to_nchw(out_m[:, :, half:])
    return mask, boundary, mask_bo, boundary_bo


# ----------------------------------------------------------------------------
# Deterministic synthetic parameter init (shapes mirror the PyTorch __init__)
# ----------------------------------------------------------------------------
def init_params(key, cin, conv_dims, num_conv, num_mask_classes):
    keys = iter(jax.random.split(key, 64))

    def nrm(shape, std=0.1):
        return jax.random.normal(next(keys), shape, jnp.float32) * std

    p = {}
    for k in range(num_conv):
        ci = cin if k == 0 else conv_dims
        p[f"boundary_fcn{k+1}_w"] = nrm((conv_dims, ci, 3, 3))
        p[f"boundary_fcn{k+1}_b"] = nrm((conv_dims,))
        p[f"mask_fcn{k+1}_w"] = nrm((conv_dims, ci, 3, 3))
        p[f"mask_fcn{k+1}_b"] = nrm((conv_dims,))
    for prefix in ("bound_bo", "bound"):
        for t in ("q", "k", "v", "out"):
            p[f"{prefix}_{t}"] = nrm((cin, cin, 1, 1))
    for name in ("deconv", "bo_deconv", "boundary_deconv", "boundary_deconv_bo"):
        p[name + "_w"] = nrm((conv_dims, conv_dims, 2, 2))  # (Cin, Cout, kh, kw)
        p[name + "_b"] = nrm((conv_dims,))
    for name in ("predictor", "predictor_bo", "boundary_predictor",
                 "boundary_predictor_bo"):
        p[name + "_w"] = nrm((num_mask_classes, conv_dims, 1, 1), std=0.001)
        p[name + "_b"] = jnp.zeros((num_mask_classes,), jnp.float32)
    return p


if __name__ == "__main__":
    B, C, H, W = 2, 4, 16, 16
    conv_dims = C            # attention / residual require conv_dims == C
    num_mask_classes = 4
    scale = 1.0 / (C ** 0.5)

    key = jax.random.PRNGKey(0)
    kx, kp = jax.random.split(key)
    x = jax.random.normal(kx, (B, C, H, W), jnp.float32)
    params = init_params(kp, C, conv_dims, NUM_CONV, num_mask_classes)

    fwd = jax.jit(functools.partial(mask_head_forward, scale=scale))
    mask, boundary, mask_bo, boundary_bo = fwd(x, params)
    jax.block_until_ready((mask, boundary, mask_bo, boundary_bo))

    for t in (mask, boundary, mask_bo, boundary_bo):
        assert t.shape == (B, num_mask_classes, 2 * H, 2 * W)
        assert bool(jnp.isfinite(t).all())
    print("KERNEL_OK")
</pallas_src>

<mosaic_0001>
module attributes {stable_mosaic.version = 11 : i64} {
  func.func @_fused_head_kernel(%arg0: i32, %arg1: memref<1x16x64xf32, #tpu.memory_space<vmem>>, %arg2: memref<4x576x64xf32, #tpu.memory_space<vmem>>, %arg3: memref<4x1x64xf32, #tpu.memory_space<vmem>>, %arg4: memref<2x4x12xf32, #tpu.memory_space<vmem>>, %arg5: memref<2x4x4xf32, #tpu.memory_space<vmem>>, %arg6: memref<2x64x512xf32, #tpu.memory_space<vmem>>, %arg7: memref<2x1x512xf32, #tpu.memory_space<vmem>>, %arg8: memref<2x512x512xf32, #tpu.memory_space<vmem>>, %arg9: memref<2x1x512xf32, #tpu.memory_space<vmem>>, %arg10: memref<1x16x512xf32, #tpu.memory_space<vmem>>, %arg11: memref<1x16x512xf32, #tpu.memory_space<vmem>>, %arg12: memref<18x72xf32, #tpu.memory_space<vmem>>, %arg13: memref<16x576xf32, #tpu.memory_space<vmem>>, %arg14: memref<256x4xf32, #tpu.memory_space<vmem>>, %arg15: memref<16x64xf32, #tpu.memory_space<vmem>>) attributes {dimension_semantics = [#tpu.dimension_semantics<parallel>], iteration_bounds = array<i64: 2>, scalar_prefetch = 0 : i64, scratch_operands = 4 : i64, tpu.core_type = #tpu.core_type<tc>, window_params = [{transform_indices = @transform_0, window_bounds = array<i64: 1, 16, 64>}, {pipeline_mode = #tpu.pipeline_mode<synchronous>, transform_indices = @transform_1, window_bounds = array<i64: 4, 576, 64>}, {pipeline_mode = #tpu.pipeline_mode<synchronous>, transform_indices = @transform_2, window_bounds = array<i64: 4, 1, 64>}, {pipeline_mode = #tpu.pipeline_mode<synchronous>, transform_indices = @transform_3, window_bounds = array<i64: 2, 4, 12>}, {pipeline_mode = #tpu.pipeline_mode<synchronous>, transform_indices = @transform_4, window_bounds = array<i64: 2, 4, 4>}, {pipeline_mode = #tpu.pipeline_mode<synchronous>, transform_indices = @transform_5, window_bounds = array<i64: 2, 64, 512>}, {pipeline_mode = #tpu.pipeline_mode<synchronous>, transform_indices = @transform_6, window_bounds = array<i64: 2, 1, 512>}, {pipeline_mode = #tpu.pipeline_mode<synchronous>, transform_indices = @transform_7, window_bounds = array<i64: 2, 512, 512>}, {pipeline_mode = #tpu.pipeline_mode<synchronous>, transform_indices = @transform_8, window_bounds = array<i64: 2, 1, 512>}, {transform_indices = @transform_9, window_bounds = array<i64: 1, 16, 512>}, {transform_indices = @transform_10, window_bounds = array<i64: 1, 16, 512>}]} {
    %cst = arith.constant 0.000000e+00 : f32
    %0 = vector.broadcast %cst : f32 to vector<18x72xf32>
    %c0 = arith.constant 0 : index
    %c0_0 = arith.constant 0 : index
    %1 = vector.load %arg12[%c0, %c0_0] : memref<18x72xf32, #tpu.memory_space<vmem>>, vector<18x72xf32>
    tpu.vector_store %arg12[%c0, %c0_0], %0 {strides = array<i32>} : memref<18x72xf32, #tpu.memory_space<vmem>>, vector<18x72xf32>,
    %c0_1 = arith.constant 0 : index
    %c0_2 = arith.constant 0 : index
    %c0_3 = arith.constant 0 : index
    %2 = vector.load %arg1[%c0_1, %c0_2, %c0_3] : memref<1x16x64xf32, #tpu.memory_space<vmem>>, vector<1x16x64xf32>
    %3 = vector.shape_cast %2 : vector<1x16x64xf32> to vector<16x64xf32>
    %c1 = arith.constant 1 : index
    %c4 = arith.constant 4 : index
    %4 = vector.load %arg12[%c1, %c4] : memref<18x72xf32, #tpu.memory_space<vmem>>, vector<16x64xf32>
    tpu.vector_store %arg12[%c1, %c4], %3 {strides = array<i32>} : memref<18x72xf32, #tpu.memory_space<vmem>>, vector<16x64xf32>,
    %c0_4 = arith.constant 0 : index
    %c0_5 = arith.constant 0 : index
    %5 = vector.load %arg12[%c0_4, %c0_5] : memref<18x72xf32, #tpu.memory_space<vmem>>, vector<16x64xf32>
    %c0_6 = arith.constant 0 : index
    %c0_7 = arith.constant 0 : index
    %6 = vector.load %arg13[%c0_6, %c0_7] : memref<16x576xf32, #tpu.memory_space<vmem>>, vector<16x64xf32>
    tpu.vector_store %arg13[%c0_6, %c0_7], %5 {strides = array<i32>} : memref<16x576xf32, #tpu.memory_space<vmem>>, vector<16x64xf32>,
    %c0_8 = arith.constant 0 : index
    %c4_9 = arith.constant 4 : index
    %7 = vector.load %arg12[%c0_8, %c4_9] : memref<18x72xf32, #tpu.memory_space<vmem>>, vector<16x64xf32>
    %c0_10 = arith.constant 0 : index
    %c64 = arith.constant 64 : index
    %8 = vector.load %arg13[%c0_10, %c64] : memref<16x576xf32, #tpu.memory_space<vmem>>, vector<16x64xf32>
    tpu.vector_store %arg13[%c0_10, %c64], %7 {strides = array<i32>} : memref<16x576xf32, #tpu.memory_space<vmem>>, vector<16x64xf32>,
    %c0_11 = arith.constant 0 : index
    %c8 = arith.constant 8 : index
    %9 = vector.load %arg12[%c0_11, %c8] : memref<18x72xf32, #tpu.memory_space<vmem>>, vector<16x64xf32>
    %c0_12 = arith.constant 0 : index
    %c128 = arith.constant 128 : index
    %10 = vector.load %arg13[%c0_12, %c128] : memref<16x576xf32, #tpu.memory_space<vmem>>, vector<16x64xf32>
    tpu.vector_store %arg13[%c0_12, %c128], %9 {strides = array<i32>} : memref<16x576xf32, #tpu.memory_space<vmem>>, vector<16x64xf32>,
    %c1_13 = arith.constant 1 : index
    %c0_14 = arith.constant 0 : index
    %11 = vector.load %arg12[%c1_13, %c0_14] : memref<18x72xf32, #tpu.memory_space<vmem>>, vector<16x64xf32>
    %c0_15 = arith.constant 0 : index
    %c192 = arith.constant 192 : index
    %12 = vector.load %arg13[%c0_15, %c192] : memref<16x576xf32, #tpu.memory_space<vmem>>, vector<16x64xf32>
    tpu.vector_store %arg13[%c0_15, %c192], %11 {strides = array<i32>} : memref<16x576xf32, #tpu.memory_space<vmem>>, vector<16x64xf32>,
    %c1_16 = arith.constant 1 : index
    %c4_17 = arith.constant 4 : index
    %13 = vector.load %arg12[%c1_16, %c4_17] : memref<18x72xf32, #tpu.memory_space<vmem>>, vector<16x64xf32>
    %c0_18 = arith.constant 0 : index
    %c256 = arith.constant 256 : index
    %14 = vector.load %arg13[%c0_18, %c256] : memref<16x576xf32, #tpu.memory_space<vmem>>, vector<16x64xf32>
    tpu.vector_store %arg13[%c0_18, %c256], %13 {strides = array<i32>} : memref<16x576xf32, #tpu.memory_space<vmem>>, vector<16x64xf32>,
    %c1_19 = arith.constant 1 : index
    %c8_20 = arith.constant 8 : index
    %15 = vector.load %arg12[%c1_19, %c8_20] : memref<18x72xf32, #tpu.memory_space<vmem>>, vector<16x64xf32>
    %c0_21 = arith.constant 0 : index
    %c320 = arith.constant 320 : index
    %16 = vector.load %arg13[%c0_21, %c320] : memref<16x576xf32, #tpu.memory_space<vmem>>, vector<16x64xf32>
    tpu.vector_store %arg13[%c0_21, %c320], %15 {strides = array<i32>} : memref<16x576xf32, #tpu.memory_space<vmem>>, vector<16x64xf32>,
    %c2 = arith.constant 2 : index
    %c0_22 = arith.constant 0 : index
    %17 = vector.load %arg12[%c2, %c0_22] : memref<18x72xf32, #tpu.memory_space<vmem>>, vector<16x64xf32>
    %c0_23 = arith.constant 0 : index
    %c384 = arith.constant 384 : index
    %18 = vector.load %arg13[%c0_23, %c384] : memref<16x576xf32, #tpu.memory_space<vmem>>, vector<16x64xf32>
    tpu.vector_store %arg13[%c0_23, %c384], %17 {strides = array<i32>} : memref<16x576xf32, #tpu.memory_space<vmem>>, vector<16x64xf32>,
    %c2_24 = arith.constant 2 : index
    %c4_25 = arith.constant 4 : index
    %19 = vector.load %arg12[%c2_24, %c4_25] : memref<18x72xf32, #tpu.memory_space<vmem>>, vector<16x64xf32>
    %c0_26 = arith.constant 0 : index
    %c448 = arith.constant 448 : index
    %20 = vector.load %arg13[%c0_26, %c448] : memref<16x576xf32, #tpu.memory_space<vmem>>, vector<16x64xf32>
    tpu.vector_store %arg13[%c0_26, %c448], %19 {strides = array<i32>} : memref<16x576xf32, #tpu.memory_space<vmem>>, vector<16x64xf32>,
    %c2_27 = arith.constant 2 : index
    %c8_28 = arith.constant 8 : index
    %21 = vector.load %arg12[%c2_27, %c8_28] : memref<18x72xf32, #tpu.memory_space<vmem>>, vector<16x64xf32>
    %c0_29 = arith.constant 0 : index
    %c512 = arith.constant 512 : index
    %22 = vector.load %arg13[%c0_29, %c512] : memref<16x576xf32, #tpu.memory_space<vmem>>, vector<16x64xf32>
    tpu.vector_store %arg13[%c0_29, %c512], %21 {strides = array<i32>} : memref<16x576xf32, #tpu.memory_space<vmem>>, vector<16x64xf32>,
    %c0_30 = arith.constant 0 : index
    %c0_31 = arith.constant 0 : index
    %23 = vector.load %arg13[%c0_30, %c0_31] : memref<16x576xf32, #tpu.memory_space<vmem>>, vector<16x576xf32>
    %c0_32 = arith.constant 0 : index
    %c0_33 = arith.constant 0 : index
    %c0_34 = arith.constant 0 : index
    %24 = vector.load %arg2[%c0_32, %c0_33, %c0_34] : memref<4x576x64xf32, #tpu.memory_space<vmem>>, vector<1x576x64xf32>
    %25 = vector.shape_cast %24 : vector<1x576x64xf32> to vector<576x64xf32>
    %cst_35 = arith.constant dense<0.000000e+00> : vector<16x64xf32>
    %26 = tpu.matmul %23, %25, %cst_35 {dimension_numbers = #tpu.dot_dimension_numbers<[1], [0], [0], [1], [0, 0, 1, 1], [], []>} : vector<16x576xf32>, vector<576x64xf32>, vector<16x64xf32> -> vector<16x64xf32>
    %c0_36 = arith.constant 0 : index
    %c0_37 = arith.constant 0 : index
    %c0_38 = arith.constant 0 : index
    %27 = vector.load %arg3[%c0_36, %c0_37, %c0_38] : memref<4x1x64xf32, #tpu.memory_space<vmem>>, vector<1x1x64xf32>
    %28 = vector.shape_cast %27 : vector<1x1x64xf32> to vector<1x64xf32>
    %29 = vector.broadcast %28 : vector<1x64xf32> to vector<16x64xf32>
    %30 = arith.addf %26, %29 : vector<16x64xf32>
    %cst_39 = arith.constant 0.000000e+00 : f32
    %31 = vector.broadcast %cst_39 : f32 to vector<16x64xf32>
    %32 = arith.maximumf %30, %31 : vector<16x64xf32>
    %c1_40 = arith.constant 1 : index
    %c4_41 = arith.constant 4 : index
    %33 = vector.load %arg12[%c1_40, %c4_41] : memref<18x72xf32, #tpu.memory_space<vmem>>, vector<16x64xf32>
    tpu.vector_store %arg12[%c1_40, %c4_41], %32 {strides = array<i32>} : memref<18x72xf32, #tpu.memory_space<vmem>>, vector<16x64xf32>,
    %c0_42 = arith.constant 0 : index
    %c0_43 = arith.constant 0 : index
    %34 = vector.load %arg12[%c0_42, %c0_43] : memref<18x72xf32, #tpu.memory_space<vmem>>, vector<16x64xf32>
    %c0_44 = arith.constant 0 : index
    %c0_45 = arith.constant 0 : index
    %35 = vector.load %arg13[%c0_44, %c0_45] : memref<16x576xf32, #tpu.memory_space<vmem>>, vector<16x64xf32>
    tpu.vector_store %arg13[%c0_44, %c0_45], %34 {strides = array<i32>} : memref<16x576xf32, #tpu.memory_space<vmem>>, vector<16x64xf32>,
    %c0_46 = arith.constant 0 : index
    %c4_47 = arith.constant 4 : index
    %36 = vector.load %arg12[%c0_46, %c4_47] : memref<18x72xf32, #tpu.memory_space<vmem>>, vector<16x64xf32>
    %c0_48 = arith.constant 0 : index
    %c64_49 = arith.constant 64 : index
    %37 = vector.load %arg13[%c0_48, %c64_49] : memref<16x576xf32, #tpu.memory_space<vmem>>, vector<16x64xf32>
    tpu.vector_store %arg13[%c0_48, %c64_49], %36 {strides = array<i32>} : memref<16x576xf32, #tpu.memory_space<vmem>>, vector<16x64xf32>,
    %c0_50 = arith.constant 0 : index
    %c8_51 = arith.constant 8 : index
    %38 = vector.load %arg12[%c0_50, %c8_51] : memref<18x72xf32, #tpu.memory_space<vmem>>, vector<16x64xf32>
    %c0_52 = arith.constant 0 : index
    %c128_53 = arith.constant 128 : index
    %39 = vector.load %arg13[%c0_52, %c128_53] : memref<16x576xf32, #tpu.memory_space<vmem>>, vector<16x64xf32>
    tpu.vector_store %arg13[%c0_52, %c128_53], %38 {strides = array<i32>} : memref<16x576xf32, #tpu.memory_space<vmem>>, vector<16x64xf32>,
    %c1_54 = arith.constant 1 : index
    %c0_55 = arith.constant 0 : index
    %40 = vector.load %arg12[%c1_54, %c0_55] : memref<18x72xf32, #tpu.memory_space<vmem>>, vector<16x64xf32>
    %c0_56 = arith.constant 0 : index
    %c192_57 = arith.constant 192 : index
    %41 = vector.load %arg13[%c0_56, %c192_57] : memref<16x576xf32, #tpu.memory_space<vmem>>, vector<16x64xf32>
    tpu.vector_store %arg13[%c0_56, %c192_57], %40 {strides = array<i32>} : memref<16x576xf32, #tpu.memory_space<vmem>>, vector<16x64xf32>,
    %c1_58 = arith.constant 1 : index
    %c4_59 = arith.constant 4 : index
    %42 = vector.load %arg12[%c1_58, %c4_59] : memref<18x72xf32, #tpu.memory_space<vmem>>, vector<16x64xf32>
    %c0_60 = arith.constant 0 : index
    %c256_61 = arith.constant 256 : index
    %43 = vector.load %arg13[%c0_60, %c256_61] : memref<16x576xf32, #tpu.memory_space<vmem>>, vector<16x64xf32>
    tpu.vector_store %arg13[%c0_60, %c256_61], %42 {strides = array<i32>} : memref<16x576xf32, #tpu.memory_space<vmem>>, vector<16x64xf32>,
    %c1_62 = arith.constant 1 : index
    %c8_63 = arith.constant 8 : index
    %44 = vector.load %arg12[%c1_62, %c8_63] : memref<18x72xf32, #tpu.memory_space<vmem>>, vector<16x64xf32>
    %c0_64 = arith.constant 0 : index
    %c320_65 = arith.constant 320 : index
    %45 = vector.load %arg13[%c0_64, %c320_65] : memref<16x576xf32, #tpu.memory_space<vmem>>, vector<16x64xf32>
    tpu.vector_store %arg13[%c0_64, %c320_65], %44 {strides = array<i32>} : memref<16x576xf32, #tpu.memory_space<vmem>>, vector<16x64xf32>,
    %c2_66 = arith.constant 2 : index
    %c0_67 = arith.constant 0 : index
    %46 = vector.load %arg12[%c2_66, %c0_67] : memref<18x72xf32, #tpu.memory_space<vmem>>, vector<16x64xf32>
    %c0_68 = arith.constant 0 : index
    %c384_69 = arith.constant 384 : index
    %47 = vector.load %arg13[%c0_68, %c384_69] : memref<16x576xf32, #tpu.memory_space<vmem>>, vector<16x64xf32>
    tpu.vector_store %arg13[%c0_68, %c384_69], %46 {strides = array<i32>} : memref<16x576xf32, #tpu.memory_space<vmem>>, vector<16x64xf32>,
    %c2_70 = arith.constant 2 : index
    %c4_71 = arith.constant 4 : index
    %48 = vector.load %arg12[%c2_70, %c4_71] : memref<18x72xf32, #tpu.memory_space<vmem>>, vector<16x64xf32>
    %c0_72 = arith.constant 0 : index
    %c448_73 = arith.constant 448 : index
    %49 = vector.load %arg13[%c0_72, %c448_73] : memref<16x576xf32, #tpu.memory_space<vmem>>, vector<16x64xf32>
    tpu.vector_store %arg13[%c0_72, %c448_73], %48 {strides = array<i32>} : memref<16x576xf32, #tpu.memory_space<vmem>>, vector<16x64xf32>,
    %c2_74 = arith.constant 2 : index
    %c8_75 = arith.constant 8 : index
    %50 = vector.load %arg12[%c2_74, %c8_75] : memref<18x72xf32, #tpu.memory_space<vmem>>, vector<16x64xf32>
    %c0_76 = arith.constant 0 : index
    %c512_77 = arith.constant 512 : index
    %51 = vector.load %arg13[%c0_76, %c512_77] : memref<16x576xf32, #tpu.memory_space<vmem>>, vector<16x64xf32>
    tpu.vector_store %arg13[%c0_76, %c512_77], %50 {strides = array<i32>} : memref<16x576xf32, #tpu.memory_space<vmem>>, vector<16x64xf32>,
    %c0_78 = arith.constant 0 : index
    %c0_79 = arith.constant 0 : index
    %52 = vector.load %arg13[%c0_78, %c0_79] : memref<16x576xf32, #tpu.memory_space<vmem>>, vector<16x576xf32>
    %c1_80 = arith.constant 1 : index
    %c0_81 = arith.constant 0 : index
    %c0_82 = arith.constant 0 : index
    %53 = vector.load %arg2[%c1_80, %c0_81, %c0_82] : memref<4x576x64xf32, #tpu.memory_space<vmem>>, vector<1x576x64xf32>
    %54 = vector.shape_cast %53 : vector<1x576x64xf32> to vector<576x64xf32>
    %cst_83 = arith.constant dense<0.000000e+00> : vector<16x64xf32>
    %55 = tpu.matmul %52, %54, %cst_83 {dimension_numbers = #tpu.dot_dimension_numbers<[1], [0], [0], [1], [0, 0, 1, 1], [], []>} : vector<16x576xf32>, vector<576x64xf32>, vector<16x64xf32> -> vector<16x64xf32>
    %c1_84 = arith.constant 1 : index
    %c0_85 = arith.constant 0 : index
    %c0_86 = arith.constant 0 : index
    %56 = vector.load %arg3[%c1_84, %c0_85, %c0_86] : memref<4x1x64xf32, #tpu.memory_space<vmem>>, vector<1x1x64xf32>
    %57 = vector.shape_cast %56 : vector<1x1x64xf32> to vector<1x64xf32>
    %58 = vector.broadcast %57 : vector<1x64xf32> to vector<16x64xf32>
    %59 = arith.addf %55, %58 : vector<16x64xf32>
    %cst_87 = arith.constant 0.000000e+00 : f32
    %60 = vector.broadcast %cst_87 : f32 to vector<16x64xf32>
    %61 = arith.maximumf %59, %60 : vector<16x64xf32>
    %62 = vector.extract_strided_slice %61 {offsets = [0, 0], sizes = [16, 4], strides = [1, 1]} : vector<16x64xf32> to vector<16x4xf32>
    %c0_88 = arith.constant 0 : index
    %c0_89 = arith.constant 0 : index
    %63 = vector.load %arg14[%c0_88, %c0_89] : memref<256x4xf32, #tpu.memory_space<vmem>>, vector<16x4xf32>
    tpu.vector_store %arg14[%c0_88, %c0_89], %62 {strides = array<i32>} : memref<256x4xf32, #tpu.memory_space<vmem>>, vector<16x4xf32>,
    %64 = vector.extract_strided_slice %61 {offsets = [0, 4], sizes = [16, 4], strides = [1, 1]} : vector<16x64xf32> to vector<16x4xf32>
    %c16 = arith.constant 16 : index
    %c0_90 = arith.constant 0 : index
    %65 = vector.load %arg14[%c16, %c0_90] : memref<256x4xf32, #tpu.memory_space<vmem>>, vector<16x4xf32>
    tpu.vector_store %arg14[%c16, %c0_90], %64 {strides = array<i32>} : memref<256x4xf32, #tpu.memory_space<vmem>>, vector<16x4xf32>,
    %66 = vector.extract_strided_slice %61 {offsets = [0, 8], sizes = [16, 4], strides = [1, 1]} : vector<16x64xf32> to vector<16x4xf32>
    %c32 = arith.constant 32 : index
    %c0_91 = arith.constant 0 : index
    %67 = vector.load %arg14[%c32, %c0_91] : memref<256x4xf32, #tpu.memory_space<vmem>>, vector<16x4xf32>
    tpu.vector_store %arg14[%c32, %c0_91], %66 {strides = array<i32>} : memref<256x4xf32, #tpu.memory_space<vmem>>, vector<16x4xf32>,
    %68 = vector.extract_strided_slice %61 {offsets = [0, 12], sizes = [16, 4], strides = [1, 1]} : vector<16x64xf32> to vector<16x4xf32>
    %c48 = arith.constant 48 : index
    %c0_92 = arith.constant 0 : index
    %69 = vector.load %arg14[%c48, %c0_92] : memref<256x4xf32, #tpu.memory_space<vmem>>, vector<16x4xf32>
    tpu.vector_store %arg14[%c48, %c0_92], %68 {strides = array<i32>} : memref<256x4xf32, #tpu.memory_space<vmem>>, vector<16x4xf32>,
    %70 = vector.extract_strided_slice %61 {offsets = [0, 16], sizes = [16, 4], strides = [1, 1]} : vector<16x64xf32> to vector<16x4xf32>
    %c64_93 = arith.constant 64 : index
    %c0_94 = arith.constant 0 : index
    %71 = vector.load %arg14[%c64_93, %c0_94] : memref<256x4xf32, #tpu.memory_space<vmem>>, vector<16x4xf32>
    tpu.vector_store %arg14[%c64_93, %c0_94], %70 {strides = array<i32>} : memref<256x4xf32, #tpu.memory_space<vmem>>, vector<16x4xf32>,
    %72 = vector.extract_strided_slice %61 {offsets = [0, 20], sizes = [16, 4], strides = [1, 1]} : vector<16x64xf32> to vector<16x4xf32>
    %c80 = arith.constant 80 : index
    %c0_95 = arith.constant 0 : index
    %73 = vector.load %arg14[%c80, %c0_95] : memref<256x4xf32, #tpu.memory_space<vmem>>, vector<16x4xf32>
    tpu.vector_store %arg14[%c80, %c0_95], %72 {strides = array<i32>} : memref<256x4xf32, #tpu.memory_space<vmem>>, vector<16x4xf32>,
    %74 = vector.extract_strided_slice %61 {offsets = [0, 24], sizes = [16, 4], strides = [1, 1]} : vector<16x64xf32> to vector<16x4xf32>
    %c96 = arith.constant 96 : index
    %c0_96 = arith.constant 0 : index
    %75 = vector.load %arg14[%c96, %c0_96] : memref<256x4xf32, #tpu.memory_space<vmem>>, vector<16x4xf32>
    tpu.vector_store %arg14[%c96, %c0_96], %74 {strides = array<i32>} : memref<256x4xf32, #tpu.memory_space<vmem>>, vector<16x4xf32>,
    %76 = vector.extract_strided_slice %61 {offsets = [0, 28], sizes = [16, 4], strides = [1, 1]} : vector<16x64xf32> to vector<16x4xf32>
    %c112 = arith.constant 112 : index
    %c0_97 = arith.constant 0 : index
    %77 = vector.load %arg14[%c112, %c0_97] : memref<256x4xf32, #tpu.memory_space<vmem>>, vector<16x4xf32>
    tpu.vector_store %arg14[%c112, %c0_97], %76 {strides = array<i32>} : memref<256x4xf32, #tpu.memory_space<vmem>>, vector<16x4xf32>,
    %78 = vector.extract_strided_slice %61 {offsets = [0, 32], sizes = [16, 4], strides = [1, 1]} : vector<16x64xf32> to vector<16x4xf32>
    %c128_98 = arith.constant 128 : index
    %c0_99 = arith.constant 0 : index
    %79 = vector.load %arg14[%c128_98, %c0_99] : memref<256x4xf32, #tpu.memory_space<vmem>>, vector<16x4xf32>
    tpu.vector_store %arg14[%c128_98, %c0_99], %78 {strides = array<i32>} : memref<256x4xf32, #tpu.memory_space<vmem>>, vector<16x4xf32>,
    %80 = vector.extract_strided_slice %61 {offsets = [0, 36], sizes = [16, 4], strides = [1, 1]} : vector<16x64xf32> to vector<16x4xf32>
    %c144 = arith.constant 144 : index
    %c0_100 = arith.constant 0 : index
    %81 = vector.load %arg14[%c144, %c0_100] : memref<256x4xf32, #tpu.memory_space<vmem>>, vector<16x4xf32>
    tpu.vector_store %arg14[%c144, %c0_100], %80 {strides = array<i32>} : memref<256x4xf32, #tpu.memory_space<vmem>>, vector<16x4xf32>,
    %82 = vector.extract_strided_slice %61 {offsets = [0, 40], sizes = [16, 4], strides = [1, 1]} : vector<16x64xf32> to vector<16x4xf32>
    %c160 = arith.constant 160 : index
    %c0_101 = arith.constant 0 : index
    %83 = vector.load %arg14[%c160, %c0_101] : memref<256x4xf32, #tpu.memory_space<vmem>>, vector<16x4xf32>
    tpu.vector_store %arg14[%c160, %c0_101], %82 {strides = array<i32>} : memref<256x4xf32, #tpu.memory_space<vmem>>, vector<16x4xf32>,
    %84 = vector.extract_strided_slice %61 {offsets = [0, 44], sizes = [16, 4], strides = [1, 1]} : vector<16x64xf32> to vector<16x4xf32>
    %c176 = arith.constant 176 : index
    %c0_102 = arith.constant 0 : index
    %85 = vector.load %arg14[%c176, %c0_102] : memref<256x4xf32, #tpu.memory_space<vmem>>, vector<16x4xf32>
    tpu.vector_store %arg14[%c176, %c0_102], %84 {strides = array<i32>} : memref<256x4xf32, #tpu.memory_space<vmem>>, vector<16x4xf32>,
    %86 = vector.extract_strided_slice %61 {offsets = [0, 48], sizes = [16, 4], strides = [1, 1]} : vector<16x64xf32> to vector<16x4xf32>
    %c192_103 = arith.constant 192 : index
    %c0_104 = arith.constant 0 : index
    %87 = vector.load %arg14[%c192_103, %c0_104] : memref<256x4xf32, #tpu.memory_space<vmem>>, vector<16x4xf32>
    tpu.vector_store %arg14[%c192_103, %c0_104], %86 {strides = array<i32>} : memref<256x4xf32, #tpu.memory_space<vmem>>, vector<16x4xf32>,
    %88 = vector.extract_strided_slice %61 {offsets = [0, 52], sizes = [16, 4], strides = [1, 1]} : vector<16x64xf32> to vector<16x4xf32>
    %c208 = arith.constant 208 : index
    %c0_105 = arith.constant 0 : index
    %89 = vector.load %arg14[%c208, %c0_105] : memref<256x4xf32, #tpu.memory_space<vmem>>, vector<16x4xf32>
    tpu.vector_store %arg14[%c208, %c0_105], %88 {strides = array<i32>} : memref<256x4xf32, #tpu.memory_space<vmem>>, vector<16x4xf32>,
    %90 = vector.extract_strided_slice %61 {offsets = [0, 56], sizes = [16, 4], strides = [1, 1]} : vector<16x64xf32> to vector<16x4xf32>
    %c224 = arith.constant 224 : index
    %c0_106 = arith.constant 0 : index
    %91 = vector.load %arg14[%c224, %c0_106] : memref<256x4xf32, #tpu.memory_space<vmem>>, vector<16x4xf32>
    tpu.vector_store %arg14[%c224, %c0_106], %90 {strides = array<i32>} : memref<256x4xf32, #tpu.memory_space<vmem>>, vector<16x4xf32>,
    %92 = vector.extract_strided_slice %61 {offsets = [0, 60], sizes = [16, 4], strides = [1, 1]} : vector<16x64xf32> to vector<16x4xf32>
    %c240 = arith.constant 240 : index
    %c0_107 = arith.constant 0 : index
    %93 = vector.load %arg14[%c240, %c0_107] : memref<256x4xf32, #tpu.memory_space<vmem>>, vector<16x4xf32>
    tpu.vector_store %arg14[%c240, %c0_107], %92 {strides = array<i32>} : memref<256x4xf32, #tpu.memory_space<vmem>>, vector<16x4xf32>,
    %c0_108 = arith.constant 0 : index
    %c0_109 = arith.constant 0 : index
    %94 = vector.load %arg14[%c0_108, %c0_109] : memref<256x4xf32, #tpu.memory_space<vmem>>, vector<256x4xf32>
    %c0_110 = arith.constant 0 : index
    %c0_111 = arith.constant 0 : index
    %c0_112 = arith.constant 0 : index
    %95 = vector.load %arg4[%c0_110, %c0_111, %c0_112] : memref<2x4x12xf32, #tpu.memory_space<vmem>>, vector<1x4x12xf32>
    %96 = vector.shape_cast %95 : vector<1x4x12xf32> to vector<4x12xf32>
    %cst_113 = arith.constant dense<0.000000e+00> : vector<256x12xf32>
    %97 = tpu.matmul %94, %96, %cst_113 {dimension_numbers = #tpu.dot_dimension_numbers<[1], [0], [0], [1], [0, 0, 1, 1], [], []>} : vector<256x4xf32>, vector<4x12xf32>, vector<256x12xf32> -> vector<256x12xf32>
    %98 = vector.extract_strided_slice %97 {offsets = [0, 0], sizes = [256, 4], strides = [1, 1]} : vector<256x12xf32> to vector<256x4xf32>
    %99 = vector.extract_strided_slice %97 {offsets = [0, 4], sizes = [256, 4], strides = [1, 1]} : vector<256x12xf32> to vector<256x4xf32>
    %100 = vector.extract_strided_slice %97 {offsets = [0, 8], sizes = [256, 4], strides = [1, 1]} : vector<256x12xf32> to vector<256x4xf32>
    %cst_114 = arith.constant dense<0.000000e+00> : vector<256x256xf32>
    %101 = tpu.matmul %98, %99, %cst_114 {dimension_numbers = #tpu.dot_dimension_numbers<[1], [1], [0], [0], [0, 0, 1, 0], [], []>} : vector<256x4xf32>, vector<256x4xf32>, vector<256x256xf32> -> vector<256x256xf32>
    %cst_115 = arith.constant 5.000000e-01 : f32
    %102 = vector.broadcast %cst_115 : f32 to vector<256x256xf32>
    %103 = arith.mulf %101, %102 : vector<256x256xf32>
    %cst_116 = arith.constant dense<0xFF800000> : vector<256xf32>
    %104 = vector.multi_reduction <maximumf>, %103, %cst_116 [1] : vector<256x256xf32> to vector<256xf32>
    %105 = vector.shape_cast %104 : vector<256xf32> to vector<256x1xf32>
    %106 = vector.broadcast %105 : vector<256x1xf32> to vector<256x256xf32>
    %107 = arith.subf %103, %106 : vector<256x256xf32>
    %108 = math.exp %107 : vector<256x256xf32>
    %cst_117 = arith.constant dense<0.000000e+00> : vector<256xf32>
    %109 = vector.multi_reduction <add>, %108, %cst_117 [1] : vector<256x256xf32> to vector<256xf32>
    %110 = vector.shape_cast %109 : vector<256xf32> to vector<256x1xf32>
    %111 = tpu.reciprocal %110 {approx = true} : vector<256x1xf32> -> vector<256x1xf32>
    %112 = vector.broadcast %111 : vector<256x1xf32> to vector<256x256xf32>
    %113 = arith.mulf %108, %112 : vector<256x256xf32>
    %cst_118 = arith.constant dense<0.000000e+00> : vector<256x4xf32>
    %114 = tpu.matmul %113, %100, %cst_118 {dimension_numbers = #tpu.dot_dimension_numbers<[1], [0], [0], [1], [0, 0, 1, 1], [], []>} : vector<256x256xf32>, vector<256x4xf32>, vector<256x4xf32> -> vector<256x4xf32>
    %c0_119 = arith.constant 0 : index
    %c0_120 = arith.constant 0 : index
    %c0_121 = arith.constant 0 : index
    %115 = vector.load %arg5[%c0_119, %c0_120, %c0_121] : memref<2x4x4xf32, #tpu.memory_space<vmem>>, vector<1x4x4xf32>
    %116 = vector.shape_cast %115 : vector<1x4x4xf32> to vector<4x4xf32>
    %cst_122 = arith.constant dense<0.000000e+00> : vector<256x4xf32>
    %117 = tpu.matmul %114, %116, %cst_122 {dimension_numbers = #tpu.dot_dimension_numbers<[1], [0], [0], [1], [0, 0, 1, 1], [], []>} : vector<256x4xf32>, vector<4x4xf32>, vector<256x4xf32> -> vector<256x4xf32>
    %118 = vector.extract_strided_slice %117 {offsets = [0, 0], sizes = [16, 4], strides = [1, 1]} : vector<256x4xf32> to vector<16x4xf32>
    %c0_123 = arith.constant 0 : index
    %c0_124 = arith.constant 0 : index
    %119 = vector.load %arg15[%c0_123, %c0_124] : memref<16x64xf32, #tpu.memory_space<vmem>>, vector<16x4xf32>
    tpu.vector_store %arg15[%c0_123, %c0_124], %118 {strides = array<i32>} : memref<16x64xf32, #tpu.memory_space<vmem>>, vector<16x4xf32>,
    %120 = vector.extract_strided_slice %117 {offsets = [16, 0], sizes = [16, 4], strides = [1, 1]} : vector<256x4xf32> to vector<16x4xf32>
    %c0_125 = arith.constant 0 : index
    %c4_126 = arith.constant 4 : index
    %121 = vector.load %arg15[%c0_125, %c4_126] : memref<16x64xf32, #tpu.memory_space<vmem>>, vector<16x4xf32>
    tpu.vector_store %arg15[%c0_125, %c4_126], %120 {strides = array<i32>} : memref<16x64xf32, #tpu.memory_space<vmem>>, vector<16x4xf32>,
    %122 = vector.extract_strided_slice %117 {offsets = [32, 0], sizes = [16, 4], strides = [1, 1]} : vector<256x4xf32> to vector<16x4xf32>
    %c0_127 = arith.constant 0 : index
    %c8_128 = arith.constant 8 : index
    %123 = vector.load %arg15[%c0_127, %c8_128] : memref<16x64xf32, #tpu.memory_space<vmem>>, vector<16x4xf32>
    tpu.vector_store %arg15[%c0_127, %c8_128], %122 {strides = array<i32>} : memref<16x64xf32, #tpu.memory_space<vmem>>, vector<16x4xf32>,
    %124 = vector.extract_strided_slice %117 {offsets = [48, 0], sizes = [16, 4], strides = [1, 1]} : vector<256x4xf32> to vector<16x4xf32>
    %c0_129 = arith.constant 0 : index
    %c12 = arith.constant 12 : index
    %125 = vector.load %arg15[%c0_129, %c12] : memref<16x64xf32, #tpu.memory_space<vmem>>, vector<16x4xf32>
    tpu.vector_store %arg15[%c0_129, %c12], %124 {strides = array<i32>} : memref<16x64xf32, #tpu.memory_space<vmem>>, vector<16x4xf32>,
    %126 = vector.extract_strided_slice %117 {offsets = [64, 0], sizes = [16, 4], strides = [1, 1]} : vector<256x4xf32> to vector<16x4xf32>
    %c0_130 = arith.constant 0 : index
    %c16_131 = arith.constant 16 : index
    %127 = vector.load %arg15[%c0_130, %c16_131] : memref<16x64xf32, #tpu.memory_space<vmem>>, vector<16x4xf32>
    tpu.vector_store %arg15[%c0_130, %c16_131], %126 {strides = array<i32>} : memref<16x64xf32, #tpu.memory_space<vmem>>, vector<16x4xf32>,
    %128 = vector.extract_strided_slice %117 {offsets = [80, 0], sizes = [16, 4], strides = [1, 1]} : vector<256x4xf32> to vector<16x4xf32>
    %c0_132 = arith.constant 0 : index
    %c20 = arith.constant 20 : index
    %129 = vector.load %arg15[%c0_132, %c20] : memref<16x64xf32, #tpu.memory_space<vmem>>, vector<16x4xf32>
    tpu.vector_store %arg15[%c0_132, %c20], %128 {strides = array<i32>} : memref<16x64xf32, #tpu.memory_space<vmem>>, vector<16x4xf32>,
    %130 = vector.extract_strided_slice %117 {offsets = [96, 0], sizes = [16, 4], strides = [1, 1]} : vector<256x4xf32> to vector<16x4xf32>
    %c0_133 = arith.constant 0 : index
    %c24 = arith.constant 24 : index
    %131 = vector.load %arg15[%c0_133, %c24] : memref<16x64xf32, #tpu.memory_space<vmem>>, vector<16x4xf32>
    tpu.vector_store %arg15[%c0_133, %c24], %130 {strides = array<i32>} : memref<16x64xf32, #tpu.memory_space<vmem>>, vector<16x4xf32>,
    %132 = vector.extract_strided_slice %117 {offsets = [112, 0], sizes = [16, 4], strides = [1, 1]} : vector<256x4xf32> to vector<16x4xf32>
    %c0_134 = arith.constant 0 : index
    %c28 = arith.constant 28 : index
    %133 = vector.load %arg15[%c0_134, %c28] : memref<16x64xf32, #tpu.memory_space<vmem>>, vector<16x4xf32>
    tpu.vector_store %arg15[%c0_134, %c28], %132 {strides = array<i32>} : memref<16x64xf32, #tpu.memory_space<vmem>>, vector<16x4xf32>,
    %134 = vector.extract_strided_slice %117 {offsets = [128, 0], sizes = [16, 4], strides = [1, 1]} : vector<256x4xf32> to vector<16x4xf32>
    %c0_135 = arith.constant 0 : index
    %c32_136 = arith.constant 32 : index
    %135 = vector.load %arg15[%c0_135, %c32_136] : memref<16x64xf32, #tpu.memory_space<vmem>>, vector<16x4xf32>
    tpu.vector_store %arg15[%c0_135, %c32_136], %134 {strides = array<i32>} : memref<16x64xf32, #tpu.memory_space<vmem>>, vector<16x4xf32>,
    %136 = vector.extract_strided_slice %117 {offsets = [144, 0], sizes = [16, 4], strides = [1, 1]} : vector<256x4xf32> to vector<16x4xf32>
    %c0_137 = arith.constant 0 : index
    %c36 = arith.constant 36 : index
    %137 = vector.load %arg15[%c0_137, %c36] : memref<16x64xf32, #tpu.memory_space<vmem>>, vector<16x4xf32>
    tpu.vector_store %arg15[%c0_137, %c36], %136 {strides = array<i32>} : memref<16x64xf32, #tpu.memory_space<vmem>>, vector<16x4xf32>,
    %138 = vector.extract_strided_slice %117 {offsets = [160, 0], sizes = [16, 4], strides = [1, 1]} : vector<256x4xf32> to vector<16x4xf32>
    %c0_138 = arith.constant 0 : index
    %c40 = arith.constant 40 : index
    %139 = vector.load %arg15[%c0_138, %c40] : memref<16x64xf32, #tpu.memory_space<vmem>>, vector<16x4xf32>
    tpu.vector_store %arg15[%c0_138, %c40], %138 {strides = array<i32>} : memref<16x64xf32, #tpu.memory_space<vmem>>, vector<16x4xf32>,
    %140 = vector.extract_strided_slice %117 {offsets = [176, 0], sizes = [16, 4], strides = [1, 1]} : vector<256x4xf32> to vector<16x4xf32>
    %c0_139 = arith.constant 0 : index
    %c44 = arith.constant 44 : index
    %141 = vector.load %arg15[%c0_139, %c44] : memref<16x64xf32, #tpu.memory_space<vmem>>, vector<16x4xf32>
    tpu.vector_store %arg15[%c0_139, %c44], %140 {strides = array<i32>} : memref<16x64xf32, #tpu.memory_space<vmem>>, vector<16x4xf32>,
    %142 = vector.extract_strided_slice %117 {offsets = [192, 0], sizes = [16, 4], strides = [1, 1]} : vector<256x4xf32> to vector<16x4xf32>
    %c0_140 = arith.constant 0 : index
    %c48_141 = arith.constant 48 : index
    %143 = vector.load %arg15[%c0_140, %c48_141] : memref<16x64xf32, #tpu.memory_space<vmem>>, vector<16x4xf32>
    tpu.vector_store %arg15[%c0_140, %c48_141], %142 {strides = array<i32>} : memref<16x64xf32, #tpu.memory_space<vmem>>, vector<16x4xf32>,
    %144 = vector.extract_strided_slice %117 {offsets = [208, 0], sizes = [16, 4], strides = [1, 1]} : vector<256x4xf32> to vector<16x4xf32>
    %c0_142 = arith.constant 0 : index
    %c52 = arith.constant 52 : index
    %145 = vector.load %arg15[%c0_142, %c52] : memref<16x64xf32, #tpu.memory_space<vmem>>, vector<16x4xf32>
    tpu.vector_store %arg15[%c0_142, %c52], %144 {strides = array<i32>} : memref<16x64xf32, #tpu.memory_space<vmem>>, vector<16x4xf32>,
    %146 = vector.extract_strided_slice %117 {offsets = [224, 0], sizes = [16, 4], strides = [1, 1]} : vector<256x4xf32> to vector<16x4xf32>
    %c0_143 = arith.constant 0 : index
    %c56 = arith.constant 56 : index
    %147 = vector.load %arg15[%c0_143, %c56] : memref<16x64xf32, #tpu.memory_space<vmem>>, vector<16x4xf32>
    tpu.vector_store %arg15[%c0_143, %c56], %146 {strides = array<i32>} : memref<16x64xf32, #tpu.memory_space<vmem>>, vector<16x4xf32>,
    %148 = vector.extract_strided_slice %117 {offsets = [240, 0], sizes = [16, 4], strides = [1, 1]} : vector<256x4xf32> to vector<16x4xf32>
    %c0_144 = arith.constant 0 : index
    %c60 = arith.constant 60 : index
    %149 = vector.load %arg15[%c0_144, %c60] : memref<16x64xf32, #tpu.memory_space<vmem>>, vector<16x4xf32>
    tpu.vector_store %arg15[%c0_144, %c60], %148 {strides = array<i32>} : memref<16x64xf32, #tpu.memory_space<vmem>>, vector<16x4xf32>,
    %c0_145 = arith.constant 0 : index
    %c0_146 = arith.constant 0 : index
    %150 = vector.load %arg15[%c0_145, %c0_146] : memref<16x64xf32, #tpu.memory_space<vmem>>, vector<16x64xf32>
    %151 = arith.addf %61, %150 : vector<16x64xf32>
    %c0_147 = arith.constant 0 : index
    %c0_148 = arith.constant 0 : index
    %c0_149 = arith.constant 0 : index
    %152 = vector.load %arg6[%c0_147, %c0_148, %c0_149] : memref<2x64x512xf32, #tpu.memory_space<vmem>>, vector<1x64x512xf32>
    %153 = vector.shape_cast %152 : vector<1x64x512xf32> to vector<64x512xf32>
    %cst_150 = arith.constant dense<0.000000e+00> : vector<16x512xf32>
    %154 = tpu.matmul %151, %153, %cst_150 {dimension_numbers = #tpu.dot_dimension_numbers<[1], [0], [0], [1], [0, 0, 1, 1], [], []>} : vector<16x64xf32>, vector<64x512xf32>, vector<16x512xf32> -> vector<16x512xf32>
    %c0_151 = arith.constant 0 : index
    %c0_152 = arith.constant 0 : index
    %c0_153 = arith.constant 0 : index
    %155 = vector.load %arg7[%c0_151, %c0_152, %c0_153] : memref<2x1x512xf32, #tpu.memory_space<vmem>>, vector<1x1x512xf32>
    %156 = vector.shape_cast %155 : vector<1x1x512xf32> to vector<1x512xf32>
    %157 = vector.broadcast %156 : vector<1x512xf32> to vector<16x512xf32>
    %158 = arith.addf %154, %157 : vector<16x512xf32>
    %cst_154 = arith.constant 0.000000e+00 : f32
    %159 = vector.broadcast %cst_154 : f32 to vector<16x512xf32>
    %160 = arith.maximumf %158, %159 : vector<16x512xf32>
    %c0_155 = arith.constant 0 : index
    %c0_156 = arith.constant 0 : index
    %c0_157 = arith.constant 0 : index
    %161 = vector.load %arg8[%c0_155, %c0_156, %c0_157] : memref<2x512x512xf32, #tpu.memory_space<vmem>>, vector<1x512x512xf32>
    %162 = vector.shape_cast %161 : vector<1x512x512xf32> to vector<512x512xf32>
    %cst_158 = arith.constant dense<0.000000e+00> : vector<16x512xf32>
    %163 = tpu.matmul %160, %162, %cst_158 {dimension_numbers = #tpu.dot_dimension_numbers<[1], [0], [0], [1], [0, 0, 1, 1], [], []>} : vector<16x512xf32>, vector<512x512xf32>, vector<16x512xf32> -> vector<16x512xf32>
    %c0_159 = arith.constant 0 : index
    %c0_160 = arith.constant 0 : index
    %c0_161 = arith.constant 0 : index
    %164 = vector.load %arg9[%c0_159, %c0_160, %c0_161] : memref<2x1x512xf32, #tpu.memory_space<vmem>>, vector<1x1x512xf32>
    %165 = vector.shape_cast %164 : vector<1x1x512xf32> to vector<1x512xf32>
    %166 = vector.broadcast %165 : vector<1x512xf32> to vector<16x512xf32>
    %167 = arith.addf %163, %166 : vector<16x512xf32>
    %c0_162 = arith.constant 0 : index
    %c0_163 = arith.constant 0 : index
    %c0_164 = arith.constant 0 : index
    %168 = vector.load %arg10[%c0_162, %c0_163, %c0_164] : memref<1x16x512xf32, #tpu.memory_space<vmem>>, vector<1x16x512xf32>
    %169 = vector.shape_cast %168 : vector<1x16x512xf32> to vector<16x512xf32>
    %170 = vector.shape_cast %167 : vector<16x512xf32> to vector<1x16x512xf32>
    tpu.vector_store %arg10[%c0_162, %c0_163, %c0_164], %170 {strides = array<i32>} : memref<1x16x512xf32, #tpu.memory_space<vmem>>, vector<1x16x512xf32>,
    %171 = arith.addf %3, %151 : vector<16x64xf32>
    %c1_165 = arith.constant 1 : index
    %c4_166 = arith.constant 4 : index
    %172 = vector.load %arg12[%c1_165, %c4_166] : memref<18x72xf32, #tpu.memory_space<vmem>>, vector<16x64xf32>
    tpu.vector_store %arg12[%c1_165, %c4_166], %171 {strides = array<i32>} : memref<18x72xf32, #tpu.memory_space<vmem>>, vector<16x64xf32>,
    %c0_167 = arith.constant 0 : index
    %c0_168 = arith.constant 0 : index
    %173 = vector.load %arg12[%c0_167, %c0_168] : memref<18x72xf32, #tpu.memory_space<vmem>>, vector<16x64xf32>
    %c0_169 = arith.constant 0 : index
    %c0_170 = arith.constant 0 : index
    %174 = vector.load %arg13[%c0_169, %c0_170] : memref<16x576xf32, #tpu.memory_space<vmem>>, vector<16x64xf32>
    tpu.vector_store %arg13[%c0_169, %c0_170], %173 {strides = array<i32>} : memref<16x576xf32, #tpu.memory_space<vmem>>, vector<16x64xf32>,
    %c0_171 = arith.constant 0 : index
    %c4_172 = arith.constant 4 : index
    %175 = vector.load %arg12[%c0_171, %c4_172] : memref<18x72xf32, #tpu.memory_space<vmem>>, vector<16x64xf32>
    %c0_173 = arith.constant 0 : index
    %c64_174 = arith.constant 64 : index
    %176 = vector.load %arg13[%c0_173, %c64_174] : memref<16x576xf32, #tpu.memory_space<vmem>>, vector<16x64xf32>
    tpu.vector_store %arg13[%c0_173, %c64_174], %175 {strides = array<i32>} : memref<16x576xf32, #tpu.memory_space<vmem>>, vector<16x64xf32>,
    %c0_175 = arith.constant 0 : index
    %c8_176 = arith.constant 8 : index
    %177 = vector.load %arg12[%c0_175, %c8_176] : memref<18x72xf32, #tpu.memory_space<vmem>>, vector<16x64xf32>
    %c0_177 = arith.constant 0 : index
    %c128_178 = arith.constant 128 : index
    %178 = vector.load %arg13[%c0_177, %c128_178] : memref<16x576xf32, #tpu.memory_space<vmem>>, vector<16x64xf32>
    tpu.vector_store %arg13[%c0_177, %c128_178], %177 {strides = array<i32>} : memref<16x576xf32, #tpu.memory_space<vmem>>, vector<16x64xf32>,
    %c1_179 = arith.constant 1 : index
    %c0_180 = arith.constant 0 : index
    %179 = vector.load %arg12[%c1_179, %c0_180] : memref<18x72xf32, #tpu.memory_space<vmem>>, vector<16x64xf32>
    %c0_181 = arith.constant 0 : index
    %c192_182 = arith.constant 192 : index
    %180 = vector.load %arg13[%c0_181, %c192_182] : memref<16x576xf32, #tpu.memory_space<vmem>>, vector<16x64xf32>
    tpu.vector_store %arg13[%c0_181, %c192_182], %179 {strides = array<i32>} : memref<16x576xf32, #tpu.memory_space<vmem>>, vector<16x64xf32>,
    %c1_183 = arith.constant 1 : index
    %c4_184 = arith.constant 4 : index
    %181 = vector.load %arg12[%c1_183, %c4_184] : memref<18x72xf32, #tpu.memory_space<vmem>>, vector<16x64xf32>
    %c0_185 = arith.constant 0 : index
    %c256_186 = arith.constant 256 : index
    %182 = vector.load %arg13[%c0_185, %c256_186] : memref<16x576xf32, #tpu.memory_space<vmem>>, vector<16x64xf32>
    tpu.vector_store %arg13[%c0_185, %c256_186], %181 {strides = array<i32>} : memref<16x576xf32, #tpu.memory_space<vmem>>, vector<16x64xf32>,
    %c1_187 = arith.constant 1 : index
    %c8_188 = arith.constant 8 : index
    %183 = vector.load %arg12[%c1_187, %c8_188] : memref<18x72xf32, #tpu.memory_space<vmem>>, vector<16x64xf32>
    %c0_189 = arith.constant 0 : index
    %c320_190 = arith.constant 320 : index
    %184 = vector.load %arg13[%c0_189, %c320_190] : memref<16x576xf32, #tpu.memory_space<vmem>>, vector<16x64xf32>
    tpu.vector_store %arg13[%c0_189, %c320_190], %183 {strides = array<i32>} : memref<16x576xf32, #tpu.memory_space<vmem>>, vector<16x64xf32>,
    %c2_191 = arith.constant 2 : index
    %c0_192 = arith.constant 0 : index
    %185 = vector.load %arg12[%c2_191, %c0_192] : memref<18x72xf32, #tpu.memory_space<vmem>>, vector<16x64xf32>
    %c0_193 = arith.constant 0 : index
    %c384_194 = arith.constant 384 : index
    %186 = vector.load %arg13[%c0_193, %c384_194] : memref<16x576xf32, #tpu.memory_space<vmem>>, vector<16x64xf32>
    tpu.vector_store %arg13[%c0_193, %c384_194], %185 {strides = array<i32>} : memref<16x576xf32, #tpu.memory_space<vmem>>, vector<16x64xf32>,
    %c2_195 = arith.constant 2 : index
    %c4_196 = arith.constant 4 : index
    %187 = vector.load %arg12[%c2_195, %c4_196] : memref<18x72xf32, #tpu.memory_space<vmem>>, vector<16x64xf32>
    %c0_197 = arith.constant 0 : index
    %c448_198 = arith.constant 448 : index
    %188 = vector.load %arg13[%c0_197, %c448_198] : memref<16x576xf32, #tpu.memory_space<vmem>>, vector<16x64xf32>
    tpu.vector_store %arg13[%c0_197, %c448_198], %187 {strides = array<i32>} : memref<16x576xf32, #tpu.memory_space<vmem>>, vector<16x64xf32>,
    %c2_199 = arith.constant 2 : index
    %c8_200 = arith.constant 8 : index
    %189 = vector.load %arg12[%c2_199, %c8_200] : memref<18x72xf32, #tpu.memory_space<vmem>>, vector<16x64xf32>
    %c0_201 = arith.constant 0 : index
    %c512_202 = arith.constant 512 : index
    %190 = vector.load %arg13[%c0_201, %c512_202] : memref<16x576xf32, #tpu.memory_space<vmem>>, vector<16x64xf32>
    tpu.vector_store %arg13[%c0_201, %c512_202], %189 {strides = array<i32>} : memref<16x576xf32, #tpu.memory_space<vmem>>, vector<16x64xf32>,
    %c0_203 = arith.constant 0 : index
    %c0_204 = arith.constant 0 : index
    %191 = vector.load %arg13[%c0_203, %c0_204] : memref<16x576xf32, #tpu.memory_space<vmem>>, vector<16x576xf32>
    %c2_205 = arith.constant 2 : index
    %c0_206 = arith.constant 0 : index
    %c0_207 = arith.constant 0 : index
    %192 = vector.load %arg2[%c2_205, %c0_206, %c0_207] : memref<4x576x64xf32, #tpu.memory_space<vmem>>, vector<1x576x64xf32>
    %193 = vector.shape_cast %192 : vector<1x576x64xf32> to vector<576x64xf32>
    %cst_208 = arith.constant dense<0.000000e+00> : vector<16x64xf32>
    %194 = tpu.matmul %191, %193, %cst_208 {dimension_numbers = #tpu.dot_dimension_numbers<[1], [0], [0], [1], [0, 0, 1, 1], [], []>} : vector<16x576xf32>, vector<576x64xf32>, vector<16x64xf32> -> vector<16x64xf32>
    %c2_209 = arith.constant 2 : index
    %c0_210 = arith.constant 0 : index
    %c0_211 = arith.constant 0 : index
    %195 = vector.load %arg3[%c2_209, %c0_210, %c0_211] : memref<4x1x64xf32, #tpu.memory_space<vmem>>, vector<1x1x64xf32>
    %196 = vector.shape_cast %195 : vector<1x1x64xf32> to vector<1x64xf32>
    %197 = vector.broadcast %196 : vector<1x64xf32> to vector<16x64xf32>
    %198 = arith.addf %194, %197 : vector<16x64xf32>
    %cst_212 = arith.constant 0.000000e+00 : f32
    %199 = vector.broadcast %cst_212 : f32 to vector<16x64xf32>
    %200 = arith.maximumf %198, %199 : vector<16x64xf32>
    %c1_213 = arith.constant 1 : index
    %c4_214 = arith.constant 4 : index
    %201 = vector.load %arg12[%c1_213, %c4_214] : memref<18x72xf32, #tpu.memory_space<vmem>>, vector<16x64xf32>
    tpu.vector_store %arg12[%c1_213, %c4_214], %200 {strides = array<i32>} : memref<18x72xf32, #tpu.memory_space<vmem>>, vector<16x64xf32>,
    %c0_215 = arith.constant 0 : index
    %c0_216 = arith.constant 0 : index
    %202 = vector.load %arg12[%c0_215, %c0_216] : memref<18x72xf32, #tpu.memory_space<vmem>>, vector<16x64xf32>
    %c0_217 = arith.constant 0 : index
    %c0_218 = arith.constant 0 : index
    %203 = vector.load %arg13[%c0_217, %c0_218] : memref<16x576xf32, #tpu.memory_space<vmem>>, vector<16x64xf32>
    tpu.vector_store %arg13[%c0_217, %c0_218], %202 {strides = array<i32>} : memref<16x576xf32, #tpu.memory_space<vmem>>, vector<16x64xf32>,
    %c0_219 = arith.constant 0 : index
    %c4_220 = arith.constant 4 : index
    %204 = vector.load %arg12[%c0_219, %c4_220] : memref<18x72xf32, #tpu.memory_space<vmem>>, vector<16x64xf32>
    %c0_221 = arith.constant 0 : index
    %c64_222 = arith.constant 64 : index
    %205 = vector.load %arg13[%c0_221, %c64_222] : memref<16x576xf32, #tpu.memory_space<vmem>>, vector<16x64xf32>
    tpu.vector_store %arg13[%c0_221, %c64_222], %204 {strides = array<i32>} : memref<16x576xf32, #tpu.memory_space<vmem>>, vector<16x64xf32>,
    %c0_223 = arith.constant 0 : index
    %c8_224 = arith.constant 8 : index
    %206 = vector.load %arg12[%c0_223, %c8_224] : memref<18x72xf32, #tpu.memory_space<vmem>>, vector<16x64xf32>
    %c0_225 = arith.constant 0 : index
    %c128_226 = arith.constant 128 : index
    %207 = vector.load %arg13[%c0_225, %c128_226] : memref<16x576xf32, #tpu.memory_space<vmem>>, vector<16x64xf32>
    tpu.vector_store %arg13[%c0_225, %c128_226], %206 {strides = array<i32>} : memref<16x576xf32, #tpu.memory_space<vmem>>, vector<16x64xf32>,
    %c1_227 = arith.constant 1 : index
    %c0_228 = arith.constant 0 : index
    %208 = vector.load %arg12[%c1_227, %c0_228] : memref<18x72xf32, #tpu.memory_space<vmem>>, vector<16x64xf32>
    %c0_229 = arith.constant 0 : index
    %c192_230 = arith.constant 192 : index
    %209 = vector.load %arg13[%c0_229, %c192_230] : memref<16x576xf32, #tpu.memory_space<vmem>>, vector<16x64xf32>
    tpu.vector_store %arg13[%c0_229, %c192_230], %208 {strides = array<i32>} : memref<16x576xf32, #tpu.memory_space<vmem>>, vector<16x64xf32>,
    %c1_231 = arith.constant 1 : index
    %c4_232 = arith.constant 4 : index
    %210 = vector.load %arg12[%c1_231, %c4_232] : memref<18x72xf32, #tpu.memory_space<vmem>>, vector<16x64xf32>
    %c0_233 = arith.constant 0 : index
    %c256_234 = arith.constant 256 : index
    %211 = vector.load %arg13[%c0_233, %c256_234] : memref<16x576xf32, #tpu.memory_space<vmem>>, vector<16x64xf32>
    tpu.vector_store %arg13[%c0_233, %c256_234], %210 {strides = array<i32>} : memref<16x576xf32, #tpu.memory_space<vmem>>, vector<16x64xf32>,
    %c1_235 = arith.constant 1 : index
    %c8_236 = arith.constant 8 : index
    %212 = vector.load %arg12[%c1_235, %c8_236] : memref<18x72xf32, #tpu.memory_space<vmem>>, vector<16x64xf32>
    %c0_237 = arith.constant 0 : index
    %c320_238 = arith.constant 320 : index
    %213 = vector.load %arg13[%c0_237, %c320_238] : memref<16x576xf32, #tpu.memory_space<vmem>>, vector<16x64xf32>
    tpu.vector_store %arg13[%c0_237, %c320_238], %212 {strides = array<i32>} : memref<16x576xf32, #tpu.memory_space<vmem>>, vector<16x64xf32>,
    %c2_239 = arith.constant 2 : index
    %c0_240 = arith.constant 0 : index
    %214 = vector.load %arg12[%c2_239, %c0_240] : memref<18x72xf32, #tpu.memory_space<vmem>>, vector<16x64xf32>
    %c0_241 = arith.constant 0 : index
    %c384_242 = arith.constant 384 : index
    %215 = vector.load %arg13[%c0_241, %c384_242] : memref<16x576xf32, #tpu.memory_space<vmem>>, vector<16x64xf32>
    tpu.vector_store %arg13[%c0_241, %c384_242], %214 {strides = array<i32>} : memref<16x576xf32, #tpu.memory_space<vmem>>, vector<16x64xf32>,
    %c2_243 = arith.constant 2 : index
    %c4_244 = arith.constant 4 : index
    %216 = vector.load %arg12[%c2_243, %c4_244] : memref<18x72xf32, #tpu.memory_space<vmem>>, vector<16x64xf32>
    %c0_245 = arith.constant 0 : index
    %c448_246 = arith.constant 448 : index
    %217 = vector.load %arg13[%c0_245, %c448_246] : memref<16x576xf32, #tpu.memory_space<vmem>>, vector<16x64xf32>
    tpu.vector_store %arg13[%c0_245, %c448_246], %216 {strides = array<i32>} : memref<16x576xf32, #tpu.memory_space<vmem>>, vector<16x64xf32>,
    %c2_247 = arith.constant 2 : index
    %c8_248 = arith.constant 8 : index
    %218 = vector.load %arg12[%c2_247, %c8_248] : memref<18x72xf32, #tpu.memory_space<vmem>>, vector<16x64xf32>
    %c0_249 = arith.constant 0 : index
    %c512_250 = arith.constant 512 : index
    %219 = vector.load %arg13[%c0_249, %c512_250] : memref<16x576xf32, #tpu.memory_space<vmem>>, vector<16x64xf32>
    tpu.vector_store %arg13[%c0_249, %c512_250], %218 {strides = array<i32>} : memref<16x576xf32, #tpu.memory_space<vmem>>, vector<16x64xf32>,
    %c0_251 = arith.constant 0 : index
    %c0_252 = arith.constant 0 : index
    %220 = vector.load %arg13[%c0_251, %c0_252] : memref<16x576xf32, #tpu.memory_space<vmem>>, vector<16x576xf32>
    %c3 = arith.constant 3 : index
    %c0_253 = arith.constant 0 : index
    %c0_254 = arith.constant 0 : index
    %221 = vector.load %arg2[%c3, %c0_253, %c0_254] : memref<4x576x64xf32, #tpu.memory_space<vmem>>, vector<1x576x64xf32>
    %222 = vector.shape_cast %221 : vector<1x576x64xf32> to vector<576x64xf32>
    %cst_255 = arith.constant dense<0.000000e+00> : vector<16x64xf32>
    %223 = tpu.matmul %220, %222, %cst_255 {dimension_numbers = #tpu.dot_dimension_numbers<[1], [0], [0], [1], [0, 0, 1, 1], [], []>} : vector<16x576xf32>, vector<576x64xf32>, vector<16x64xf32> -> vector<16x64xf32>
    %c3_256 = arith.constant 3 : index
    %c0_257 = arith.constant 0 : index
    %c0_258 = arith.constant 0 : index
    %224 = vector.load %arg3[%c3_256, %c0_257, %c0_258] : memref<4x1x64xf32, #tpu.memory_space<vmem>>, vector<1x1x64xf32>
    %225 = vector.shape_cast %224 : vector<1x1x64xf32> to vector<1x64xf32>
    %226 = vector.broadcast %225 : vector<1x64xf32> to vector<16x64xf32>
    %227 = arith.addf %223, %226 : vector<16x64xf32>
    %cst_259 = arith.constant 0.000000e+00 : f32
    %228 = vector.broadcast %cst_259 : f32 to vector<16x64xf32>
    %229 = arith.maximumf %227, %228 : vector<16x64xf32>
    %230 = vector.extract_strided_slice %229 {offsets = [0, 0], sizes = [16, 4], strides = [1, 1]} : vector<16x64xf32> to vector<16x4xf32>
    %c0_260 = arith.constant 0 : index
    %c0_261 = arith.constant 0 : index
    %231 = vector.load %arg14[%c0_260, %c0_261] : memref<256x4xf32, #tpu.memory_space<vmem>>, vector<16x4xf32>
    tpu.vector_store %arg14[%c0_260, %c0_261], %230 {strides = array<i32>} : memref<256x4xf32, #tpu.memory_space<vmem>>, vector<16x4xf32>,
    %232 = vector.extract_strided_slice %229 {offsets = [0, 4], sizes = [16, 4], strides = [1, 1]} : vector<16x64xf32> to vector<16x4xf32>
    %c16_262 = arith.constant 16 : index
    %c0_263 = arith.constant 0 : index
    %233 = vector.load %arg14[%c16_262, %c0_263] : memref<256x4xf32, #tpu.memory_space<vmem>>, vector<16x4xf32>
    tpu.vector_store %arg14[%c16_262, %c0_263], %232 {strides = array<i32>} : memref<256x4xf32, #tpu.memory_space<vmem>>, vector<16x4xf32>,
    %234 = vector.extract_strided_slice %229 {offsets = [0, 8], sizes = [16, 4], strides = [1, 1]} : vector<16x64xf32> to vector<16x4xf32>
    %c32_264 = arith.constant 32 : index
    %c0_265 = arith.constant 0 : index
    %235 = vector.load %arg14[%c32_264, %c0_265] : memref<256x4xf32, #tpu.memory_space<vmem>>, vector<16x4xf32>
    tpu.vector_store %arg14[%c32_264, %c0_265], %234 {strides = array<i32>} : memref<256x4xf32, #tpu.memory_space<vmem>>, vector<16x4xf32>,
    %236 = vector.extract_strided_slice %229 {offsets = [0, 12], sizes = [16, 4], strides = [1, 1]} : vector<16x64xf32> to vector<16x4xf32>
    %c48_266 = arith.constant 48 : index
    %c0_267 = arith.constant 0 : index
    %237 = vector.load %arg14[%c48_266, %c0_267] : memref<256x4xf32, #tpu.memory_space<vmem>>, vector<16x4xf32>
    tpu.vector_store %arg14[%c48_266, %c0_267], %236 {strides = array<i32>} : memref<256x4xf32, #tpu.memory_space<vmem>>, vector<16x4xf32>,
    %238 = vector.extract_strided_slice %229 {offsets = [0, 16], sizes = [16, 4], strides = [1, 1]} : vector<16x64xf32> to vector<16x4xf32>
    %c64_268 = arith.constant 64 : index
    %c0_269 = arith.constant 0 : index
    %239 = vector.load %arg14[%c64_268, %c0_269] : memref<256x4xf32, #tpu.memory_space<vmem>>, vector<16x4xf32>
    tpu.vector_store %arg14[%c64_268, %c0_269], %238 {strides = array<i32>} : memref<256x4xf32, #tpu.memory_space<vmem>>, vector<16x4xf32>,
    %240 = vector.extract_strided_slice %229 {offsets = [0, 20], sizes = [16, 4], strides = [1, 1]} : vector<16x64xf32> to vector<16x4xf32>
    %c80_270 = arith.constant 80 : index
    %c0_271 = arith.constant 0 : index
    %241 = vector.load %arg14[%c80_270, %c0_271] : memref<256x4xf32, #tpu.memory_space<vmem>>, vector<16x4xf32>
    tpu.vector_store %arg14[%c80_270, %c0_271], %240 {strides = array<i32>} : memref<256x4xf32, #tpu.memory_space<vmem>>, vector<16x4xf32>,
    %242 = vector.extract_strided_slice %229 {offsets = [0, 24], sizes = [16, 4], strides = [1, 1]} : vector<16x64xf32> to vector<16x4xf32>
    %c96_272 = arith.constant 96 : index
    %c0_273 = arith.constant 0 : index
    %243 = vector.load %arg14[%c96_272, %c0_273] : memref<256x4xf32, #tpu.memory_space<vmem>>, vector<16x4xf32>
    tpu.vector_store %arg14[%c96_272, %c0_273], %242 {strides = array<i32>} : memref<256x4xf32, #tpu.memory_space<vmem>>, vector<16x4xf32>,
    %244 = vector.extract_strided_slice %229 {offsets = [0, 28], sizes = [16, 4], strides = [1, 1]} : vector<16x64xf32> to vector<16x4xf32>
    %c112_274 = arith.constant 112 : index
    %c0_275 = arith.constant 0 : index
    %245 = vector.load %arg14[%c112_274, %c0_275] : memref<256x4xf32, #tpu.memory_space<vmem>>, vector<16x4xf32>
    tpu.vector_store %arg14[%c112_274, %c0_275], %244 {strides = array<i32>} : memref<256x4xf32, #tpu.memory_space<vmem>>, vector<16x4xf32>,
    %246 = vector.extract_strided_slice %229 {offsets = [0, 32], sizes = [16, 4], strides = [1, 1]} : vector<16x64xf32> to vector<16x4xf32>
    %c128_276 = arith.constant 128 : index
    %c0_277 = arith.constant 0 : index
    %247 = vector.load %arg14[%c128_276, %c0_277] : memref<256x4xf32, #tpu.memory_space<vmem>>, vector<16x4xf32>
    tpu.vector_store %arg14[%c128_276, %c0_277], %246 {strides = array<i32>} : memref<256x4xf32, #tpu.memory_space<vmem>>, vector<16x4xf32>,
    %248 = vector.extract_strided_slice %229 {offsets = [0, 36], sizes = [16, 4], strides = [1, 1]} : vector<16x64xf32> to vector<16x4xf32>
    %c144_278 = arith.constant 144 : index
    %c0_279 = arith.constant 0 : index
    %249 = vector.load %arg14[%c144_278, %c0_279] : memref<256x4xf32, #tpu.memory_space<vmem>>, vector<16x4xf32>
    tpu.vector_store %arg14[%c144_278, %c0_279], %248 {strides = array<i32>} : memref<256x4xf32, #tpu.memory_space<vmem>>, vector<16x4xf32>,
    %250 = vector.extract_strided_slice %229 {offsets = [0, 40], sizes = [16, 4], strides = [1, 1]} : vector<16x64xf32> to vector<16x4xf32>
    %c160_280 = arith.constant 160 : index
    %c0_281 = arith.constant 0 : index
    %251 = vector.load %arg14[%c160_280, %c0_281] : memref<256x4xf32, #tpu.memory_space<vmem>>, vector<16x4xf32>
    tpu.vector_store %arg14[%c160_280, %c0_281], %250 {strides = array<i32>} : memref<256x4xf32, #tpu.memory_space<vmem>>, vector<16x4xf32>,
    %252 = vector.extract_strided_slice %229 {offsets = [0, 44], sizes = [16, 4], strides = [1, 1]} : vector<16x64xf32> to vector<16x4xf32>
    %c176_282 = arith.constant 176 : index
    %c0_283 = arith.constant 0 : index
    %253 = vector.load %arg14[%c176_282, %c0_283] : memref<256x4xf32, #tpu.memory_space<vmem>>, vector<16x4xf32>
    tpu.vector_store %arg14[%c176_282, %c0_283], %252 {strides = array<i32>} : memref<256x4xf32, #tpu.memory_space<vmem>>, vector<16x4xf32>,
    %254 = vector.extract_strided_slice %229 {offsets = [0, 48], sizes = [16, 4], strides = [1, 1]} : vector<16x64xf32> to vector<16x4xf32>
    %c192_284 = arith.constant 192 : index
    %c0_285 = arith.constant 0 : index
    %255 = vector.load %arg14[%c192_284, %c0_285] : memref<256x4xf32, #tpu.memory_space<vmem>>, vector<16x4xf32>
    tpu.vector_store %arg14[%c192_284, %c0_285], %254 {strides = array<i32>} : memref<256x4xf32, #tpu.memory_space<vmem>>, vector<16x4xf32>,
    %256 = vector.extract_strided_slice %229 {offsets = [0, 52], sizes = [16, 4], strides = [1, 1]} : vector<16x64xf32> to vector<16x4xf32>
    %c208_286 = arith.constant 208 : index
    %c0_287 = arith.constant 0 : index
    %257 = vector.load %arg14[%c208_286, %c0_287] : memref<256x4xf32, #tpu.memory_space<vmem>>, vector<16x4xf32>
    tpu.vector_store %arg14[%c208_286, %c0_287], %256 {strides = array<i32>} : memref<256x4xf32, #tpu.memory_space<vmem>>, vector<16x4xf32>,
    %258 = vector.extract_strided_slice %229 {offsets = [0, 56], sizes = [16, 4], strides = [1, 1]} : vector<16x64xf32> to vector<16x4xf32>
    %c224_288 = arith.constant 224 : index
    %c0_289 = arith.constant 0 : index
    %259 = vector.load %arg14[%c224_288, %c0_289] : memref<256x4xf32, #tpu.memory_space<vmem>>, vector<16x4xf32>
    tpu.vector_store %arg14[%c224_288, %c0_289], %258 {strides = array<i32>} : memref<256x4xf32, #tpu.memory_space<vmem>>, vector<16x4xf32>,
    %260 = vector.extract_strided_slice %229 {offsets = [0, 60], sizes = [16, 4], strides = [1, 1]} : vector<16x64xf32> to vector<16x4xf32>
    %c240_290 = arith.constant 240 : index
    %c0_291 = arith.constant 0 : index
    %261 = vector.load %arg14[%c240_290, %c0_291] : memref<256x4xf32, #tpu.memory_space<vmem>>, vector<16x4xf32>
    tpu.vector_store %arg14[%c240_290, %c0_291], %260 {strides = array<i32>} : memref<256x4xf32, #tpu.memory_space<vmem>>, vector<16x4xf32>,
    %c0_292 = arith.constant 0 : index
    %c0_293 = arith.constant 0 : index
    %262 = vector.load %arg14[%c0_292, %c0_293] : memref<256x4xf32, #tpu.memory_space<vmem>>, vector<256x4xf32>
    %c1_294 = arith.constant 1 : index
    %c0_295 = arith.constant 0 : index
    %c0_296 = arith.constant 0 : index
    %263 = vector.load %arg4[%c1_294, %c0_295, %c0_296] : memref<2x4x12xf32, #tpu.memory_space<vmem>>, vector<1x4x12xf32>
    %264 = vector.shape_cast %263 : vector<1x4x12xf32> to vector<4x12xf32>
    %cst_297 = arith.constant dense<0.000000e+00> : vector<256x12xf32>
    %265 = tpu.matmul %262, %264, %cst_297 {dimension_numbers = #tpu.dot_dimension_numbers<[1], [0], [0], [1], [0, 0, 1, 1], [], []>} : vector<256x4xf32>, vector<4x12xf32>, vector<256x12xf32> -> vector<256x12xf32>
    %266 = vector.extract_strided_slice %265 {offsets = [0, 0], sizes = [256, 4], strides = [1, 1]} : vector<256x12xf32> to vector<256x4xf32>
    %267 = vector.extract_strided_slice %265 {offsets = [0, 4], sizes = [256, 4], strides = [1, 1]} : vector<256x12xf32> to vector<256x4xf32>
    %268 = vector.extract_strided_slice %265 {offsets = [0, 8], sizes = [256, 4], strides = [1, 1]} : vector<256x12xf32> to vector<256x4xf32>
    %cst_298 = arith.constant dense<0.000000e+00> : vector<256x256xf32>
    %269 = tpu.matmul %266, %267, %cst_298 {dimension_numbers = #tpu.dot_dimension_numbers<[1], [1], [0], [0], [0, 0, 1, 0], [], []>} : vector<256x4xf32>, vector<256x4xf32>, vector<256x256xf32> -> vector<256x256xf32>
    %cst_299 = arith.constant 5.000000e-01 : f32
    %270 = vector.broadcast %cst_299 : f32 to vector<256x256xf32>
    %271 = arith.mulf %269, %270 : vector<256x256xf32>
    %cst_300 = arith.constant dense<0xFF800000> : vector<256xf32>
    %272 = vector.multi_reduction <maximumf>, %271, %cst_300 [1] : vector<256x256xf32> to vector<256xf32>
    %273 = vector.shape_cast %272 : vector<256xf32> to vector<256x1xf32>
    %274 = vector.broadcast %273 : vector<256x1xf32> to vector<256x256xf32>
    %275 = arith.subf %271, %274 : vector<256x256xf32>
    %276 = math.exp %275 : vector<256x256xf32>
    %cst_301 = arith.constant dense<0.000000e+00> : vector<256xf32>
    %277 = vector.multi_reduction <add>, %276, %cst_301 [1] : vector<256x256xf32> to vector<256xf32>
    %278 = vector.shape_cast %277 : vector<256xf32> to vector<256x1xf32>
    %279 = tpu.reciprocal %278 {approx = true} : vector<256x1xf32> -> vector<256x1xf32>
    %280 = vector.broadcast %279 : vector<256x1xf32> to vector<256x256xf32>
    %281 = arith.mulf %276, %280 : vector<256x256xf32>
    %cst_302 = arith.constant dense<0.000000e+00> : vector<256x4xf32>
    %282 = tpu.matmul %281, %268, %cst_302 {dimension_numbers = #tpu.dot_dimension_numbers<[1], [0], [0], [1], [0, 0, 1, 1], [], []>} : vector<256x256xf32>, vector<256x4xf32>, vector<256x4xf32> -> vector<256x4xf32>
    %c1_303 = arith.constant 1 : index
    %c0_304 = arith.constant 0 : index
    %c0_305 = arith.constant 0 : index
    %283 = vector.load %arg5[%c1_303, %c0_304, %c0_305] : memref<2x4x4xf32, #tpu.memory_space<vmem>>, vector<1x4x4xf32>
    %284 = vector.shape_cast %283 : vector<1x4x4xf32> to vector<4x4xf32>
    %cst_306 = arith.constant dense<0.000000e+00> : vector<256x4xf32>
    %285 = tpu.matmul %282, %284, %cst_306 {dimension_numbers = #tpu.dot_dimension_numbers<[1], [0], [0], [1], [0, 0, 1, 1], [], []>} : vector<256x4xf32>, vector<4x4xf32>, vector<256x4xf32> -> vector<256x4xf32>
    %286 = vector.extract_strided_slice %285 {offsets = [0, 0], sizes = [16, 4], strides = [1, 1]} : vector<256x4xf32> to vector<16x4xf32>
    %c0_307 = arith.constant 0 : index
    %c0_308 = arith.constant 0 : index
    %287 = vector.load %arg15[%c0_307, %c0_308] : memref<16x64xf32, #tpu.memory_space<vmem>>, vector<16x4xf32>
    tpu.vector_store %arg15[%c0_307, %c0_308], %286 {strides = array<i32>} : memref<16x64xf32, #tpu.memory_space<vmem>>, vector<16x4xf32>,
    %288 = vector.extract_strided_slice %285 {offsets = [16, 0], sizes = [16, 4], strides = [1, 1]} : vector<256x4xf32> to vector<16x4xf32>
    %c0_309 = arith.constant 0 : index
    %c4_310 = arith.constant 4 : index
    %289 = vector.load %arg15[%c0_309, %c4_310] : memref<16x64xf32, #tpu.memory_space<vmem>>, vector<16x4xf32>
    tpu.vector_store %arg15[%c0_309, %c4_310], %288 {strides = array<i32>} : memref<16x64xf32, #tpu.memory_space<vmem>>, vector<16x4xf32>,
    %290 = vector.extract_strided_slice %285 {offsets = [32, 0], sizes = [16, 4], strides = [1, 1]} : vector<256x4xf32> to vector<16x4xf32>
    %c0_311 = arith.constant 0 : index
    %c8_312 = arith.constant 8 : index
    %291 = vector.load %arg15[%c0_311, %c8_312] : memref<16x64xf32, #tpu.memory_space<vmem>>, vector<16x4xf32>
    tpu.vector_store %arg15[%c0_311, %c8_312], %290 {strides = array<i32>} : memref<16x64xf32, #tpu.memory_space<vmem>>, vector<16x4xf32>,
    %292 = vector.extract_strided_slice %285 {offsets = [48, 0], sizes = [16, 4], strides = [1, 1]} : vector<256x4xf32> to vector<16x4xf32>
    %c0_313 = arith.constant 0 : index
    %c12_314 = arith.constant 12 : index
    %293 = vector.load %arg15[%c0_313, %c12_314] : memref<16x64xf32, #tpu.memory_space<vmem>>, vector<16x4xf32>
    tpu.vector_store %arg15[%c0_313, %c12_314], %292 {strides = array<i32>} : memref<16x64xf32, #tpu.memory_space<vmem>>, vector<16x4xf32>,
    %294 = vector.extract_strided_slice %285 {offsets = [64, 0], sizes = [16, 4], strides = [1, 1]} : vector<256x4xf32> to vector<16x4xf32>
    %c0_315 = arith.constant 0 : index
    %c16_316 = arith.constant 16 : index
    %295 = vector.load %arg15[%c0_315, %c16_316] : memref<16x64xf32, #tpu.memory_space<vmem>>, vector<16x4xf32>
    tpu.vector_store %arg15[%c0_315, %c16_316], %294 {strides = array<i32>} : memref<16x64xf32, #tpu.memory_space<vmem>>, vector<16x4xf32>,
    %296 = vector.extract_strided_slice %285 {offsets = [80, 0], sizes = [16, 4], strides = [1, 1]} : vector<256x4xf32> to vector<16x4xf32>
    %c0_317 = arith.constant 0 : index
    %c20_318 = arith.constant 20 : index
    %297 = vector.load %arg15[%c0_317, %c20_318] : memref<16x64xf32, #tpu.memory_space<vmem>>, vector<16x4xf32>
    tpu.vector_store %arg15[%c0_317, %c20_318], %296 {strides = array<i32>} : memref<16x64xf32, #tpu.memory_space<vmem>>, vector<16x4xf32>,
    %298 = vector.extract_strided_slice %285 {offsets = [96, 0], sizes = [16, 4], strides = [1, 1]} : vector<256x4xf32> to vector<16x4xf32>
    %c0_319 = arith.constant 0 : index
    %c24_320 = arith.constant 24 : index
    %299 = vector.load %arg15[%c0_319, %c24_320] : memref<16x64xf32, #tpu.memory_space<vmem>>, vector<16x4xf32>
    tpu.vector_store %arg15[%c0_319, %c24_320], %298 {strides = array<i32>} : memref<16x64xf32, #tpu.memory_space<vmem>>, vector<16x4xf32>,
    %300 = vector.extract_strided_slice %285 {offsets = [112, 0], sizes = [16, 4], strides = [1, 1]} : vector<256x4xf32> to vector<16x4xf32>
    %c0_321 = arith.constant 0 : index
    %c28_322 = arith.constant 28 : index
    %301 = vector.load %arg15[%c0_321, %c28_322] : memref<16x64xf32, #tpu.memory_space<vmem>>, vector<16x4xf32>
    tpu.vector_store %arg15[%c0_321, %c28_322], %300 {strides = array<i32>} : memref<16x64xf32, #tpu.memory_space<vmem>>, vector<16x4xf32>,
    %302 = vector.extract_strided_slice %285 {offsets = [128, 0], sizes = [16, 4], strides = [1, 1]} : vector<256x4xf32> to vector<16x4xf32>
    %c0_323 = arith.constant 0 : index
    %c32_324 = arith.constant 32 : index
    %303 = vector.load %arg15[%c0_323, %c32_324] : memref<16x64xf32, #tpu.memory_space<vmem>>, vector<16x4xf32>
    tpu.vector_store %arg15[%c0_323, %c32_324], %302 {strides = array<i32>} : memref<16x64xf32, #tpu.memory_space<vmem>>, vector<16x4xf32>,
    %304 = vector.extract_strided_slice %285 {offsets = [144, 0], sizes = [16, 4], strides = [1, 1]} : vector<256x4xf32> to vector<16x4xf32>
    %c0_325 = arith.constant 0 : index
    %c36_326 = arith.constant 36 : index
    %305 = vector.load %arg15[%c0_325, %c36_326] : memref<16x64xf32, #tpu.memory_space<vmem>>, vector<16x4xf32>
    tpu.vector_store %arg15[%c0_325, %c36_326], %304 {strides = array<i32>} : memref<16x64xf32, #tpu.memory_space<vmem>>, vector<16x4xf32>,
    %306 = vector.extract_strided_slice %285 {offsets = [160, 0], sizes = [16, 4], strides = [1, 1]} : vector<256x4xf32> to vector<16x4xf32>
    %c0_327 = arith.constant 0 : index
    %c40_328 = arith.constant 40 : index
    %307 = vector.load %arg15[%c0_327, %c40_328] : memref<16x64xf32, #tpu.memory_space<vmem>>, vector<16x4xf32>
    tpu.vector_store %arg15[%c0_327, %c40_328], %306 {strides = array<i32>} : memref<16x64xf32, #tpu.memory_space<vmem>>, vector<16x4xf32>,
    %308 = vector.extract_strided_slice %285 {offsets = [176, 0], sizes = [16, 4], strides = [1, 1]} : vector<256x4xf32> to vector<16x4xf32>
    %c0_329 = arith.constant 0 : index
    %c44_330 = arith.constant 44 : index
    %309 = vector.load %arg15[%c0_329, %c44_330] : memref<16x64xf32, #tpu.memory_space<vmem>>, vector<16x4xf32>
    tpu.vector_store %arg15[%c0_329, %c44_330], %308 {strides = array<i32>} : memref<16x64xf32, #tpu.memory_space<vmem>>, vector<16x4xf32>,
    %310 = vector.extract_strided_slice %285 {offsets = [192, 0], sizes = [16, 4], strides = [1, 1]} : vector<256x4xf32> to vector<16x4xf32>
    %c0_331 = arith.constant 0 : index
    %c48_332 = arith.constant 48 : index
    %311 = vector.load %arg15[%c0_331, %c48_332] : memref<16x64xf32, #tpu.memory_space<vmem>>, vector<16x4xf32>
    tpu.vector_store %arg15[%c0_331, %c48_332], %310 {strides = array<i32>} : memref<16x64xf32, #tpu.memory_space<vmem>>, vector<16x4xf32>,
    %312 = vector.extract_strided_slice %285 {offsets = [208, 0], sizes = [16, 4], strides = [1, 1]} : vector<256x4xf32> to vector<16x4xf32>
    %c0_333 = arith.constant 0 : index
    %c52_334 = arith.constant 52 : index
    %313 = vector.load %arg15[%c0_333, %c52_334] : memref<16x64xf32, #tpu.memory_space<vmem>>, vector<16x4xf32>
    tpu.vector_store %arg15[%c0_333, %c52_334], %312 {strides = array<i32>} : memref<16x64xf32, #tpu.memory_space<vmem>>, vector<16x4xf32>,
    %314 = vector.extract_strided_slice %285 {offsets = [224, 0], sizes = [16, 4], strides = [1, 1]} : vector<256x4xf32> to vector<16x4xf32>
    %c0_335 = arith.constant 0 : index
    %c56_336 = arith.constant 56 : index
    %315 = vector.load %arg15[%c0_335, %c56_336] : memref<16x64xf32, #tpu.memory_space<vmem>>, vector<16x4xf32>
    tpu.vector_store %arg15[%c0_335, %c56_336], %314 {strides = array<i32>} : memref<16x64xf32, #tpu.memory_space<vmem>>, vector<16x4xf32>,
    %316 = vector.extract_strided_slice %285 {offsets = [240, 0], sizes = [16, 4], strides = [1, 1]} : vector<256x4xf32> to vector<16x4xf32>
    %c0_337 = arith.constant 0 : index
    %c60_338 = arith.constant 60 : index
    %317 = vector.load %arg15[%c0_337, %c60_338] : memref<16x64xf32, #tpu.memory_space<vmem>>, vector<16x4xf32>
    tpu.vector_store %arg15[%c0_337, %c60_338], %316 {strides = array<i32>} : memref<16x64xf32, #tpu.memory_space<vmem>>, vector<16x4xf32>,
    %c0_339 = arith.constant 0 : index
    %c0_340 = arith.constant 0 : index
    %318 = vector.load %arg15[%c0_339, %c0_340] : memref<16x64xf32, #tpu.memory_space<vmem>>, vector<16x64xf32>
    %319 = arith.addf %229, %318 : vector<16x64xf32>
    %c1_341 = arith.constant 1 : index
    %c0_342 = arith.constant 0 : index
    %c0_343 = arith.constant 0 : index
    %320 = vector.load %arg6[%c1_341, %c0_342, %c0_343] : memref<2x64x512xf32, #tpu.memory_space<vmem>>, vector<1x64x512xf32>
    %321 = vector.shape_cast %320 : vector<1x64x512xf32> to vector<64x512xf32>
    %cst_344 = arith.constant dense<0.000000e+00> : vector<16x512xf32>
    %322 = tpu.matmul %319, %321, %cst_344 {dimension_numbers = #tpu.dot_dimension_numbers<[1], [0], [0], [1], [0, 0, 1, 1], [], []>} : vector<16x64xf32>, vector<64x512xf32>, vector<16x512xf32> -> vector<16x512xf32>
    %c1_345 = arith.constant 1 : index
    %c0_346 = arith.constant 0 : index
    %c0_347 = arith.constant 0 : index
    %323 = vector.load %arg7[%c1_345, %c0_346, %c0_347] : memref<2x1x512xf32, #tpu.memory_space<vmem>>, vector<1x1x512xf32>
    %324 = vector.shape_cast %323 : vector<1x1x512xf32> to vector<1x512xf32>
    %325 = vector.broadcast %324 : vector<1x512xf32> to vector<16x512xf32>
    %326 = arith.addf %322, %325 : vector<16x512xf32>
    %cst_348 = arith.constant 0.000000e+00 : f32
    %327 = vector.broadcast %cst_348 : f32 to vector<16x512xf32>
    %328 = arith.maximumf %326, %327 : vector<16x512xf32>
    %c1_349 = arith.constant 1 : index
    %c0_350 = arith.constant 0 : index
    %c0_351 = arith.constant 0 : index
    %329 = vector.load %arg8[%c1_349, %c0_350, %c0_351] : memref<2x512x512xf32, #tpu.memory_space<vmem>>, vector<1x512x512xf32>
    %330 = vector.shape_cast %329 : vector<1x512x512xf32> to vector<512x512xf32>
    %cst_352 = arith.constant dense<0.000000e+00> : vector<16x512xf32>
    %331 = tpu.matmul %328, %330, %cst_352 {dimension_numbers = #tpu.dot_dimension_numbers<[1], [0], [0], [1], [0, 0, 1, 1], [], []>} : vector<16x512xf32>, vector<512x512xf32>, vector<16x512xf32> -> vector<16x512xf32>
    %c1_353 = arith.constant 1 : index
    %c0_354 = arith.constant 0 : index
    %c0_355 = arith.constant 0 : index
    %332 = vector.load %arg9[%c1_353, %c0_354, %c0_355] : memref<2x1x512xf32, #tpu.memory_space<vmem>>, vector<1x1x512xf32>
    %333 = vector.shape_cast %332 : vector<1x1x512xf32> to vector<1x512xf32>
    %334 = vector.broadcast %333 : vector<1x512xf32> to vector<16x512xf32>
    %335 = arith.addf %331, %334 : vector<16x512xf32>
    %c0_356 = arith.constant 0 : index
    %c0_357 = arith.constant 0 : index
    %c0_358 = arith.constant 0 : index
    %336 = vector.load %arg11[%c0_356, %c0_357, %c0_358] : memref<1x16x512xf32, #tpu.memory_space<vmem>>, vector<1x16x512xf32>
    %337 = vector.shape_cast %336 : vector<1x16x512xf32> to vector<16x512xf32>
    %338 = vector.shape_cast %335 : vector<16x512xf32> to vector<1x16x512xf32>
    tpu.vector_store %arg11[%c0_356, %c0_357, %c0_358], %338 {strides = array<i32>} : memref<1x16x512xf32, #tpu.memory_space<vmem>>, vector<1x16x512xf32>,
    return
  }
  func.func @transform_0(%arg0: i32) -> (i32, i32, i32) {
    %c0_i32 = arith.constant 0 : i32
    %c0_i32_0 = arith.constant 0 : i32
    %c0_i32_1 = arith.constant 0 : i32
    return %arg0, %c0_i32, %c0_i32_0 : i32, i32, i32
  }
  func.func @transform_1(%arg0: i32) -> (i32, i32, i32) {
    %c0_i32 = arith.constant 0 : i32
    %c0_i32_0 = arith.constant 0 : i32
    %c0_i32_1 = arith.constant 0 : i32
    %c0_i32_2 = arith.constant 0 : i32
    return %c0_i32, %c0_i32_0, %c0_i32_1 : i32, i32, i32
  }
  func.func @transform_2(%arg0: i32) -> (i32, i32, i32) {
    %c0_i32 = arith.constant 0 : i32
    %c0_i32_0 = arith.constant 0 : i32
    %c0_i32_1 = arith.constant 0 : i32
    %c0_i32_2 = arith.constant 0 : i32
    return %c0_i32, %c0_i32_0, %c0_i32_1 : i32, i32, i32
  }
  func.func @transform_3(%arg0: i32) -> (i32, i32, i32) {
    %c0_i32 = arith.constant 0 : i32
    %c0_i32_0 = arith.constant 0 : i32
    %c0_i32_1 = arith.constant 0 : i32
    %c0_i32_2 = arith.constant 0 : i32
    return %c0_i32, %c0_i32_0, %c0_i32_1 : i32, i32, i32
  }
  func.func @transform_4(%arg0: i32) -> (i32, i32, i32) {
    %c0_i32 = arith.constant 0 : i32
    %c0_i32_0 = arith.constant 0 : i32
    %c0_i32_1 = arith.constant 0 : i32
    %c0_i32_2 = arith.constant 0 : i32
    return %c0_i32, %c0_i32_0, %c0_i32_1 : i32, i32, i32
  }
  func.func @transform_5(%arg0: i32) -> (i32, i32, i32) {
    %c0_i32 = arith.constant 0 : i32
    %c0_i32_0 = arith.constant 0 : i32
    %c0_i32_1 = arith.constant 0 : i32
    %c0_i32_2 = arith.constant 0 : i32
    return %c0_i32, %c0_i32_0, %c0_i32_1 : i32, i32, i32
  }
  func.func @transform_6(%arg0: i32) -> (i32, i32, i32) {
    %c0_i32 = arith.constant 0 : i32
    %c0_i32_0 = arith.constant 0 : i32
    %c0_i32_1 = arith.constant 0 : i32
    %c0_i32_2 = arith.constant 0 : i32
    return %c0_i32, %c0_i32_0, %c0_i32_1 : i32, i32, i32
  }
  func.func @transform_7(%arg0: i32) -> (i32, i32, i32) {
    %c0_i32 = arith.constant 0 : i32
    %c0_i32_0 = arith.constant 0 : i32
    %c0_i32_1 = arith.constant 0 : i32
    %c0_i32_2 = arith.constant 0 : i32
    return %c0_i32, %c0_i32_0, %c0_i32_1 : i32, i32, i32
  }
  func.func @transform_8(%arg0: i32) -> (i32, i32, i32) {
    %c0_i32 = arith.constant 0 : i32
    %c0_i32_0 = arith.constant 0 : i32
    %c0_i32_1 = arith.constant 0 : i32
    %c0_i32_2 = arith.constant 0 : i32
    return %c0_i32, %c0_i32_0, %c0_i32_1 : i32, i32, i32
  }
  func.func @transform_9(%arg0: i32) -> (i32, i32, i32) {
    %c0_i32 = arith.constant 0 : i32
    %c0_i32_0 = arith.constant 0 : i32
    %c0_i32_1 = arith.constant 0 : i32
    return %arg0, %c0_i32, %c0_i32_0 : i32, i32, i32
  }
  func.func @transform_10(%arg0: i32) -> (i32, i32, i32) {
    %c0_i32 = arith.constant 0 : i32
    %c0_i32_0 = arith.constant 0 : i32
    %c0_i32_1 = arith.constant 0 : i32
    return %arg0, %c0_i32, %c0_i32_0 : i32, i32, i32
  }
}

</mosaic_0001>

<bundles_post_ra>
// kernel: tile.103
= control target key start
LH: loop header
LB: loop body
LE: loop exit
PB: predicated region body
PF: predicated region fallthrough
CT: control target
= control target key end

     0   :  { %s64_s0 = inlined_call_operand.vmem [shape: f32[4], index: 0, kind: input, shape index: {}]   ;;  %s65_s1 = inlined_call_operand.vmem [shape: f32[64,4], index: 1, kind: output, shape index: {}]  }
   0x1   :  { %v4_v0 = vld [vmem:[%s64_s0] ss:$0 sm:$0xff] }
   0x2   :  { %5 = vst [vmem:[%s65_s1] sm:$0xff] %v4_v0  ;;  %20 = vst [vmem:[%s65_s1 + $0x8] sm:$0xff] %v4_v0 }
   0x3   :  { %21 = vst [vmem:[%s65_s1 + $0x10] sm:$0xff] %v4_v0  ;;  %22 = vst [vmem:[%s65_s1 + $0x18] sm:$0xff] %v4_v0 }
   0x4   :  { %23 = vst [vmem:[%s65_s1 + $0x20] sm:$0xff] %v4_v0  ;;  %24 = vst [vmem:[%s65_s1 + $0x28] sm:$0xff] %v4_v0 }
   0x5   :  { %25 = vst [vmem:[%s65_s1 + $0x30] sm:$0xff] %v4_v0  ;;  %26 = vst [vmem:[%s65_s1 + $0x38] sm:$0xff] %v4_v0 }

// kernel: tile.104
= control target key start
LH: loop header
LB: loop body
LE: loop exit
PB: predicated region body
PF: predicated region fallthrough
CT: control target
= control target key end

     0   :  { %vm5_vm0 = vcmask 1041409   ;;  %s425_s14 = smov 124   ;;  %s426_s21 = smov 116   ;;  %vm7_vm1 = vcmask 31744   ;;  %vm17_vm2 = vcmask 1048544   ;;  %vm27_vm3 = vcmask 1015744   ;;  %s696_s0 = inlined_call_operand.vmem [shape: f32[64,4], index: 0, kind: input, shape index: {}]   ;;  %s697_s1 = inlined_call_operand.vmem [shape: f32[1,256], index: 1, kind: output, shape index: {}]  }
   0x1   :  { %v331_v0 = vld [vmem:[%s696_s0 + $0x1f] sm:$0x1]   ;;  %v335_v3 = vld [vmem:[%s696_s0 + $0x1d] sm:$0x1]   ;;  %v333_v6 = vld [vmem:[%s696_s0 + $0x1e] sm:$0x1]  }
   0x2   :  { %v332_v1 = vld [vmem:[%s696_s0 + $0x3e] sm:$0x2]   ;;  %v336_v4 = vld [vmem:[%s696_s0 + $0x3c] sm:$0x2]   ;;  %v334_v7 = vld [vmem:[%s696_s0 + $0x3d] sm:$0x2]  }
   0x3   :  { %v14_v2 = vsel %vm5_vm0, %v332_v1, %v331_v0  ;;  %v34_v5 = vsel %vm5_vm0, %v336_v4, %v335_v3  ;;  %v337_v8 = vld [vmem:[%s696_s0 + $0x1c] sm:$0x1]   ;;  %v24_v9 = vsel %vm5_vm0, %v334_v7, %v333_v6  ;;  %v339_v12 = vld [vmem:[%s696_s0 + $0x1b] sm:$0x1]   ;;  %v341_v14 = vld [vmem:[%s696_s0 + $0x1a] sm:$0x1]  }
   0x4   :  { %15 = vrot.lane.b32.xlu0 %v14_v2, %s425_s14  ;;  %35 = vrot.lane.b32.xlu1 %v34_v5, %s426_s21  ;;  %v338_v10 = vld [vmem:[%s696_s0 + $0x3b] sm:$0x2]   ;;  %v340_v13 = vld [vmem:[%s696_s0 + $0x3a] sm:$0x2]   ;;  %s427_s3 = smov 120   ;;  %s428_s4 = smov 112  }
   0x5   :  { %v44_v11 = vsel %vm5_vm0, %v338_v10, %v337_v8  ;;  %v342_v15 = vld [vmem:[%s696_s0 + $0x39] sm:$0x2]   ;;  %v54_v16 = vsel %vm5_vm0, %v340_v13, %v339_v12  ;;  %v343_v18 = vld [vmem:[%s696_s0 + $0x19] sm:$0x1]   ;;  %v345_v20 = vld [vmem:[%s696_s0 + $0x18] sm:$0x1]  }
   0x6   :  { %v64_v17 = vsel %vm5_vm0, %v342_v15, %v341_v14  ;;  %v344_v19 = vld [vmem:[%s696_s0 + $0x38] sm:$0x2]   ;;  %v346_v21 = vld [vmem:[%s696_s0 + $0x37] sm:$0x2]   ;;  %s429_s13 = smov 108   ;;  %s430_s14 = smov 104  }
   0x7   :  { %v74_v22 = vsel %vm5_vm0, %v344_v19, %v343_v18  ;;  %v84_v23 = vsel %vm5_vm0, %v346_v21, %v345_v20  ;;  %v347_v24 = vld [vmem:[%s696_s0 + $0x17] sm:$0x1]   ;;  %v349_v26 = vld [vmem:[%s696_s0 + $0x16] sm:$0x1]   ;;  %s431_s23 = smov 100   ;;  %s432_s24 = smov 96  }
   0x8   :  { %25 = vrot.lane.b32.xlu0 %v24_v9, %s427_s3  ;;  %45 = vrot.lane.b32.xlu1 %v44_v11, %s428_s4  ;;  %v348_v25 = vld [vmem:[%s696_s0 + $0x36] sm:$0x2]   ;;  %v350_v27 = vld [vmem:[%s696_s0 + $0x35] sm:$0x2]   ;;  %s433_s4 = smov 92   ;;  %s434_s5 = smov 88  }
   0x9   :  { %v94_v28 = vsel %vm5_vm0, %v348_v25, %v347_v24  ;;  %v104_v29 = vsel %vm5_vm0, %v350_v27, %v349_v26  ;;  %v351_v30 = vld [vmem:[%s696_s0 + $0x15] sm:$0x1]   ;;  %v353_v32 = vld [vmem:[%s696_s0 + $0x14] sm:$0x1]   ;;  %v355_v36 = vld [vmem:[%s696_s0 + $0x13] sm:$0x1]  }
   0xa   :  { %v352_v31 = vld [vmem:[%s696_s0 + $0x34] sm:$0x2]   ;;  %v354_v33 = vld [vmem:[%s696_s0 + $0x33] sm:$0x2]   ;;  %v356_v37 = vld [vmem:[%s696_s0 + $0x32] sm:$0x2]  }
   0xb   :  { %v114_v34 = vsel %vm5_vm0, %v352_v31, %v351_v30  ;;  %v124_v35 = vsel %vm5_vm0, %v354_v33, %v353_v32  ;;  %v357_v38 = vld [vmem:[%s696_s0 + $0x12] sm:$0x1]   ;;  %s436_s15 = smov 80   ;;  %v134_v40 = vsel %vm5_vm0, %v356_v37, %v355_v36  ;;  %v359_v42 = vld [vmem:[%s696_s0 + $0x11] sm:$0x1]   ;;  %s438_s29 = smov 72  }
   0xc   :  { %55 = vrot.lane.b32.xlu0 %v54_v16, %s429_s13  ;;  %65 = vrot.lane.b32.xlu1 %v64_v17, %s430_s14  ;;  %v358_v39 = vld [vmem:[%s696_s0 + $0x31] sm:$0x2]   ;;  %s435_s14 = smov 84   ;;  %v360_v43 = vld [vmem:[%s696_s0 + $0x30] sm:$0x2]   ;;  %s439_s9 = smov 68  }
   0xd   :  { %v144_v41 = vsel %vm5_vm0, %v358_v39, %v357_v38  ;;  %v361_v44 = vld [vmem:[%s696_s0 + $0x10] sm:$0x1]   ;;  %v2_v46 = vld [vmem:[%s696_s0] sm:$0x1]   ;;  %v154_v48 = vsel %vm5_vm0, %v360_v43, %v359_v42  ;;  %v363_v51 = vld [vmem:[%s696_s0 + $0xf] sm:$0x1]  }
   0xe   :  { %v362_v45 = vld [vmem:[%s696_s0 + $0x2f] sm:$0x2]   ;;  %v330_v47 = vld [vmem:[%s696_s0 + $0x1f] sm:$0x2]   ;;  %v364_v52 = vld [vmem:[%s696_s0 + $0x2e] sm:$0x2]  }
   0xf   :  { %v6_v49 = vsel %vm5_vm0, %v330_v47, %v2_v46  ;;  %v164_v50 = vsel %vm5_vm0, %v362_v45, %v361_v44  ;;  %v365_v53 = vld [vmem:[%s696_s0 + $0xe] sm:$0x1]   ;;  %s440_s10 = smov 64   ;;  %v174_v55 = vsel %vm5_vm0, %v364_v52, %v363_v51  ;;  %v367_v57 = vld [vmem:[%s696_s0 + $0xd] sm:$0x1]   ;;  %s441_s19 = smov 60  }
  0x10   :  { %75 = vrot.lane.b32.xlu0 %v74_v22, %s431_s23  ;;  %85 = vrot.lane.b32.xlu1 %v84_v23, %s432_s24  ;;  %s437_s24 = smov 76   ;;  %8 = vst.msk [vmem:[#allocation0] ss:$8 sm:$0x3] %vm7_vm1, %v6_v49   ;;  %v366_v54 = vld [vmem:[%s696_s0 + $0x2d] sm:$0x2]  }
  0x11   :  { %v184_v56 = vsel %vm5_vm0, %v366_v54, %v365_v53  ;;  %v368_v58 = vld [vmem:[%s696_s0 + $0x2c] sm:$0x2]   ;;  %v369_v59 = vld [vmem:[%s696_s0 + $0xc] sm:$0x1]   ;;  %s442_s20 = smov 56   ;;  %s444_s30 = smov 48  }
  0x12   :  { %v370_v60 = vld [vmem:[%s696_s0 + $0x2b] sm:$0x2]   ;;  %v194_v61 = vsel %vm5_vm0, %v368_v58, %v367_v57  ;;  %v371_v63 = vld [vmem:[%s696_s0 + $0xb] sm:$0x1]   ;;  %v373_v1 = vld [vmem:[%s696_s0 + $0xa] sm:$0x1]  }
  0x13   :  { %v204_v62 = vsel %vm5_vm0, %v370_v60, %v369_v59  ;;  %v372_v0 = vld [vmem:[%s696_s0 + $0x2a] sm:$0x2]   ;;  %v374_v2 = vld [vmem:[%s696_s0 + $0x29] sm:$0x2]   ;;  %v375_v5 = vld [vmem:[%s696_s0 + $0x9] sm:$0x1]  }
  0x14   :  { %95 = vrot.lane.b32.xlu0 %v94_v28, %s433_s4  ;;  %105 = vrot.lane.b32.xlu1 %v104_v29, %s434_s5  ;;  %v214_v3 = vsel %vm5_vm0, %v372_v0, %v371_v63  ;;  %v224_v4 = vsel %vm5_vm0, %v374_v2, %v373_v1  ;;  %v376_v6 = vld [vmem:[%s696_s0 + $0x28] sm:$0x2]   ;;  %v377_v7 = vld [vmem:[%s696_s0 + $0x8] sm:$0x1]   ;;  %s446_s11 = smov 40   ;;  %s448_s21 = smov 32  }
  0x15   :  { %v378_v8 = vld [vmem:[%s696_s0 + $0x27] sm:$0x2]   ;;  %v234_v9 = vsel %vm5_vm0, %v376_v6, %v375_v5  ;;  %v379_v11 = vld [vmem:[%s696_s0 + $0x7] sm:$0x1]   ;;  %v381_v13 = vld [vmem:[%s696_s0 + $0x6] sm:$0x1]  }
  0x16   :  { %v244_v10 = vsel %vm5_vm0, %v378_v8, %v377_v7  ;;  %v380_v12 = vld [vmem:[%s696_s0 + $0x26] sm:$0x2]   ;;  %v382_v14 = vld [vmem:[%s696_s0 + $0x25] sm:$0x2]   ;;  %v383_v17 = vld [vmem:[%s696_s0 + $0x5] sm:$0x1]  }
  0x17   :  { %v254_v15 = vsel %vm5_vm0, %v380_v12, %v379_v11  ;;  %v264_v16 = vsel %vm5_vm0, %v382_v14, %v381_v13  ;;  %v384_v18 = vld [vmem:[%s696_s0 + $0x24] sm:$0x2]   ;;  %v385_v19 = vld [vmem:[%s696_s0 + $0x4] sm:$0x1]   ;;  %s450_s2 = smov 24   ;;  %s452_s12 = smov 16  }
  0x18   :  { %115 = vrot.lane.b32.xlu0 %v114_v34, %s435_s14  ;;  %125 = vrot.lane.b32.xlu1 %v124_v35, %s436_s15  ;;  %v386_v20 = vld [vmem:[%s696_s0 + $0x23] sm:$0x2]   ;;  %v274_v21 = vsel %vm5_vm0, %v384_v18, %v383_v17  ;;  %v387_v23 = vld [vmem:[%s696_s0 + $0x3] sm:$0x1]   ;;  %s454_s17 = smov 8   ;;  %s455_s18 = smov 4  }
  0x19   :  { %v284_v22 = vsel %vm5_vm0, %v386_v20, %v385_v19  ;;  %v388_v24 = vld [vmem:[%s696_s0 + $0x22] sm:$0x2]   ;;  %v389_v25 = vld [vmem:[%s696_s0 + $0x2] sm:$0x1]   ;;  %v391_v29 = vld [vmem:[%s696_s0 + $0x1] sm:$0x1]  }
  0x1a   :  { %v390_v26 = vld [vmem:[%s696_s0 + $0x21] sm:$0x2]   ;;  %v294_v27 = vsel %vm5_vm0, %v388_v24, %v387_v23  ;;  %v392_v30 = vld [vmem:[%s696_s0 + $0x20] sm:$0x2]   ;;  %s453_s0 = smov 12   ;;  %vm37_vm4 = vcmask 982944  }
  0x1b   :  { %v304_v28 = vsel %vm5_vm0, %v390_v26, %v389_v25  ;;  %v314_v31 = vsel %vm5_vm0, %v392_v30, %v391_v29  ;;  %vm47_vm5 = vcmask 950144   ;;  %vm57_vm6 = vcmask 917344  }
  0x1c   :  { %135 = vrot.lane.b32.xlu0 %v134_v40, %s437_s24  ;;  %145 = vrot.lane.b32.xlu1 %v144_v41, %s438_s29  ;;  %s443_s29 = smov 52   ;;  %vm67_vm7 = vcmask 884544   ;;  %vm77_vm8 = vcmask 851744   ;;  %vm87_vm9 = vcmask 818944   ;;  %vm97_vm10 = vcmask 786144  }
  0x1d   :  { %vm107_vm11 = vcmask 753344   ;;  %vm117_vm12 = vcmask 720544   ;;  %vm127_vm13 = vcmask 687744   ;;  %vm137_vm14 = vcmask 654944  }
  0x1e   :  { %vm147_vm15 = vcmask 622144   ;;  %vm157_vm0 = vcmask 589344   ;;  %vm167_vm1 = vcmask 556544  }
  0x20   :  { %155 = vrot.lane.b32.xlu0 %v154_v48, %s439_s9  ;;  %165 = vrot.lane.b32.xlu1 %v164_v50, %s440_s10  ;;  %s445_s10 = smov 44  }
  0x24   :  { %175 = vrot.lane.b32.xlu0 %v174_v55, %s441_s19  ;;  %185 = vrot.lane.b32.xlu1 %v184_v56, %s442_s20  ;;  %s447_s20 = smov 36  }
  0x28   :  { %195 = vrot.lane.b32.xlu0 %v194_v61, %s443_s29  ;;  %205 = vrot.lane.b32.xlu1 %v204_v62, %s444_s30  ;;  %s449_s30 = smov 28  }
  0x2c   :  { %215 = vrot.lane.b32.xlu0 %v214_v3, %s445_s10  ;;  %225 = vrot.lane.b32.xlu1 %v224_v4, %s446_s11  ;;  %s451_s11 = smov 20  }
  0x30   :  { %235 = vrot.lane.b32.xlu0 %v234_v9, %s447_s20  ;;  %245 = vrot.lane.b32.xlu1 %v244_v10, %s448_s21 }
  0x34   :  { %255 = vrot.lane.b32.xlu0 %v254_v15, %s449_s30  ;;  %265 = vrot.lane.b32.xlu1 %v264_v16, %s450_s2 }
  0x38   :  { %275 = vrot.lane.b32.xlu0 %v274_v21, %s451_s11  ;;  %285 = vrot.lane.b32.xlu1 %v284_v22, %s452_s12 }
  0x3c   :  { %295 = vrot.lane.b32.xlu0 %v294_v27, %s453_s0  ;;  %305 = vrot.lane.b32.xlu1 %v304_v28, %s454_s17 }
  0x40   :  { %315 = vrot.lane.b32.xlu0 %v314_v31, %s455_s18 }
  0x76   :  { %v16_v32 = vpop.permute.xlu0 %15   ;;  %v36_v33 = vpop.permute.xlu1 %35  }
  0x77   :  { %18 = vst.msk [vmem:[#allocation0] ss:$8 sm:$0x3] %vm17_vm2, %v16_v32   ;;  %vm177_vm2 = vcmask 523744  }
  0x7a   :  { %v26_v34 = vpop.permute.xlu0 %25   ;;  %v46_v35 = vpop.permute.xlu1 %45  }
  0x7b   :  { %28 = vst.msk [vmem:[#allocation0] ss:$8 sm:$0x3] %vm27_vm3, %v26_v34   ;;  %vm187_vm3 = vcmask 490944  }
  0x7c   :  { %38 = vst.msk [vmem:[#allocation0] ss:$8 sm:$0x3] %vm37_vm4, %v36_v33   ;;  %vm197_vm4 = vcmask 458144  }
  0x7d   :  { %48 = vst.msk [vmem:[#allocation0] ss:$8 sm:$0x3] %vm47_vm5, %v46_v35   ;;  %vm207_vm5 = vcmask 425344  }
  0x7e   :  { %v56_v36 = vpop.permute.xlu0 %55   ;;  %v66_v37 = vpop.permute.xlu1 %65  }
  0x7f   :  { %58 = vst.msk [vmem:[#allocation0] ss:$8 sm:$0x3] %vm57_vm6, %v56_v36   ;;  %vm217_vm6 = vcmask 392544  }
  0x80   :  { %68 = vst.msk [vmem:[#allocation0] ss:$8 sm:$0x3] %vm67_vm7, %v66_v37   ;;  %vm227_vm7 = vcmask 359744  }
  0x82   :  { %v76_v38 = vpop.permute.xlu0 %75   ;;  %v86_v39 = vpop.permute.xlu1 %85  }
  0x83   :  { %78 = vst.msk [vmem:[#allocation0] ss:$8 sm:$0x3] %vm77_vm8, %v76_v38   ;;  %vm237_vm8 = vcmask 326944  }
  0x84   :  { %88 = vst.msk [vmem:[#allocation0] ss:$8 sm:$0x3] %vm87_vm9, %v86_v39   ;;  %vm247_vm9 = vcmask 294144  }
  0x86   :  { %v96_v40 = vpop.permute.xlu0 %95   ;;  %v106_v41 = vpop.permute.xlu1 %105  }
  0x87   :  { %98 = vst.msk [vmem:[#allocation0] ss:$8 sm:$0x3] %vm97_vm10, %v96_v40   ;;  %vm257_vm10 = vcmask 261344  }
  0x88   :  { %108 = vst.msk [vmem:[#allocation0] ss:$8 sm:$0x3] %vm107_vm11, %v106_v41   ;;  %vm267_vm11 = vcmask 228544  }
  0x8a   :  { %v116_v42 = vpop.permute.xlu0 %115   ;;  %v126_v43 = vpop.permute.xlu1 %125  }
  0x8b   :  { %118 = vst.msk [vmem:[#allocation0] ss:$8 sm:$0x3] %vm117_vm12, %v116_v42   ;;  %vm277_vm12 = vcmask 195744  }
  0x8c   :  { %128 = vst.msk [vmem:[#allocation0] ss:$8 sm:$0x3] %vm127_vm13, %v126_v43   ;;  %vm287_vm13 = vcmask 162944  }
  0x8e   :  { %v136_v44 = vpop.permute.xlu0 %135   ;;  %v146_v45 = vpop.permute.xlu1 %145  }
  0x8f   :  { %138 = vst.msk [vmem:[#allocation0] ss:$8 sm:$0x3] %vm137_vm14, %v136_v44   ;;  %vm297_vm14 = vcmask 130144  }
  0x90   :  { %148 = vst.msk [vmem:[#allocation0] ss:$8 sm:$0x3] %vm147_vm15, %v146_v45   ;;  %vm307_vm15 = vcmask 97344  }
  0x92   :  { %v156_v46 = vpop.permute.xlu0 %155   ;;  %v166_v47 = vpop.permute.xlu1 %165  }
  0x93   :  { %158 = vst.msk [vmem:[#allocation0] ss:$8 sm:$0x3] %vm157_vm0, %v156_v46   ;;  %vm317_vm0 = vcmask 64544  }
  0x94   :  { %168 = vst.msk [vmem:[#allocation0] ss:$8 sm:$0x3] %vm167_vm1, %v166_v47  }
  0x96   :  { %v176_v48 = vpop.permute.xlu0 %175   ;;  %v186_v49 = vpop.permute.xlu1 %185  }
  0x97   :  { %178 = vst.msk [vmem:[#allocation0] ss:$8 sm:$0x3] %vm177_vm2, %v176_v48  }
  0x98   :  { %188 = vst.msk [vmem:[#allocation0] ss:$8 sm:$0x3] %vm187_vm3, %v186_v49  }
  0x9a   :  { %v196_v50 = vpop.permute.xlu0 %195   ;;  %v206_v51 = vpop.permute.xlu1 %205  }
  0x9b   :  { %198 = vst.msk [vmem:[#allocation0] ss:$8 sm:$0x3] %vm197_vm4, %v196_v50  }
  0x9c   :  { %208 = vst.msk [vmem:[#allocation0] ss:$8 sm:$0x3] %vm207_vm5, %v206_v51  }
  0x9e   :  { %v216_v52 = vpop.permute.xlu0 %215   ;;  %v226_v53 = vpop.permute.xlu1 %225  }
  0x9f   :  { %218 = vst.msk [vmem:[#allocation0] ss:$8 sm:$0x3] %vm217_vm6, %v216_v52  }
  0xa0   :  { %228 = vst.msk [vmem:[#allocation0] ss:$8 sm:$0x3] %vm227_vm7, %v226_v53  }
  0xa2   :  { %v236_v54 = vpop.permute.xlu0 %235   ;;  %v246_v55 = vpop.permute.xlu1 %245  }
  0xa3   :  { %238 = vst.msk [vmem:[#allocation0] ss:$8 sm:$0x3] %vm237_vm8, %v236_v54  }
  0xa4   :  { %248 = vst.msk [vmem:[#allocation0] ss:$8 sm:$0x3] %vm247_vm9, %v246_v55  }
  0xa6   :  { %v256_v56 = vpop.permute.xlu0 %255   ;;  %v266_v57 = vpop.permute.xlu1 %265  }
  0xa7   :  { %258 = vst.msk [vmem:[#allocation0] ss:$8 sm:$0x3] %vm257_vm10, %v256_v56  }
  0xa8   :  { %268 = vst.msk [vmem:[#allocation0] ss:$8 sm:$0x3] %vm267_vm11, %v266_v57  }
  0xaa   :  { %v276_v58 = vpop.permute.xlu0 %275   ;;  %v286_v59 = vpop.permute.xlu1 %285  }
  0xab   :  { %278 = vst.msk [vmem:[#allocation0] ss:$8 sm:$0x3] %vm277_vm12, %v276_v58  }
  0xac   :  { %288 = vst.msk [vmem:[#allocation0] ss:$8 sm:$0x3] %vm287_vm13, %v286_v59  }
  0xae   :  { %v296_v60 = vpop.permute.xlu0 %295   ;;  %v306_v61 = vpop.permute.xlu1 %305  }
  0xaf   :  { %298 = vst.msk [vmem:[#allocation0] ss:$8 sm:$0x3] %vm297_vm14, %v296_v60  }
  0xb0   :  { %308 = vst.msk [vmem:[#allocation0] ss:$8 sm:$0x3] %vm307_vm15, %v306_v61  }
  0xb2   :  { %v316_v62 = vpop.permute.xlu0 %315  }
  0xb3   :  { %318 = vst.msk [vmem:[#allocation0] ss:$8 sm:$0x3] %vm317_vm0, %v316_v62  }
  0xba   :  { %v322_v63 = vld [vmem:[#allocation0] sm:$0x1]  ;;  %v326_v0 = vld [vmem:[#allocation0 + $0x8] sm:$0x1] }
  0xbb   :  { %324 = vst [vmem:[%s697_s1] sm:$0x1] %v322_v63  ;;  %393 = vst [vmem:[%s697_s1 + $0x1] sm:$0x1] %v326_v0 }

// kernel: tile.63
= control target key start
LH: loop header
LB: loop body
LE: loop exit
PB: predicated region body
PF: predicated region fallthrough
CT: control target
= control target key end

     0   :  { %s28_s0 = inlined_call_operand.vmem [shape: f32[4], index: 0, kind: input, shape index: {}]   ;;  %s29_s1 = inlined_call_operand.vmem [shape: f32[16,4], index: 1, kind: output, shape index: {}]  }
   0x1   :  { %v4_v0 = vld [vmem:[%s28_s0] ss:$0 sm:$0xff] }
   0x2   :  { %5 = vst [vmem:[%s29_s1] sm:$0xff] %v4_v0  ;;  %8 = vst [vmem:[%s29_s1 + $0x8] sm:$0xff] %v4_v0 }

// kernel: tile.76
= control target key start
LH: loop header
LB: loop body
LE: loop exit
PB: predicated region body
PF: predicated region fallthrough
CT: control target
= control target key end

     0   :  { %s131_s10 = smov 60   ;;  %s132_s11 = smov 52   ;;  %vm3_vm0 = vcmask 31744   ;;  %vm9_vm1 = vcmask 523744   ;;  %vm15_vm2 = vcmask 490944   ;;  %vm21_vm3 = vcmask 458144   ;;  %s207_s0 = inlined_call_operand.vmem [shape: f32[16,4], index: 0, kind: input, shape index: {}]   ;;  %s208_s1 = inlined_call_operand.vmem [shape: f32[1,1,64], index: 1, kind: output, shape index: {}]  }
   0x1   :  { %v101_v0 = vld [vmem:[%s207_s0 + $0xf] sm:$0x1]   ;;  %v103_v1 = vld [vmem:[%s207_s0 + $0xd] sm:$0x1]   ;;  %v102_v2 = vld [vmem:[%s207_s0 + $0xe] sm:$0x1]  }
   0x2   :  { %7 = vrot.lane.b32.xlu0 %v101_v0, %s131_s10  ;;  %19 = vrot.lane.b32.xlu1 %v103_v1, %s132_s11  ;;  %v104_v3 = vld [vmem:[%s207_s0 + $0xc] sm:$0x1]   ;;  %s133_s16 = smov 56   ;;  %s134_s17 = smov 48   ;;  %v105_v4 = vld [vmem:[%s207_s0 + $0xb] sm:$0x1]  }
   0x3   :  { %v106_v5 = vld [vmem:[%s207_s0 + $0xa] sm:$0x1]   ;;  %v2_v6 = vld [vmem:[%s207_s0] sm:$0x1]   ;;  %s135_s24 = smov 44   ;;  %s136_s25 = smov 40  }
   0x4   :  { %4 = vst.msk [vmem:[#allocation0] sm:$0x1] %vm3_vm0, %v2_v6   ;;  %v107_v7 = vld [vmem:[%s207_s0 + $0x9] sm:$0x1]   ;;  %v108_v8 = vld [vmem:[%s207_s0 + $0x8] sm:$0x1]  }
   0x5   :  { %s137_s30 = smov 36   ;;  %s138_s2 = smov 32   ;;  %v109_v9 = vld [vmem:[%s207_s0 + $0x7] sm:$0x1]   ;;  %v110_v10 = vld [vmem:[%s207_s0 + $0x6] sm:$0x1]  }
   0x6   :  { %13 = vrot.lane.b32.xlu0 %v102_v2, %s133_s16  ;;  %25 = vrot.lane.b32.xlu1 %v104_v3, %s134_s17  ;;  %s139_s7 = smov 28   ;;  %s140_s8 = smov 24   ;;  %v111_v11 = vld [vmem:[%s207_s0 + $0x5] sm:$0x1]   ;;  %v112_v12 = vld [vmem:[%s207_s0 + $0x4] sm:$0x1]  }
   0x7   :  { %s141_s13 = smov 20   ;;  %s142_s14 = smov 16   ;;  %v113_v13 = vld [vmem:[%s207_s0 + $0x3] sm:$0x1]   ;;  %v114_v14 = vld [vmem:[%s207_s0 + $0x2] sm:$0x1]  }
   0x8   :  { %s143_s19 = smov 12   ;;  %s144_s20 = smov 8   ;;  %v115_v15 = vld [vmem:[%s207_s0 + $0x1] sm:$0x1]   ;;  %vm27_vm4 = vcmask 425344   ;;  %vm33_vm5 = vcmask 392544  }
   0x9   :  { %s145_s0 = smov 4   ;;  %vm39_vm6 = vcmask 359744   ;;  %vm45_vm7 = vcmask 326944   ;;  %vm51_vm8 = vcmask 294144   ;;  %vm57_vm9 = vcmask 261344  }
   0xa   :  { %31 = vrot.lane.b32.xlu0 %v105_v4, %s135_s24  ;;  %37 = vrot.lane.b32.xlu1 %v106_v5, %s136_s25  ;;  %vm63_vm10 = vcmask 228544   ;;  %vm69_vm11 = vcmask 195744   ;;  %vm75_vm12 = vcmask 162944   ;;  %vm81_vm13 = vcmask 130144  }
   0xb   :  { %vm87_vm14 = vcmask 97344   ;;  %vm93_vm15 = vcmask 64544  }
   0xe   :  { %43 = vrot.lane.b32.xlu0 %v107_v7, %s137_s30  ;;  %49 = vrot.lane.b32.xlu1 %v108_v8, %s138_s2 }
  0x12   :  { %55 = vrot.lane.b32.xlu0 %v109_v9, %s139_s7  ;;  %61 = vrot.lane.b32.xlu1 %v110_v10, %s140_s8 }
  0x16   :  { %67 = vrot.lane.b32.xlu0 %v111_v11, %s141_s13  ;;  %73 = vrot.lane.b32.xlu1 %v112_v12, %s142_s14 }
  0x1a   :  { %79 = vrot.lane.b32.xlu0 %v113_v13, %s143_s19  ;;  %85 = vrot.lane.b32.xlu1 %v114_v14, %s144_s20 }
  0x1e   :  { %91 = vrot.lane.b32.xlu0 %v115_v15, %s145_s0 }
  0x74   :  { %v8_v16 = vpop.permute.xlu0 %7   ;;  %v20_v17 = vpop.permute.xlu1 %19  }
  0x75   :  { %10 = vst.msk [vmem:[#allocation0] sm:$0x1] %vm9_vm1, %v8_v16  }
  0x78   :  { %v14_v18 = vpop.permute.xlu0 %13   ;;  %v26_v19 = vpop.permute.xlu1 %25  }
  0x79   :  { %16 = vst.msk [vmem:[#allocation0] sm:$0x1] %vm15_vm2, %v14_v18  }
  0x7a   :  { %22 = vst.msk [vmem:[#allocation0] sm:$0x1] %vm21_vm3, %v20_v17  }
  0x7b   :  { %28 = vst.msk [vmem:[#allocation0] sm:$0x1] %vm27_vm4, %v26_v19  }
  0x7c   :  { %v32_v20 = vpop.permute.xlu0 %31   ;;  %v38_v21 = vpop.permute.xlu1 %37  }
  0x7d   :  { %34 = vst.msk [vmem:[#allocation0] sm:$0x1] %vm33_vm5, %v32_v20  }
  0x7e   :  { %40 = vst.msk [vmem:[#allocation0] sm:$0x1] %vm39_vm6, %v38_v21  }
  0x80   :  { %v44_v22 = vpop.permute.xlu0 %43   ;;  %v50_v23 = vpop.permute.xlu1 %49  }
  0x81   :  { %46 = vst.msk [vmem:[#allocation0] sm:$0x1] %vm45_vm7, %v44_v22  }
  0x82   :  { %52 = vst.msk [vmem:[#allocation0] sm:$0x1] %vm51_vm8, %v50_v23  }
  0x84   :  { %v56_v24 = vpop.permute.xlu0 %55   ;;  %v62_v25 = vpop.permute.xlu1 %61  }
  0x85   :  { %58 = vst.msk [vmem:[#allocation0] sm:$0x1] %vm57_vm9, %v56_v24  }
  0x86   :  { %64 = vst.msk [vmem:[#allocation0] sm:$0x1] %vm63_vm10, %v62_v25  }
  0x88   :  { %v68_v26 = vpop.permute.xlu0 %67   ;;  %v74_v27 = vpop.permute.xlu1 %73  }
  0x89   :  { %70 = vst.msk [vmem:[#allocation0] sm:$0x1] %vm69_vm11, %v68_v26  }
  0x8a   :  { %76 = vst.msk [vmem:[#allocation0] sm:$0x1] %vm75_vm12, %v74_v27  }
  0x8c   :  { %v80_v28 = vpop.permute.xlu0 %79   ;;  %v86_v29 = vpop.permute.xlu1 %85  }
  0x8d   :  { %82 = vst.msk [vmem:[#allocation0] sm:$0x1] %vm81_vm13, %v80_v28  }
  0x8e   :  { %88 = vst.msk [vmem:[#allocation0] sm:$0x1] %vm87_vm14, %v86_v29  }
  0x90   :  { %v92_v30 = vpop.permute.xlu0 %91  }
  0x91   :  { %94 = vst.msk [vmem:[#allocation0] sm:$0x1] %vm93_vm15, %v92_v30  }
  0x98   :  { %v98_v31 = vld [vmem:[#allocation0] sm:$0x1] }
  0x99   :  { %100 = vst [vmem:[%s208_s1] sm:$0x1] %v98_v31 }

// kernel: mask_head_forward.1
= control target key start
LH: loop header
LB: loop body
LE: loop exit
PB: predicated region body
PF: predicated region fallthrough
CT: control target
= control target key end

     0   :  { %s12192_s13 = smov 0   ;;  %s17402_s0 = inlined_call_operand.vmem [shape: f32[2,16,64], index: 0, kind: input, shape index: {}]   ;;  %s17403_s1 = inlined_call_operand.vmem [shape: f32[4,576,64], index: 1, kind: input, shape index: {}]   ;;  %s17404_s2 = inlined_call_operand.vmem [shape: f32[4,1,64], index: 2, kind: input, shape index: {}]   ;;  %s17405_s3 = inlined_call_operand.vmem [shape: f32[2,4,12], index: 3, kind: input, shape index: {}]   ;;  %s17406_s4 = inlined_call_operand.vmem [shape: f32[2,4,4], index: 4, kind: input, shape index: {}]   ;;  %s17407_s5 = inlined_call_operand.vmem [shape: f32[2,64,512], index: 5, kind: input, shape index: {}]   ;;  %s17408_s6 = inlined_call_operand.vmem [shape: f32[2,1,512], index: 6, kind: input, shape index: {}]   ;;  %s17409_s7 = inlined_call_operand.vmem [shape: f32[2,512,512], index: 7, kind: input, shape index: {}]   ;;  %s17410_s8 = inlined_call_operand.vmem [shape: f32[2,1,512], index: 8, kind: input, shape index: {}]   ;;  %s17411_s9 = inlined_call_operand.vmem [shape: f32[2,16,512], index: 9, kind: output, shape index: {0}]   ;;  %s17412_s10 = inlined_call_operand.vmem [shape: f32[2,16,512], index: 10, kind: output, shape index: {1}]  }
   0x1   :  { %17556 = sst [smem:[#allocation31_spill]] %s17402_s0 }
   0x2   :  { %17557 = sst [smem:[#allocation32_spill]] %s17403_s1 }
   0x3 LB: > { %s8446_s14 = sadd.s32 4294967295, %s12102_s13   ;;  %p8450_p0 = scmp.ge.s32.totalorder %s12102_s13, 1  ;;  %s12102_s13 = sphi %s12192_s13, %s21_s13  }
   0x4   : > { %p315_p1 = scmp.lt.s32.totalorder %s12102_s13, 3 }
   0x6   : > { %p316_p2 = pnand %p8450_p0, %p315_p1 }
   0x8   : > { %319 = sbr.rel (%p316_p2) target bundleno = 6153 (0x1809), region = 56 }
   0xf   : > { %p358_p3 = scmp.lt.s32.totalorder %s8446_s14, 1  ;;  %vm373_vm0 = vcmask 588800   ;;  %vm376_vm1 = vcmask 582656   ;;  %v17417_v0 = vmov 0.0   ;;  %s17558_s0 = sld [smem:[#allocation31_spill]]  ;;  %vm17488_vm2 = vcmask 556064  }
  0x10   : > { %374 = vst.msk [vmem:[#allocation2] sm:$0xff] %vm373_vm0, %v17417_v0  ;;  %375 = vst.msk [vmem:[#allocation2 + $0x8] sm:$0xff] %vm373_vm0, %v17417_v0  ;;  %s17512_s19 = smov 4   ;;  %s17559_s1 = sld [smem:[#allocation32_spill]]  ;;  %vm17516_vm3 = vcmask 523264   ;;  %vm17487_vm4 = vcmask 1048064  }
  0x11   : > { %377 = vst.msk [vmem:[#allocation2 + $0x10] sm:$0x3] %vm376_vm1, %v17417_v0  ;;  %s17894_s14 = smov (!%p358_p3, %s8446_s14), 1  ;;  %s17475_s12 = smov 120   ;;  %vm17486_vm5 = vcmask 1043456   ;;  %vm17485_vm6 = vcmask 31744  }
  0x12   : > { %s9250_s15 = sshll.u32 %s17894_s14, 4  ;;  %s17473_s26 = smov 64   ;;  %vm13022_vm7 = vmpackc.low %vm17485_vm6, %vm17485_vm6  ;;  %vm3397_vm8 = vcmask 64544   ;;  %vm3408_vm9 = vcmask 97344   ;;  %vm3419_vm10 = vcmask 130144   ;;  %vm3430_vm11 = vcmask 162944  }
  0x13   : > { %s17508_s27 = smov 56   ;;  %s17471_s28 = smov 124   ;;  %vm3441_vm12 = vcmask 195744   ;;  %vm3452_vm13 = vcmask 228544   ;;  %vm17500_vm14 = vcmask 261344   ;;  %vm3474_vm15 = vcmask 294144  }
  0x14   : > { %s17469_s23 = smov 116   ;;  %s17467_s24 = smov 112   ;;  %vm17520_vm0 = vcmask 326944   ;;  %vm17489_vm1 = vcmask 359744  }
  0x15   : > { %s12209_s18 = scalar_lea.vmem %s17558_s0, %s9250_s15  ;;  %s17510_s15 = smov 60  }
  0x16   : > { %v378_v1 = vld [vmem:[%s12209_s18] sm:$0xff]  ;;  %v379_v2 = vld [vmem:[%s12209_s18 + $0x8] sm:$0xff]  ;;  %v513_v8 = vld [vmem:[%s17559_s1 + $0x90] sm:$0xff]  ;;  %s17465_s25 = smov 108   ;;  %s17463_s29 = smov 104  }
  0x17   : > { %382 = vrot.lane.b32.xlu0 %v378_v1, %s17512_s19  ;;  %v511_v3 = vld [vmem:[%s17559_s1 + $0x80] sm:$0xff]  ;;  %v512_v4 = vld [vmem:[%s17559_s1 + $0x88] sm:$0xff]  ;;  %v514_v9 = vld [vmem:[%s17559_s1 + $0x98] sm:$0xff]  ;;  %s17461_s30 = smov 100   ;;  %s17459_s11 = smov 96  }
  0x18   : > { %v495_v5 = vld [vmem:[%s17559_s1] sm:$0xff]  ;;  %v10197_v6 = vpack.c.bf16 %v512_v4, %v511_v3  ;;  %v496_v7 = vld [vmem:[%s17559_s1 + $0x8] sm:$0xff]  ;;  %v10201_v11 = vpack.c.bf16 %v514_v9, %v513_v8  ;;  %v497_v12 = vld [vmem:[%s17559_s1 + $0x10] sm:$0xff]  ;;  %s17457_s16 = smov 92   ;;  %s17413_s17 = smov 88  }
  0x19   : > { %v10199_v10 = vpack.c.bf16 %v496_v7, %v495_v5  ;;  %v498_v13 = vld [vmem:[%s17559_s1 + $0x18] sm:$0xff]  ;;  %v515_v14 = vld [vmem:[%s17559_s1 + $0xa0] sm:$0xff]  ;;  %v516_v15 = vld [vmem:[%s17559_s1 + $0xa8] sm:$0xff]  ;;  %s17415_s20 = smov 84   ;;  %s17455_s21 = smov 80  }
  0x1a   : > { %10198 = vmatprep.subr.bf16.mxu0 %v10197_v6  ;;  %v543_v16 = vld [vmem:[%s17559_s1 + $0x180] sm:$0xff]  ;;  %v544_v17 = vld [vmem:[%s17559_s1 + $0x188] sm:$0xff]  ;;  %v10203_v18 = vpack.c.bf16 %v498_v13, %v497_v12  ;;  %v10205_v22 = vpack.c.bf16 %v516_v15, %v515_v14  ;;  %v517_v25 = vld [vmem:[%s17559_s1 + $0xb0] sm:$0xff]  ;;  %s17453_s22 = smov 76  }
  0x1b   : > { %384 = vrot.lane.b32.xlu0 %v379_v2, %s17512_s19  ;;  %10200 = vmatpush3.bf16.msra.mxu0 %v10199_v10  ;;  %v10229_v19 = vpack.c.bf16 %v544_v17, %v543_v16  ;;  %v499_v20 = vld [vmem:[%s17559_s1 + $0x20] sm:$0xff]  ;;  %v500_v23 = vld [vmem:[%s17559_s1 + $0x28] sm:$0xff]  ;;  %v518_v27 = vld [vmem:[%s17559_s1 + $0xb8] sm:$0xff] }
  0x1c   : > { %v527_v21 = vld [vmem:[%s17559_s1 + $0x100] sm:$0xff]  ;;  %10202 = vmatprep.subr.bf16.mxu0 %v10201_v11  ;;  %v528_v24 = vld [vmem:[%s17559_s1 + $0x108] sm:$0xff]  ;;  %v545_v28 = vld [vmem:[%s17559_s1 + $0x190] sm:$0xff]  ;;  %v10207_v33 = vpack.c.bf16 %v500_v23, %v499_v20  ;;  %v10209_v37 = vpack.c.bf16 %v518_v27, %v517_v25 }
  0x1d   : > { %10230 = vmatprep.subr.bf16.mxu1 %v10229_v19  ;;  %v10231_v26 = vpack.c.bf16 %v528_v24, %v527_v21  ;;  %v546_v29 = vld [vmem:[%s17559_s1 + $0x198] sm:$0xff]  ;;  %v529_v31 = vld [vmem:[%s17559_s1 + $0x110] sm:$0xff]  ;;  %v547_v36 = vld [vmem:[%s17559_s1 + $0x1a0] sm:$0xff] }
  0x1e   : > { %v10233_v30 = vpack.c.bf16 %v546_v29, %v545_v28  ;;  %v530_v32 = vld [vmem:[%s17559_s1 + $0x118] sm:$0xff]  ;;  %v501_v34 = vld [vmem:[%s17559_s1 + $0x30] sm:$0xff]  ;;  %v519_v39 = vld [vmem:[%s17559_s1 + $0xc0] sm:$0xff] }
  0x1f   : > { %10204 = vmatpush3.bf16.msra.mxu0 %v10203_v18  ;;  %10232 = vmatpush3.bf16.msra.mxu1 %v10231_v26  ;;  %v10235_v35 = vpack.c.bf16 %v530_v32, %v529_v31  ;;  %v502_v38 = vld [vmem:[%s17559_s1 + $0x38] sm:$0xff]  ;;  %v548_v40 = vld [vmem:[%s17559_s1 + $0x1a8] sm:$0xff]  ;;  %v531_v43 = vld [vmem:[%s17559_s1 + $0x120] sm:$0xff] }
  0x20   : > { %10206 = vmatprep.subr.bf16.mxu0 %v10205_v22  ;;  %10234 = vmatprep.subr.bf16.mxu1 %v10233_v30  ;;  %v520_v41 = vld [vmem:[%s17559_s1 + $0xc8] sm:$0xff]  ;;  %v10237_v42 = vpack.c.bf16 %v548_v40, %v547_v36  ;;  %v10211_v45 = vpack.c.bf16 %v502_v38, %v501_v34  ;;  %v503_v48 = vld [vmem:[%s17559_s1 + $0x40] sm:$0xff]  ;;  %v521_v51 = vld [vmem:[%s17559_s1 + $0xd0] sm:$0xff] }
  0x21   : > { %v532_v44 = vld [vmem:[%s17559_s1 + $0x128] sm:$0xff]  ;;  %v10213_v47 = vpack.c.bf16 %v520_v41, %v519_v39  ;;  %v522_v52 = vld [vmem:[%s17559_s1 + $0xd8] sm:$0xff]  ;;  %v549_v53 = vld [vmem:[%s17559_s1 + $0x1b0] sm:$0xff] }
  0x22   : > { %v10239_v46 = vpack.c.bf16 %v532_v44, %v531_v43  ;;  %v504_v49 = vld [vmem:[%s17559_s1 + $0x48] sm:$0xff]  ;;  %v10217_v54 = vpack.c.bf16 %v522_v52, %v521_v51  ;;  %v550_v55 = vld [vmem:[%s17559_s1 + $0x1b8] sm:$0xff]  ;;  %v505_v56 = vld [vmem:[%s17559_s1 + $0x50] sm:$0xff] }
  0x23   : > { %10208 = vmatpush3.bf16.msra.mxu0 %v10207_v33  ;;  %10236 = vmatpush3.bf16.msra.mxu1 %v10235_v35  ;;  %v10215_v50 = vpack.c.bf16 %v504_v49, %v503_v48  ;;  %v506_v57 = vld [vmem:[%s17559_s1 + $0x58] sm:$0xff]  ;;  %v10241_v58 = vpack.c.bf16 %v550_v55, %v549_v53  ;;  %v533_v60 = vld [vmem:[%s17559_s1 + $0x130] sm:$0xff]  ;;  %v523_v63 = vld [vmem:[%s17559_s1 + $0xe0] sm:$0xff] }
  0x24   : > { %10210 = vmatprep.subr.bf16.mxu0 %v10209_v37  ;;  %10238 = vmatprep.subr.bf16.mxu1 %v10237_v42  ;;  %v10219_v59 = vpack.c.bf16 %v506_v57, %v505_v56  ;;  %v534_v61 = vld [vmem:[%s17559_s1 + $0x138] sm:$0xff]  ;;  %v524_v1 = vld [vmem:[%s17559_s1 + $0xe8] sm:$0xff]  ;;  %v551_v2 = vld [vmem:[%s17559_s1 + $0x1c0] sm:$0xff] }
  0x25   : > { %v10243_v62 = vpack.c.bf16 %v534_v61, %v533_v60  ;;  %v10221_v3 = vpack.c.bf16 %v524_v1, %v523_v63  ;;  %v552_v4 = vld [vmem:[%s17559_s1 + $0x1c8] sm:$0xff]  ;;  %v507_v5 = vld [vmem:[%s17559_s1 + $0x60] sm:$0xff]  ;;  %v525_v13 = vld [vmem:[%s17559_s1 + $0xf0] sm:$0xff] }
  0x26   : > { %v508_v6 = vld [vmem:[%s17559_s1 + $0x68] sm:$0xff]  ;;  %v10245_v8 = vpack.c.bf16 %v552_v4, %v551_v2  ;;  %v535_v10 = vld [vmem:[%s17559_s1 + $0x140] sm:$0xff]  ;;  %v526_v14 = vld [vmem:[%s17559_s1 + $0xf8] sm:$0xff] }
  0x27   : > { %10212 = vmatpush3.bf16.msra.mxu0 %v10211_v45  ;;  %10240 = vmatpush3.bf16.msra.mxu1 %v10239_v46  ;;  %v10223_v9 = vpack.c.bf16 %v508_v6, %v507_v5  ;;  %v536_v11 = vld [vmem:[%s17559_s1 + $0x148] sm:$0xff]  ;;  %v553_v15 = vld [vmem:[%s17559_s1 + $0x1d0] sm:$0xff]  ;;  %v10225_v16 = vpack.c.bf16 %v526_v14, %v525_v13  ;;  %v554_v17 = vld [vmem:[%s17559_s1 + $0x1d8] sm:$0xff] }
  0x28   : > { %10214 = vmatprep.subr.bf16.mxu0 %v10213_v47  ;;  %10242 = vmatprep.subr.bf16.mxu1 %v10241_v58  ;;  %v10247_v12 = vpack.c.bf16 %v536_v11, %v535_v10  ;;  %v509_v18 = vld [vmem:[%s17559_s1 + $0x70] sm:$0xff]  ;;  %v510_v19 = vld [vmem:[%s17559_s1 + $0x78] sm:$0xff]  ;;  %v10249_v21 = vpack.c.bf16 %v554_v17, %v553_v15  ;;  %v555_v26 = vld [vmem:[%s17559_s1 + $0x1e0] sm:$0xff] }
  0x29   : > { %v10227_v22 = vpack.c.bf16 %v510_v19, %v509_v18  ;;  %v537_v23 = vld [vmem:[%s17559_s1 + $0x150] sm:$0xff]  ;;  %v538_v24 = vld [vmem:[%s17559_s1 + $0x158] sm:$0xff]  ;;  %v556_v27 = vld [vmem:[%s17559_s1 + $0x1e8] sm:$0xff] }
  0x2a   : > { %v10251_v25 = vpack.c.bf16 %v538_v24, %v537_v23  ;;  %v559_v28 = vld [vmem:[%s17559_s1 + $0x200] sm:$0xff]  ;;  %v10253_v29 = vpack.c.bf16 %v556_v27, %v555_v26  ;;  %v560_v30 = vld [vmem:[%s17559_s1 + $0x208] sm:$0xff]  ;;  %v557_v36 = vld [vmem:[%s17559_s1 + $0x1f0] sm:$0xff] }
  0x2b   : > { %10216 = vmatpush3.bf16.msra.mxu0 %v10215_v50  ;;  %10244 = vmatpush3.bf16.msra.mxu1 %v10243_v62  ;;  %v539_v31 = vld [vmem:[%s17559_s1 + $0x160] sm:$0xff]  ;;  %v540_v32 = vld [vmem:[%s17559_s1 + $0x168] sm:$0xff]  ;;  %v12403_v34 = vpack.c.bf16 %v560_v30, %v559_v28  ;;  %v558_v37 = vld [vmem:[%s17559_s1 + $0x1f8] sm:$0xff] }
  0x2c   : > { %10218 = vmatprep.subr.bf16.mxu0 %v10217_v54  ;;  %10246 = vmatprep.subr.bf16.mxu1 %v10245_v8  ;;  %v10255_v35 = vpack.c.bf16 %v540_v32, %v539_v31  ;;  %v10257_v39 = vpack.c.bf16 %v558_v37, %v557_v36  ;;  %v541_v40 = vld [vmem:[%s17559_s1 + $0x170] sm:$0xff]  ;;  %v542_v41 = vld [vmem:[%s17559_s1 + $0x178] sm:$0xff]  ;;  %v563_v60 = vld [vmem:[%s17559_s1 + $0x220] sm:$0xff] }
  0x2d   : > { %v10259_v45 = vpack.c.bf16 %v542_v41, %v541_v40  ;;  %v561_v53 = vld [vmem:[%s17559_s1 + $0x210] sm:$0xff]  ;;  %v562_v54 = vld [vmem:[%s17559_s1 + $0x218] sm:$0xff]  ;;  %v564_v61 = vld [vmem:[%s17559_s1 + $0x228] sm:$0xff] }
  0x2e   : > { %v10265_v58 = vpack.c.bf16 %v562_v54, %v561_v53  ;;  %v10269_v2 = vpack.c.bf16 %v564_v61, %v563_v60  ;;  %v565_v4 = vld [vmem:[%s17559_s1 + $0x230] sm:$0xff]  ;;  %v566_v5 = vld [vmem:[%s17559_s1 + $0x238] sm:$0xff]  ;;  %v8476_v40 = vld [vmem:[%s17559_s1 + $0x2c0] sm:$0xff] }
  0x2f   : > { %10220 = vmatpush3.bf16.msra.mxu0 %v10219_v59  ;;  %10248 = vmatpush3.bf16.msra.mxu1 %v10247_v12  ;;  %v10273_v8 = vpack.c.bf16 %v566_v5, %v565_v4  ;;  %v8477_v41 = vld [vmem:[%s17559_s1 + $0x2c8] sm:$0xff]  ;;  %v8480_v53 = vld [vmem:[%s17559_s1 + $0x2e0] sm:$0xff]  ;;  %v8483_v4 = vld [vmem:[%s17559_s1 + $0x2f8] sm:$0xff] }
  0x30   : > { %10222 = vmatprep.subr.bf16.mxu0 %v10221_v3  ;;  %10250 = vmatprep.subr.bf16.mxu1 %v10249_v21  ;;  %v8481_v54 = vld [vmem:[%s17559_s1 + $0x2e8] sm:$0xff]  ;;  %v8494_v5 = vld [vmem:[%s17559_s1 + $0x350] sm:$0xff] }
  0x31   : > { %v10285_v60 = vpack.c.bf16 %v8481_v54, %v8480_v53  ;;  %v8519_v53 = vld [vmem:[%s17559_s1 + $0x418] sm:$0xff] }
  0x33   : > { %10224 = vmatpush3.bf16.msra.mxu0 %v10223_v9  ;;  %10252 = vmatpush3.bf16.msra.mxu1 %v10251_v25 }
  0x34   : > { %10226 = vmatprep.subr.bf16.mxu0 %v10225_v16  ;;  %10254 = vmatprep.subr.bf16.mxu1 %v10253_v29 }
  0x37   : > { %10228 = vmatpush3.bf16.msra.mxu0 %v10227_v22  ;;  %10256 = vmatpush3.bf16.msra.mxu1 %v10255_v35 }
  0x38   : > { %10262 = vmatprep.subr.bf16.mxu0 %v12403_v34  ;;  %10258 = vmatprep.subr.bf16.mxu1 %v10257_v39 }
  0x3b   : > { %10260 = vmatpush3.bf16.msra.mxu1 %v10259_v45  ;;  %v8478_v45 = vld [vmem:[%s17559_s1 + $0x2d0] sm:$0xff] }
  0x89   : > { %v383_v7 = vpop.permute.xlu0 %382 }
  0x8a   : > { %389 = vst.msk [vmem:[#allocation2 + $0x1] sm:$0xff] %vm17488_vm2, %v383_v7 }
  0x8d   : > { %v385_v20 = vpop.permute.xlu0 %384 }
  0x8e   : > { %390 = vst.msk [vmem:[#allocation2 + $0x9] sm:$0xff] %vm17488_vm2, %v385_v20  ;;  %v8457_v20 = vld [vmem:[%s17404_s2] ss:$0 sm:$0xff] }
  0x91   : > { %v409_v33 = vld [vmem:[#allocation2] sm:$0xff] }
  0x92   : > { %413 = vrot.lane.b32.xlu1 %v409_v33, %s17475_s12  ;;  %400 = vrot.lane.b32.xlu0 %v409_v33, %s17510_s15  ;;  %394 = vst.msk [vmem:[#allocation3] sm:$0xff] %vm17516_vm3, %v409_v33  ;;  %v421_v38 = vld [vmem:[#allocation2 + $0x1] sm:$0xff] }
  0x95   : > { %v422_v42 = vld [vmem:[#allocation2 + $0x9] sm:$0xff] }
  0x96   : > { %v461_v43 = vld [vmem:[#allocation2 + $0x2] sm:$0xff]  ;;  %425 = vrot.lane.b32.xlu1 %v421_v38, %s17473_s26  ;;  %427 = vrot.lane.b32.xlu0 %v422_v42, %s17473_s26  ;;  %v474_v46 = vld [vmem:[#allocation2 + $0xa] sm:$0xff] }
  0x97   : > { %v410_v44 = vld [vmem:[#allocation2 + $0x8] sm:$0xff]  ;;  %459 = vst.msk [vmem:[#allocation3 + $0x18] sm:$0xff] %vm17516_vm3, %v461_v43  ;;  %460 = vst.msk [vmem:[#allocation3 + $0x40] sm:$0xff] %vm17516_vm3, %v474_v46 }
  0x98   : > { %395 = vst.msk [vmem:[#allocation3 + $0x28] sm:$0xff] %vm17516_vm3, %v410_v44 }
  0x9a   : > { %465 = vrot.lane.b32.xlu0 %v461_v43, %s17510_s15  ;;  %415 = vrot.lane.b32.xlu1 %v410_v44, %s17475_s12 }
  0x9e   : > { %449 = vrot.lane.b32.xlu0 %v421_v38, %s17508_s27  ;;  %437 = vrot.lane.b32.xlu1 %v421_v38, %s17471_s28 }
  0xa2   : > { %479 = vrot.lane.b32.xlu0 %v474_v46, %s17475_s12  ;;  %402 = vrot.lane.b32.xlu1 %v410_v44, %s17510_s15  ;;  %v8461_v44 = vld [vmem:[%s17559_s1 + $0x248] sm:$0xff] }
  0xa6   : > { %467 = vrot.lane.b32.xlu0 %v474_v46, %s17510_s15  ;;  %477 = vrot.lane.b32.xlu1 %v461_v43, %s17475_s12  ;;  %v10277_v43 = vpack.c.bf16 %v8477_v41, %v8476_v40  ;;  %v8479_v46 = vld [vmem:[%s17559_s1 + $0x2d8] sm:$0xff]  ;;  %v8516_v40 = vld [vmem:[%s17559_s1 + $0x400] sm:$0xff] }
  0xa7   : > { %v8517_v41 = vld [vmem:[%s17559_s1 + $0x408] sm:$0xff] }
  0xa8   : > { %10278 = vmatprep.subr.bf16.mxu1 %v10277_v43  ;;  %v8488_v43 = vld [vmem:[%s17559_s1 + $0x320] sm:$0xff] }
  0xaa   : > { %439 = vrot.lane.b32.xlu1 %v422_v42, %s17471_s28 }
  0xae   : > { %451 = vrot.lane.b32.xlu1 %v422_v42, %s17508_s27  ;;  %v8460_v42 = vld [vmem:[%s17559_s1 + $0x240] sm:$0xff] }
 0x104   : > { %v414_v47 = vpop.permute.xlu1 %413  ;;  %v401_v48 = vpop.permute.xlu0 %400 }
 0x105   : > { %419 = vst.msk [vmem:[#allocation3 + $0x8] sm:$0xff] %vm17516_vm3, %v414_v47  ;;  %v10279_v47 = vpack.c.bf16 %v8461_v44, %v8460_v42  ;;  %v10325_v42 = vpack.c.bf16 %v8517_v41, %v8516_v40  ;;  %v8489_v44 = vld [vmem:[%s17559_s1 + $0x328] sm:$0xff] }
 0x106   : > { %407 = vst.msk [vmem:[#allocation3] sm:$0xff] %vm17487_vm4, %v401_v48  ;;  %v10281_v48 = vpack.c.bf16 %v8479_v46, %v8478_v45  ;;  %v8500_v45 = vld [vmem:[%s17559_s1 + $0x380] sm:$0xff]  ;;  %v10301_v46 = vpack.c.bf16 %v8489_v44, %v8488_v43  ;;  %v8531_v43 = vld [vmem:[%s17559_s1 + $0x478] sm:$0xff] }
 0x108   : > { %v426_v49 = vpop.permute.xlu1 %425  ;;  %v428_v50 = vpop.permute.xlu0 %427 }
 0x109   : > { %431 = vst.msk [vmem:[#allocation3 + $0x8] sm:$0xff] %vm17487_vm4, %v426_v49  ;;  %v8462_v49 = vld [vmem:[%s17559_s1 + $0x250] sm:$0xff] }
 0x10c   : > { %v416_v51 = vpop.permute.xlu1 %415  ;;  %v466_v52 = vpop.permute.xlu0 %465 }
 0x10d   : > { %420 = vst.msk [vmem:[#allocation3 + $0x30] sm:$0xff] %vm17516_vm3, %v416_v51  ;;  %v485_v59 = vld [vmem:[#allocation3] sm:$0xff]  ;;  %v8508_v51 = vld [vmem:[%s17559_s1 + $0x3c0] sm:$0xff] }
 0x10e   : > { %471 = vst.msk [vmem:[#allocation3 + $0x18] sm:$0xff] %vm17487_vm4, %v466_v52  ;;  %432 = vst.msk [vmem:[#allocation3 + $0x30] sm:$0xff] %vm17487_vm4, %v428_v50  ;;  %v8463_v50 = vld [vmem:[%s17559_s1 + $0x258] sm:$0xff]  ;;  %v8509_v52 = vld [vmem:[%s17559_s1 + $0x3c8] sm:$0xff] }
 0x110   : > { %v438_v55 = vpop.permute.xlu1 %437  ;;  %v450_v56 = vpop.permute.xlu0 %449  ;;  %v486_v57 = vld [vmem:[#allocation3 + $0x8] sm:$0xff] }
 0x111   : > { %443 = vst.msk [vmem:[#allocation3 + $0x10] sm:$0xff] %vm17516_vm3, %v438_v55  ;;  %644 = vmatprep.mubr.f32.mxu0 %v486_v57  ;;  %v10283_v55 = vpack.c.bf16 %v8463_v50, %v8462_v49  ;;  %v8492_v57 = vld [vmem:[%s17559_s1 + $0x340] sm:$0xff]  ;;  %v8473_v49 = vld [vmem:[%s17559_s1 + $0x2a8] sm:$0xff] }
 0x112   : > { %455 = vst.msk [vmem:[#allocation3 + $0x10] sm:$0xff] %vm17487_vm4, %v450_v56  ;;  %645 = vmatmul.mubr.f32.vlgmr.msra.gmra.mrb[0].mxu0 %v485_v59  ;;  %v10309_v56 = vpack.c.bf16 %v8509_v52, %v8508_v51  ;;  %v8464_v59 = vld [vmem:[%s17559_s1 + $0x260] sm:$0xff]  ;;  %v8518_v52 = vld [vmem:[%s17559_s1 + $0x410] sm:$0xff] }
 0x113   : > { %10264 = vmatpush3.bf16.msra.mxu0 %v12403_v34  ;;  %v10329_v54 = vpack.c.bf16 %v8519_v53, %v8518_v52 }
 0x114   : > { %v403_v62 = vpop.permute.xlu1 %402  ;;  %v480_v63 = vpop.permute.xlu0 %479  ;;  %10266 = vmatprep.subr.bf16.mxu0 %v10265_v58 }
 0x115   : > { %v488_v1 = vld [vmem:[#allocation3 + $0x18] sm:$0xff]  ;;  %408 = vst.msk [vmem:[#allocation3 + $0x28] sm:$0xff] %vm17487_vm4, %v403_v62  ;;  %v491_v3 = vld [vmem:[#allocation3 + $0x30] sm:$0xff] }
 0x116   : > { %484 = vst.msk [vmem:[#allocation3 + $0x48] sm:$0xff] %vm17516_vm3, %v480_v63  ;;  %719 = vmatprep.mubr.f32.mxu1 %v488_v1  ;;  %649 = vmatprep.mubr.f32.mxu0 %v491_v3  ;;  %v8465_v62 = vld [vmem:[%s17559_s1 + $0x268] sm:$0xff]  ;;  %v8510_v63 = vld [vmem:[%s17559_s1 + $0x3d0] sm:$0xff]  ;;  %v8511_v1 = vld [vmem:[%s17559_s1 + $0x3d8] sm:$0xff] }
 0x117   : > { %10268 = vmatpush3.bf16.msra.mxu0 %v10265_v58  ;;  %v8493_v58 = vld [vmem:[%s17559_s1 + $0x348] sm:$0xff]  ;;  %v8482_v3 = vld [vmem:[%s17559_s1 + $0x2f0] sm:$0xff] }
 0x118   : > { %v478_v6 = vpop.permute.xlu1 %477  ;;  %v468_v7 = vpop.permute.xlu0 %467  ;;  %10270 = vmatprep.subr.bf16.mxu0 %v10269_v2  ;;  %v10311_v61 = vpack.c.bf16 %v8493_v58, %v8492_v57  ;;  %v8502_v57 = vld [vmem:[%s17559_s1 + $0x390] sm:$0xff] }
 0x119   : > { %483 = vst.msk [vmem:[#allocation3 + $0x20] sm:$0xff] %vm17516_vm3, %v478_v6  ;;  %v487_v9 = vld [vmem:[#allocation3 + $0x10] sm:$0xff]  ;;  %v8495_v6 = vld [vmem:[%s17559_s1 + $0x358] sm:$0xff] }
 0x11a   : > { %472 = vst.msk [vmem:[#allocation3 + $0x40] sm:$0xff] %vm17487_vm4, %v468_v7  ;;  %720 = vmatmul.mubr.f32.vlgmr.msra.gmra.mrb[0].mxu1 %v487_v9  ;;  %v10287_v7 = vpack.c.bf16 %v8465_v62, %v8464_v59  ;;  %v10289_v9 = vpack.c.bf16 %v8483_v4, %v8482_v3  ;;  %v8475_v3 = vld [vmem:[%s17559_s1 + $0x2b8] sm:$0xff]  ;;  %v8520_v4 = vld [vmem:[%s17559_s1 + $0x420] sm:$0xff] }
 0x11b   : > { %10272 = vmatpush3.bf16.msra.mxu0 %v10269_v2  ;;  %10280 = vmatpush3.bf16.msra.mxu1 %v10279_v47  ;;  %v10313_v2 = vpack.c.bf16 %v8511_v1, %v8510_v63  ;;  %v8501_v47 = vld [vmem:[%s17559_s1 + $0x388] sm:$0xff]  ;;  %v8503_v63 = vld [vmem:[%s17559_s1 + $0x398] sm:$0xff]  ;;  %v8474_v1 = vld [vmem:[%s17559_s1 + $0x2b0] sm:$0xff] }
 0x11c   : > { %v440_v10 = vpop.permute.xlu1 %439  ;;  %v490_v11 = vld [vmem:[#allocation3 + $0x28] sm:$0xff]  ;;  %10274 = vmatprep.subr.bf16.mxu0 %v10273_v8  ;;  %10282 = vmatprep.subr.bf16.mxu1 %v10281_v48  ;;  %v10327_v50 = vpack.c.bf16 %v8501_v47, %v8500_v45 }
 0x11d   : > { %444 = vst.msk [vmem:[#allocation3 + $0x38] sm:$0xff] %vm17516_vm3, %v440_v10  ;;  %650 = vmatmul.mubr.f32.gmra.mrb[2].mxu0 %v490_v11  ;;  %v494_v15 = vld [vmem:[#allocation3 + $0x48] sm:$0xff]  ;;  %v8466_v10 = vld [vmem:[%s17559_s1 + $0x270] sm:$0xff]  ;;  %v8467_v11 = vld [vmem:[%s17559_s1 + $0x278] sm:$0xff] }
 0x11e   : > { %v8472_v48 = vld [vmem:[%s17559_s1 + $0x2a0] sm:$0xff] }
 0x11f   : > { %10276 = vmatpush3.bf16.msra.mxu0 %v10273_v8  ;;  %10284 = vmatpush3.bf16.msra.mxu1 %v10283_v55  ;;  %v10315_v8 = vpack.c.bf16 %v8495_v6, %v8494_v5  ;;  %v10303_v51 = vpack.c.bf16 %v8473_v49, %v8472_v48  ;;  %v8490_v55 = vld [vmem:[%s17559_s1 + $0x330] sm:$0xff]  ;;  %v8521_v5 = vld [vmem:[%s17559_s1 + $0x428] sm:$0xff]  ;;  %v10307_v6 = vpack.c.bf16 %v8475_v3, %v8474_v1 }
 0x120   : > { %v452_v12 = vpop.permute.xlu1 %451  ;;  %v489_v14 = vld [vmem:[#allocation3 + $0x20] sm:$0xff]  ;;  %10310 = vmatprep.subr.bf16.mxu0 %v10309_v56  ;;  %10286 = vmatprep.subr.bf16.mxu1 %v10285_v60 }
 0x121   : > { %v493_v13 = vld [vmem:[#allocation3 + $0x40] sm:$0xff]  ;;  %456 = vst.msk [vmem:[#allocation3 + $0x38] sm:$0xff] %vm17487_vm4, %v452_v12  ;;  %9937 = vmatprep.mubr.msk.f32.mxu0 %vm17516_vm3, %v489_v14  ;;  %v10291_v12 = vpack.c.bf16 %v8467_v11, %v8466_v10  ;;  %v8512_v14 = vld [vmem:[%s17559_s1 + $0x3e0] sm:$0xff] }
 0x122   : > { %724 = vmatprep.mubr.f32.mxu1 %v493_v13  ;;  %9938 = vmatmul.mubr.msk.f32.vlgmr.msra.gmra.mrb[4].mxu0 %vm17516_vm3, %v494_v15  ;;  %v8513_v15 = vld [vmem:[%s17559_s1 + $0x3e8] sm:$0xff]  ;;  %v8491_v56 = vld [vmem:[%s17559_s1 + $0x338] sm:$0xff]  ;;  %v8524_v10 = vld [vmem:[%s17559_s1 + $0x440] sm:$0xff] }
 0x123   : > { %10312 = vmatpush3.bf16.msra.mxu0 %v10311_v61  ;;  %10288 = vmatpush3.bf16.msra.mxu1 %v10287_v7  ;;  %v10305_v61 = vpack.c.bf16 %v8491_v56, %v8490_v55  ;;  %v10333_v7 = vpack.c.bf16 %v8521_v5, %v8520_v4 }
 0x124   : > { %10314 = vmatprep.subr.bf16.mxu0 %v10313_v2  ;;  %10290 = vmatprep.subr.bf16.mxu1 %v10289_v9  ;;  %v10331_v2 = vpack.c.bf16 %v8503_v63, %v8502_v57  ;;  %v8505_v9 = vld [vmem:[%s17559_s1 + $0x3a8] sm:$0xff] }
 0x127   : > { %10316 = vmatpush3.bf16.msra.mxu0 %v10315_v8  ;;  %10292 = vmatpush3.bf16.msra.mxu1 %v10291_v12  ;;  %v8504_v8 = vld [vmem:[%s17559_s1 + $0x3a0] sm:$0xff]  ;;  %v8525_v12 = vld [vmem:[%s17559_s1 + $0x448] sm:$0xff] }
 0x128   : > { %v492_v16 = vld [vmem:[#allocation3 + $0x38] sm:$0xff]  ;;  %v10335_v11 = vpack.c.bf16 %v8505_v9, %v8504_v8 }
 0x129   : > { %725 = vmatmul.mubr.f32.gmra.mrb[2].mxu1 %v492_v16  ;;  %v10317_v16 = vpack.c.bf16 %v8513_v15, %v8512_v14  ;;  %v8522_v14 = vld [vmem:[%s17559_s1 + $0x430] sm:$0xff]  ;;  %v8523_v15 = vld [vmem:[%s17559_s1 + $0x438] sm:$0xff] }
 0x12b   : > { %10318 = vmatprep.subr.bf16.mxu0 %v10317_v16  ;;  %v10337_v16 = vpack.c.bf16 %v8523_v15, %v8522_v14 }
 0x1e5   : > { %v9285_v17 = vpop.f32.mrb[0].mxu0 }
 0x1e6   : > { %v9286_v18 = vpop.f32.mrb[1].mxu0 }
 0x1e7   : > { %v9287_v19 = vadd.f32 %v9286_v18, %v9285_v17  ;;  %v8484_v17 = vld [vmem:[%s17559_s1 + $0x300] sm:$0xff]  ;;  %v8485_v18 = vld [vmem:[%s17559_s1 + $0x308] sm:$0xff] }
 0x1e9   : > { %v647_v23 = vadd.f32 %v9287_v19, %v8457_v20  ;;  %v8496_v19 = vld [vmem:[%s17559_s1 + $0x360] sm:$0xff] }
 0x1ed   : > { %v9323_v21 = vpop.f32.mrb[0].mxu1 }
 0x1ee   : > { %v9324_v22 = vpop.f32.mrb[1].mxu1 }
 0x1ef   : > { %v9325_v24 = vadd.f32 %v9324_v22, %v9323_v21  ;;  %v8497_v21 = vld [vmem:[%s17559_s1 + $0x368] sm:$0xff]  ;;  %v8468_v22 = vld [vmem:[%s17559_s1 + $0x280] sm:$0xff] }
 0x1f0   : > { %v9288_v25 = vpop.f32.mrb[2].mxu0 }
 0x1f1   : > { %v9289_v26 = vpop.f32.mrb[3].mxu0  ;;  %v722_v27 = vadd.f32 %v9325_v24, %v647_v23  ;;  %v8469_v23 = vld [vmem:[%s17559_s1 + $0x288] sm:$0xff] }
 0x1f2   : > { %v9290_v28 = vadd.f32 %v9289_v26, %v9288_v25  ;;  %v10319_v25 = vpack.c.bf16 %v8497_v21, %v8496_v19  ;;  %v10295_v26 = vpack.c.bf16 %v8469_v23, %v8468_v22 }
 0x1f4   : > { %v652_v35 = vadd.f32 %v9290_v28, %v8457_v20  ;;  %v10293_v20 = vpack.c.bf16 %v8485_v18, %v8484_v17  ;;  %v8515_v28 = vld [vmem:[%s17559_s1 + $0x3f8] sm:$0xff]  ;;  %10320 = vmatpush3.bf16.msra.mxu0 %v10319_v25  ;;  %v8506_v17 = vld [vmem:[%s17559_s1 + $0x3b0] sm:$0xff] }
 0x1f5   : > { %v9939_v29 = vpop.f32.mrb[4].mxu0  ;;  %v8507_v18 = vld [vmem:[%s17559_s1 + $0x3b8] sm:$0xff] }
 0x1f6   : > { %v796_v30 = vpop.f32.mrb[5].mxu0  ;;  %10294 = vmatprep.subr.bf16.mxu1 %v10293_v20  ;;  %v10339_v20 = vpack.c.bf16 %v8507_v18, %v8506_v17 }
 0x1f7   : > { %v797_v31 = vadd.f32 %v796_v30, %v722_v27  ;;  %v8514_v27 = vld [vmem:[%s17559_s1 + $0x3f0] sm:$0xff]  ;;  %10296 = vmatpush3.bf16.msra.mxu1 %v10295_v26 }
 0x1f8   : > { %v8486_v30 = vld [vmem:[%s17559_s1 + $0x310] sm:$0xff] }
 0x1f9   : > { %v805_v32 = vmax.f32 %v797_v31, 0.0  ;;  %v8487_v31 = vld [vmem:[%s17559_s1 + $0x318] sm:$0xff] }
 0x1fb   : > { %809 = vrot.lane.b32.xlu0 %v805_v32, %s17512_s19  ;;  %v8498_v32 = vld [vmem:[%s17559_s1 + $0x370] sm:$0xff] }
 0x1fc   : > { %v9326_v33 = vpop.f32.mrb[2].mxu1 }
 0x1fd   : > { %v9327_v34 = vpop.f32.mrb[3].mxu1 }
 0x1fe   : > { %v9328_v36 = vadd.f32 %v9327_v34, %v9326_v33  ;;  %v10297_v34 = vpack.c.bf16 %v8487_v31, %v8486_v30  ;;  %v8527_v30 = vld [vmem:[%s17559_s1 + $0x458] sm:$0xff] }
 0x200   : > { %v727_v37 = vadd.f32 %v9328_v36, %v652_v35  ;;  %v8499_v35 = vld [vmem:[%s17559_s1 + $0x378] sm:$0xff]  ;;  %v8470_v36 = vld [vmem:[%s17559_s1 + $0x290] sm:$0xff]  ;;  %10298 = vmatprep.subr.bf16.mxu1 %v10297_v34 }
 0x202   : > { %v802_v38 = vadd.f32 %v9939_v29, %v727_v37  ;;  %v10321_v29 = vpack.c.bf16 %v8515_v28, %v8514_v27  ;;  %v8471_v37 = vld [vmem:[%s17559_s1 + $0x298] sm:$0xff] }
 0x204   : > { %v806_v39 = vmax.f32 %v802_v38, 0.0  ;;  %10322 = vmatprep.subr.bf16.mxu0 %v10321_v29  ;;  %v10323_v38 = vpack.c.bf16 %v8499_v35, %v8498_v32  ;;  %v8526_v29 = vld [vmem:[%s17559_s1 + $0x450] sm:$0xff] }
 0x205   : > { %v10345_v35 = vpack.c.bf16 %v8527_v30, %v8526_v29 }
 0x206   : > { %811 = vrot.lane.b32.xlu1 %v806_v39, %s17512_s19  ;;  %v10299_v39 = vpack.c.bf16 %v8471_v37, %v8470_v36  ;;  %10324 = vmatpush3.bf16.msra.mxu0 %v10323_v38  ;;  %v8528_v36 = vld [vmem:[%s17559_s1 + $0x460] sm:$0xff]  ;;  %v8529_v37 = vld [vmem:[%s17559_s1 + $0x468] sm:$0xff] }
 0x207   : > { %10326 = vmatprep.subr.bf16.mxu0 %v10325_v42  ;;  %v10349_v41 = vpack.c.bf16 %v8529_v37, %v8528_v36  ;;  %v8530_v42 = vld [vmem:[%s17559_s1 + $0x470] sm:$0xff] }
 0x208   : > { %10300 = vmatpush3.bf16.msra.mxu1 %v10299_v39  ;;  %v10353_v47 = vpack.c.bf16 %v8531_v43, %v8530_v42 }
 0x209   : > { %10302 = vmatprep.subr.bf16.mxu1 %v10301_v46 }
 0x20a   : > { %10328 = vmatpush3.bf16.msra.mxu0 %v10327_v50 }
 0x20b   : > { %10330 = vmatprep.subr.bf16.mxu0 %v10329_v54  ;;  %v1390_v54 = vld [vmem:[%s17405_s3] sm:$0xf] }
 0x20c   : > { %10304 = vmatpush3.bf16.msra.mxu1 %v10303_v51 }
 0x20d   : > { %10306 = vmatprep.subr.bf16.mxu1 %v10305_v61 }
 0x20e   : > { %10332 = vmatpush3.bf16.msra.mxu0 %v10331_v2 }
 0x20f   : > { %10334 = vmatprep.subr.bf16.mxu0 %v10333_v7 }
 0x210   : > { %10308 = vmatpush3.bf16.msra.mxu1 %v10307_v6 }
 0x212   : > { %10336 = vmatpush3.bf16.msra.mxu0 %v10335_v11 }
 0x213   : > { %10338 = vmatprep.subr.bf16.mxu0 %v10337_v16 }
 0x216   : > { %10340 = vmatpush3.bf16.msra.mxu0 %v10339_v20 }
 0x26d   : > { %v810_v13 = vpop.permute.xlu0 %809 }
 0x26e   : > { %815 = vst.msk [vmem:[#allocation2 + $0x1] sm:$0xff] %vm17488_vm2, %v810_v13  ;;  %v10341_v13 = vpack.c.bf16 %v8525_v12, %v8524_v10 }
 0x270   : > { %10342 = vmatprep.subr.bf16.mxu1 %v10341_v13 }
 0x275   : > { %v12573_v24 = vld [vmem:[#allocation2] sm:$0xff] }
 0x276   : > { %819 = vst.msk [vmem:[#allocation3] sm:$0xff] %vm17516_vm3, %v12573_v24  ;;  %v845_v19 = vld [vmem:[#allocation2 + $0x1] sm:$0xff] }
 0x278   : > { %v812_v33 = vpop.permute.xlu1 %811 }
 0x279   : > { %816 = vst.msk [vmem:[#allocation2 + $0x9] sm:$0xff] %vm17488_vm2, %v812_v33  ;;  %vm17515_vm2 = vcmask 490944  }
 0x280   : > { %v886_v58 = vld [vmem:[#allocation2 + $0xa] sm:$0xff]  ;;  %v885_v60 = vld [vmem:[#allocation2 + $0x2] sm:$0xff] }
 0x281   : > { %v846_v59 = vld [vmem:[#allocation2 + $0x9] sm:$0xff]  ;;  %891 = vrot.lane.b32.xlu0 %v886_v58, %s17510_s15  ;;  %884 = vst.msk [vmem:[#allocation3 + $0x40] sm:$0xff] %vm17516_vm3, %v886_v58  ;;  %883 = vst.msk [vmem:[#allocation3 + $0x18] sm:$0xff] %vm17516_vm3, %v885_v60 }
 0x282   : > { %851 = vrot.lane.b32.xlu1 %v846_v59, %s17473_s26  ;;  %v834_v62 = vld [vmem:[#allocation2 + $0x8] sm:$0xff] }
 0x283   : > { %820 = vst.msk [vmem:[#allocation3 + $0x28] sm:$0xff] %vm17516_vm3, %v834_v62 }
 0x285   : > { %837 = vrot.lane.b32.xlu0 %v12573_v24, %s17475_s12 }
 0x286   : > { %863 = vrot.lane.b32.xlu1 %v846_v59, %s17471_s28 }
 0x289   : > { %825 = vrot.lane.b32.xlu0 %v12573_v24, %s17510_s15 }
 0x28a   : > { %849 = vrot.lane.b32.xlu1 %v845_v19, %s17473_s26  ;;  %s17481_s26 = smov 40  }
 0x28d   : > { %889 = vrot.lane.b32.xlu0 %v885_v60, %s17510_s15 }
 0x28e   : > { %861 = vrot.lane.b32.xlu1 %v845_v19, %s17471_s28 }
 0x291   : > { %873 = vrot.lane.b32.xlu0 %v845_v19, %s17508_s27 }
 0x292   : > { %839 = vrot.lane.b32.xlu1 %v834_v62, %s17475_s12 }
 0x295   : > { %827 = vrot.lane.b32.xlu0 %v834_v62, %s17510_s15 }
 0x296   : > { %875 = vrot.lane.b32.xlu1 %v846_v59, %s17508_s27 }
 0x299   : > { %901 = vrot.lane.b32.xlu0 %v885_v60, %s17475_s12 }
 0x29a   : > { %903 = vrot.lane.b32.xlu1 %v886_v58, %s17475_s12  ;;  %v8533_v58 = vld [vmem:[%s17404_s2 + $0x1] ss:$0 sm:$0xff] }
 0x2f3   : > { %v892_v22 = vpop.permute.xlu0 %891 }
 0x2f4   : > { %v852_v21 = vpop.permute.xlu1 %851  ;;  %896 = vst.msk [vmem:[#allocation3 + $0x40] sm:$0xff] %vm17487_vm4, %v892_v22 }
 0x2f7   : > { %v838_v24 = vpop.permute.xlu0 %837 }
 0x2f8   : > { %v864_v23 = vpop.permute.xlu1 %863  ;;  %843 = vst.msk [vmem:[#allocation3 + $0x8] sm:$0xff] %vm17516_vm3, %v838_v24 }
 0x2f9   : > { %868 = vst.msk [vmem:[#allocation3 + $0x38] sm:$0xff] %vm17516_vm3, %v864_v23 }
 0x2fb   : > { %v826_v26 = vpop.permute.xlu0 %825  ;;  %v917_v49 = vld [vmem:[#allocation3 + $0x40] sm:$0xff] }
 0x2fc   : > { %v850_v25 = vpop.permute.xlu1 %849  ;;  %831 = vst.msk [vmem:[#allocation3] sm:$0xff] %vm17487_vm4, %v826_v26 }
 0x2fd   : > { %855 = vst.msk [vmem:[#allocation3 + $0x8] sm:$0xff] %vm17487_vm4, %v850_v25 }
 0x2ff   : > { %v890_v28 = vpop.permute.xlu0 %889 }
 0x300   : > { %v862_v27 = vpop.permute.xlu1 %861  ;;  %895 = vst.msk [vmem:[#allocation3 + $0x18] sm:$0xff] %vm17487_vm4, %v890_v28 }
 0x301   : > { %867 = vst.msk [vmem:[#allocation3 + $0x10] sm:$0xff] %vm17516_vm3, %v862_v27 }
 0x303   : > { %v874_v32 = vpop.permute.xlu0 %873  ;;  %v909_v34 = vld [vmem:[#allocation3] sm:$0xff] }
 0x304   : > { %v840_v31 = vpop.permute.xlu1 %839  ;;  %v910_v33 = vld [vmem:[#allocation3 + $0x8] sm:$0xff]  ;;  %879 = vst.msk [vmem:[#allocation3 + $0x10] sm:$0xff] %vm17487_vm4, %v874_v32 }
 0x305   : > { %844 = vst.msk [vmem:[#allocation3 + $0x30] sm:$0xff] %vm17516_vm3, %v840_v31  ;;  %1070 = vmatprep.mubr.f32.mxu1 %v910_v33 }
 0x306   : > { %856 = vst.msk [vmem:[#allocation3 + $0x30] sm:$0xff] %vm17487_vm4, %v852_v21  ;;  %1071 = vmatmul.mubr.f32.vlgmr.msra.gmra.mrb[4].mxu1 %v909_v34 }
 0x307   : > { %10344 = vmatpush3.bf16.msra.mxu1 %v10341_v13  ;;  %v828_v39 = vpop.permute.xlu0 %827  ;;  %v912_v40 = vld [vmem:[#allocation3 + $0x18] sm:$0xff] }
 0x308   : > { %v876_v38 = vpop.permute.xlu1 %875  ;;  %10346 = vmatprep.subr.bf16.mxu1 %v10345_v35  ;;  %832 = vst.msk [vmem:[#allocation3 + $0x28] sm:$0xff] %vm17487_vm4, %v828_v39  ;;  %1145 = vmatprep.mubr.f32.mxu0 %v912_v40 }
 0x309   : > { %880 = vst.msk [vmem:[#allocation3 + $0x38] sm:$0xff] %vm17487_vm4, %v876_v38  ;;  %vm17517_vm4 = vcmask 458144  }
 0x30b   : > { %10348 = vmatpush3.bf16.msra.mxu1 %v10345_v35  ;;  %v902_v45 = vpop.permute.xlu0 %901  ;;  %v911_v46 = vld [vmem:[#allocation3 + $0x10] sm:$0xff] }
 0x30c   : > { %v904_v44 = vpop.permute.xlu1 %903  ;;  %10350 = vmatprep.subr.bf16.mxu1 %v10349_v41  ;;  %907 = vst.msk [vmem:[#allocation3 + $0x20] sm:$0xff] %vm17516_vm3, %v902_v45  ;;  %1146 = vmatmul.mubr.f32.vlgmr.msra.gmra.mrb[6].mxu0 %v911_v46 }
 0x30d   : > { %908 = vst.msk [vmem:[#allocation3 + $0x48] sm:$0xff] %vm17516_vm3, %v904_v44  ;;  %v915_v48 = vld [vmem:[#allocation3 + $0x30] sm:$0xff]  ;;  %1150 = vmatprep.mubr.f32.mxu0 %v917_v49 }
 0x30e   : > { %1075 = vmatprep.mubr.f32.mxu1 %v915_v48 }
 0x30f   : > { %10352 = vmatpush3.bf16.msra.mxu1 %v10349_v41  ;;  %v914_v50 = vld [vmem:[#allocation3 + $0x28] sm:$0xff] }
 0x310   : > { %v916_v51 = vld [vmem:[#allocation3 + $0x38] sm:$0xff]  ;;  %10354 = vmatprep.subr.bf16.mxu1 %v10353_v47  ;;  %1076 = vmatmul.mubr.f32.gmra.mrb[6].mxu1 %v914_v50 }
 0x311   : > { %1151 = vmatmul.mubr.f32.gmra.mrb[8].mxu0 %v916_v51 }
 0x313   : > { %10356 = vmatpush3.bf16.msra.mxu1 %v10353_v47  ;;  %v913_v52 = vld [vmem:[#allocation3 + $0x20] sm:$0xff] }
 0x314   : > { %v918_v53 = vld [vmem:[#allocation3 + $0x48] sm:$0xff]  ;;  %9956 = vmatprep.mubr.msk.f32.mxu1 %vm17516_vm3, %v913_v52  ;;  %9959 = vmatprep.subr.msk.mxu1 %vm17486_vm5, %v1390_v54 }
 0x316   : > { %9957 = vmatmul.mubr.msk.f32.vlgmr.msra.gmra.mrb[8].mxu1 %vm17516_vm3, %v918_v53 }
 0x317   : > { %9960 = vmatpush3.msk.msra.mxu1 %vm17486_vm5, %v1390_v54 }
 0x3d9   : > { %v9371_v55 = vpop.f32.mrb[4].mxu1 }
 0x3da   : > { %v9372_v56 = vpop.f32.mrb[5].mxu1 }
 0x3db   : > { %v9373_v57 = vadd.f32 %v9372_v56, %v9371_v55 }
 0x3dd   : > { %v1073_v61 = vadd.f32 %v9373_v57, %v8533_v58 }
 0x3df   : > { %v9409_v59 = vpop.f32.mrb[6].mxu0 }
 0x3e0   : > { %v9410_v60 = vpop.f32.mrb[7].mxu0 }
 0x3e1   : > { %v9411_v62 = vadd.f32 %v9410_v60, %v9409_v59 }
 0x3e3   : > { %v9374_v63 = vpop.f32.mrb[6].mxu1  ;;  %v1148_v2 = vadd.f32 %v9411_v62, %v1073_v61 }
 0x3e4   : > { %v9412_v1 = vpop.f32.mrb[8].mxu0  ;;  %v9375_v3 = vpop.f32.mrb[7].mxu1 }
 0x3e5   : > { %v9413_v4 = vpop.f32.mrb[9].mxu0  ;;  %v9376_v5 = vadd.f32 %v9375_v3, %v9374_v63 }
 0x3e6   : > { %v9414_v6 = vadd.f32 %v9413_v4, %v9412_v1 }
 0x3e7   : > { %v1078_v7 = vadd.f32 %v9376_v5, %v8533_v58 }
 0x3e9   : > { %v9958_v8 = vpop.f32.mrb[8].mxu1  ;;  %v1153_v9 = vadd.f32 %v9414_v6, %v1078_v7 }
 0x3ea   : > { %v1222_v10 = vpop.f32.mrb[9].mxu1 }
 0x3eb   : > { %v1223_v11 = vadd.f32 %v1222_v10, %v1148_v2  ;;  %v1228_v12 = vadd.f32 %v9958_v8, %v1153_v9 }
 0x3ed   : > { %v12741_v13 = vmax.f32 %v1223_v11, 0.0  ;;  %v12743_v14 = vmax.f32 %v1228_v12, 0.0 }
 0x3ef   : > { %17560 = vst [vmem:[#allocation6_spill] sm:$0xff] %v12741_v13  ;;  %17561 = vst [vmem:[#allocation7_spill] sm:$0xff] %v12743_v14  ;;  %1238 = vrot.lane.b32.xlu0 %v12741_v13, %s17471_s28  ;;  %1240 = vrot.lane.b32.xlu1 %v12743_v14, %s17471_s28 }
 0x3f0   : > { %1234 = vst.msk [vmem:[#allocation4] sm:$0xff] %vm17485_vm6, %v12741_v13  ;;  %1235 = vst.msk [vmem:[#allocation4 + $0x8] sm:$0xff] %vm17485_vm6, %v12743_v14 }
 0x3f3   : > { %1246 = vrot.lane.b32.xlu0 %v12741_v13, %s17475_s12  ;;  %1248 = vrot.lane.b32.xlu1 %v12743_v14, %s17475_s12 }
 0x3f7   : > { %v1358_v15 = vld [vmem:[#allocation4] sm:$0xff]  ;;  %1254 = vrot.lane.b32.xlu0 %v12741_v13, %s17469_s23  ;;  %v1359_v16 = vld [vmem:[#allocation4 + $0x8] sm:$0xff]  ;;  %1256 = vrot.lane.b32.xlu1 %v12743_v14, %s17469_s23  ;;  %s17496_s23 = smov 36  }
 0x3f8   : > { %9961 = vmatprep.mubr.msk.f32.mxu1 %vm17485_vm6, %v1358_v15 }
 0x3f9   : > { %9962 = vmatmul.mubr.msk.f32.vlgmr.msra.gmra.mrb[10].mxu1 %vm17485_vm6, %v1359_v16 }
 0x3fb   : > { %1262 = vrot.lane.b32.xlu0 %v12741_v13, %s17467_s24  ;;  %1264 = vrot.lane.b32.xlu1 %v12743_v14, %s17467_s24  ;;  %s17503_s24 = smov 12  }
 0x3ff   : > { %1270 = vrot.lane.b32.xlu0 %v12741_v13, %s17465_s25  ;;  %1272 = vrot.lane.b32.xlu1 %v12743_v14, %s17465_s25  ;;  %s17620_s25 = smov 120  }
 0x403   : > { %1278 = vrot.lane.b32.xlu0 %v12741_v13, %s17463_s29  ;;  %1280 = vrot.lane.b32.xlu1 %v12743_v14, %s17463_s29  ;;  %s17613_s29 = smov 24  }
 0x407   : > { %1286 = vrot.lane.b32.xlu0 %v12741_v13, %s17461_s30  ;;  %1288 = vrot.lane.b32.xlu1 %v12743_v14, %s17461_s30  ;;  %s17477_s30 = smov 32  }
 0x40b   : > { %1294 = vrot.lane.b32.xlu0 %v12741_v13, %s17459_s11  ;;  %1296 = vrot.lane.b32.xlu1 %v12743_v14, %s17459_s11  ;;  %s17662_s11 = smov 80  }
 0x40f   : > { %1302 = vrot.lane.b32.xlu0 %v12741_v13, %s17457_s16  ;;  %1304 = vrot.lane.b32.xlu1 %v12743_v14, %s17457_s16  ;;  %s17479_s16 = smov 24  }
 0x413   : > { %1310 = vrot.lane.b32.xlu0 %v12741_v13, %s17413_s17  ;;  %1312 = vrot.lane.b32.xlu1 %v12743_v14, %s17413_s17  ;;  %s17451_s17 = smov 72  }
 0x417   : > { %1318 = vrot.lane.b32.xlu0 %v12741_v13, %s17415_s20  ;;  %1320 = vrot.lane.b32.xlu1 %v12743_v14, %s17415_s20  ;;  %s17449_s20 = smov 68  }
 0x41b   : > { %1326 = vrot.lane.b32.xlu0 %v12741_v13, %s17455_s21  ;;  %1328 = vrot.lane.b32.xlu1 %v12743_v14, %s17455_s21  ;;  %s17483_s21 = smov 28  }
 0x41f   : > { %1334 = vrot.lane.b32.xlu0 %v12741_v13, %s17453_s22  ;;  %1336 = vrot.lane.b32.xlu1 %v12743_v14, %s17453_s22  ;;  %s17501_s22 = smov 16  }
 0x423   : > { %1342 = vrot.lane.b32.xlu0 %v12741_v13, %s17451_s17  ;;  %1344 = vrot.lane.b32.xlu1 %v12743_v14, %s17451_s17  ;;  %s17505_s17 = smov 8  }
 0x427   : > { %1350 = vrot.lane.b32.xlu0 %v12741_v13, %s17449_s20  ;;  %1352 = vrot.lane.b32.xlu1 %v12743_v14, %s17449_s20  ;;  %s17498_s20 = smov 20  }
 0x461   : > { %v1239_v17 = vpop.permute.xlu0 %1238  ;;  %v1241_v18 = vpop.permute.xlu1 %1240 }
 0x462   : > { %1244 = vst.msk [vmem:[#allocation4 + $0x10] sm:$0xff] %vm17485_vm6, %v1239_v17  ;;  %1245 = vst.msk [vmem:[#allocation4 + $0x18] sm:$0xff] %vm17485_vm6, %v1241_v18 }
 0x465   : > { %v1247_v19 = vpop.permute.xlu0 %1246  ;;  %v1249_v20 = vpop.permute.xlu1 %1248 }
 0x466   : > { %1252 = vst.msk [vmem:[#allocation4 + $0x20] sm:$0xff] %vm17485_vm6, %v1247_v19  ;;  %1253 = vst.msk [vmem:[#allocation4 + $0x28] sm:$0xff] %vm17485_vm6, %v1249_v20 }
 0x469   : > { %v1255_v21 = vpop.permute.xlu0 %1254  ;;  %v1360_v22 = vld [vmem:[#allocation4 + $0x10] sm:$0xff]  ;;  %v1257_v23 = vpop.permute.xlu1 %1256  ;;  %v1361_v24 = vld [vmem:[#allocation4 + $0x18] sm:$0xff] }
 0x46a   : > { %1260 = vst.msk [vmem:[#allocation4 + $0x30] sm:$0xff] %vm17485_vm6, %v1255_v21  ;;  %9964 = vmatprep.mubr.msk.f32.mxu1 %vm17485_vm6, %v1360_v22  ;;  %1261 = vst.msk [vmem:[#allocation4 + $0x38] sm:$0xff] %vm17485_vm6, %v1257_v23 }
 0x46b   : > { %9965 = vmatmul.mubr.msk.f32.gmra.mrb[12].mxu1 %vm17485_vm6, %v1361_v24 }
 0x46d   : > { %v1263_v25 = vpop.permute.xlu0 %1262  ;;  %v1362_v26 = vld [vmem:[#allocation4 + $0x20] sm:$0xff]  ;;  %v1265_v27 = vpop.permute.xlu1 %1264  ;;  %v1363_v28 = vld [vmem:[#allocation4 + $0x28] sm:$0xff] }
 0x46e   : > { %1268 = vst.msk [vmem:[#allocation4 + $0x40] sm:$0xff] %vm17485_vm6, %v1263_v25  ;;  %9967 = vmatprep.mubr.msk.f32.mxu1 %vm17485_vm6, %v1362_v26  ;;  %1269 = vst.msk [vmem:[#allocation4 + $0x48] sm:$0xff] %vm17485_vm6, %v1265_v27 }
 0x46f   : > { %9968 = vmatmul.mubr.msk.f32.gmra.mrb[14].mxu1 %vm17485_vm6, %v1363_v28 }
 0x471   : > { %v1271_v29 = vpop.permute.xlu0 %1270  ;;  %v1364_v30 = vld [vmem:[#allocation4 + $0x30] sm:$0xff]  ;;  %v1273_v31 = vpop.permute.xlu1 %1272  ;;  %v1365_v32 = vld [vmem:[#allocation4 + $0x38] sm:$0xff] }
 0x472   : > { %1276 = vst.msk [vmem:[#allocation4 + $0x50] sm:$0xff] %vm17485_vm6, %v1271_v29  ;;  %9970 = vmatprep.mubr.msk.f32.mxu1 %vm17485_vm6, %v1364_v30  ;;  %1277 = vst.msk [vmem:[#allocation4 + $0x58] sm:$0xff] %vm17485_vm6, %v1273_v31 }
 0x473   : > { %9971 = vmatmul.mubr.msk.f32.gmra.mrb[16].mxu1 %vm17485_vm6, %v1365_v32 }
 0x475   : > { %v1279_v33 = vpop.permute.xlu0 %1278  ;;  %v1366_v34 = vld [vmem:[#allocation4 + $0x40] sm:$0xff]  ;;  %v1281_v35 = vpop.permute.xlu1 %1280  ;;  %v1367_v36 = vld [vmem:[#allocation4 + $0x48] sm:$0xff] }
 0x476   : > { %1284 = vst.msk [vmem:[#allocation4 + $0x60] sm:$0xff] %vm17485_vm6, %v1279_v33  ;;  %9973 = vmatprep.mubr.msk.f32.mxu1 %vm17485_vm6, %v1366_v34  ;;  %1285 = vst.msk [vmem:[#allocation4 + $0x68] sm:$0xff] %vm17485_vm6, %v1281_v35 }
 0x477   : > { %9974 = vmatmul.mubr.msk.f32.gmra.mrb[18].mxu1 %vm17485_vm6, %v1367_v36 }
 0x479   : > { %v1287_v37 = vpop.permute.xlu0 %1286  ;;  %v1368_v38 = vld [vmem:[#allocation4 + $0x50] sm:$0xff]  ;;  %v1289_v39 = vpop.permute.xlu1 %1288  ;;  %v1369_v40 = vld [vmem:[#allocation4 + $0x58] sm:$0xff] }
 0x47a   : > { %1292 = vst.msk [vmem:[#allocation4 + $0x70] sm:$0xff] %vm17485_vm6, %v1287_v37  ;;  %9976 = vmatprep.mubr.msk.f32.mxu1 %vm17485_vm6, %v1368_v38  ;;  %1293 = vst.msk [vmem:[#allocation4 + $0x78] sm:$0xff] %vm17485_vm6, %v1289_v39  ;;  %v17419_v37 = vmov 0.0|0.0  }
 0x47b   : > { %9977 = vmatmul.mubr.msk.f32.gmra.mrb[20].mxu1 %vm17485_vm6, %v1369_v40  ;;  %11285 = vmatprep.subr.bf16.mxu1 %v17419_v37 }
 0x47d   : > { %v1295_v41 = vpop.permute.xlu0 %1294  ;;  %v1370_v42 = vld [vmem:[#allocation4 + $0x60] sm:$0xff]  ;;  %v1297_v43 = vpop.permute.xlu1 %1296  ;;  %v1371_v44 = vld [vmem:[#allocation4 + $0x68] sm:$0xff] }
 0x47e   : > { %1300 = vst.msk [vmem:[#allocation4 + $0x80] sm:$0xff] %vm17485_vm6, %v1295_v41  ;;  %9979 = vmatprep.mubr.msk.f32.mxu1 %vm17485_vm6, %v1370_v42  ;;  %1301 = vst.msk [vmem:[#allocation4 + $0x88] sm:$0xff] %vm17485_vm6, %v1297_v43 }
 0x47f   : > { %9980 = vmatmul.mubr.msk.f32.gmra.mrb[22].mxu1 %vm17485_vm6, %v1371_v44 }
 0x481   : > { %v1303_v45 = vpop.permute.xlu0 %1302  ;;  %v1372_v46 = vld [vmem:[#allocation4 + $0x70] sm:$0xff]  ;;  %v1305_v47 = vpop.permute.xlu1 %1304  ;;  %v1373_v48 = vld [vmem:[#allocation4 + $0x78] sm:$0xff] }
 0x482   : > { %1308 = vst.msk [vmem:[#allocation4 + $0x90] sm:$0xff] %vm17485_vm6, %v1303_v45  ;;  %9982 = vmatprep.mubr.msk.f32.mxu1 %vm17485_vm6, %v1372_v46  ;;  %1309 = vst.msk [vmem:[#allocation4 + $0x98] sm:$0xff] %vm17485_vm6, %v1305_v47 }
 0x483   : > { %9983 = vmatmul.mubr.msk.f32.gmra.mrb[24].mxu1 %vm17485_vm6, %v1373_v48 }
 0x485   : > { %v1311_v49 = vpop.permute.xlu0 %1310  ;;  %v1374_v50 = vld [vmem:[#allocation4 + $0x80] sm:$0xff]  ;;  %v1313_v51 = vpop.permute.xlu1 %1312  ;;  %v1375_v52 = vld [vmem:[#allocation4 + $0x88] sm:$0xff] }
 0x486   : > { %1316 = vst.msk [vmem:[#allocation4 + $0xa0] sm:$0xff] %vm17485_vm6, %v1311_v49  ;;  %9985 = vmatprep.mubr.msk.f32.mxu1 %vm17485_vm6, %v1374_v50  ;;  %1317 = vst.msk [vmem:[#allocation4 + $0xa8] sm:$0xff] %vm17485_vm6, %v1313_v51 }
 0x487   : > { %9986 = vmatmul.mubr.msk.f32.gmra.mrb[26].mxu1 %vm17485_vm6, %v1375_v52 }
 0x489   : > { %v1319_v53 = vpop.permute.xlu0 %1318  ;;  %v1376_v54 = vld [vmem:[#allocation4 + $0x90] sm:$0xff]  ;;  %v1321_v55 = vpop.permute.xlu1 %1320  ;;  %v1377_v56 = vld [vmem:[#allocation4 + $0x98] sm:$0xff] }
 0x48a   : > { %1324 = vst.msk [vmem:[#allocation4 + $0xb0] sm:$0xff] %vm17485_vm6, %v1319_v53  ;;  %9988 = vmatprep.mubr.msk.f32.mxu1 %vm17485_vm6, %v1376_v54  ;;  %1325 = vst.msk [vmem:[#allocation4 + $0xb8] sm:$0xff] %vm17485_vm6, %v1321_v55 }
 0x48b   : > { %9989 = vmatmul.mubr.msk.f32.gmra.mrb[28].mxu1 %vm17485_vm6, %v1377_v56 }
 0x48d   : > { %v1327_v57 = vpop.permute.xlu0 %1326  ;;  %v1378_v58 = vld [vmem:[#allocation4 + $0xa0] sm:$0xff]  ;;  %v1329_v59 = vpop.permute.xlu1 %1328  ;;  %v1379_v60 = vld [vmem:[#allocation4 + $0xa8] sm:$0xff] }
 0x48e   : > { %1332 = vst.msk [vmem:[#allocation4 + $0xc0] sm:$0xff] %vm17485_vm6, %v1327_v57  ;;  %9991 = vmatprep.mubr.msk.f32.mxu1 %vm17485_vm6, %v1378_v58  ;;  %1333 = vst.msk [vmem:[#allocation4 + $0xc8] sm:$0xff] %vm17485_vm6, %v1329_v59 }
 0x48f   : > { %9992 = vmatmul.mubr.msk.f32.gmra.mrb[30].mxu1 %vm17485_vm6, %v1379_v60 }
 0x491   : > { %v1335_v61 = vpop.permute.xlu0 %1334  ;;  %v1380_v62 = vld [vmem:[#allocation4 + $0xb0] sm:$0xff]  ;;  %v1337_v63 = vpop.permute.xlu1 %1336  ;;  %v1381_v1 = vld [vmem:[#allocation4 + $0xb8] sm:$0xff] }
 0x492   : > { %1340 = vst.msk [vmem:[#allocation4 + $0xd0] sm:$0xff] %vm17485_vm6, %v1335_v61  ;;  %9994 = vmatprep.mubr.msk.f32.mxu1 %vm17485_vm6, %v1380_v62  ;;  %1341 = vst.msk [vmem:[#allocation4 + $0xd8] sm:$0xff] %vm17485_vm6, %v1337_v63 }
 0x493   : > { %9995 = vmatmul.mubr.msk.f32.gmra.mrb[32].mxu1 %vm17485_vm6, %v1381_v1 }
 0x495   : > { %v1343_v2 = vpop.permute.xlu0 %1342  ;;  %v1382_v3 = vld [vmem:[#allocation4 + $0xc0] sm:$0xff]  ;;  %v1345_v4 = vpop.permute.xlu1 %1344  ;;  %v1383_v5 = vld [vmem:[#allocation4 + $0xc8] sm:$0xff] }
 0x496   : > { %1348 = vst.msk [vmem:[#allocation4 + $0xe0] sm:$0xff] %vm17485_vm6, %v1343_v2  ;;  %9997 = vmatprep.mubr.msk.f32.mxu1 %vm17485_vm6, %v1382_v3  ;;  %1349 = vst.msk [vmem:[#allocation4 + $0xe8] sm:$0xff] %vm17485_vm6, %v1345_v4 }
 0x497   : > { %9998 = vmatmul.mubr.msk.f32.gmra.mrb[34].mxu1 %vm17485_vm6, %v1383_v5 }
 0x499   : > { %v1351_v6 = vpop.permute.xlu0 %1350  ;;  %v1384_v7 = vld [vmem:[#allocation4 + $0xd0] sm:$0xff]  ;;  %v1353_v8 = vpop.permute.xlu1 %1352  ;;  %v1385_v9 = vld [vmem:[#allocation4 + $0xd8] sm:$0xff] }
 0x49a   : > { %1356 = vst.msk [vmem:[#allocation4 + $0xf0] sm:$0xff] %vm17485_vm6, %v1351_v6  ;;  %10000 = vmatprep.mubr.msk.f32.mxu1 %vm17485_vm6, %v1384_v7  ;;  %1357 = vst.msk [vmem:[#allocation4 + $0xf8] sm:$0xff] %vm17485_vm6, %v1353_v8 }
 0x49b   : > { %10001 = vmatmul.mubr.msk.f32.gmra.mrb[36].mxu1 %vm17485_vm6, %v1385_v9 }
 0x49d   : > { %v1386_v10 = vld [vmem:[#allocation4 + $0xe0] sm:$0xff]  ;;  %v1387_v11 = vld [vmem:[#allocation4 + $0xe8] sm:$0xff] }
 0x49e   : > { %10003 = vmatprep.mubr.msk.f32.mxu1 %vm17485_vm6, %v1386_v10 }
 0x49f   : > { %10004 = vmatmul.mubr.msk.f32.gmra.mrb[38].mxu1 %vm17485_vm6, %v1387_v11 }
 0x4a1   : > { %v1388_v12 = vld [vmem:[#allocation4 + $0xf0] sm:$0xff]  ;;  %v1389_v15 = vld [vmem:[#allocation4 + $0xf8] sm:$0xff] }
 0x4a2   : > { %10006 = vmatprep.mubr.msk.f32.mxu1 %vm17485_vm6, %v1388_v12 }
 0x4a3   : > { %10007 = vmatmul.mubr.msk.f32.gmra.mrb[40].mxu1 %vm17485_vm6, %v1389_v15 }
 0x4cc   : > { %v12871_v16 = vpop.f32.mrb[10].mxu1 }
 0x4cd   : > { %v12873_v17 = vpop.f32.mrb[11].mxu1 }
 0x4ce   : > { %9490 = vmatprep.mubr.msk.f32.mxu0 %vm17485_vm6, %v12873_v17  ;;  %v11395_v18 = vpack.i.bf16 %v12871_v16, %v12873_v17 }
 0x4d0   : > { %11396 = vrot.lane.b32.xlu1 %v11395_v18, %s17471_s28 }
 0x53e   : > { %v12880_v19 = vpop.f32.mrb[12].mxu1 }
 0x53f   : > { %v12882_v20 = vpop.f32.mrb[13].mxu1 }
 0x540   : > { %v12886_v21 = vpack.i.bf16 %v12880_v19, %v12882_v20 }
 0x542   : > { %11406 = vrot.lane.b32.xlu1 %v12886_v21, %s17471_s28  ;;  %v12890_v22 = vpop.f32.mrb[14].mxu1  ;;  %v11397_v2 = vpop.permute.xlu1 %11396 }
 0x543   : > { %v12892_v23 = vpop.f32.mrb[15].mxu1  ;;  %v11399_v10 = vunpack.i.h.bf16 %v11397_v2  ;;  %v11398_v11 = vunpack.i.l.bf16 %v11397_v2 }
 0x544   : > { %v11415_v24 = vpack.i.bf16 %v12890_v22, %v12892_v23 }
 0x546   : > { %11416 = vrot.lane.b32.xlu1 %v11415_v24, %s17471_s28  ;;  %v12897_v25 = vpop.f32.mrb[16].mxu1 }
 0x547   : > { %v12899_v26 = vpop.f32.mrb[17].mxu1 }
 0x548   : > { %v11425_v27 = vpack.i.bf16 %v12897_v25, %v12899_v26 }
 0x54a   : > { %11426 = vrot.lane.b32.xlu1 %v11425_v27, %s17471_s28  ;;  %v12904_v28 = vpop.f32.mrb[18].mxu1 }
 0x54b   : > { %v12906_v29 = vpop.f32.mrb[19].mxu1 }
 0x54c   : > { %v11435_v30 = vpack.i.bf16 %v12904_v28, %v12906_v29 }
 0x54e   : > { %11436 = vrot.lane.b32.xlu1 %v11435_v30, %s17471_s28  ;;  %v12911_v31 = vpop.f32.mrb[20].mxu1 }
 0x54f   : > { %v12913_v32 = vpop.f32.mrb[21].mxu1 }
 0x550   : > { %v11445_v33 = vpack.i.bf16 %v12911_v31, %v12913_v32 }
 0x552   : > { %11446 = vrot.lane.b32.xlu1 %v11445_v33, %s17471_s28  ;;  %v12918_v34 = vpop.f32.mrb[22].mxu1 }
 0x553   : > { %v12920_v35 = vpop.f32.mrb[23].mxu1 }
 0x554   : > { %v11455_v36 = vpack.i.bf16 %v12918_v34, %v12920_v35 }
 0x556   : > { %11456 = vrot.lane.b32.xlu1 %v11455_v36, %s17471_s28  ;;  %v12926_v38 = vpop.f32.mrb[24].mxu1 }
 0x557   : > { %v12928_v39 = vpop.f32.mrb[25].mxu1 }
 0x558   : > { %v11465_v40 = vpack.i.bf16 %v12926_v38, %v12928_v39 }
 0x55a   : > { %11466 = vrot.lane.b32.xlu1 %v11465_v40, %s17471_s28  ;;  %v12933_v41 = vpop.f32.mrb[26].mxu1 }
 0x55b   : > { %v12935_v42 = vpop.f32.mrb[27].mxu1 }
 0x55c   : > { %v11390_v43 = vpack.i.bf16 %v12933_v41, %v12935_v42 }
 0x55e   : > { %11471 = vrot.lane.b32.xlu1 %v11395_v18, %s17475_s12  ;;  %11391 = vrot.lane.b32.xlu0 %v11390_v43, %s17471_s28  ;;  %v12941_v44 = vpop.f32.mrb[28].mxu1 }
 0x55f   : > { %v12943_v45 = vpop.f32.mrb[29].mxu1 }
 0x560   : > { %v11400_v46 = vpack.i.bf16 %v12941_v44, %v12943_v45 }
 0x562   : > { %11481 = vrot.lane.b32.xlu1 %v11415_v24, %s17475_s12  ;;  %11401 = vrot.lane.b32.xlu0 %v11400_v46, %s17471_s28  ;;  %v12949_v47 = vpop.f32.mrb[30].mxu1 }
 0x563   : > { %v12951_v48 = vpop.f32.mrb[31].mxu1 }
 0x564   : > { %v11410_v49 = vpack.i.bf16 %v12949_v47, %v12951_v48 }
 0x566   : > { %11496 = vrot.lane.b32.xlu1 %v11445_v33, %s17475_s12  ;;  %11411 = vrot.lane.b32.xlu0 %v11410_v49, %s17471_s28  ;;  %v12957_v50 = vpop.f32.mrb[32].mxu1 }
 0x567   : > { %v12959_v51 = vpop.f32.mrb[33].mxu1 }
 0x568   : > { %v11420_v52 = vpack.i.bf16 %v12957_v50, %v12959_v51 }
 0x56a   : > { %11501 = vrot.lane.b32.xlu1 %v11455_v36, %s17475_s12  ;;  %11421 = vrot.lane.b32.xlu0 %v11420_v52, %s17471_s28  ;;  %v12965_v53 = vpop.f32.mrb[34].mxu1 }
 0x56b   : > { %v12967_v54 = vpop.f32.mrb[35].mxu1 }
 0x56c   : > { %v11430_v55 = vpack.i.bf16 %v12965_v53, %v12967_v54 }
 0x56e   : > { %11506 = vrot.lane.b32.xlu1 %v11465_v40, %s17475_s12  ;;  %11431 = vrot.lane.b32.xlu0 %v11430_v55, %s17471_s28  ;;  %v12973_v56 = vpop.f32.mrb[36].mxu1  ;;  %v10360_v40 = vpack.c.bf16 %v11399_v10, %v11398_v11 }
 0x56f   : > { %v12975_v57 = vpop.f32.mrb[37].mxu1 }
 0x570   : > { %v12979_v58 = vpack.i.bf16 %v12973_v56, %v12975_v57 }
 0x572   : > { %11511 = vrot.lane.b32.xlu1 %v11390_v43, %s17475_s12  ;;  %11441 = vrot.lane.b32.xlu0 %v12979_v58, %s17471_s28  ;;  %v12984_v59 = vpop.f32.mrb[38].mxu1 }
 0x573   : > { %v12986_v60 = vpop.f32.mrb[39].mxu1 }
 0x574   : > { %v12990_v61 = vpack.i.bf16 %v12984_v59, %v12986_v60 }
 0x576   : > { %11516 = vrot.lane.b32.xlu1 %v11400_v46, %s17475_s12  ;;  %11451 = vrot.lane.b32.xlu0 %v12990_v61, %s17471_s28  ;;  %v12995_v62 = vpop.f32.mrb[40].mxu1 }
 0x577   : > { %v12997_v63 = vpop.f32.mrb[41].mxu1 }
 0x578   : > { %v13001_v1 = vpack.i.bf16 %v12995_v62, %v12997_v63 }
 0x57a   : > { %11526 = vrot.lane.b32.xlu1 %v11420_v52, %s17475_s12  ;;  %11461 = vrot.lane.b32.xlu0 %v13001_v1, %s17471_s28  ;;  %s17494_s28 = smov 44  }
 0x57e   : > { %11476 = vrot.lane.b32.xlu0 %v12886_v21, %s17475_s12 }
 0x582   : > { %11486 = vrot.lane.b32.xlu0 %v11425_v27, %s17475_s12 }
 0x586   : > { %11491 = vrot.lane.b32.xlu0 %v11435_v30, %s17475_s12  ;;  %v17562_v30 = vmov 0 }
 0x587   : > { %v17563_v30 = vsel %vm13022_vm7, 4294967295, %v17562_v30 }
 0x588   : > { %17564 = vst [vmem:[#allocation8_spill] sm:$0xff] %v17563_v30 }
 0x58a   : > { %11521 = vrot.lane.b32.xlu0 %v11410_v49, %s17475_s12 }
 0x58e   : > { %11531 = vrot.lane.b32.xlu0 %v11430_v55, %s17475_s12 }
 0x5b4   : > { %v11407_v3 = vpop.permute.xlu1 %11406 }
 0x5b5   : > { %v11409_v55 = vunpack.i.h.bf16 %v11407_v3  ;;  %v11408_v2 = vunpack.i.l.bf16 %v11407_v3 }
 0x5b7   : > { %v10366_v10 = vpack.c.bf16 %v11409_v55, %v11408_v2 }
 0x5b8   : > { %v11417_v4 = vpop.permute.xlu1 %11416 }
 0x5bc   : > { %v11427_v5 = vpop.permute.xlu1 %11426 }
 0x5bd   : > { %v11428_v55 = vunpack.i.l.bf16 %v11427_v5 }
 0x5c0   : > { %v13012_v6 = vpop.permute.xlu1 %11436 }
 0x5c4   : > { %v13014_v7 = vpop.permute.xlu1 %11446 }
 0x5c8   : > { %v13016_v8 = vpop.permute.xlu1 %11456 }
 0x5cc   : > { %v13018_v9 = vpop.permute.xlu1 %11466 }
 0x5d0   : > { %v11472_v12 = vpop.permute.xlu1 %11471  ;;  %v11392_v15 = vpop.permute.xlu0 %11391 }
 0x5d1   : > { %v11474_v18 = vunpack.i.h.bf16 %v11472_v12  ;;  %v11473_v21 = vunpack.i.l.bf16 %v11472_v12  ;;  %v11394_v24 = vunpack.i.h.bf16 %v11392_v15  ;;  %v11393_v27 = vunpack.i.l.bf16 %v11392_v15 }
 0x5d3   : > { %v13026_v33 = vpack.c.bf16 %v11474_v18, %v11473_v21  ;;  %v10357_v36 = vpack.c.bf16 %v11394_v24, %v11393_v27  ;;  %v11419_v24 = vunpack.i.h.bf16 %v11417_v4  ;;  %v11418_v27 = vunpack.i.l.bf16 %v11417_v4 }
 0x5d4   : > { %v11402_v43 = vpop.permute.xlu0 %11401 }
 0x5d5   : > { %v11404_v46 = vunpack.i.h.bf16 %v11402_v43  ;;  %v11403_v49 = vunpack.i.l.bf16 %v11402_v43  ;;  %10359 = vmatprep.subr.msk.bf16.mxu0 %vm13022_vm7, %v10357_v36  ;;  %11301 = vmatpush1.bf16.msra.mxu1 %v13026_v33  ;;  %v10372_v43 = vpack.c.bf16 %v11419_v24, %v11418_v27  ;;  %v11438_v24 = vunpack.i.l.bf16 %v13012_v6 }
 0x5d6   : > { %10362 = vmatpush3.bf16.xpose.msk.msra.mxu0 %vm13022_vm7, %v10360_v40  ;;  %11286 = vmatprep.subr.bf16.mxu1 %v17419_v37 }
 0x5d7   : > { %v10363_v52 = vpack.c.bf16 %v11404_v46, %v11403_v49 }
 0x5d8   : > { %v11412_v12 = vpop.permute.xlu0 %11411 }
 0x5d9   : > { %v11414_v15 = vunpack.i.h.bf16 %v11412_v12  ;;  %v11413_v18 = vunpack.i.l.bf16 %v11412_v12  ;;  %10365 = vmatprep.subr.msk.bf16.mxu0 %vm13022_vm7, %v10363_v52  ;;  %v11429_v52 = vunpack.i.h.bf16 %v11427_v5 }
 0x5db   : > { %v10369_v21 = vpack.c.bf16 %v11414_v15, %v11413_v18  ;;  %v10378_v18 = vpack.c.bf16 %v11429_v52, %v11428_v55 }
 0x5dc   : > { %v11422_v11 = vpop.permute.xlu0 %11421 }
 0x5dd   : > { %v11424_v40 = vunpack.i.h.bf16 %v11422_v11  ;;  %v11423_v3 = vunpack.i.l.bf16 %v11422_v11  ;;  %v11439_v11 = vunpack.i.h.bf16 %v13012_v6 }
 0x5de   : > { %10368 = vmatpush3.bf16.xpose.msk.msra.mxu0 %vm13022_vm7, %v10366_v10 }
 0x5df   : > { %10371 = vmatprep.subr.msk.bf16.mxu0 %vm13022_vm7, %v10369_v21  ;;  %v10375_v49 = vpack.c.bf16 %v11424_v40, %v11423_v3  ;;  %v11482_v21 = vpop.permute.xlu1 %11481  ;;  %v10384_v55 = vpack.c.bf16 %v11439_v11, %v11438_v24  ;;  %v11448_v11 = vunpack.i.l.bf16 %v13014_v7 }
 0x5e0   : > { %v11432_v36 = vpop.permute.xlu0 %11431 }
 0x5e1   : > { %v11434_v12 = vunpack.i.h.bf16 %v11432_v36  ;;  %v11433_v15 = vunpack.i.l.bf16 %v11432_v36  ;;  %v11484_v36 = vunpack.i.h.bf16 %v11482_v21 }
 0x5e3   : > { %v10381_v4 = vpack.c.bf16 %v11434_v12, %v11433_v15  ;;  %v11497_v12 = vpop.permute.xlu1 %11496 }
 0x5e4   : > { %v11442_v46 = vpop.permute.xlu0 %11441 }
 0x5e5   : > { %v11444_v40 = vunpack.i.h.bf16 %v11442_v46  ;;  %v11443_v5 = vunpack.i.l.bf16 %v11442_v46 }
 0x5e6   : > { %10374 = vmatpush3.bf16.xpose.msk.msra.mxu0 %vm13022_vm7, %v10372_v43 }
 0x5e7   : > { %10377 = vmatprep.subr.msk.bf16.mxu0 %vm13022_vm7, %v10375_v49  ;;  %v11483_v49 = vunpack.i.l.bf16 %v11482_v21  ;;  %v11449_v21 = vunpack.i.h.bf16 %v13014_v7  ;;  %v11499_v7 = vunpack.i.h.bf16 %v11497_v12 }
 0x5e8   : > { %v11452_v2 = vpop.permute.xlu0 %11451 }
 0x5e9   : > { %v13056_v6 = vpack.c.bf16 %v11484_v36, %v11483_v49  ;;  %v10390_v49 = vpack.c.bf16 %v11449_v21, %v11448_v11 }
 0x5ec   : > { %v11462_v10 = vpop.permute.xlu0 %11461 }
 0x5ed   : > { %v11464_v21 = vunpack.i.h.bf16 %v11462_v10  ;;  %v11463_v11 = vunpack.i.l.bf16 %v11462_v10 }
 0x5ee   : > { %10380 = vmatpush3.bf16.xpose.msk.msra.mxu0 %vm13022_vm7, %v10378_v18  ;;  %v10387_v18 = vpack.c.bf16 %v11444_v40, %v11443_v5  ;;  %v11453_v40 = vunpack.i.l.bf16 %v11452_v2  ;;  %v11502_v5 = vpop.permute.xlu1 %11501 }
 0x5ef   : > { %10383 = vmatprep.subr.msk.bf16.mxu0 %vm13022_vm7, %v10381_v4 }
 0x5f0   : > { %v11477_v27 = vpop.permute.xlu0 %11476 }
 0x5f1   : > { %v11479_v3 = vunpack.i.h.bf16 %v11477_v27  ;;  %v11478_v43 = vunpack.i.l.bf16 %v11477_v27  ;;  %v11454_v27 = vunpack.i.h.bf16 %v11452_v2  ;;  %v11498_v2 = vunpack.i.l.bf16 %v11497_v12 }
 0x5f2   : > { %v11503_v12 = vunpack.i.l.bf16 %v11502_v5 }
 0x5f3   : > { %v13050_v52 = vpack.c.bf16 %v11479_v3, %v11478_v43 }
 0x5f4   : > { %v11487_v15 = vpop.permute.xlu0 %11486 }
 0x5f5   : > { %11302 = vmatpush1.bf16.msra.mxu1 %v13050_v52  ;;  %v11489_v46 = vunpack.i.h.bf16 %v11487_v15  ;;  %v11488_v4 = vunpack.i.l.bf16 %v11487_v15 }
 0x5f6   : > { %10386 = vmatpush3.bf16.xpose.msk.msra.mxu0 %vm13022_vm7, %v10384_v55  ;;  %11287 = vmatprep.subr.bf16.mxu1 %v17419_v37  ;;  %v10393_v55 = vpack.c.bf16 %v11454_v27, %v11453_v40  ;;  %v11504_v27 = vunpack.i.h.bf16 %v11502_v5  ;;  %v11468_v5 = vunpack.i.l.bf16 %v13018_v9 }
 0x5f7   : > { %10389 = vmatprep.subr.msk.bf16.mxu0 %vm13022_vm7, %v10387_v18  ;;  %v13064_v3 = vpack.c.bf16 %v11489_v46, %v11488_v4  ;;  %v11459_v18 = vunpack.i.h.bf16 %v13016_v8  ;;  %v11458_v46 = vunpack.i.l.bf16 %v13016_v8  ;;  %v11507_v4 = vpop.permute.xlu1 %11506 }
 0x5f8   : > { %v11492_v24 = vpop.permute.xlu0 %11491  ;;  %v13084_v8 = vpack.c.bf16 %v11504_v27, %v11503_v12  ;;  %v11509_v10 = vunpack.i.h.bf16 %v11507_v4 }
 0x5f9   : > { %11303 = vmatpush1.bf16.msra.mxu1 %v13056_v6  ;;  %v11494_v43 = vunpack.i.h.bf16 %v11492_v24  ;;  %v11493_v36 = vunpack.i.l.bf16 %v11492_v24  ;;  %v13078_v24 = vpack.c.bf16 %v11499_v7, %v11498_v2  ;;  %v10396_v40 = vpack.c.bf16 %v11459_v18, %v11458_v46 }
 0x5fa   : > { %11288 = vmatprep.subr.bf16.mxu1 %v17419_v37 }
 0x5fb   : > { %v13070_v15 = vpack.c.bf16 %v11494_v43, %v11493_v36  ;;  %v10399_v43 = vpack.c.bf16 %v11464_v21, %v11463_v11  ;;  %v11512_v36 = vpop.permute.xlu1 %11511 }
 0x5fc   : > { %v11514_v2 = vunpack.i.h.bf16 %v11512_v36  ;;  %v11513_v18 = vunpack.i.l.bf16 %v11512_v36  ;;  %v11522_v27 = vpop.permute.xlu0 %11521 }
 0x5fd   : > { %11304 = vmatpush1.bf16.msra.mxu1 %v13064_v3 }
 0x5fe   : > { %10392 = vmatpush3.bf16.xpose.msk.msra.mxu0 %vm13022_vm7, %v10390_v49  ;;  %11289 = vmatprep.subr.bf16.mxu1 %v17419_v37  ;;  %v11508_v49 = vunpack.i.l.bf16 %v11507_v4  ;;  %v10430_v4 = vpack.c.bf16 %v11514_v2, %v11513_v18 }
 0x5ff   : > { %10395 = vmatprep.subr.msk.bf16.mxu0 %vm13022_vm7, %v10393_v55  ;;  %v11469_v55 = vunpack.i.h.bf16 %v13018_v9  ;;  %v11517_v21 = vpop.permute.xlu1 %11516 }
 0x600   : > { %v13092_v7 = vpack.c.bf16 %v11509_v10, %v11508_v49  ;;  %v11519_v11 = vunpack.i.h.bf16 %v11517_v21  ;;  %v11518_v9 = vunpack.i.l.bf16 %v11517_v21 }
 0x601   : > { %11305 = vmatpush1.bf16.msra.mxu1 %v13070_v15  ;;  %v10402_v46 = vpack.c.bf16 %v11469_v55, %v11468_v5  ;;  %v11532_v5 = vpop.permute.xlu0 %11531 }
 0x602   : > { %11290 = vmatprep.subr.bf16.mxu1 %v17419_v37  ;;  %v10433_v12 = vpack.c.bf16 %v11519_v11, %v11518_v9  ;;  %v11534_v2 = vunpack.i.h.bf16 %v11532_v5 }
 0x603   : > { %v11527_v36 = vpop.permute.xlu1 %11526 }
 0x604   : > { %v11529_v10 = vunpack.i.h.bf16 %v11527_v36  ;;  %v11528_v49 = vunpack.i.l.bf16 %v11527_v36 }
 0x605   : > { %11306 = vmatpush1.bf16.msra.mxu1 %v13078_v24 }
 0x606   : > { %10398 = vmatpush3.bf16.xpose.msk.msra.mxu0 %vm13022_vm7, %v10396_v40  ;;  %11291 = vmatprep.subr.bf16.mxu1 %v17419_v37  ;;  %v11524_v40 = vunpack.i.h.bf16 %v11522_v27 }
 0x607   : > { %10401 = vmatprep.subr.msk.bf16.mxu0 %vm13022_vm7, %v10399_v43  ;;  %v11523_v43 = vunpack.i.l.bf16 %v11522_v27 }
 0x609   : > { %11307 = vmatpush1.bf16.msra.mxu1 %v13084_v8  ;;  %v10436_v55 = vpack.c.bf16 %v11524_v40, %v11523_v43 }
 0x60a   : > { %11292 = vmatprep.subr.bf16.mxu1 %v17419_v37 }
 0x60d   : > { %11308 = vmatpush1.bf16.msra.mxu1 %v13092_v7 }
 0x60e   : > { %10404 = vmatpush3.bf16.xpose.msk.msra.mxu0 %vm13022_vm7, %v10402_v46  ;;  %11293 = vmatprep.subr.bf16.mxu1 %v17419_v37 }
 0x60f   : > { %10405 = vmatprep.subr.bf16.mxu0 %v17419_v37 }
 0x611   : > { %11309 = vmatpush1.bf16.msra.mxu1 %v10430_v4 }
 0x612   : > { %11294 = vmatprep.subr.bf16.mxu1 %v17419_v37 }
 0x615   : > { %9491 = vmatmul.mubr.msk.f32.vlgmr.msra.gmra.mrb[10].mxu0 %vm17485_vm6, %v12873_v17  ;;  %11310 = vmatpush1.bf16.msra.mxu1 %v10433_v12  ;;  %v10439_v17 = vpack.c.bf16 %v11529_v10, %v11528_v49 }
 0x616   : > { %9492 = vmatprep.mubr.msk.f32.mxu0 %vm17485_vm6, %v12871_v16  ;;  %10407 = vmatpush1.bf16.msra.mxu0 %v13026_v33  ;;  %v11533_v33 = vunpack.i.l.bf16 %v11532_v5 }
 0x617   : > { %11295 = vmatprep.subr.bf16.mxu1 %v17419_v37  ;;  %10408 = vmatprep.subr.bf16.mxu0 %v17419_v37 }
 0x619   : > { %9493 = vmatmul.mubr.msk.f32.gmra.mrb[12].mxu0 %vm17485_vm6, %v12871_v16  ;;  %11311 = vmatpush1.bf16.msra.mxu1 %v10436_v55  ;;  %v10442_v16 = vpack.c.bf16 %v11534_v2, %v11533_v33 }
 0x61a   : > { %9494 = vmatprep.mubr.msk.f32.mxu0 %vm17485_vm6, %v12882_v20  ;;  %10410 = vmatpush1.bf16.msra.mxu0 %v13050_v52 }
 0x61b   : > { %11296 = vmatprep.subr.bf16.mxu1 %v17419_v37  ;;  %10411 = vmatprep.subr.bf16.mxu0 %v17419_v37 }
 0x61d   : > { %9495 = vmatmul.mubr.msk.f32.gmra.mrb[14].mxu0 %vm17485_vm6, %v12882_v20  ;;  %11312 = vmatpush1.bf16.msra.mxu1 %v10439_v17 }
 0x61e   : > { %9496 = vmatprep.mubr.msk.f32.mxu0 %vm17485_vm6, %v12880_v19  ;;  %10413 = vmatpush1.bf16.msra.mxu0 %v13056_v6 }
 0x61f   : > { %11297 = vmatprep.subr.bf16.mxu1 %v17419_v37  ;;  %10414 = vmatprep.subr.bf16.mxu0 %v17419_v37 }
 0x621   : > { %9497 = vmatmul.mubr.msk.f32.gmra.mrb[16].mxu0 %vm17485_vm6, %v12880_v19  ;;  %11313 = vmatpush1.bf16.msra.mxu1 %v10442_v16 }
 0x622   : > { %9498 = vmatprep.mubr.msk.f32.mxu0 %vm17485_vm6, %v12892_v23  ;;  %10416 = vmatpush1.bf16.msra.mxu0 %v13064_v3 }
 0x623   : > { %10417 = vmatprep.subr.bf16.mxu0 %v17419_v37  ;;  %11298 = vmatprep.subr.bf16.mxu1 %v17419_v37 }
 0x625   : > { %9499 = vmatmul.mubr.msk.f32.gmra.mrb[18].mxu0 %vm17485_vm6, %v12892_v23 }
 0x626   : > { %9500 = vmatprep.mubr.msk.f32.mxu0 %vm17485_vm6, %v12890_v22  ;;  %10419 = vmatpush1.bf16.msra.mxu0 %v13070_v15 }
 0x627   : > { %10420 = vmatprep.subr.bf16.mxu0 %v17419_v37 }
 0x629   : > { %9501 = vmatmul.mubr.msk.f32.gmra.mrb[20].mxu0 %vm17485_vm6, %v12890_v22 }
 0x62a   : > { %9502 = vmatprep.mubr.msk.f32.mxu0 %vm17485_vm6, %v12899_v26  ;;  %10422 = vmatpush1.bf16.msra.mxu0 %v13078_v24 }
 0x62b   : > { %10423 = vmatprep.subr.bf16.mxu0 %v17419_v37 }
 0x62d   : > { %9503 = vmatmul.mubr.msk.f32.gmra.mrb[22].mxu0 %vm17485_vm6, %v12899_v26 }
 0x62e   : > { %9504 = vmatprep.mubr.msk.f32.mxu0 %vm17485_vm6, %v12897_v25  ;;  %10425 = vmatpush1.bf16.msra.mxu0 %v13084_v8 }
 0x62f   : > { %10426 = vmatprep.subr.bf16.mxu0 %v17419_v37 }
 0x631   : > { %9505 = vmatmul.mubr.msk.f32.gmra.mrb[24].mxu0 %vm17485_vm6, %v12897_v25 }
 0x632   : > { %9506 = vmatprep.mubr.msk.f32.mxu0 %vm17485_vm6, %v12906_v29  ;;  %10428 = vmatpush1.bf16.msra.mxu0 %v13092_v7 }
 0x633   : > { %10429 = vmatprep.subr.bf16.mxu0 %v17419_v37 }
 0x635   : > { %9507 = vmatmul.mubr.msk.f32.gmra.mrb[26].mxu0 %vm17485_vm6, %v12906_v29 }
 0x636   : > { %9508 = vmatprep.mubr.msk.f32.mxu0 %vm17485_vm6, %v12904_v28  ;;  %10431 = vmatpush1.bf16.msra.mxu0 %v10430_v4 }
 0x637   : > { %10432 = vmatprep.subr.bf16.mxu0 %v17419_v37 }
 0x639   : > { %9509 = vmatmul.mubr.msk.f32.gmra.mrb[28].mxu0 %vm17485_vm6, %v12904_v28 }
 0x63a   : > { %9510 = vmatprep.mubr.msk.f32.mxu0 %vm17485_vm6, %v12913_v32  ;;  %10434 = vmatpush1.bf16.msra.mxu0 %v10433_v12 }
 0x63b   : > { %10435 = vmatprep.subr.bf16.mxu0 %v17419_v37 }
 0x63d   : > { %9511 = vmatmul.mubr.msk.f32.gmra.mrb[30].mxu0 %vm17485_vm6, %v12913_v32 }
 0x63e   : > { %9512 = vmatprep.mubr.msk.f32.mxu0 %vm17485_vm6, %v12911_v31  ;;  %10437 = vmatpush1.bf16.msra.mxu0 %v10436_v55 }
 0x63f   : > { %10438 = vmatprep.subr.bf16.mxu0 %v17419_v37 }
 0x641   : > { %9513 = vmatmul.mubr.msk.f32.gmra.mrb[32].mxu0 %vm17485_vm6, %v12911_v31 }
 0x642   : > { %9514 = vmatprep.mubr.msk.f32.mxu0 %vm17485_vm6, %v12920_v35  ;;  %10440 = vmatpush1.bf16.msra.mxu0 %v10439_v17 }
 0x643   : > { %10441 = vmatprep.subr.bf16.mxu0 %v17419_v37 }
 0x645   : > { %9515 = vmatmul.mubr.msk.f32.gmra.mrb[34].mxu0 %vm17485_vm6, %v12920_v35 }
 0x646   : > { %9516 = vmatprep.mubr.msk.f32.mxu0 %vm17485_vm6, %v12918_v34  ;;  %10443 = vmatpush1.bf16.msra.mxu0 %v10442_v16 }
 0x647   : > { %10444 = vmatprep.subr.bf16.mxu0 %v17419_v37 }
 0x649   : > { %9517 = vmatmul.mubr.msk.f32.gmra.mrb[36].mxu0 %vm17485_vm6, %v12918_v34 }
 0x64a   : > { %9518 = vmatprep.mubr.msk.f32.mxu0 %vm17485_vm6, %v12928_v39 }
 0x64d   : > { %9519 = vmatmul.mubr.msk.f32.gmra.mrb[38].mxu0 %vm17485_vm6, %v12928_v39 }
 0x64e   : > { %9520 = vmatprep.mubr.msk.f32.mxu0 %vm17485_vm6, %v12926_v38 }
 0x651   : > { %9521 = vmatmul.mubr.msk.f32.gmra.mrb[40].mxu0 %vm17485_vm6, %v12926_v38 }
 0x652   : > { %9522 = vmatprep.mubr.msk.f32.mxu0 %vm17485_vm6, %v12935_v42 }
 0x655   : > { %9523 = vmatmul.mubr.msk.f32.gmra.mrb[42].mxu0 %vm17485_vm6, %v12935_v42 }
 0x656   : > { %9524 = vmatprep.mubr.msk.f32.mxu0 %vm17485_vm6, %v12933_v41 }
 0x659   : > { %9525 = vmatmul.mubr.msk.f32.gmra.mrb[44].mxu0 %vm17485_vm6, %v12933_v41 }
 0x65a   : > { %9526 = vmatprep.mubr.msk.f32.mxu0 %vm17485_vm6, %v12943_v45 }
 0x65d   : > { %9527 = vmatmul.mubr.msk.f32.gmra.mrb[46].mxu0 %vm17485_vm6, %v12943_v45 }
 0x65e   : > { %9528 = vmatprep.mubr.msk.f32.mxu0 %vm17485_vm6, %v12941_v44 }
 0x661   : > { %9529 = vmatmul.mubr.msk.f32.gmra.mrb[48].mxu0 %vm17485_vm6, %v12941_v44 }
 0x662   : > { %9530 = vmatprep.mubr.msk.f32.mxu0 %vm17485_vm6, %v12951_v48 }
 0x665   : > { %9531 = vmatmul.mubr.msk.f32.gmra.mrb[50].mxu0 %vm17485_vm6, %v12951_v48 }
 0x666   : > { %9532 = vmatprep.mubr.msk.f32.mxu0 %vm17485_vm6, %v12949_v47 }
 0x669   : > { %9533 = vmatmul.mubr.msk.f32.gmra.mrb[52].mxu0 %vm17485_vm6, %v12949_v47 }
 0x66a   : > { %9534 = vmatprep.mubr.msk.f32.mxu0 %vm17485_vm6, %v12959_v51 }
 0x66d   : > { %9535 = vmatmul.mubr.msk.f32.gmra.mrb[54].mxu0 %vm17485_vm6, %v12959_v51 }
 0x66e   : > { %9536 = vmatprep.mubr.msk.f32.mxu0 %vm17485_vm6, %v12957_v50 }
 0x671   : > { %9537 = vmatmul.mubr.msk.f32.gmra.mrb[56].mxu0 %vm17485_vm6, %v12957_v50 }
 0x672   : > { %9538 = vmatprep.mubr.msk.f32.mxu0 %vm17485_vm6, %v12967_v54 }
 0x675   : > { %9539 = vmatmul.mubr.msk.f32.gmra.mrb[58].mxu0 %vm17485_vm6, %v12967_v54 }
 0x676   : > { %9540 = vmatprep.mubr.msk.f32.mxu0 %vm17485_vm6, %v12965_v53 }
 0x679   : > { %9541 = vmatmul.mubr.msk.f32.gmra.mrb[60].mxu0 %vm17485_vm6, %v12965_v53 }
 0x67a   : > { %9542 = vmatprep.mubr.msk.f32.mxu0 %vm17485_vm6, %v12975_v57 }
 0x67d   : > { %9543 = vmatmul.mubr.msk.f32.gmra.mrb[62].mxu0 %vm17485_vm6, %v12975_v57 }
 0x67e   : > { %9544 = vmatprep.mubr.msk.f32.mxu0 %vm17485_vm6, %v12973_v56 }
 0x681   : > { %9545 = vmatmul.mubr.msk.f32.gmra.mrb[64].mxu0 %vm17485_vm6, %v12973_v56 }
 0x682   : > { %9546 = vmatprep.mubr.msk.f32.mxu0 %vm17485_vm6, %v12986_v60 }
 0x685   : > { %9547 = vmatmul.mubr.msk.f32.gmra.mrb[66].mxu0 %vm17485_vm6, %v12986_v60 }
 0x686   : > { %9548 = vmatprep.mubr.msk.f32.mxu0 %vm17485_vm6, %v12984_v59 }
 0x689   : > { %9549 = vmatmul.mubr.msk.f32.gmra.mrb[68].mxu0 %vm17485_vm6, %v12984_v59 }
 0x68a   : > { %9550 = vmatprep.mubr.msk.f32.mxu0 %vm17485_vm6, %v12997_v63 }
 0x68d   : > { %9551 = vmatmul.mubr.msk.f32.gmra.mrb[70].mxu0 %vm17485_vm6, %v12997_v63 }
 0x68e   : > { %9552 = vmatprep.mubr.msk.f32.mxu0 %vm17485_vm6, %v12995_v62 }
 0x691   : > { %9553 = vmatmul.mubr.msk.f32.gmra.mrb[72].mxu0 %vm17485_vm6, %v12995_v62 }
 0x6e8   : > { %v2006_v19 = vpop.f32.mrb[10].mxu0 }
 0x6e9   : > { %v13251_v20 = vmul.f32 0.5, %v2006_v19  ;;  %v2008_v22 = vpop.f32.mrb[11].mxu0 }
 0x6ea   : > { %v13253_v23 = vmul.f32 0.5, %v2008_v22 }
 0x6ec   : > { %v2012_v25 = vpop.f32.mrb[12].mxu0  ;;  %v2261_v26 = vmax.f32 %v13251_v20, %v13253_v23 }
 0x6ed   : > { %v13257_v28 = vmul.f32 0.5, %v2012_v25  ;;  %v2014_v29 = vpop.f32.mrb[13].mxu0 }
 0x6ee   : > { %v13259_v31 = vmul.f32 0.5, %v2014_v29  ;;  %2262 = vmax.xlane.f32.xlu1 %v2261_v26 }
 0x6f0   : > { %v2018_v32 = vpop.f32.mrb[14].mxu0  ;;  %v2264_v34 = vmax.f32 %v13257_v28, %v13259_v31 }
 0x6f1   : > { %v13263_v35 = vmul.f32 0.5, %v2018_v32  ;;  %v2020_v38 = vpop.f32.mrb[15].mxu0 }
 0x6f2   : > { %v13265_v39 = vmul.f32 0.5, %v2020_v38  ;;  %2265 = vmax.xlane.f32.xlu0 %v2264_v34 }
 0x6f4   : > { %v2024_v41 = vpop.f32.mrb[16].mxu0  ;;  %v2267_v42 = vmax.f32 %v13263_v35, %v13265_v39 }
 0x6f5   : > { %v13269_v44 = vmul.f32 0.5, %v2024_v41  ;;  %v2026_v45 = vpop.f32.mrb[17].mxu0 }
 0x6f6   : > { %v13271_v47 = vmul.f32 0.5, %v2026_v45  ;;  %2268 = vmax.xlane.f32.xlu1 %v2267_v42 }
 0x6f8   : > { %v2030_v48 = vpop.f32.mrb[18].mxu0  ;;  %v2270_v50 = vmax.f32 %v13269_v44, %v13271_v47 }
 0x6f9   : > { %v13275_v51 = vmul.f32 0.5, %v2030_v48  ;;  %v2032_v53 = vpop.f32.mrb[19].mxu0 }
 0x6fa   : > { %v13277_v54 = vmul.f32 0.5, %v2032_v53  ;;  %2271 = vmax.xlane.f32.xlu0 %v2270_v50 }
 0x6fc   : > { %v2036_v56 = vpop.f32.mrb[20].mxu0  ;;  %v2273_v57 = vmax.f32 %v13275_v51, %v13277_v54 }
 0x6fd   : > { %v13281_v59 = vmul.f32 0.5, %v2036_v56  ;;  %v2038_v60 = vpop.f32.mrb[21].mxu0 }
 0x6fe   : > { %v13283_v62 = vmul.f32 0.5, %v2038_v60  ;;  %2274 = vmax.xlane.f32.xlu0 %v2273_v57 }
 0x700   : > { %v2276_v63 = vmax.f32 %v13281_v59, %v13283_v62  ;;  %v2042_v52 = vpop.f32.mrb[22].mxu0 }
 0x701   : > { %v13287_v6 = vmul.f32 0.5, %v2042_v52  ;;  %v2044_v3 = vpop.f32.mrb[23].mxu0 }
 0x702   : > { %v13289_v15 = vmul.f32 0.5, %v2044_v3  ;;  %2277 = vmax.xlane.f32.xlu1 %v2276_v63 }
 0x704   : > { %v2048_v24 = vpop.f32.mrb[24].mxu0  ;;  %v2279_v8 = vmax.f32 %v13287_v6, %v13289_v15 }
 0x705   : > { %v2050_v7 = vpop.f32.mrb[25].mxu0  ;;  %v13313_v45 = vmul.f32 0.5, %v2048_v24 }
 0x706   : > { %2280 = vmax.xlane.f32.xlu0 %v2279_v8  ;;  %v13315_v48 = vmul.f32 0.5, %v2050_v7 }
 0x708   : > { %v2054_v18 = vpop.f32.mrb[26].mxu0  ;;  %v2282_v56 = vmax.f32 %v13313_v45, %v13315_v48 }
 0x709   : > { %v13293_v46 = vmul.f32 0.5, %v2054_v18  ;;  %v2056_v21 = vpop.f32.mrb[27].mxu0 }
 0x70a   : > { %v13295_v4 = vmul.f32 0.5, %v2056_v21 }
 0x70c   : > { %v2060_v11 = vpop.f32.mrb[28].mxu0  ;;  %v2285_v9 = vmax.f32 %v13293_v46, %v13295_v4 }
 0x70d   : > { %v2062_v27 = vpop.f32.mrb[29].mxu0  ;;  %v13321_v57 = vmul.f32 0.5, %v2060_v11 }
 0x70e   : > { %2286 = vmax.xlane.f32.xlu0 %v2285_v9  ;;  %v13323_v60 = vmul.f32 0.5, %v2062_v27 }
 0x710   : > { %v2066_v12 = vpop.f32.mrb[30].mxu0  ;;  %v2288_v3 = vmax.f32 %v13321_v57, %v13323_v60 }
 0x711   : > { %v13299_v40 = vmul.f32 0.5, %v2066_v12  ;;  %v2068_v43 = vpop.f32.mrb[31].mxu0 }
 0x712   : > { %v13301_v36 = vmul.f32 0.5, %v2068_v43 }
 0x713   : > { %11536 = vrot.lane.b32.xlu1 %v12979_v58, %s17475_s12 }
 0x714   : > { %v2291_v10 = vmax.f32 %v13299_v40, %v13301_v36  ;;  %v2072_v49 = vpop.f32.mrb[32].mxu0 }
 0x715   : > { %v2074_v55 = vpop.f32.mrb[33].mxu0  ;;  %v13327_v24 = vmul.f32 0.5, %v2072_v49 }
 0x716   : > { %2292 = vmax.xlane.f32.xlu0 %v2291_v10  ;;  %v13329_v8 = vmul.f32 0.5, %v2074_v55 }
 0x718   : > { %v2078_v5 = vpop.f32.mrb[34].mxu0  ;;  %v2294_v18 = vmax.f32 %v13327_v24, %v13329_v8 }
 0x719   : > { %v13307_v17 = vmul.f32 0.5, %v2078_v5  ;;  %v2080_v2 = vpop.f32.mrb[35].mxu0 }
 0x71a   : > { %v13309_v33 = vmul.f32 0.5, %v2080_v2 }
 0x71c   : > { %v2297_v16 = vmax.f32 %v13307_v17, %v13309_v33  ;;  %v2084_v19 = vpop.f32.mrb[36].mxu0 }
 0x71d   : > { %v2086_v22 = vpop.f32.mrb[37].mxu0  ;;  %v13333_v21 = vmul.f32 0.5, %v2084_v19 }
 0x71e   : > { %2298 = vmax.xlane.f32.xlu0 %v2297_v16  ;;  %v13335_v11 = vmul.f32 0.5, %v2086_v22 }
 0x720   : > { %v2090_v25 = vpop.f32.mrb[38].mxu0  ;;  %v2300_v12 = vmax.f32 %v13333_v21, %v13335_v11 }
 0x721   : > { %v2092_v58 = vpop.f32.mrb[39].mxu0 }
 0x724   : > { %v2096_v26 = vpop.f32.mrb[40].mxu0 }
 0x725   : > { %v2098_v29 = vpop.f32.mrb[41].mxu0  ;;  %v13351_v0 = vmul.f32 0.5, %v2096_v26 }
 0x727   : > { %17566 = vst [vmem:[#allocation10_spill] sm:$0xff] %v13351_v0 }
 0x728   : > { %v2102_v32 = vpop.f32.mrb[42].mxu0 }
 0x729   : > { %v2104_v34 = vpop.f32.mrb[43].mxu0  ;;  %v13357_v14 = vmul.f32 0.5, %v2102_v32 }
 0x72c   : > { %v2108_v38 = vpop.f32.mrb[44].mxu0 }
 0x72d   : > { %v2110_v41 = vpop.f32.mrb[45].mxu0 }
 0x730   : > { %v2114_v42 = vpop.f32.mrb[46].mxu0 }
 0x731   : > { %v2116_v50 = vpop.f32.mrb[47].mxu0  ;;  %v13339_v43 = vmul.f32 0.5, %v2114_v42 }
 0x732   : > { %v13341_v10 = vmul.f32 0.5, %v2116_v50 }
 0x734   : > { %11541 = vrot.lane.b32.xlu0 %v12990_v61, %s17475_s12  ;;  %v2120_v53 = vpop.f32.mrb[48].mxu0  ;;  %17565 = vst [vmem:[#allocation9_spill] sm:$0xff] %v13341_v10  ;;  %v2315_v5 = vmax.f32 %v13339_v43, %v13341_v10 }
 0x735   : > { %v2122_v63 = vpop.f32.mrb[49].mxu0 }
 0x737   : > { %2283 = vmax.xlane.f32.xlu1 %v2282_v56  ;;  %v13345_v56 = vmul.f32 0.5, %v2090_v25  ;;  %v13359_v25 = vmul.f32 0.5, %v2104_v34 }
 0x738   : > { %v2126_v52 = vpop.f32.mrb[50].mxu0 }
 0x739   : > { %v2128_v7 = vpop.f32.mrb[51].mxu0  ;;  %17568 = vst [vmem:[#allocation12_spill] sm:$0xff] %v13359_v25  ;;  %v2309_v26 = vmax.f32 %v13357_v14, %v13359_v25 }
 0x73b   : > { %2289 = vmax.xlane.f32.xlu1 %v2288_v3  ;;  %v13347_v3 = vmul.f32 0.5, %v2092_v58 }
 0x73c   : > { %v2132_v61 = vpop.f32.mrb[52].mxu0 }
 0x73d   : > { %v2134_v9 = vpop.f32.mrb[53].mxu0  ;;  %v2303_v50 = vmax.f32 %v13345_v56, %v13347_v3 }
 0x73f   : > { %2295 = vmax.xlane.f32.xlu1 %v2294_v18 }
 0x740   : > { %v2138_v27 = vpop.f32.mrb[54].mxu0 }
 0x741   : > { %v2140_v49 = vpop.f32.mrb[55].mxu0 }
 0x743   : > { %2301 = vmax.xlane.f32.xlu1 %v2300_v12  ;;  %v13353_v12 = vmul.f32 0.5, %v2098_v29  ;;  %v13367_v29 = vmul.f32 0.5, %v2108_v38 }
 0x744   : > { %v2144_v55 = vpop.f32.mrb[56].mxu0 }
 0x745   : > { %v2146_v2 = vpop.f32.mrb[57].mxu0  ;;  %17567 = vst [vmem:[#allocation11_spill] sm:$0xff] %v13353_v12  ;;  %17569 = vst [vmem:[#allocation13_spill] sm:$0xff] %v13367_v29 }
 0x747   : > { %2316 = vmax.xlane.f32.xlu1 %v2315_v5  ;;  %v2306_v5 = vmax.f32 %v13351_v0, %v13353_v12  ;;  %v13377_v12 = vmul.f32 0.5, %v2122_v63  ;;  %v13393_v63 = vmul.f32 0.5, %v2132_v61 }
 0x748   : > { %v2150_v16 = vpop.f32.mrb[58].mxu0 }
 0x749   : > { %v2152_v19 = vpop.f32.mrb[59].mxu0  ;;  %17572 = vst [vmem:[#allocation16_spill] sm:$0xff] %v13377_v12 }
 0x74c   : > { %v2156_v22 = vpop.f32.mrb[60].mxu0 }
 0x74d   : > { %v2158_v18 = vpop.f32.mrb[61].mxu0 }
 0x750   : > { %v2162_v42 = vpop.f32.mrb[62].mxu0 }
 0x751   : > { %v2164_v37 = vpop.f32.mrb[63].mxu0 }
 0x753   : > { %2304 = vmax.xlane.f32.xlu0 %v2303_v50  ;;  %v13369_v50 = vmul.f32 0.5, %v2110_v41  ;;  %v13385_v41 = vmul.f32 0.5, %v2126_v52  ;;  %v13399_v52 = vmul.f32 0.5, %v2138_v27 }
 0x754   : > { %v2168_v30 = vpop.f32.mrb[64].mxu0 }
 0x755   : > { %v2170_v58 = vpop.f32.mrb[65].mxu0  ;;  %17570 = vst [vmem:[#allocation14_spill] sm:$0xff] %v13369_v50  ;;  %v2312_v34 = vmax.f32 %v13367_v29, %v13369_v50  ;;  %v13395_v29 = vmul.f32 0.5, %v2134_v9 }
 0x757   : > { %2307 = vmax.xlane.f32.xlu0 %v2306_v5  ;;  %v13375_v5 = vmul.f32 0.5, %v2120_v53 }
 0x758   : > { %11546 = vrot.lane.b32.xlu1 %v13001_v1, %s17475_s12  ;;  %v13363_v13 = vpop.f32.mrb[66].mxu0  ;;  %s17492_s12 = smov 48  }
 0x759   : > { %v2176_v10 = vpop.f32.mrb[67].mxu0  ;;  %17571 = vst [vmem:[#allocation15_spill] sm:$0xff] %v13375_v5  ;;  %v2318_v38 = vmax.f32 %v13375_v5, %v13377_v12  ;;  %v2324_v12 = vmax.f32 %v13393_v63, %v13395_v29  ;;  %v13405_v5 = vmul.f32 0.5, %v2144_v55 }
 0x75b   : > { %2310 = vmax.xlane.f32.xlu0 %v2309_v26  ;;  %v13387_v26 = vmul.f32 0.5, %v2128_v7  ;;  %v13401_v7 = vmul.f32 0.5, %v2140_v49  ;;  %v13417_v49 = vmul.f32 0.5, %v2150_v16 }
 0x75c   : > { %v13371_v32 = vpop.f32.mrb[68].mxu0 }
 0x75d   : > { %v13379_v1 = vpop.f32.mrb[69].mxu0  ;;  %17573 = vst [vmem:[#allocation17_spill] sm:$0xff] %v13387_v26  ;;  %v2321_v53 = vmax.f32 %v13385_v41, %v13387_v26  ;;  %v13407_v26 = vmul.f32 0.5, %v2146_v2  ;;  %v13423_v2 = vmul.f32 0.5, %v2156_v22 }
 0x75f   : > { %2313 = vmax.xlane.f32.xlu0 %v2312_v34  ;;  %v2330_v61 = vmax.f32 %v13405_v5, %v13407_v26  ;;  %17577 = vst [vmem:[#allocation21_spill] sm:$0xff] %v13423_v2 }
 0x760   : > { %v13381_v0 = vpop.f32.mrb[70].mxu0 }
 0x761   : > { %v13389_v25 = vpop.f32.mrb[71].mxu0 }
 0x763   : > { %2319 = vmax.xlane.f32.xlu0 %v2318_v38  ;;  %v2327_v38 = vmax.f32 %v13399_v52, %v13401_v7 }
 0x764   : > { %v2192_v50 = vpop.f32.mrb[72].mxu0 }
 0x765   : > { %v2194_v34 = vpop.f32.mrb[73].mxu0  ;;  %v13411_v9 = vmul.f32 0.5, %v2192_v50 }
 0x767   : > { %2322 = vmax.xlane.f32.xlu0 %v2321_v53  ;;  %17574 = vst [vmem:[#allocation18_spill] sm:$0xff] %v13411_v9  ;;  %v13413_v53 = vmul.f32 0.5, %v2194_v34  ;;  %v13427_v34 = vmul.f32 0.5, %v2162_v42  ;;  %v13440_v42 = vmul.f32 0.5, %v2170_v58 }
 0x769   : > { %17575 = vst [vmem:[#allocation19_spill] sm:$0xff] %v13413_v53  ;;  %v2354_v27 = vmax.f32 %v13411_v9, %v13413_v53 }
 0x76b   : > { %2325 = vmax.xlane.f32.xlu0 %v2324_v12  ;;  %v13419_v12 = vmul.f32 0.5, %v2152_v19 }
 0x76d   : > { %17576 = vst [vmem:[#allocation20_spill] sm:$0xff] %v13419_v12  ;;  %v2333_v55 = vmax.f32 %v13417_v49, %v13419_v12 }
 0x76f   : > { %2328 = vmax.xlane.f32.xlu0 %v2327_v38  ;;  %v13425_v38 = vmul.f32 0.5, %v2158_v18  ;;  %v13438_v18 = vmul.f32 0.5, %v2168_v30 }
 0x771   : > { %17578 = vst [vmem:[#allocation22_spill] sm:$0xff] %v13425_v38  ;;  %v2336_v16 = vmax.f32 %v13423_v2, %v13425_v38  ;;  %v2342_v30 = vmax.f32 %v13438_v18, %v13440_v42 }
 0x773   : > { %2331 = vmax.xlane.f32.xlu0 %v2330_v61  ;;  %v13429_v61 = vmul.f32 0.5, %v2164_v37 }
 0x775   : > { %v2339_v22 = vmax.f32 %v13427_v34, %v13429_v61 }
 0x777   : > { %2355 = vmax.xlane.f32.xlu0 %v2354_v27 }
 0x77b   : > { %v2263_v50 = vpop.xlane.xlu1 %2262 }
 0x77c   : > { %2334 = vmax.xlane.f32.xlu1 %v2333_v55  ;;  %v2357_v19 = vsub.f32 %v13251_v20, %v2263_v50  ;;  %v2358_v37 = vsub.f32 %v13253_v23, %v2263_v50 }
 0x77e   : > { %v2421_v38 = vmul.f32 1.442695, %v2357_v19  ;;  %v2423_v23 = vmul.f32 1.442695, %v2358_v37  ;;  %v13469_v19 = vmul.f32 0.5, %v13381_v0 }
 0x77f   : > { %v2266_v53 = vpop.xlane.xlu0 %2265 }
 0x780   : > { %v2359_v27 = vsub.f32 %v13257_v28, %v2266_v53  ;;  %v2360_v9 = vsub.f32 %v13259_v31, %v2266_v53  ;;  %2337 = vmax.xlane.f32.xlu1 %v2336_v16  ;;  %v13446_v31 = vmul.f32 0.5, %v13363_v13  ;;  %v13448_v53 = vmul.f32 0.5, %v2176_v10 }
 0x781   : > { %v13455_v13 = vmul.f32 0.5, %v13371_v32  ;;  %v13458_v10 = vmul.f32 0.5, %v13379_v1 }
 0x782   : > { %v2425_v55 = vmul.f32 1.442695, %v2359_v27  ;;  %v2427_v12 = vmul.f32 1.442695, %v2360_v9  ;;  %v13472_v27 = vmul.f32 0.5, %v13389_v25 }
 0x783   : > { %v2269_v2 = vpop.xlane.xlu1 %2268  ;;  %v2348_v32 = vmax.f32 %v13455_v13, %v13458_v10 }
 0x784   : > { %11710 = vpow2.f32 %v2425_v55  ;;  %v2361_v20 = vsub.f32 %v13263_v35, %v2269_v2  ;;  %v2362_v28 = vsub.f32 %v13265_v39, %v2269_v2  ;;  %2340 = vmax.xlane.f32.xlu1 %v2339_v22  ;;  %v2351_v25 = vmax.f32 %v13469_v19, %v13472_v27 }
 0x785   : > { %11712 = vpow2.f32 %v2427_v12  ;;  %v2345_v12 = vmax.f32 %v13446_v31, %v13448_v53 }
 0x786   : > { %v2429_v58 = vmul.f32 1.442695, %v2361_v20  ;;  %v2431_v9 = vmul.f32 1.442695, %v2362_v28  ;;  %11714 = vpow2.f32 %v2421_v38 }
 0x787   : > { %v2272_v50 = vpop.xlane.xlu0 %2271 }
 0x788   : > { %11716 = vpow2.f32 %v2429_v58  ;;  %v2363_v35 = vsub.f32 %v13269_v44, %v2272_v50  ;;  %v2364_v39 = vsub.f32 %v13271_v47, %v2272_v50  ;;  %2343 = vmax.xlane.f32.xlu1 %v2342_v30 }
 0x789   : > { %11718 = vpow2.f32 %v2431_v9 }
 0x78a   : > { %11720 = vpow2.f32 %v2423_v23  ;;  %v2433_v2 = vmul.f32 1.442695, %v2363_v35  ;;  %v2435_v38 = vmul.f32 1.442695, %v2364_v39 }
 0x78b   : > { %v2275_v16 = vpop.xlane.xlu0 %2274 }
 0x78c   : > { %11722 = vpow2.f32 %v2433_v2  ;;  %v2365_v44 = vsub.f32 %v13275_v51, %v2275_v16  ;;  %v2366_v47 = vsub.f32 %v13277_v54, %v2275_v16  ;;  %2346 = vmax.xlane.f32.xlu1 %v2345_v12 }
 0x78d   : > { %11724 = vpow2.f32 %v2435_v38 }
 0x78e   : > { %v13466_v1 = vpop.eup %11710  ;;  %v2437_v22 = vmul.f32 1.442695, %v2365_v44  ;;  %v2439_v37 = vmul.f32 1.442695, %v2366_v47 }
 0x78f   : > { %v13474_v55 = vpop.eup %11712  ;;  %v2278_v51 = vpop.xlane.xlu1 %2277 }
 0x790   : > { %11726 = vpow2.f32 %v2437_v22  ;;  %v2367_v54 = vsub.f32 %v13281_v59, %v2278_v51  ;;  %v2368_v20 = vsub.f32 %v13283_v62, %v2278_v51  ;;  %2349 = vmax.xlane.f32.xlu1 %v2348_v32  ;;  %v2552_v28 = vadd.f32 %v13474_v55, %v13466_v1  ;;  %v13480_v30 = vpop.eup %11714 }
 0x791   : > { %11728 = vpow2.f32 %v2439_v37 }
 0x792   : > { %v13482_v0 = vpop.eup %11716  ;;  %v2441_v23 = vmul.f32 1.442695, %v2367_v54  ;;  %v2443_v58 = vmul.f32 1.442695, %v2368_v20  ;;  %2553 = vadd.xlane.f32.xlu0 %v2552_v28 }
 0x793   : > { %v13486_v9 = vpop.eup %11718  ;;  %v11537_v59 = vpop.permute.xlu1 %11536 }
 0x794   : > { %v2281_v50 = vpop.xlane.xlu0 %2280  ;;  %v13488_v62 = vpop.eup %11720  ;;  %11730 = vpow2.f32 %v2441_v23  ;;  %v11539_v35 = vunpack.i.h.bf16 %v11537_v59  ;;  %v11538_v39 = vunpack.i.l.bf16 %v11537_v59  ;;  %2352 = vmax.xlane.f32.xlu1 %v2351_v25  ;;  %v2555_v38 = vadd.f32 %v13486_v9, %v13482_v0 }
 0x795   : > { %v2369_v12 = vsub.f32 %v13287_v6, %v2281_v50  ;;  %11732 = vpow2.f32 %v2443_v58  ;;  %v2370_v2 = vsub.f32 %v13289_v15, %v2281_v50  ;;  %v2549_v37 = vadd.f32 %v13488_v62, %v13480_v30 }
 0x796   : > { %v13494_v16 = vpop.eup %11722  ;;  %v10445_v44 = vpack.c.bf16 %v11539_v35, %v11538_v39  ;;  %2556 = vadd.xlane.f32.xlu0 %v2555_v38  ;;  %v17579_v15 = vmov 0.0|0.0  }
 0x797   : > { %v2445_v47 = vmul.f32 1.442695, %v2369_v12  ;;  %v13496_v32 = vpop.eup %11724  ;;  %v2447_v22 = vmul.f32 1.442695, %v2370_v2 }
 0x798   : > { %10446 = vmatpush1.bf16.msra.mxu0 %v10445_v44  ;;  %11314 = vmatpush1.bf16.msra.mxu1 %v10445_v44  ;;  %v2558_v6 = vadd.f32 %v13496_v32, %v13494_v16 }
 0x799   : > { %11734 = vpow2.f32 %v2445_v47  ;;  %2550 = vadd.xlane.f32.xlu1 %v2549_v37  ;;  %10447 = vmatprep.subr.bf16.mxu0 %v17579_v15 }
 0x79a   : > { %11736 = vpow2.f32 %v2447_v22  ;;  %v13503_v51 = vpop.eup %11726  ;;  %11299 = vmatprep.subr.bf16.mxu1 %v17579_v15  ;;  %2559 = vadd.xlane.f32.xlu0 %v2558_v6 }
 0x79b   : > { %v13506_v54 = vpop.eup %11728  ;;  %v2287_v50 = vpop.xlane.xlu0 %2286 }
 0x79c   : > { %v2561_v20 = vadd.f32 %v13506_v54, %v13503_v51  ;;  %v2373_v22 = vsub.f32 %v13293_v46, %v2287_v50  ;;  %v2374_v37 = vsub.f32 %v13295_v4, %v2287_v50 }
 0x79e   : > { %v13510_v28 = vpop.eup %11730  ;;  %2562 = vadd.xlane.f32.xlu0 %v2561_v20 }
 0x79f   : > { %v13512_v25 = vpop.eup %11732 }
 0x7a0   : > { %v2564_v23 = vadd.f32 %v13512_v25, %v13510_v28 }
 0x7a2   : > { %2565 = vadd.xlane.f32.xlu0 %v2564_v23 }
 0x7a3   : > { %v13516_v58 = vpop.eup %11734  ;;  %v2293_v39 = vpop.xlane.xlu0 %2292 }
 0x7a4   : > { %17580 = vst [vmem:[#allocation23_spill] sm:$0xff] %v13516_v58  ;;  %v13518_v59 = vpop.eup %11736  ;;  %v2377_v46 = vsub.f32 %v13299_v40, %v2293_v39 }
 0x7a5   : > { %17581 = vst [vmem:[#allocation24_spill] sm:$0xff] %v13518_v59  ;;  %v2567_v35 = vadd.f32 %v13518_v59, %v13516_v58 }
 0x7a7   : > { %2568 = vadd.xlane.f32.xlu0 %v2567_v35  ;;  %v2453_v35 = vmul.f32 1.442695, %v2373_v22  ;;  %v2461_v22 = vmul.f32 1.442695, %v2377_v46 }
 0x7ab   : > { %v2299_v12 = vpop.xlane.xlu0 %2298 }
 0x7ac   : > { %v2381_v40 = vsub.f32 %v13307_v17, %v2299_v12 }
 0x7af   : > { %v11542_v2 = vpop.permute.xlu0 %11541 }
 0x7b0   : > { %v11544_v38 = vunpack.i.h.bf16 %v11542_v2  ;;  %v11543_v44 = vunpack.i.l.bf16 %v11542_v2  ;;  %v2455_v2 = vmul.f32 1.442695, %v2374_v37 }
 0x7b2   : > { %v10448_v47 = vpack.c.bf16 %v11544_v38, %v11543_v44 }
 0x7b4   : > { %10449 = vmatpush1.bf16.msra.mxu0 %v10448_v47  ;;  %11315 = vmatpush1.bf16.msra.mxu1 %v10448_v47 }
 0x7b5   : > { %10450 = vmatprep.subr.bf16.mxu0 %v17579_v15  ;;  %11300 = vmatprep.subr.bf16.mxu1 %v17579_v15 }
 0x7c4   : > { %v2284_v6 = vpop.xlane.xlu1 %2283 }
 0x7c5   : > { %v2371_v20 = vsub.f32 %v13313_v45, %v2284_v6  ;;  %v2372_v23 = vsub.f32 %v13315_v48, %v2284_v6  ;;  %v2378_v45 = vsub.f32 %v13301_v36, %v2293_v39  ;;  %v2382_v36 = vsub.f32 %v13309_v33, %v2299_v12 }
 0x7c7   : > { %v2449_v58 = vmul.f32 1.442695, %v2371_v20  ;;  %v2451_v59 = vmul.f32 1.442695, %v2372_v23  ;;  %v2463_v6 = vmul.f32 1.442695, %v2378_v45 }
 0x7c8   : > { %v2290_v38 = vpop.xlane.xlu1 %2289  ;;  %v2471_v17 = vmul.f32 1.442695, %v2382_v36 }
 0x7c9   : > { %11738 = vpow2.f32 %v2449_v58  ;;  %v2375_v44 = vsub.f32 %v13321_v57, %v2290_v38  ;;  %v2376_v47 = vsub.f32 %v13323_v60, %v2290_v38 }
 0x7ca   : > { %11740 = vpow2.f32 %v2451_v59 }
 0x7cb   : > { %11742 = vpow2.f32 %v2453_v35  ;;  %v2457_v4 = vmul.f32 1.442695, %v2375_v44  ;;  %v2459_v50 = vmul.f32 1.442695, %v2376_v47 }
 0x7cc   : > { %11744 = vpow2.f32 %v2455_v2  ;;  %v2296_v48 = vpop.xlane.xlu1 %2295  ;;  %v2469_v2 = vmul.f32 1.442695, %v2381_v40 }
 0x7cd   : > { %11746 = vpow2.f32 %v2457_v4  ;;  %v2379_v37 = vsub.f32 %v13327_v24, %v2296_v48  ;;  %v2380_v57 = vsub.f32 %v13329_v8, %v2296_v48 }
 0x7ce   : > { %11748 = vpow2.f32 %v2459_v50 }
 0x7cf   : > { %11750 = vpow2.f32 %v2461_v22  ;;  %v2465_v59 = vmul.f32 1.442695, %v2379_v37  ;;  %v2467_v39 = vmul.f32 1.442695, %v2380_v57 }
 0x7d0   : > { %v2302_v58 = vpop.xlane.xlu1 %2301  ;;  %11752 = vpow2.f32 %v2463_v6 }
 0x7d1   : > { %11754 = vpow2.f32 %v2465_v59  ;;  %v2383_v38 = vsub.f32 %v13333_v21, %v2302_v58  ;;  %v2384_v44 = vsub.f32 %v13335_v11, %v2302_v58 }
 0x7d2   : > { %11756 = vpow2.f32 %v2467_v39 }
 0x7d3   : > { %v13534_v60 = vpop.eup %11738  ;;  %11758 = vpow2.f32 %v2469_v2  ;;  %v2473_v50 = vmul.f32 1.442695, %v2383_v38  ;;  %v2475_v21 = vmul.f32 1.442695, %v2384_v44  ;;  %v17582_v44 = vld [vmem:[#allocation10_spill] sm:$0xff] }
 0x7d4   : > { %v13537_v20 = vpop.eup %11740  ;;  %v2317_v23 = vpop.xlane.xlu1 %2316  ;;  %11760 = vpow2.f32 %v2471_v17 }
 0x7d5   : > { %v13540_v35 = vpop.eup %11742  ;;  %v2570_v24 = vadd.f32 %v13537_v20, %v13534_v60  ;;  %11762 = vpow2.f32 %v2473_v50  ;;  %v2393_v2 = vsub.f32 %v13339_v43, %v2317_v23 }
 0x7d6   : > { %v13544_v8 = vpop.eup %11744  ;;  %11764 = vpow2.f32 %v2475_v21 }
 0x7d7   : > { %2571 = vadd.xlane.f32.xlu0 %v2570_v24  ;;  %v13548_v33 = vpop.eup %11746  ;;  %v2573_v4 = vadd.f32 %v13544_v8, %v13540_v35  ;;  %v2493_v43 = vmul.f32 1.442695, %v2393_v2 }
 0x7d8   : > { %v11547_v47 = vpop.permute.xlu1 %11546  ;;  %v13552_v45 = vpop.eup %11748 }
 0x7d9   : > { %v11549_v12 = vunpack.i.h.bf16 %v11547_v47  ;;  %v11548_v46 = vunpack.i.l.bf16 %v11547_v47  ;;  %v13554_v22 = vpop.eup %11750  ;;  %v2576_v11 = vadd.f32 %v13552_v45, %v13548_v33 }
 0x7da   : > { %v13558_v37 = vpop.eup %11752 }
 0x7db   : > { %v10451_v48 = vpack.c.bf16 %v11549_v12, %v11548_v46  ;;  %2574 = vadd.xlane.f32.xlu0 %v2573_v4  ;;  %v13560_v57 = vpop.eup %11754  ;;  %v2579_v59 = vadd.f32 %v13558_v37, %v13554_v22  ;;  %v17583_v12 = vld [vmem:[#allocation11_spill] sm:$0xff]  ;;  %v17584_v4 = vld [vmem:[#allocation9_spill] sm:$0xff] }
 0x7dc   : > { %v13566_v36 = vpop.eup %11756  ;;  %v2394_v50 = vsub.f32 %v17584_v4, %v2317_v23 }
 0x7dd   : > { %10452 = vmatpush1.bf16.msra.mxu0 %v10451_v48  ;;  %11316 = vmatpush1.bf16.msra.mxu1 %v10451_v48  ;;  %v13569_v17 = vpop.eup %11758 }
 0x7de   : > { %v13575_v46 = vpop.eup %11760 }
 0x7df   : > { %2577 = vadd.xlane.f32.xlu0 %v2576_v11 }
 0x7e0   : > { %v2305_v6 = vpop.xlane.xlu0 %2304 }
 0x7e1   : > { %v2385_v58 = vsub.f32 %v13345_v56, %v2305_v6  ;;  %v2386_v40 = vsub.f32 %v13347_v3, %v2305_v6  ;;  %v2582_v3 = vadd.f32 %v13566_v36, %v13560_v57  ;;  %v13578_v6 = vpop.eup %11762 }
 0x7e3   : > { %v2477_v39 = vmul.f32 1.442695, %v2385_v58  ;;  %v2479_v24 = vmul.f32 1.442695, %v2386_v40  ;;  %2580 = vadd.xlane.f32.xlu0 %v2579_v59  ;;  %v17585_v40 = vld [vmem:[#allocation12_spill] sm:$0xff] }
 0x7e4   : > { %v2308_v38 = vpop.xlane.xlu0 %2307 }
 0x7e5   : > { %11766 = vpow2.f32 %v2477_v39  ;;  %v2387_v47 = vsub.f32 %v17582_v44, %v2308_v38  ;;  %v2388_v56 = vsub.f32 %v17583_v12, %v2308_v38  ;;  %v2585_v39 = vadd.f32 %v13575_v46, %v13569_v17  ;;  %v13584_v38 = vpop.eup %11764 }
 0x7e6   : > { %11768 = vpow2.f32 %v2479_v24  ;;  %v2495_v24 = vmul.f32 1.442695, %v2394_v50 }
 0x7e7   : > { %v2481_v48 = vmul.f32 1.442695, %v2387_v47  ;;  %v2483_v21 = vmul.f32 1.442695, %v2388_v56  ;;  %2583 = vadd.xlane.f32.xlu0 %v2582_v3  ;;  %v17586_v47 = vld [vmem:[#allocation13_spill] sm:$0xff]  ;;  %v17587_v56 = vld [vmem:[#allocation14_spill] sm:$0xff] }
 0x7e8   : > { %v2311_v11 = vpop.xlane.xlu0 %2310 }
 0x7e9   : > { %11770 = vpow2.f32 %v2481_v48  ;;  %v2389_v58 = vsub.f32 %v13357_v14, %v2311_v11  ;;  %v2390_v59 = vsub.f32 %v17585_v40, %v2311_v11  ;;  %v2588_v14 = vadd.f32 %v13584_v38, %v13578_v6  ;;  %v17589_v40 = vld [vmem:[#allocation16_spill] sm:$0xff] }
 0x7ea   : > { %11772 = vpow2.f32 %v2483_v21 }
 0x7eb   : > { %v2485_v23 = vmul.f32 1.442695, %v2389_v58  ;;  %v2487_v44 = vmul.f32 1.442695, %v2390_v59  ;;  %2586 = vadd.xlane.f32.xlu0 %v2585_v39  ;;  %11774 = vpow2.f32 %v2493_v43  ;;  %v17588_v43 = vld [vmem:[#allocation15_spill] sm:$0xff] }
 0x7ec   : > { %v2314_v2 = vpop.xlane.xlu0 %2313 }
 0x7ed   : > { %11776 = vpow2.f32 %v2485_v23  ;;  %v2391_v12 = vsub.f32 %v17586_v47, %v2314_v2  ;;  %v2392_v3 = vsub.f32 %v17587_v56, %v2314_v2  ;;  %v17590_v56 = vld [vmem:[#allocation17_spill] sm:$0xff] }
 0x7ee   : > { %11778 = vpow2.f32 %v2487_v44 }
 0x7ef   : > { %v13590_v4 = vpop.eup %11766  ;;  %11780 = vpow2.f32 %v2495_v24  ;;  %v2489_v48 = vmul.f32 1.442695, %v2391_v12  ;;  %v2491_v21 = vmul.f32 1.442695, %v2392_v3  ;;  %2589 = vadd.xlane.f32.xlu0 %v2588_v14 }
 0x7f0   : > { %v13592_v50 = vpop.eup %11768  ;;  %v2320_v11 = vpop.xlane.xlu0 %2319 }
 0x7f1   : > { %11782 = vpow2.f32 %v2489_v48  ;;  %v2395_v58 = vsub.f32 %v17588_v43, %v2320_v11  ;;  %v2396_v59 = vsub.f32 %v17589_v40, %v2320_v11  ;;  %v2591_v39 = vadd.f32 %v13592_v50, %v13590_v4 }
 0x7f2   : > { %11784 = vpow2.f32 %v2491_v21 }
 0x7f3   : > { %v13598_v23 = vpop.eup %11770  ;;  %v2497_v44 = vmul.f32 1.442695, %v2395_v58  ;;  %v2499_v2 = vmul.f32 1.442695, %v2396_v59  ;;  %2592 = vadd.xlane.f32.xlu0 %v2591_v39 }
 0x7f4   : > { %v13600_v24 = vpop.eup %11772  ;;  %v2323_v47 = vpop.xlane.xlu0 %2322 }
 0x7f5   : > { %11786 = vpow2.f32 %v2497_v44  ;;  %v2397_v12 = vsub.f32 %v13385_v41, %v2323_v47  ;;  %v2398_v3 = vsub.f32 %v17590_v56, %v2323_v47  ;;  %v2594_v14 = vadd.f32 %v13600_v24, %v13598_v23  ;;  %v13606_v48 = vpop.eup %11774 }
 0x7f6   : > { %11788 = vpow2.f32 %v2499_v2 }
 0x7f7   : > { %v13608_v21 = vpop.eup %11776  ;;  %v2501_v11 = vmul.f32 1.442695, %v2397_v12  ;;  %v2503_v43 = vmul.f32 1.442695, %v2398_v3  ;;  %2595 = vadd.xlane.f32.xlu0 %v2594_v14 }
 0x7f8   : > { %v13610_v58 = vpop.eup %11778  ;;  %v2326_v40 = vpop.xlane.xlu0 %2325 }
 0x7f9   : > { %v13612_v59 = vpop.eup %11780  ;;  %11790 = vpow2.f32 %v2501_v11  ;;  %v2399_v41 = vsub.f32 %v13393_v63, %v2326_v40  ;;  %v2400_v39 = vsub.f32 %v13395_v29, %v2326_v40  ;;  %v2597_v44 = vadd.f32 %v13610_v58, %v13608_v21 }
 0x7fa   : > { %11792 = vpow2.f32 %v2503_v43  ;;  %v2603_v14 = vadd.f32 %v13612_v59, %v13606_v48 }
 0x7fb   : > { %v13618_v2 = vpop.eup %11782  ;;  %v2505_v47 = vmul.f32 1.442695, %v2399_v41  ;;  %v2507_v12 = vmul.f32 1.442695, %v2400_v39  ;;  %2598 = vadd.xlane.f32.xlu0 %v2597_v44 }
 0x7fc   : > { %v13620_v56 = vpop.eup %11784  ;;  %v2329_v3 = vpop.xlane.xlu0 %2328 }
 0x7fd   : > { %11794 = vpow2.f32 %v2505_v47  ;;  %v2401_v63 = vsub.f32 %v13399_v52, %v2329_v3  ;;  %v2402_v29 = vsub.f32 %v13401_v7, %v2329_v3  ;;  %v2600_v11 = vadd.f32 %v13620_v56, %v13618_v2 }
 0x7fe   : > { %11796 = vpow2.f32 %v2507_v12 }
 0x7ff   : > { %v13628_v43 = vpop.eup %11786  ;;  %v2509_v40 = vmul.f32 1.442695, %v2401_v63  ;;  %v2511_v41 = vmul.f32 1.442695, %v2402_v29  ;;  %2601 = vadd.xlane.f32.xlu1 %v2600_v11  ;;  %2604 = vadd.xlane.f32.xlu0 %v2603_v14 }
 0x800   : > { %17591 = vst [vmem:[#allocation10_spill] sm:$0xff] %v13628_v43  ;;  %v13630_v39 = vpop.eup %11788  ;;  %v2332_v44 = vpop.xlane.xlu0 %2331 }
 0x801   : > { %11798 = vpow2.f32 %v2509_v40  ;;  %v2403_v47 = vsub.f32 %v13405_v5, %v2332_v44  ;;  %v2404_v52 = vsub.f32 %v13407_v26, %v2332_v44  ;;  %v2606_v7 = vadd.f32 %v13630_v39, %v13628_v43  ;;  %v17598_v43 = vld [vmem:[#allocation22_spill] sm:$0xff] }
 0x802   : > { %11800 = vpow2.f32 %v2511_v41  ;;  %v17596_v41 = vld [vmem:[#allocation20_spill] sm:$0xff] }
 0x803   : > { %v13636_v3 = vpop.eup %11790  ;;  %v2513_v12 = vmul.f32 1.442695, %v2403_v47  ;;  %v2515_v15 = vmul.f32 1.442695, %v2404_v52  ;;  %2607 = vadd.xlane.f32.xlu1 %v2606_v7 }
 0x804   : > { %17592 = vst [vmem:[#allocation11_spill] sm:$0xff] %v13636_v3  ;;  %v13638_v63 = vpop.eup %11792 }
 0x805   : > { %17593 = vst [vmem:[#allocation9_spill] sm:$0xff] %v13638_v63  ;;  %11802 = vpow2.f32 %v2513_v12  ;;  %v2609_v14 = vadd.f32 %v13638_v63, %v13636_v3  ;;  %v17597_v3 = vld [vmem:[#allocation21_spill] sm:$0xff] }
 0x806   : > { %11804 = vpow2.f32 %v2515_v15 }
 0x807   : > { %v13642_v29 = vpop.eup %11794  ;;  %2610 = vadd.xlane.f32.xlu0 %v2609_v14 }
 0x808   : > { %17594 = vst [vmem:[#allocation12_spill] sm:$0xff] %v13642_v29  ;;  %v13644_v5 = vpop.eup %11796 }
 0x809   : > { %17595 = vst [vmem:[#allocation13_spill] sm:$0xff] %v13644_v5  ;;  %v2335_v26 = vpop.xlane.xlu1 %2334  ;;  %v2612_v11 = vadd.f32 %v13644_v5, %v13642_v29 }
 0x80a   : > { %v2405_v40 = vsub.f32 %v13417_v49, %v2335_v26  ;;  %v2406_v44 = vsub.f32 %v17596_v41, %v2335_v26 }
 0x80b   : > { %v13650_v47 = vpop.eup %11798  ;;  %2613 = vadd.xlane.f32.xlu1 %v2612_v11 }
 0x80c   : > { %v13652_v52 = vpop.eup %11800  ;;  %v2517_v7 = vmul.f32 1.442695, %v2405_v40  ;;  %v2519_v15 = vmul.f32 1.442695, %v2406_v44 }
 0x80d   : > { %v2338_v12 = vpop.xlane.xlu1 %2337  ;;  %v2615_v14 = vadd.f32 %v13652_v52, %v13650_v47 }
 0x80e   : > { %11806 = vpow2.f32 %v2517_v7  ;;  %v2407_v63 = vsub.f32 %v17597_v3, %v2338_v12  ;;  %v2408_v29 = vsub.f32 %v17598_v43, %v2338_v12 }
 0x80f   : > { %v13658_v5 = vpop.eup %11802  ;;  %11808 = vpow2.f32 %v2519_v15  ;;  %2616 = vadd.xlane.f32.xlu0 %v2615_v14  ;;  %v2356_v15 = vpop.xlane.xlu0 %2355 }
 0x810   : > { %17599 = vst [vmem:[#allocation14_spill] sm:$0xff] %v13658_v5  ;;  %v13660_v49 = vpop.eup %11804  ;;  %v2521_v26 = vmul.f32 1.442695, %v2407_v63  ;;  %v2523_v11 = vmul.f32 1.442695, %v2408_v29 }
 0x811   : > { %17600 = vst [vmem:[#allocation15_spill] sm:$0xff] %v13660_v49  ;;  %v2341_v41 = vpop.xlane.xlu1 %2340  ;;  %v2618_v40 = vadd.f32 %v13660_v49, %v13658_v5 }
 0x812   : > { %11810 = vpow2.f32 %v2521_v26  ;;  %v2409_v44 = vsub.f32 %v13427_v34, %v2341_v41  ;;  %v2410_v7 = vsub.f32 %v13429_v61, %v2341_v41  ;;  %v17601_v34 = vld [vmem:[#allocation18_spill] sm:$0xff] }
 0x813   : > { %11812 = vpow2.f32 %v2523_v11  ;;  %2619 = vadd.xlane.f32.xlu1 %v2618_v40  ;;  %v2419_v61 = vsub.f32 %v17601_v34, %v2356_v15 }
 0x814   : > { %v2525_v43 = vmul.f32 1.442695, %v2409_v44  ;;  %v2527_v3 = vmul.f32 1.442695, %v2410_v7  ;;  %v17602_v44 = vld [vmem:[#allocation19_spill] sm:$0xff] }
 0x815   : > { %v2344_v12 = vpop.xlane.xlu1 %2343  ;;  %v2420_v7 = vsub.f32 %v17602_v44, %v2356_v15 }
 0x816   : > { %11814 = vpow2.f32 %v2525_v43  ;;  %v2411_v14 = vsub.f32 %v13438_v18, %v2344_v12  ;;  %v2412_v63 = vsub.f32 %v13440_v42, %v2344_v12 }
 0x817   : > { %11816 = vpow2.f32 %v2527_v3  ;;  %v2547_v15 = vmul.f32 1.442695, %v2420_v7 }
 0x818   : > { %v13668_v29 = vpop.eup %11806  ;;  %v2529_v5 = vmul.f32 1.442695, %v2411_v14  ;;  %v2531_v26 = vmul.f32 1.442695, %v2412_v63  ;;  %v2545_v14 = vmul.f32 1.442695, %v2419_v61 }
 0x819   : > { %v13670_v49 = vpop.eup %11808  ;;  %v2347_v11 = vpop.xlane.xlu1 %2346 }
 0x81a   : > { %11818 = vpow2.f32 %v2529_v5  ;;  %v2413_v41 = vsub.f32 %v13446_v31, %v2347_v11  ;;  %v2414_v40 = vsub.f32 %v13448_v53, %v2347_v11  ;;  %v2621_v18 = vadd.f32 %v13670_v49, %v13668_v29 }
 0x81b   : > { %11820 = vpow2.f32 %v2531_v26 }
 0x81c   : > { %v13677_v42 = vpop.eup %11810  ;;  %v2533_v43 = vmul.f32 1.442695, %v2413_v41  ;;  %v2535_v3 = vmul.f32 1.442695, %v2414_v40  ;;  %2622 = vadd.xlane.f32.xlu0 %v2621_v18 }
 0x81d   : > { %v13680_v12 = vpop.eup %11812  ;;  %v2350_v63 = vpop.xlane.xlu1 %2349 }
 0x81e   : > { %11822 = vpow2.f32 %v2533_v43  ;;  %v2415_v31 = vsub.f32 %v13455_v13, %v2350_v63  ;;  %v2416_v53 = vsub.f32 %v13458_v10, %v2350_v63  ;;  %v2624_v5 = vadd.f32 %v13680_v12, %v13677_v42 }
 0x81f   : > { %11824 = vpow2.f32 %v2535_v3  ;;  %v2554_v26 = vpop.xlane.xlu0 %2553 }
 0x820   : > { %v13686_v34 = vpop.eup %11814  ;;  %v2537_v11 = vmul.f32 1.442695, %v2415_v31  ;;  %v2539_v41 = vmul.f32 1.442695, %v2416_v53  ;;  %11826 = vrcp.f32 %v2554_v26  ;;  %2625 = vadd.xlane.f32.xlu1 %v2624_v5 }
 0x821   : > { %v13688_v40 = vpop.eup %11816  ;;  %11828 = vpow2.f32 %v2545_v14  ;;  %v2353_v61 = vpop.xlane.xlu1 %2352 }
 0x822   : > { %11830 = vpow2.f32 %v2537_v11  ;;  %v2417_v13 = vsub.f32 %v13469_v19, %v2353_v61  ;;  %v2418_v10 = vsub.f32 %v13472_v27, %v2353_v61  ;;  %v2627_v18 = vadd.f32 %v13688_v40, %v13686_v34 }
 0x823   : > { %11832 = vpow2.f32 %v2539_v41  ;;  %v2557_v3 = vpop.xlane.xlu0 %2556 }
 0x824   : > { %v13694_v44 = vpop.eup %11818  ;;  %11834 = vpow2.f32 %v2547_v15  ;;  %v2541_v7 = vmul.f32 1.442695, %v2417_v13  ;;  %v2543_v43 = vmul.f32 1.442695, %v2418_v10  ;;  %2628 = vadd.xlane.f32.xlu0 %v2627_v18 }
 0x825   : > { %v13696_v63 = vpop.eup %11820  ;;  %11836 = vrcp.f32 %v2557_v3 }
 0x826   : > { %11838 = vpow2.f32 %v2541_v7  ;;  %v2551_v14 = vpop.xlane.xlu1 %2550  ;;  %v2630_v19 = vadd.f32 %v13696_v63, %v13694_v44 }
 0x827   : > { %11840 = vpow2.f32 %v2543_v43  ;;  %v2560_v31 = vpop.xlane.xlu0 %2559 }
 0x828   : > { %v13700_v27 = vpop.eup %11822  ;;  %11842 = vrcp.f32 %v2551_v14  ;;  %2631 = vadd.xlane.f32.xlu1 %v2630_v19 }
 0x829   : > { %v13702_v53 = vpop.eup %11824  ;;  %11844 = vrcp.f32 %v2560_v31 }
 0x82a   : > { %v11827_v5 = vpop.eup %11826  ;;  %v2633_v26 = vadd.f32 %v13702_v53, %v13700_v27 }
 0x82b   : > { %v13706_v15 = vpop.eup %11828  ;;  %v2680_v11 = vmul.f32 %v11827_v5, %v13474_v55  ;;  %v2679_v41 = vmul.f32 %v11827_v5, %v13466_v1  ;;  %v2563_v13 = vpop.xlane.xlu0 %2562 }
 0x82c   : > { %v13710_v61 = vpop.eup %11830  ;;  %2634 = vadd.xlane.f32.xlu0 %v2633_v26  ;;  %11846 = vrcp.f32 %v2563_v13 }
 0x82d   : > { %v13712_v10 = vpop.eup %11832  ;;  %2906 = vmatprep.mubr.f32.mxu1 %v2680_v11 }
 0x82e   : > { %v13714_v18 = vpop.eup %11834  ;;  %2907 = vmatmul.mubr.f32.vlgmr.msra.gmra.mrb[42].mxu1 %v2679_v41  ;;  %v2636_v7 = vadd.f32 %v13712_v10, %v13710_v61 }
 0x82f   : > { %v11837_v43 = vpop.eup %11836  ;;  %v2566_v55 = vpop.xlane.xlu0 %2565  ;;  %v2642_v26 = vadd.f32 %v13714_v18, %v13706_v15 }
 0x830   : > { %v13718_v3 = vpop.eup %11838  ;;  %2637 = vadd.xlane.f32.xlu1 %v2636_v7  ;;  %v2682_v1 = vmul.f32 %v11837_v43, %v13486_v9  ;;  %v2681_v14 = vmul.f32 %v11837_v43, %v13482_v0  ;;  %11848 = vrcp.f32 %v2566_v55 }
 0x831   : > { %v13722_v19 = vpop.eup %11840 }
 0x832   : > { %v11843_v31 = vpop.eup %11842  ;;  %2911 = vmatprep.mubr.f32.mxu1 %v2682_v1  ;;  %v2639_v5 = vadd.f32 %v13722_v19, %v13718_v3 }
 0x833   : > { %v11845_v11 = vpop.eup %11844  ;;  %2912 = vmatmul.mubr.f32.gmra.mrb[44].mxu1 %v2681_v14  ;;  %v2678_v41 = vmul.f32 %v11843_v31, %v13488_v62  ;;  %v2677_v13 = vmul.f32 %v11843_v31, %v13480_v30 }
 0x834   : > { %v2569_v9 = vpop.xlane.xlu0 %2568  ;;  %2640 = vadd.xlane.f32.xlu0 %v2639_v5  ;;  %2643 = vadd.xlane.f32.xlu1 %v2642_v26  ;;  %v2684_v0 = vmul.f32 %v11845_v11, %v13496_v32  ;;  %v2683_v7 = vmul.f32 %v11845_v11, %v13494_v16  ;;  %v17603_v16 = vld [vmem:[#allocation24_spill] sm:$0xff]  ;;  %v17604_v5 = vld [vmem:[#allocation23_spill] sm:$0xff] }
 0x835   : > { %11850 = vrcp.f32 %v2569_v9  ;;  %2901 = vmatprep.mubr.f32.mxu0 %v2678_v41 }
 0x836   : > { %2902 = vmatmul.mubr.f32.vlgmr.msra.gmra.mrb[74].mxu0 %v2677_v13  ;;  %2916 = vmatprep.mubr.f32.mxu1 %v2684_v0  ;;  %v11847_v43 = vpop.eup %11846 }
 0x837   : > { %2917 = vmatmul.mubr.f32.gmra.mrb[46].mxu1 %v2683_v7  ;;  %v2686_v55 = vmul.f32 %v11847_v43, %v13506_v54  ;;  %v2685_v1 = vmul.f32 %v11847_v43, %v13503_v51 }
 0x839   : > { %2921 = vmatprep.mubr.f32.mxu1 %v2686_v55 }
 0x83a   : > { %v11849_v62 = vpop.eup %11848 }
 0x83b   : > { %2922 = vmatmul.mubr.f32.gmra.mrb[48].mxu1 %v2685_v1  ;;  %v2688_v30 = vmul.f32 %v11849_v62, %v13512_v25  ;;  %v2687_v14 = vmul.f32 %v11849_v62, %v13510_v28 }
 0x83d   : > { %2926 = vmatprep.mubr.f32.mxu1 %v2688_v30 }
 0x83f   : > { %v11851_v32 = vpop.eup %11850  ;;  %2927 = vmatmul.mubr.f32.gmra.mrb[50].mxu1 %v2687_v14 }
 0x840   : > { %v2690_v31 = vmul.f32 %v11851_v32, %v17603_v16  ;;  %v2689_v26 = vmul.f32 %v11851_v32, %v17604_v5 }
 0x842   : > { %2931 = vmatprep.mubr.f32.mxu1 %v2690_v31 }
 0x843   : > { %2932 = vmatmul.mubr.f32.gmra.mrb[52].mxu1 %v2689_v26 }
 0x864   : > { %v2572_v11 = vpop.xlane.xlu0 %2571 }
 0x865   : > { %11852 = vrcp.f32 %v2572_v11 }
 0x868   : > { %v2575_v54 = vpop.xlane.xlu0 %2574 }
 0x869   : > { %11854 = vrcp.f32 %v2575_v54 }
 0x86c   : > { %v2578_v51 = vpop.xlane.xlu0 %2577 }
 0x86d   : > { %11856 = vrcp.f32 %v2578_v51 }
 0x86f   : > { %v11853_v41 = vpop.eup %11852 }
 0x870   : > { %v2581_v13 = vpop.xlane.xlu0 %2580  ;;  %v2692_v25 = vmul.f32 %v11853_v41, %v13537_v20  ;;  %v2691_v28 = vmul.f32 %v11853_v41, %v13534_v60 }
 0x871   : > { %11858 = vrcp.f32 %v2581_v13 }
 0x872   : > { %2936 = vmatprep.mubr.f32.mxu1 %v2692_v25 }
 0x873   : > { %v11855_v9 = vpop.eup %11854  ;;  %2937 = vmatmul.mubr.f32.gmra.mrb[54].mxu1 %v2691_v28 }
 0x874   : > { %v2584_v0 = vpop.xlane.xlu0 %2583  ;;  %v2694_v7 = vmul.f32 %v11855_v9, %v13544_v8  ;;  %v2693_v43 = vmul.f32 %v11855_v9, %v13540_v35 }
 0x875   : > { %11860 = vrcp.f32 %v2584_v0 }
 0x876   : > { %2941 = vmatprep.mubr.f32.mxu1 %v2694_v7 }
 0x877   : > { %v11857_v55 = vpop.eup %11856  ;;  %2942 = vmatmul.mubr.f32.gmra.mrb[56].mxu1 %v2693_v43 }
 0x878   : > { %v2587_v1 = vpop.xlane.xlu0 %2586  ;;  %v2696_v62 = vmul.f32 %v11857_v55, %v13552_v45  ;;  %v2695_v20 = vmul.f32 %v11857_v55, %v13548_v33 }
 0x879   : > { %11862 = vrcp.f32 %v2587_v1 }
 0x87a   : > { %2946 = vmatprep.mubr.f32.mxu1 %v2696_v62 }
 0x87b   : > { %v11859_v60 = vpop.eup %11858  ;;  %2947 = vmatmul.mubr.f32.gmra.mrb[58].mxu1 %v2695_v20 }
 0x87c   : > { %v2590_v30 = vpop.xlane.xlu0 %2589  ;;  %v2698_v14 = vmul.f32 %v11859_v60, %v13558_v37  ;;  %v2697_v8 = vmul.f32 %v11859_v60, %v13554_v22 }
 0x87d   : > { %11864 = vrcp.f32 %v2590_v30  ;;  %v17606_v30 = vld [vmem:[#allocation9_spill] sm:$0xff] }
 0x87e   : > { %2951 = vmatprep.mubr.f32.mxu1 %v2698_v14 }
 0x87f   : > { %v11861_v35 = vpop.eup %11860  ;;  %2952 = vmatmul.mubr.f32.gmra.mrb[60].mxu1 %v2697_v8 }
 0x880   : > { %v2593_v32 = vpop.xlane.xlu0 %2592  ;;  %v2700_v16 = vmul.f32 %v11861_v35, %v13566_v36  ;;  %v2699_v45 = vmul.f32 %v11861_v35, %v13560_v57  ;;  %v3062_v57 = vld [vmem:[%s17406_s4] sm:$0xf] }
 0x881   : > { %11866 = vrcp.f32 %v2593_v32  ;;  %10009 = vmatprep.subr.msk.mxu0 %vm17486_vm5, %v3062_v57  ;;  %v17608_v32 = vld [vmem:[#allocation13_spill] sm:$0xff] }
 0x882   : > { %2956 = vmatprep.mubr.f32.mxu1 %v2700_v16  ;;  %10010 = vmatpush3.msk.msra.mxu0 %vm17486_vm5, %v3062_v57  ;;  %v17611_v57 = vld [vmem:[#allocation14_spill] sm:$0xff]  ;;  %vm17518_vm5 = vcmask 425344  }
 0x883   : > { %v11863_v33 = vpop.eup %11862  ;;  %2957 = vmatmul.mubr.f32.gmra.mrb[62].mxu1 %v2699_v45 }
 0x884   : > { %v2596_v31 = vpop.xlane.xlu0 %2595  ;;  %v2702_v5 = vmul.f32 %v11863_v33, %v13575_v46  ;;  %v2701_v37 = vmul.f32 %v11863_v33, %v13569_v17 }
 0x885   : > { %11868 = vrcp.f32 %v2596_v31 }
 0x886   : > { %2961 = vmatprep.mubr.f32.mxu1 %v2702_v5 }
 0x887   : > { %v11865_v22 = vpop.eup %11864  ;;  %2962 = vmatmul.mubr.f32.gmra.mrb[64].mxu1 %v2701_v37 }
 0x888   : > { %v2599_v26 = vpop.xlane.xlu0 %2598  ;;  %v2704_v11 = vmul.f32 %v11865_v22, %v13584_v38  ;;  %v2703_v36 = vmul.f32 %v11865_v22, %v13578_v6 }
 0x889   : > { %11870 = vrcp.f32 %v2599_v26  ;;  %v17610_v26 = vld [vmem:[#allocation15_spill] sm:$0xff] }
 0x88a   : > { %2966 = vmatprep.mubr.f32.mxu1 %v2704_v11 }
 0x88b   : > { %v11867_v17 = vpop.eup %11866  ;;  %2967 = vmatmul.mubr.f32.gmra.mrb[66].mxu1 %v2703_v36 }
 0x88c   : > { %v2602_v46 = vpop.xlane.xlu1 %2601  ;;  %v2605_v54 = vpop.xlane.xlu0 %2604  ;;  %v2706_v51 = vmul.f32 %v11867_v17, %v13592_v50  ;;  %v2705_v38 = vmul.f32 %v11867_v17, %v13590_v4 }
 0x88d   : > { %11872 = vrcp.f32 %v2602_v46 }
 0x88e   : > { %11874 = vrcp.f32 %v2605_v54  ;;  %2971 = vmatprep.mubr.f32.mxu1 %v2706_v51 }
 0x88f   : > { %v11869_v6 = vpop.eup %11868  ;;  %2972 = vmatmul.mubr.f32.gmra.mrb[68].mxu1 %v2705_v38 }
 0x890   : > { %v2608_v41 = vpop.xlane.xlu1 %2607  ;;  %v2708_v13 = vmul.f32 %v11869_v6, %v13600_v24  ;;  %v2707_v25 = vmul.f32 %v11869_v6, %v13598_v23 }
 0x891   : > { %11876 = vrcp.f32 %v2608_v41 }
 0x892   : > { %2976 = vmatprep.mubr.f32.mxu1 %v2708_v13 }
 0x893   : > { %v11871_v28 = vpop.eup %11870  ;;  %2977 = vmatmul.mubr.f32.gmra.mrb[70].mxu1 %v2707_v25 }
 0x894   : > { %v2611_v9 = vpop.xlane.xlu0 %2610  ;;  %v2710_v0 = vmul.f32 %v11871_v28, %v13610_v58  ;;  %v2709_v50 = vmul.f32 %v11871_v28, %v13608_v21 }
 0x895   : > { %11878 = vrcp.f32 %v2611_v9 }
 0x896   : > { %2981 = vmatprep.mubr.f32.mxu1 %v2710_v0 }
 0x897   : > { %v11873_v4 = vpop.eup %11872  ;;  %2982 = vmatmul.mubr.f32.gmra.mrb[72].mxu1 %v2709_v50 }
 0x898   : > { %v11875_v7 = vpop.eup %11874  ;;  %v2614_v43 = vpop.xlane.xlu1 %2613  ;;  %v2712_v55 = vmul.f32 %v11873_v4, %v13620_v56  ;;  %v2711_v24 = vmul.f32 %v11873_v4, %v13618_v2  ;;  %v17605_v56 = vld [vmem:[#allocation10_spill] sm:$0xff] }
 0x899   : > { %11880 = vrcp.f32 %v2614_v43  ;;  %v2714_v23 = vmul.f32 %v11875_v7, %v13612_v59  ;;  %v2713_v21 = vmul.f32 %v11875_v7, %v13606_v48  ;;  %v17607_v59 = vld [vmem:[#allocation11_spill] sm:$0xff] }
 0x89a   : > { %2986 = vmatprep.mubr.f32.mxu1 %v2712_v55 }
 0x89b   : > { %v11877_v1 = vpop.eup %11876  ;;  %2987 = vmatmul.mubr.f32.gmra.mrb[74].mxu1 %v2711_v24 }
 0x89c   : > { %2991 = vmatprep.mubr.f32.mxu1 %v2714_v23  ;;  %v2617_v58 = vpop.xlane.xlu0 %2616  ;;  %v2716_v62 = vmul.f32 %v11877_v1, %v13630_v39  ;;  %v2715_v2 = vmul.f32 %v11877_v1, %v17605_v56  ;;  %v17609_v39 = vld [vmem:[#allocation12_spill] sm:$0xff]  ;;  %v17612_v23 = vmov 0.0  }
 0x89d   : > { %11882 = vrcp.f32 %v2617_v58 }
 0x89f   : > { %v11879_v20 = vpop.eup %11878  ;;  %2992 = vmatmul.mubr.f32.gmra.mrb[76].mxu1 %v2713_v21 }
 0x8a0   : > { %v2620_v60 = vpop.xlane.xlu1 %2619  ;;  %2996 = vmatprep.mubr.f32.mxu1 %v2716_v62  ;;  %v2718_v14 = vmul.f32 %v11879_v20, %v17606_v30  ;;  %v2717_v35 = vmul.f32 %v11879_v20, %v17607_v59 }
 0x8a1   : > { %11884 = vrcp.f32 %v2620_v60 }
 0x8a3   : > { %v11881_v8 = vpop.eup %11880  ;;  %2997 = vmatmul.mubr.f32.gmra.mrb[78].mxu1 %v2715_v2 }
 0x8a4   : > { %3001 = vmatprep.mubr.f32.mxu1 %v2718_v14  ;;  %v2720_v16 = vmul.f32 %v11881_v8, %v17608_v32  ;;  %v2719_v33 = vmul.f32 %v11881_v8, %v17609_v39 }
 0x8a7   : > { %v11883_v45 = vpop.eup %11882  ;;  %3002 = vmatmul.mubr.f32.gmra.mrb[80].mxu1 %v2717_v35 }
 0x8a8   : > { %3006 = vmatprep.mubr.f32.mxu1 %v2720_v16  ;;  %v2722_v31 = vmul.f32 %v11883_v45, %v13652_v52  ;;  %v2721_v22 = vmul.f32 %v11883_v45, %v13650_v47 }
 0x8a9   : > { %v2623_v48 = vpop.xlane.xlu0 %2622 }
 0x8aa   : > { %11886 = vrcp.f32 %v2623_v48 }
 0x8ab   : > { %v11885_v5 = vpop.eup %11884  ;;  %3007 = vmatmul.mubr.f32.gmra.mrb[82].mxu1 %v2719_v33 }
 0x8ac   : > { %3011 = vmatprep.mubr.f32.mxu1 %v2722_v31  ;;  %v2724_v11 = vmul.f32 %v11885_v5, %v17610_v26  ;;  %v2723_v17 = vmul.f32 %v11885_v5, %v17611_v57 }
 0x8ad   : > { %v2626_v37 = vpop.xlane.xlu1 %2625 }
 0x8ae   : > { %11888 = vrcp.f32 %v2626_v37 }
 0x8af   : > { %3012 = vmatmul.mubr.f32.gmra.mrb[84].mxu1 %v2721_v22 }
 0x8b0   : > { %3016 = vmatprep.mubr.f32.mxu1 %v2724_v11 }
 0x8b1   : > { %v2629_v36 = vpop.xlane.xlu0 %2628 }
 0x8b2   : > { %11890 = vrcp.f32 %v2629_v36 }
 0x8b3   : > { %3017 = vmatmul.mubr.f32.gmra.mrb[86].mxu1 %v2723_v17 }
 0x8b4   : > { %v11887_v46 = vpop.eup %11886 }
 0x8b5   : > { %v2632_v54 = vpop.xlane.xlu1 %2631  ;;  %v2726_v52 = vmul.f32 %v11887_v46, %v13670_v49  ;;  %v2725_v51 = vmul.f32 %v11887_v46, %v13668_v29 }
 0x8b6   : > { %11892 = vrcp.f32 %v2632_v54 }
 0x8b7   : > { %3021 = vmatprep.mubr.f32.mxu1 %v2726_v52 }
 0x8b8   : > { %v11889_v38 = vpop.eup %11888  ;;  %3022 = vmatmul.mubr.f32.gmra.mrb[88].mxu1 %v2725_v51 }
 0x8b9   : > { %v2635_v47 = vpop.xlane.xlu0 %2634  ;;  %v2728_v6 = vmul.f32 %v11889_v38, %v13680_v12  ;;  %v2727_v41 = vmul.f32 %v11889_v38, %v13677_v42 }
 0x8ba   : > { %11894 = vrcp.f32 %v2635_v47 }
 0x8bb   : > { %3026 = vmatprep.mubr.f32.mxu1 %v2728_v6 }
 0x8bc   : > { %v11891_v13 = vpop.eup %11890  ;;  %3027 = vmatmul.mubr.f32.gmra.mrb[90].mxu1 %v2727_v41 }
 0x8bd   : > { %v2638_v25 = vpop.xlane.xlu1 %2637  ;;  %v2730_v28 = vmul.f32 %v11891_v13, %v13688_v40  ;;  %v2729_v49 = vmul.f32 %v11891_v13, %v13686_v34 }
 0x8be   : > { %11896 = vrcp.f32 %v2638_v25 }
 0x8bf   : > { %3031 = vmatprep.mubr.f32.mxu1 %v2730_v28 }
 0x8c0   : > { %v11893_v29 = vpop.eup %11892  ;;  %3032 = vmatmul.mubr.f32.gmra.mrb[92].mxu1 %v2729_v49 }
 0x8c1   : > { %v2644_v9 = vpop.xlane.xlu1 %2643  ;;  %v2641_v0 = vpop.xlane.xlu0 %2640  ;;  %v2732_v50 = vmul.f32 %v11893_v29, %v13696_v63  ;;  %v2731_v12 = vmul.f32 %v11893_v29, %v13694_v44 }
 0x8c2   : > { %11898 = vrcp.f32 %v2644_v9 }
 0x8c3   : > { %11900 = vrcp.f32 %v2641_v0  ;;  %3036 = vmatprep.mubr.f32.mxu1 %v2732_v50 }
 0x8c4   : > { %v11895_v42 = vpop.eup %11894  ;;  %3037 = vmatmul.mubr.f32.gmra.mrb[94].mxu1 %v2731_v12 }
 0x8c5   : > { %v2734_v4 = vmul.f32 %v11895_v42, %v13702_v53  ;;  %v2733_v40 = vmul.f32 %v11895_v42, %v13700_v27 }
 0x8c7   : > { %3041 = vmatprep.mubr.f32.mxu1 %v2734_v4 }
 0x8c8   : > { %v11897_v34 = vpop.eup %11896  ;;  %3042 = vmatmul.mubr.f32.gmra.mrb[96].mxu1 %v2733_v40 }
 0x8c9   : > { %v2736_v7 = vmul.f32 %v11897_v34, %v13712_v10  ;;  %v2735_v43 = vmul.f32 %v11897_v34, %v13710_v61 }
 0x8cb   : > { %3046 = vmatprep.mubr.f32.mxu1 %v2736_v7 }
 0x8cc   : > { %v11899_v63 = vpop.eup %11898  ;;  %3047 = vmatmul.mubr.f32.gmra.mrb[98].mxu1 %v2735_v43 }
 0x8cd   : > { %v11901_v44 = vpop.eup %11900  ;;  %v2740_v53 = vmul.f32 %v11899_v63, %v13714_v18  ;;  %v2739_v27 = vmul.f32 %v11899_v63, %v13706_v15 }
 0x8ce   : > { %v2738_v55 = vmul.f32 %v11901_v44, %v13722_v19  ;;  %v2737_v24 = vmul.f32 %v11901_v44, %v13718_v3 }
 0x8d0   : > { %3051 = vmatprep.mubr.f32.mxu1 %v2738_v55 }
 0x8d1   : > { %3052 = vmatmul.mubr.f32.gmra.mrb[100].mxu1 %v2737_v24 }
 0x8d2   : > { %3056 = vmatprep.mubr.f32.mxu1 %v2740_v53 }
 0x8d5   : > { %3057 = vmatmul.mubr.f32.gmra.mrb[102].mxu1 %v2739_v27 }
 0x8d6   : > { %3682 = vmatprep.mubr.f32.mxu1 %v17612_v23 }
 0x901   : > { %v2908_v10 = vpop.f32.mrb[42].mxu1 }
 0x902   : > { %v2910_v61 = vpop.f32.mrb[43].mxu1 }
 0x906   : > { %v2913_v1 = vpop.f32.mrb[44].mxu1 }
 0x907   : > { %v2915_v58 = vpop.f32.mrb[45].mxu1 }
 0x909   : > { %v2903_v21 = vpop.f32.mrb[74].mxu0 }
 0x90a   : > { %v2905_v62 = vpop.f32.mrb[75].mxu0  ;;  %v2918_v20 = vpop.f32.mrb[46].mxu1  ;;  %10011 = vmatprep.mubr.msk.f32.mxu0 %vm17485_vm6, %v2903_v21 }
 0x90b   : > { %v2920_v3 = vpop.f32.mrb[47].mxu1  ;;  %10012 = vmatmul.mubr.msk.f32.vlgmr.msra.gmra.mrb[76].mxu0 %vm17485_vm6, %v2908_v10 }
 0x90c   : > { %10014 = vmatprep.mubr.msk.f32.mxu0 %vm17485_vm6, %v2913_v1  ;;  %v3559_v3 = vld [vmem:[%s17407_s5 + $0x8] sm:$0xff] }
 0x90e   : > { %v2923_v18 = vpop.f32.mrb[48].mxu1 }
 0x90f   : > { %v2925_v19 = vpop.f32.mrb[49].mxu1  ;;  %10015 = vmatmul.mubr.msk.f32.gmra.mrb[78].mxu0 %vm17485_vm6, %v2918_v20 }
 0x910   : > { %10017 = vmatprep.mubr.msk.f32.mxu0 %vm17485_vm6, %v2923_v18  ;;  %v3563_v18 = vld [vmem:[%s17407_s5 + $0x28] sm:$0xff]  ;;  %v3558_v19 = vld [vmem:[%s17407_s5] sm:$0xff] }
 0x912   : > { %v2928_v15 = vpop.f32.mrb[50].mxu1 }
 0x913   : > { %v2930_v60 = vpop.f32.mrb[51].mxu1  ;;  %10018 = vmatmul.mubr.msk.f32.gmra.mrb[80].mxu0 %vm17485_vm6, %v2928_v15  ;;  %v10453_v15 = vpack.c.bf16 %v3563_v18, %v3559_v3 }
 0x914   : > { %v3562_v60 = vld [vmem:[%s17407_s5 + $0x20] sm:$0xff] }
 0x915   : > { %10454 = vmatprep.subr.bf16.mxu1 %v10453_v15 }
 0x916   : > { %v2933_v56 = vpop.f32.mrb[52].mxu1 }
 0x917   : > { %v2935_v2 = vpop.f32.mrb[53].mxu1  ;;  %10020 = vmatprep.mubr.msk.f32.mxu0 %vm17485_vm6, %v2933_v56  ;;  %v10455_v56 = vpack.c.bf16 %v3562_v60, %v3558_v19 }
 0x919   : > { %10456 = vmatpush1.bf16.msra.mxu1 %v10455_v56 }
 0x946   : > { %v2938_v30 = vpop.f32.mrb[54].mxu1 }
 0x947   : > { %v2940_v14 = vpop.f32.mrb[55].mxu1  ;;  %10021 = vmatmul.mubr.msk.f32.gmra.mrb[82].mxu0 %vm17485_vm6, %v2938_v30  ;;  %v3567_v30 = vld [vmem:[%s17407_s5 + $0x48] sm:$0xff] }
 0x948   : > { %v3571_v14 = vld [vmem:[%s17407_s5 + $0x68] sm:$0xff] }
 0x94a   : > { %v2943_v8 = vpop.f32.mrb[56].mxu1 }
 0x94b   : > { %v2945_v59 = vpop.f32.mrb[57].mxu1  ;;  %10023 = vmatprep.mubr.msk.f32.mxu0 %vm17485_vm6, %v2943_v8  ;;  %v3566_v8 = vld [vmem:[%s17407_s5 + $0x40] sm:$0xff] }
 0x94e   : > { %v2948_v35 = vpop.f32.mrb[58].mxu1 }
 0x94f   : > { %v2950_v32 = vpop.f32.mrb[59].mxu1  ;;  %10024 = vmatmul.mubr.msk.f32.gmra.mrb[84].mxu0 %vm17485_vm6, %v2948_v35  ;;  %v10457_v35 = vpack.c.bf16 %v3571_v14, %v3567_v30 }
 0x950   : > { %v3570_v32 = vld [vmem:[%s17407_s5 + $0x60] sm:$0xff] }
 0x951   : > { %10458 = vmatprep.subr.bf16.mxu1 %v10457_v35  ;;  %v3569_v35 = vld [vmem:[%s17407_s5 + $0x58] sm:$0xff] }
 0x952   : > { %v2953_v16 = vpop.f32.mrb[60].mxu1 }
 0x953   : > { %v2955_v45 = vpop.f32.mrb[61].mxu1  ;;  %10026 = vmatprep.mubr.msk.f32.mxu0 %vm17485_vm6, %v2953_v16  ;;  %v10459_v16 = vpack.c.bf16 %v3570_v32, %v3566_v8  ;;  %v3560_v8 = vld [vmem:[%s17407_s5 + $0x10] sm:$0xff]  ;;  %v3573_v32 = vld [vmem:[%s17407_s5 + $0x78] sm:$0xff] }
 0x955   : > { %10460 = vmatpush1.bf16.msra.mxu1 %v10459_v16 }
 0x956   : > { %v2958_v48 = vpop.f32.mrb[62].mxu1 }
 0x957   : > { %v2960_v39 = vpop.f32.mrb[63].mxu1  ;;  %10027 = vmatmul.mubr.msk.f32.gmra.mrb[86].mxu0 %vm17485_vm6, %v2958_v48 }
 0x95a   : > { %v2963_v33 = vpop.f32.mrb[64].mxu1 }
 0x95b   : > { %v2965_v31 = vpop.f32.mrb[65].mxu1  ;;  %10029 = vmatprep.mubr.msk.f32.mxu0 %vm17485_vm6, %v2963_v33 }
 0x95e   : > { %v2968_v5 = vpop.f32.mrb[66].mxu1 }
 0x95f   : > { %v2970_v37 = vpop.f32.mrb[67].mxu1  ;;  %10030 = vmatmul.mubr.msk.f32.gmra.mrb[88].mxu0 %vm17485_vm6, %v2968_v5 }
 0x960   : > { %v3575_v37 = vld [vmem:[%s17407_s5 + $0x88] sm:$0xff] }
 0x962   : > { %v2973_v22 = vpop.f32.mrb[68].mxu1 }
 0x963   : > { %v2975_v26 = vpop.f32.mrb[69].mxu1  ;;  %10032 = vmatprep.mubr.msk.f32.mxu0 %vm17485_vm6, %v2973_v22  ;;  %v3579_v22 = vld [vmem:[%s17407_s5 + $0xa8] sm:$0xff] }
 0x964   : > { %v3574_v26 = vld [vmem:[%s17407_s5 + $0x80] sm:$0xff] }
 0x966   : > { %v2978_v11 = vpop.f32.mrb[70].mxu1 }
 0x967   : > { %v2980_v36 = vpop.f32.mrb[71].mxu1  ;;  %10033 = vmatmul.mubr.msk.f32.gmra.mrb[90].mxu0 %vm17485_vm6, %v2978_v11  ;;  %v10461_v11 = vpack.c.bf16 %v3579_v22, %v3575_v37  ;;  %v3568_v37 = vld [vmem:[%s17407_s5 + $0x50] sm:$0xff] }
 0x968   : > { %v3578_v36 = vld [vmem:[%s17407_s5 + $0xa0] sm:$0xff]  ;;  %v3572_v22 = vld [vmem:[%s17407_s5 + $0x70] sm:$0xff] }
 0x969   : > { %10462 = vmatprep.subr.bf16.mxu1 %v10461_v11  ;;  %v3581_v11 = vld [vmem:[%s17407_s5 + $0xb8] sm:$0xff] }
 0x96a   : > { %v2983_v57 = vpop.f32.mrb[72].mxu1 }
 0x96b   : > { %v2985_v17 = vpop.f32.mrb[73].mxu1  ;;  %10035 = vmatprep.mubr.msk.f32.mxu0 %vm17485_vm6, %v2983_v57  ;;  %v10463_v57 = vpack.c.bf16 %v3578_v36, %v3574_v26  ;;  %v3577_v26 = vld [vmem:[%s17407_s5 + $0x98] sm:$0xff] }
 0x96d   : > { %10464 = vmatpush1.bf16.msra.mxu1 %v10463_v57  ;;  %v12094_v57 = vld [vmem:[%s12209_s18] sm:$0xff] }
 0x96e   : > { %v2988_v46 = vpop.f32.mrb[74].mxu1 }
 0x96f   : > { %v2990_v54 = vpop.f32.mrb[75].mxu1  ;;  %10036 = vmatmul.mubr.msk.f32.gmra.mrb[92].mxu0 %vm17485_vm6, %v2988_v46 }
 0x972   : > { %v2993_v52 = vpop.f32.mrb[76].mxu1 }
 0x973   : > { %v2995_v51 = vpop.f32.mrb[77].mxu1  ;;  %10038 = vmatprep.mubr.msk.f32.mxu0 %vm17485_vm6, %v2993_v52 }
 0x976   : > { %v2998_v38 = vpop.f32.mrb[78].mxu1 }
 0x977   : > { %v3000_v47 = vpop.f32.mrb[79].mxu1  ;;  %10039 = vmatmul.mubr.msk.f32.gmra.mrb[94].mxu0 %vm17485_vm6, %v2998_v38 }
 0x97a   : > { %v3003_v6 = vpop.f32.mrb[80].mxu1 }
 0x97b   : > { %v3005_v41 = vpop.f32.mrb[81].mxu1  ;;  %10041 = vmatprep.mubr.msk.f32.mxu0 %vm17485_vm6, %v3003_v6 }
 0x97e   : > { %v3008_v13 = vpop.f32.mrb[82].mxu1 }
 0x97f   : > { %v3010_v25 = vpop.f32.mrb[83].mxu1  ;;  %10042 = vmatmul.mubr.msk.f32.gmra.mrb[96].mxu0 %vm17485_vm6, %v3008_v13  ;;  %v3583_v13 = vld [vmem:[%s17407_s5 + $0xc8] sm:$0xff] }
 0x980   : > { %v3587_v25 = vld [vmem:[%s17407_s5 + $0xe8] sm:$0xff] }
 0x982   : > { %v3013_v28 = vpop.f32.mrb[84].mxu1 }
 0x983   : > { %v3015_v49 = vpop.f32.mrb[85].mxu1  ;;  %10044 = vmatprep.mubr.msk.f32.mxu0 %vm17485_vm6, %v3013_v28  ;;  %v3582_v28 = vld [vmem:[%s17407_s5 + $0xc0] sm:$0xff] }
 0x984   : > { %v10465_v49 = vpack.c.bf16 %v3587_v25, %v3583_v13 }
 0x986   : > { %v3018_v29 = vpop.f32.mrb[86].mxu1  ;;  %10466 = vmatprep.subr.bf16.mxu1 %v10465_v49  ;;  %v3584_v49 = vld [vmem:[%s17407_s5 + $0xd0] sm:$0xff] }
 0x987   : > { %v3020_v9 = vpop.f32.mrb[87].mxu1  ;;  %10045 = vmatmul.mubr.msk.f32.gmra.mrb[98].mxu0 %vm17485_vm6, %v3018_v29  ;;  %v3586_v29 = vld [vmem:[%s17407_s5 + $0xe0] sm:$0xff] }
 0x98b   : > { %v3023_v0 = vpop.f32.mrb[88].mxu1 }
 0x98c   : > { %v3025_v50 = vpop.f32.mrb[89].mxu1  ;;  %10047 = vmatprep.mubr.msk.f32.mxu0 %vm17485_vm6, %v3023_v0 }
 0x98d   : > { %v10467_v50 = vpack.c.bf16 %v3586_v29, %v3582_v28  ;;  %v3588_v29 = vld [vmem:[%s17407_s5 + $0xf0] sm:$0xff] }
 0x98f   : > { %v3028_v12 = vpop.f32.mrb[90].mxu1  ;;  %10468 = vmatpush1.bf16.msra.mxu1 %v10467_v50 }
 0x990   : > { %v3030_v42 = vpop.f32.mrb[91].mxu1  ;;  %10048 = vmatmul.mubr.msk.f32.gmra.mrb[100].mxu0 %vm17485_vm6, %v3028_v12 }
 0x993   : > { %v3033_v4 = vpop.f32.mrb[92].mxu1 }
 0x994   : > { %v3035_v40 = vpop.f32.mrb[93].mxu1  ;;  %10050 = vmatprep.mubr.msk.f32.mxu0 %vm17485_vm6, %v3033_v4 }
 0x997   : > { %v3038_v34 = vpop.f32.mrb[94].mxu1 }
 0x998   : > { %v3040_v7 = vpop.f32.mrb[95].mxu1  ;;  %10051 = vmatmul.mubr.msk.f32.gmra.mrb[102].mxu0 %vm17485_vm6, %v3038_v34 }
 0x99b   : > { %v3043_v43 = vpop.f32.mrb[96].mxu1 }
 0x99c   : > { %v3045_v63 = vpop.f32.mrb[97].mxu1  ;;  %10053 = vmatprep.mubr.msk.f32.mxu0 %vm17485_vm6, %v3043_v43 }
 0x99f   : > { %v3048_v44 = vpop.f32.mrb[98].mxu1 }
 0x9a0   : > { %v3050_v55 = vpop.f32.mrb[99].mxu1  ;;  %10054 = vmatmul.mubr.msk.f32.gmra.mrb[104].mxu0 %vm17485_vm6, %v3048_v44 }
 0x9a1   : > { %v3561_v55 = vld [vmem:[%s17407_s5 + $0x18] sm:$0xff] }
 0x9a4   : > { %v3053_v24 = vpop.f32.mrb[100].mxu1 }
 0x9a5   : > { %v3055_v53 = vpop.f32.mrb[101].mxu1  ;;  %10056 = vmatprep.mubr.msk.f32.mxu0 %vm17485_vm6, %v3053_v24  ;;  %v3565_v24 = vld [vmem:[%s17407_s5 + $0x38] sm:$0xff] }
 0x9a6   : > { %v10469_v53 = vpack.c.bf16 %v3565_v24, %v3561_v55  ;;  %v3784_v55 = vld [vmem:[%s17409_s7 + $0x20] sm:$0xff] }
 0x9a8   : > { %v3058_v27 = vpop.f32.mrb[102].mxu1  ;;  %10470 = vmatprep.subr.bf16.mxu1 %v10469_v53 }
 0x9a9   : > { %v3060_v10 = vpop.f32.mrb[103].mxu1  ;;  %10057 = vmatmul.mubr.msk.f32.gmra.mrb[106].mxu0 %vm17485_vm6, %v3058_v27 }
 0x9de   : > { %v10013_v61 = vpop.f32.mrb[76].mxu0 }
 0x9df   : > { %3388 = vst.msk [vmem:[#allocation5 + $0x8] sm:$0xff] %vm17485_vm6, %v10013_v61  ;;  %v3228_v1 = vpop.f32.mrb[77].mxu0 }
 0x9e0   : > { %3387 = vst.msk [vmem:[#allocation5] sm:$0xff] %vm17485_vm6, %v3228_v1  ;;  %vm17519_vm6 = vcmask 392544  }
 0x9e2   : > { %v13828_v58 = vpop.f32.mrb[78].mxu0 }
 0x9e3   : > { %v3238_v21 = vpop.f32.mrb[79].mxu0 }
 0x9e4   : > { %3391 = vrot.lane.b32.xlu0 %v3238_v21, %s17512_s19 }
 0x9e6   : > { %v13831_v62 = vpop.f32.mrb[80].mxu0 }
 0x9e7   : > { %v3248_v20 = vpop.f32.mrb[81].mxu0 }
 0x9e8   : > { %3402 = vrot.lane.b32.xlu1 %v3248_v20, %s17505_s17 }
 0xa1a   : > { %v13846_v2 = vpop.f32.mrb[82].mxu0 }
 0xa1b   : > { %v3258_v59 = vpop.f32.mrb[83].mxu0 }
 0xa1c   : > { %3413 = vrot.lane.b32.xlu1 %v3258_v59, %s17503_s24  ;;  %v3564_v59 = vld [vmem:[%s17407_s5 + $0x30] sm:$0xff] }
 0xa22   : > { %v13861_v45 = vpop.f32.mrb[84].mxu0 }
 0xa23   : > { %v3268_v48 = vpop.f32.mrb[85].mxu0 }
 0xa24   : > { %3424 = vrot.lane.b32.xlu0 %v3268_v48, %s17501_s22 }
 0xa2a   : > { %v13864_v39 = vpop.f32.mrb[86].mxu0 }
 0xa2b   : > { %v3278_v33 = vpop.f32.mrb[87].mxu0 }
 0xa2c   : > { %3435 = vrot.lane.b32.xlu1 %v3278_v33, %s17498_s20  ;;  %v17616_v33 = vld [vmem:[#allocation6_spill] sm:$0xff] }
 0xa32   : > { %v13867_v31 = vpop.f32.mrb[88].mxu0 }
 0xa33   : > { %v3288_v5 = vpop.f32.mrb[89].mxu0 }
 0xa34   : > { %3446 = vrot.lane.b32.xlu0 %v3288_v5, %s17479_s16  ;;  %s17490_s16 = smov 52   ;;  %v10473_v5 = vpack.c.bf16 %v3573_v32, %v3569_v35  ;;  %v3794_v32 = vld [vmem:[%s17409_s7 + $0x70] sm:$0xff] }
 0xa3a   : > { %v10034_v17 = vpop.f32.mrb[90].mxu0 }
 0xa3b   : > { %v3298_v46 = vpop.f32.mrb[91].mxu0 }
 0xa3c   : > { %3457 = vrot.lane.b32.xlu1 %v3298_v46, %s17483_s21 }
 0xa42   : > { %v10037_v54 = vpop.f32.mrb[92].mxu0 }
 0xa43   : > { %v3308_v52 = vpop.f32.mrb[93].mxu0 }
 0xa44   : > { %3468 = vrot.lane.b32.xlu0 %v3308_v52, %s17477_s30  ;;  %s17615_s30 = smov 40   ;;  %v10477_v52 = vpack.c.bf16 %v3581_v11, %v3577_v26  ;;  %v3805_v26 = vld [vmem:[%s17409_s7 + $0xc8] sm:$0xff] }
 0xa45   : > { %v3809_v11 = vld [vmem:[%s17409_s7 + $0xe8] sm:$0xff] }
 0xa4a   : > { %v10040_v51 = vpop.f32.mrb[94].mxu0 }
 0xa4b   : > { %v3318_v38 = vpop.f32.mrb[95].mxu0 }
 0xa4c   : > { %3479 = vrot.lane.b32.xlu1 %v3318_v38, %s17496_s23  ;;  %v3580_v38 = vld [vmem:[%s17407_s5 + $0xb0] sm:$0xff] }
 0xa52   : > { %v10043_v47 = vpop.f32.mrb[96].mxu0 }
 0xa53   : > { %v3328_v6 = vpop.f32.mrb[97].mxu0 }
 0xa54   : > { %3490 = vrot.lane.b32.xlu0 %v3328_v6, %s17481_s26  ;;  %v3589_v6 = vld [vmem:[%s17407_s5 + $0xf8] sm:$0xff]  ;;  %s17623_s26 = smov 124  }
 0xa56   : > { %v3392_v41 = vpop.permute.xlu0 %3391 }
 0xa57   : > { %3398 = vst.msk [vmem:[#allocation5] sm:$0xff] %vm3397_vm8, %v3392_v41 }
 0xa5a   : > { %v3403_v9 = vpop.permute.xlu1 %3402  ;;  %v10046_v0 = vpop.f32.mrb[98].mxu0 }
 0xa5b   : > { %3409 = vst.msk [vmem:[#allocation5] sm:$0xff] %vm3408_vm9, %v3403_v9  ;;  %v3338_v12 = vpop.f32.mrb[99].mxu0 }
 0xa5c   : > { %3501 = vrot.lane.b32.xlu1 %v3338_v12, %s17494_s28 }
 0xa63   : > { %v10049_v42 = vpop.f32.mrb[100].mxu0 }
 0xa64   : > { %v3348_v4 = vpop.f32.mrb[101].mxu0 }
 0xa65   : > { %3512 = vrot.lane.b32.xlu0 %v3348_v4, %s17492_s12 }
 0xa6b   : > { %v10052_v40 = vpop.f32.mrb[102].mxu0 }
 0xa6c   : > { %v3358_v34 = vpop.f32.mrb[103].mxu0 }
 0xa6d   : > { %3523 = vrot.lane.b32.xlu1 %v3358_v34, %s17490_s16  ;;  %v3785_v34 = vld [vmem:[%s17409_s7 + $0x28] sm:$0xff] }
 0xa73   : > { %v10055_v7 = vpop.f32.mrb[104].mxu0 }
 0xa74   : > { %v3368_v43 = vpop.f32.mrb[105].mxu0 }
 0xa75   : > { %3534 = vrot.lane.b32.xlu0 %v3368_v43, %s17508_s27 }
 0xa79   : > { %3393 = vrot.lane.b32.xlu0 %v13828_v58, %s17512_s19 }
 0xa7c   : > { %v10058_v63 = vpop.f32.mrb[106].mxu0 }
 0xa7d   : > { %v3378_v44 = vpop.f32.mrb[107].mxu0  ;;  %3415 = vrot.lane.b32.xlu0 %v13846_v2, %s17503_s24  ;;  %s17654_s24 = smov 112  }
 0xa7e   : > { %3545 = vrot.lane.b32.xlu1 %v3378_v44, %s17510_s15  ;;  %v3780_v44 = vld [vmem:[%s17409_s7] sm:$0xff] }
 0xa7f   : > { %v10487_v53 = vpack.c.bf16 %v3784_v55, %v3780_v44  ;;  %v3824_v44 = vld [vmem:[%s17409_s7 + $0x160] sm:$0xff]  ;;  %v3823_v55 = vld [vmem:[%s17409_s7 + $0x158] sm:$0xff] }
 0xa81   : > { %3437 = vrot.lane.b32.xlu0 %v13864_v39, %s17498_s20  ;;  %v10471_v39 = vpack.c.bf16 %v3564_v59, %v3560_v8  ;;  %v3797_v8 = vld [vmem:[%s17409_s7 + $0x88] sm:$0xff]  ;;  %s17659_s20 = smov 92  }
 0xa82   : > { %3404 = vrot.lane.b32.xlu1 %v13831_v62, %s17505_s17  ;;  %v3801_v59 = vld [vmem:[%s17409_s7 + $0xa8] sm:$0xff]  ;;  %s17514_s17 = sshll.u32 %s17894_s14, 6 }
 0xa85   : > { %3459 = vrot.lane.b32.xlu0 %v10034_v17, %s17483_s21  ;;  %s17614_s21 = smov 32  }
 0xa86   : > { %3426 = vrot.lane.b32.xlu1 %v13861_v45, %s17501_s22  ;;  %s17656_s22 = smov 104  }
 0xa89   : > { %3481 = vrot.lane.b32.xlu0 %v10040_v51, %s17496_s23  ;;  %v3576_v51 = vld [vmem:[%s17407_s5 + $0x90] sm:$0xff]  ;;  %s17660_s23 = smov 88  }
 0xa8a   : > { %3448 = vrot.lane.b32.xlu1 %v13867_v31, %s17613_s29  ;;  %v10479_v13 = vpack.c.bf16 %v3580_v38, %v3576_v51 }
 0xa8d   : > { %3503 = vrot.lane.b32.xlu0 %v10046_v0, %s17494_s28  ;;  %v10483_v0 = vpack.c.bf16 %v3588_v29, %v3584_v49  ;;  %v3812_v49 = vld [vmem:[%s17409_s7 + $0x100] sm:$0xff]  ;;  %s17633_s28 = smov 4  }
 0xa8e   : > { %3470 = vrot.lane.b32.xlu1 %v10037_v54, %s17614_s21  ;;  %v3414_v27 = vpop.permute.xlu1 %3413  ;;  %v10475_v54 = vpack.c.bf16 %v3572_v22, %v3568_v37  ;;  %v3798_v22 = vld [vmem:[%s17409_s7 + $0x90] sm:$0xff]  ;;  %v3816_v29 = vld [vmem:[%s17409_s7 + $0x120] sm:$0xff] }
 0xa8f   : > { %3420 = vst.msk [vmem:[#allocation5] sm:$0xff] %vm3419_vm10, %v3414_v27 }
 0xa91   : > { %3525 = vrot.lane.b32.xlu0 %v10052_v40, %s17490_s16  ;;  %v3781_v40 = vld [vmem:[%s17409_s7 + $0x8] sm:$0xff]  ;;  %s17622_s16 = smov 64  }
 0xa92   : > { %3492 = vrot.lane.b32.xlu1 %v10043_v47, %s17615_s30  ;;  %v3585_v47 = vld [vmem:[%s17407_s5 + $0xd8] sm:$0xff]  ;;  %v10485_v43 = vpack.c.bf16 %v3785_v34, %v3781_v40  ;;  %v3825_v40 = vld [vmem:[%s17409_s7 + $0x168] sm:$0xff] }
 0xa93   : > { %v10481_v28 = vpack.c.bf16 %v3589_v6, %v3585_v47  ;;  %v3806_v47 = vld [vmem:[%s17409_s7 + $0xd0] sm:$0xff]  ;;  %v3813_v6 = vld [vmem:[%s17409_s7 + $0x108] sm:$0xff] }
 0xa94   : > { %10486 = vmatprep.subr.bf16.mxu0 %v10485_v43 }
 0xa95   : > { %3547 = vrot.lane.b32.xlu0 %v10058_v63, %s17510_s15  ;;  %v3787_v63 = vld [vmem:[%s17409_s7 + $0x38] sm:$0xff]  ;;  %10488 = vmatpush1.bf16.msra.mxu0 %v10487_v53 }
 0xa96   : > { %3514 = vrot.lane.b32.xlu1 %v10049_v42, %s17492_s12  ;;  %v3425_v10 = vpop.permute.xlu0 %3424  ;;  %s17636_s12 = smov 60  }
 0xa97   : > { %3431 = vst.msk [vmem:[#allocation5] sm:$0xff] %vm3430_vm11, %v3425_v10  ;;  %v3789_v10 = vld [vmem:[%s17409_s7 + $0x48] sm:$0xff] }
 0xa9a   : > { %3536 = vrot.lane.b32.xlu1 %v10055_v7, %s17508_s27  ;;  %v3783_v7 = vld [vmem:[%s17409_s7 + $0x18] sm:$0xff] }
 0xa9b   : > { %v10613_v24 = vpack.c.bf16 %v3787_v63, %v3783_v7  ;;  %v3818_v7 = vld [vmem:[%s17409_s7 + $0x130] sm:$0xff]  ;;  %v3820_v63 = vld [vmem:[%s17409_s7 + $0x140] sm:$0xff] }
 0xa9c   : > { %v10507_v53 = vpack.c.bf16 %v3824_v44, %v3820_v63  ;;  %v3858_v63 = vld [vmem:[%s17409_s7 + $0x270] sm:$0xff]  ;;  %v3863_v44 = vld [vmem:[%s17409_s7 + $0x298] sm:$0xff] }
 0xa9e   : > { %v3436_v61 = vpop.permute.xlu1 %3435 }
 0xa9f   : > { %3442 = vst.msk [vmem:[#allocation5] sm:$0xff] %vm3441_vm12, %v3436_v61  ;;  %v3793_v61 = vld [vmem:[%s17409_s7 + $0x68] sm:$0xff] }
 0xaa6   : > { %v3447_v1 = vpop.permute.xlu0 %3446 }
 0xaa7   : > { %3453 = vst.msk [vmem:[#allocation5] sm:$0xff] %vm3452_vm13, %v3447_v1  ;;  %v17618_v1 = vld [vmem:[#allocation7_spill] sm:$0xff] }
 0xaae   : > { %v3458_v58 = vpop.permute.xlu1 %3457 }
 0xaaf   : > { %3464 = vst.msk [vmem:[#allocation5] sm:$0xff] %vm17500_vm14, %v3458_v58 }
 0xab6   : > { %v3469_v21 = vpop.permute.xlu0 %3468 }
 0xab7   : > { %3475 = vst.msk [vmem:[#allocation5] sm:$0xff] %vm3474_vm15, %v3469_v21  ;;  %v3782_v21 = vld [vmem:[%s17409_s7 + $0x10] sm:$0xff] }
 0xabe   : > { %v3480_v62 = vpop.permute.xlu1 %3479 }
 0xabf   : > { %3486 = vst.msk [vmem:[#allocation5] sm:$0xff] %vm17520_vm0, %v3480_v62  ;;  %v3786_v62 = vld [vmem:[%s17409_s7 + $0x30] sm:$0xff] }
 0xac6   : > { %v3491_v20 = vpop.permute.xlu0 %3490 }
 0xac7   : > { %3497 = vst.msk [vmem:[#allocation5] sm:$0xff] %vm17489_vm1, %v3491_v20  ;;  %vm17507_vm1 = vcmask 523744   ;;  %v10489_v20 = vpack.c.bf16 %v3793_v61, %v3789_v10  ;;  %v3822_v10 = vld [vmem:[%s17409_s7 + $0x150] sm:$0xff]  ;;  %v3829_v61 = vld [vmem:[%s17409_s7 + $0x188] sm:$0xff] }
 0xac9   : > { %10490 = vmatprep.subr.bf16.mxu0 %v10489_v20  ;;  %v3828_v20 = vld [vmem:[%s17409_s7 + $0x180] sm:$0xff] }
 0xace   : > { %v3502_v3 = vpop.permute.xlu1 %3501 }
 0xacf   : > { %3508 = vst.msk [vmem:[#allocation5] sm:$0xff] %vm17519_vm6, %v3502_v3  ;;  %v3788_v3 = vld [vmem:[%s17409_s7 + $0x40] sm:$0xff] }
 0xad7   : > { %v3513_v18 = vpop.permute.xlu0 %3512 }
 0xad8   : > { %3519 = vst.msk [vmem:[#allocation5] sm:$0xff] %vm17518_vm5, %v3513_v18  ;;  %v3791_v18 = vld [vmem:[%s17409_s7 + $0x58] sm:$0xff] }
 0xadf   : > { %v3524_v19 = vpop.permute.xlu1 %3523 }
 0xae0   : > { %3530 = vst.msk [vmem:[#allocation5] sm:$0xff] %vm17517_vm4, %v3524_v19  ;;  %v3795_v19 = vld [vmem:[%s17409_s7 + $0x78] sm:$0xff] }
 0xae1   : > { %v10617_v35 = vpack.c.bf16 %v3795_v19, %v3791_v18  ;;  %v3831_v18 = vld [vmem:[%s17409_s7 + $0x198] sm:$0xff] }
 0xae2   : > { %v3835_v19 = vld [vmem:[%s17409_s7 + $0x1b8] sm:$0xff] }
 0xae7   : > { %v3535_v15 = vpop.permute.xlu0 %3534 }
 0xae8   : > { %3541 = vst.msk [vmem:[#allocation5] sm:$0xff] %vm17515_vm2, %v3535_v15  ;;  %v3792_v15 = vld [vmem:[%s17409_s7 + $0x60] sm:$0xff] }
 0xaeb   : > { %v3394_v60 = vpop.permute.xlu0 %3393 }
 0xaec   : > { %3399 = vst.msk [vmem:[#allocation5 + $0x8] sm:$0xff] %vm3397_vm8, %v3394_v60  ;;  %v12095_v60 = vld [vmem:[%s12209_s18 + $0x8] sm:$0xff]  ;;  %s17661_s18 = smov 84  }
 0xaef   : > { %v3416_v56 = vpop.permute.xlu0 %3415 }
 0xaf0   : > { %v3546_v2 = vpop.permute.xlu1 %3545 }
 0xaf1   : > { %3552 = vst.msk [vmem:[#allocation5] sm:$0xff] %vm17507_vm1, %v3546_v2  ;;  %v10491_v2 = vpack.c.bf16 %v3792_v15, %v3788_v3  ;;  %v3832_v3 = vld [vmem:[%s17409_s7 + $0x1a0] sm:$0xff] }
 0xaf2   : > { %v10511_v15 = vpack.c.bf16 %v3832_v3, %v3828_v20  ;;  %v3866_v20 = vld [vmem:[%s17409_s7 + $0x2b0] sm:$0xff]  ;;  %v3871_v3 = vld [vmem:[%s17409_s7 + $0x2d8] sm:$0xff] }
 0xaf3   : > { %v3438_v30 = vpop.permute.xlu0 %3437  ;;  %10492 = vmatpush1.bf16.msra.mxu0 %v10491_v2  ;;  %v3837_v2 = vld [vmem:[%s17409_s7 + $0x1c8] sm:$0xff] }
 0xaf4   : > { %v3405_v14 = vpop.permute.xlu1 %3404 }
 0xaf5   : > { %3410 = vst.msk [vmem:[#allocation5 + $0x8] sm:$0xff] %vm3408_vm9, %v3405_v14  ;;  %v3790_v14 = vld [vmem:[%s17409_s7 + $0x50] sm:$0xff] }
 0xaf6   : > { %3421 = vst.msk [vmem:[#allocation5 + $0x8] sm:$0xff] %vm3419_vm10, %v3416_v56  ;;  %v10619_v37 = vpack.c.bf16 %v3794_v32, %v3790_v14  ;;  %v10637_v14 = vpack.c.bf16 %v3835_v19, %v3831_v18  ;;  %v3840_v32 = vld [vmem:[%s17409_s7 + $0x1e0] sm:$0xff]  ;;  %v3875_v19 = vld [vmem:[%s17409_s7 + $0x2f8] sm:$0xff] }
 0xaf7   : > { %v3460_v16 = vpop.permute.xlu0 %3459 }
 0xaf8   : > { %v3427_v45 = vpop.permute.xlu1 %3426  ;;  %v3554_v48 = vld [vmem:[#allocation5] sm:$0xff] }
 0xaf9   : > { %3432 = vst.msk [vmem:[#allocation5 + $0x8] sm:$0xff] %vm3430_vm11, %v3427_v45  ;;  %v13962_v31 = vadd.f32 %v3554_v48, %v17616_v33  ;;  %v3796_v45 = vld [vmem:[%s17409_s7 + $0x80] sm:$0xff]  ;;  %v3803_v33 = vld [vmem:[%s17409_s7 + $0xb8] sm:$0xff] }
 0xafa   : > { %3443 = vst.msk [vmem:[#allocation5 + $0x8] sm:$0xff] %vm3441_vm12, %v3438_v30  ;;  %v10615_v30 = vpack.c.bf16 %v3786_v62, %v3782_v21  ;;  %v3800_v48 = vld [vmem:[%s17409_s7 + $0xa0] sm:$0xff]  ;;  %v3826_v21 = vld [vmem:[%s17409_s7 + $0x170] sm:$0xff] }
 0xafb   : > { %8666 = vmatmul.mubr.msk.f32.vlgmr.msra.gmra.mrb[104].mxu1 %vm17516_vm3, %v13962_v31  ;;  %v3482_v36 = vpop.permute.xlu0 %3481  ;;  %v4374_v17 = vadd.f32 %v12094_v57, %v13962_v31  ;;  %v10497_v57 = vpack.c.bf16 %v3809_v11, %v3805_v26  ;;  %v3844_v26 = vld [vmem:[%s17409_s7 + $0x200] sm:$0xff] }
 0xafc   : > { %v3449_v46 = vpop.permute.xlu1 %3448  ;;  %10472 = vmatpush1.bf16.msra.mxu1 %v10471_v39  ;;  %3688 = vmatprep.mubr.f32.mxu1 %v17612_v23  ;;  %v3799_v39 = vld [vmem:[%s17409_s7 + $0x98] sm:$0xff]  ;;  %v3848_v11 = vld [vmem:[%s17409_s7 + $0x220] sm:$0xff] }
 0xafd   : > { %3454 = vst.msk [vmem:[#allocation5 + $0x8] sm:$0xff] %vm3452_vm13, %v3449_v46  ;;  %4378 = vrot.lane.b32.xlu1 %v4374_v17, %s17512_s19  ;;  %10474 = vmatprep.subr.bf16.mxu1 %v10473_v5  ;;  %v10495_v5 = vpack.c.bf16 %v3800_v48, %v3796_v45  ;;  %v3804_v17 = vld [vmem:[%s17409_s7 + $0xc0] sm:$0xff]  ;;  %v3843_v45 = vld [vmem:[%s17409_s7 + $0x1f8] sm:$0xff] }
 0xafe   : > { %3465 = vst.msk [vmem:[#allocation5 + $0x8] sm:$0xff] %vm17500_vm14, %v3460_v16  ;;  %vm17617_vm14 = vcmask 359744   ;;  %v10493_v16 = vpack.c.bf16 %v3801_v59, %v3797_v8  ;;  %v3808_v46 = vld [vmem:[%s17409_s7 + $0xe0] sm:$0xff]  ;;  %v3834_v8 = vld [vmem:[%s17409_s7 + $0x1b0] sm:$0xff] }
 0xaff   : > { %v3504_v25 = vpop.permute.xlu0 %3503  ;;  %v10499_v51 = vpack.c.bf16 %v3808_v46, %v3804_v17  ;;  %v3853_v17 = vld [vmem:[%s17409_s7 + $0x248] sm:$0xff] }
 0xb00   : > { %v3471_v41 = vpop.permute.xlu1 %3470  ;;  %10476 = vmatpush1.bf16.msra.mxu1 %v10475_v54  ;;  %10494 = vmatprep.subr.bf16.mxu0 %v10493_v16  ;;  %v3807_v54 = vld [vmem:[%s17409_s7 + $0xd8] sm:$0xff]  ;;  %v3857_v46 = vld [vmem:[%s17409_s7 + $0x268] sm:$0xff] }
 0xb01   : > { %3476 = vst.msk [vmem:[#allocation5 + $0x8] sm:$0xff] %vm3474_vm15, %v3471_v41  ;;  %10478 = vmatprep.subr.bf16.mxu1 %v10477_v52  ;;  %10496 = vmatpush1.bf16.msra.mxu0 %v10495_v5  ;;  %v3811_v52 = vld [vmem:[%s17409_s7 + $0xf8] sm:$0xff]  ;;  %v3817_v41 = vld [vmem:[%s17409_s7 + $0x128] sm:$0xff] }
 0xb02   : > { %3487 = vst.msk [vmem:[#allocation5 + $0x8] sm:$0xff] %vm17520_vm0, %v3482_v36  ;;  %v10621_v36 = vpack.c.bf16 %v3803_v33, %v3799_v39  ;;  %10498 = vmatprep.subr.bf16.mxu0 %v10497_v57  ;;  %v3839_v16 = vld [vmem:[%s17409_s7 + $0x1d8] sm:$0xff]  ;;  %v3845_v39 = vld [vmem:[%s17409_s7 + $0x208] sm:$0xff]  ;;  %v10519_v57 = vpack.c.bf16 %v3848_v11, %v3844_v26  ;;  %v3878_v11 = vld [vmem:[%s17409_s7 + $0x310] sm:$0xff] }
 0xb03   : > { %v3526_v50 = vpop.permute.xlu0 %3525  ;;  %v3849_v33 = vld [vmem:[%s17409_s7 + $0x228] sm:$0xff] }
 0xb04   : > { %v3493_v9 = vpop.permute.xlu1 %3492  ;;  %10480 = vmatpush1.bf16.msra.mxu1 %v10479_v13  ;;  %v10625_v13 = vpack.c.bf16 %v3811_v52, %v3807_v54  ;;  %v3847_v54 = vld [vmem:[%s17409_s7 + $0x218] sm:$0xff] }
 0xb05   : > { %3498 = vst.msk [vmem:[#allocation5 + $0x8] sm:$0xff] %vm17617_vm14, %v3493_v9  ;;  %10482 = vmatprep.subr.bf16.mxu1 %v10481_v28  ;;  %10500 = vmatpush1.bf16.msra.mxu0 %v10499_v51  ;;  %v10501_v28 = vpack.c.bf16 %v3817_v41, %v3813_v6  ;;  %v3815_v9 = vld [vmem:[%s17409_s7 + $0x118] sm:$0xff]  ;;  %v10521_v51 = vpack.c.bf16 %v3857_v46, %v3853_v17  ;;  %v3861_v41 = vld [vmem:[%s17409_s7 + $0x288] sm:$0xff]  ;;  %vm17619_vm14 = vcmask 556064  }
 0xb06   : > { %3509 = vst.msk [vmem:[#allocation5 + $0x8] sm:$0xff] %vm17519_vm6, %v3504_v25  ;;  %v3810_v25 = vld [vmem:[%s17409_s7 + $0xf0] sm:$0xff]  ;;  %v3851_v52 = vld [vmem:[%s17409_s7 + $0x238] sm:$0xff] }
 0xb07   : > { %v3548_v4 = vpop.permute.xlu0 %3547  ;;  %10502 = vmatprep.subr.bf16.mxu0 %v10501_v28  ;;  %v3846_v28 = vld [vmem:[%s17409_s7 + $0x210] sm:$0xff]  ;;  %v3891_v17 = vld [vmem:[%s17409_s7 + $0x378] sm:$0xff] }
 0xb08   : > { %v3515_v12 = vpop.permute.xlu1 %3514  ;;  %10484 = vmatpush1.bf16.msra.mxu1 %v10483_v0  ;;  %v3819_v0 = vld [vmem:[%s17409_s7 + $0x138] sm:$0xff] }
 0xb09   : > { %3520 = vst.msk [vmem:[#allocation5 + $0x8] sm:$0xff] %vm17518_vm5, %v3515_v12  ;;  %10614 = vmatprep.subr.bf16.mxu1 %v10613_v24  ;;  %v10627_v12 = vpack.c.bf16 %v3810_v25, %v3806_v47  ;;  %v10629_v34 = vpack.c.bf16 %v3819_v0, %v3815_v9  ;;  %v3827_v24 = vld [vmem:[%s17409_s7 + $0x178] sm:$0xff]  ;;  %v3856_v47 = vld [vmem:[%s17409_s7 + $0x260] sm:$0xff]  ;;  %v10645_v25 = vpack.c.bf16 %v3851_v52, %v3847_v54 }
 0xb0a   : > { %3531 = vst.msk [vmem:[#allocation5 + $0x8] sm:$0xff] %vm17517_vm4, %v3526_v50  ;;  %v10503_v50 = vpack.c.bf16 %v3816_v29, %v3812_v49  ;;  %v3850_v49 = vld [vmem:[%s17409_s7 + $0x230] sm:$0xff]  ;;  %v3855_v29 = vld [vmem:[%s17409_s7 + $0x258] sm:$0xff]  ;;  %v3892_v54 = vld [vmem:[%s17409_s7 + $0x380] sm:$0xff] }
 0xb0b   : > { %v3859_v0 = vld [vmem:[%s17409_s7 + $0x278] sm:$0xff]  ;;  %v3896_v52 = vld [vmem:[%s17409_s7 + $0x3a0] sm:$0xff] }
 0xb0c   : > { %v3537_v42 = vpop.permute.xlu1 %3536  ;;  %10504 = vmatpush1.bf16.msra.mxu0 %v10503_v50 }
 0xb0d   : > { %3542 = vst.msk [vmem:[#allocation5 + $0x8] sm:$0xff] %vm17515_vm2, %v3537_v42  ;;  %v3814_v42 = vld [vmem:[%s17409_s7 + $0x110] sm:$0xff] }
 0xb0e   : > { %3553 = vst.msk [vmem:[#allocation5 + $0x8] sm:$0xff] %vm17507_vm1, %v3548_v4  ;;  %v3821_v4 = vld [vmem:[%s17409_s7 + $0x148] sm:$0xff]  ;;  %vm17621_vm1 = vmmov %vm17619_vm14 }
 0xb0f   : > { %v10505_v43 = vpack.c.bf16 %v3825_v40, %v3821_v4  ;;  %v3869_v4 = vld [vmem:[%s17409_s7 + $0x2c8] sm:$0xff] }
 0xb10   : > { %v3873_v40 = vld [vmem:[%s17409_s7 + $0x2e8] sm:$0xff] }
 0xb11   : > { %10506 = vmatprep.subr.bf16.mxu0 %v10505_v43  ;;  %v3854_v43 = vld [vmem:[%s17409_s7 + $0x250] sm:$0xff] }
 0xb12   : > { %10508 = vmatpush1.bf16.msra.mxu0 %v10507_v53  ;;  %v10529_v53 = vpack.c.bf16 %v3873_v40, %v3869_v4  ;;  %v3907_v4 = vld [vmem:[%s17409_s7 + $0x3f8] sm:$0xff]  ;;  %v3900_v40 = vld [vmem:[%s17409_s7 + $0x3c0] sm:$0xff] }
 0xb15   : > { %v3555_v27 = vld [vmem:[#allocation5 + $0x8] sm:$0xff] }
 0xb16   : > { %v3557_v58 = vadd.f32 %v3555_v27, %v17618_v1  ;;  %v10631_v27 = vpack.c.bf16 %v3818_v7, %v3814_v42  ;;  %v3833_v1 = vld [vmem:[%s17409_s7 + $0x1a8] sm:$0xff]  ;;  %v3864_v42 = vld [vmem:[%s17409_s7 + $0x2a0] sm:$0xff]  ;;  %v10649_v7 = vpack.c.bf16 %v3859_v0, %v3855_v29  ;;  %v3898_v29 = vld [vmem:[%s17409_s7 + $0x3b0] sm:$0xff] }
 0xb17   : > { %v10509_v62 = vpack.c.bf16 %v3833_v1, %v3829_v61  ;;  %v3877_v61 = vld [vmem:[%s17409_s7 + $0x308] sm:$0xff] }
 0xb18   : > { %8667 = vmatmul.mubr.msk.f32.gmra.mrb[106].mxu1 %vm17516_vm3, %v3557_v58  ;;  %v4375_v56 = vadd.f32 %v12095_v60, %v3557_v58  ;;  %v10635_v60 = vpack.c.bf16 %v3826_v21, %v3822_v10  ;;  %v3872_v10 = vld [vmem:[%s17409_s7 + $0x2e0] sm:$0xff]  ;;  %v3881_v1 = vld [vmem:[%s17409_s7 + $0x328] sm:$0xff] }
 0xb19   : > { %3759 = vmatprep.mubr.f32.mxu1 %v17612_v23  ;;  %10510 = vmatprep.subr.bf16.mxu0 %v10509_v62  ;;  %v3862_v62 = vld [vmem:[%s17409_s7 + $0x290] sm:$0xff]  ;;  %v3901_v0 = vld [vmem:[%s17409_s7 + $0x3c8] sm:$0xff] }
 0xb1a   : > { %4380 = vrot.lane.b32.xlu0 %v4375_v56, %s17512_s19  ;;  %v3830_v56 = vld [vmem:[%s17409_s7 + $0x190] sm:$0xff]  ;;  %10512 = vmatpush1.bf16.msra.mxu0 %v10511_v15  ;;  %v10533_v15 = vpack.c.bf16 %v3881_v1, %v3877_v61  ;;  %v3915_v61 = vld [vmem:[%s17409_s7 + $0x438] sm:$0xff]  ;;  %s17637_s19 = smov 56  }
 0xb1b   : > { %v10639_v5 = vpack.c.bf16 %v3834_v8, %v3830_v56  ;;  %v3880_v56 = vld [vmem:[%s17409_s7 + $0x320] sm:$0xff]  ;;  %v10657_v8 = vpack.c.bf16 %v3875_v19, %v3871_v3 }
 0xb1c   : > { %8668 = vmatmul.mubr.msk.f32.vlgmr.msra.gmra.mrb[108].mxu1 %vm17516_vm3, %v13962_v31  ;;  %v3802_v31 = vld [vmem:[%s17409_s7 + $0xb0] sm:$0xff] }
 0xb1d   : > { %3765 = vmatprep.mubr.f32.mxu1 %v17612_v23  ;;  %10616 = vmatpush1.bf16.msra.mxu1 %v10615_v30  ;;  %v10623_v38 = vpack.c.bf16 %v3802_v31, %v3798_v22  ;;  %v3841_v30 = vld [vmem:[%s17409_s7 + $0x1e8] sm:$0xff]  ;;  %v10517_v22 = vpack.c.bf16 %v3849_v33, %v3845_v39  ;;  %v3842_v31 = vld [vmem:[%s17409_s7 + $0x1f0] sm:$0xff]  ;;  %v3884_v39 = vld [vmem:[%s17409_s7 + $0x340] sm:$0xff] }
 0xb1e   : > { %10618 = vmatprep.subr.bf16.mxu1 %v10617_v35  ;;  %v10513_v59 = vpack.c.bf16 %v3841_v30, %v3837_v2  ;;  %v3836_v35 = vld [vmem:[%s17409_s7 + $0x1c0] sm:$0xff]  ;;  %v3885_v2 = vld [vmem:[%s17409_s7 + $0x348] sm:$0xff] }
 0xb1f   : > { %v10515_v48 = vpack.c.bf16 %v3840_v32, %v3836_v35  ;;  %v3889_v30 = vld [vmem:[%s17409_s7 + $0x368] sm:$0xff]  ;;  %v3874_v35 = vld [vmem:[%s17409_s7 + $0x2f0] sm:$0xff]  ;;  %v3879_v32 = vld [vmem:[%s17409_s7 + $0x318] sm:$0xff] }
 0xb20   : > { %8669 = vmatmul.mubr.msk.f32.gmra.mrb[110].mxu1 %vm17516_vm3, %v3557_v58  ;;  %v10633_v58 = vpack.c.bf16 %v3827_v24, %v3823_v55  ;;  %10514 = vmatprep.subr.bf16.mxu0 %v10513_v59  ;;  %v3867_v24 = vld [vmem:[%s17409_s7 + $0x2b8] sm:$0xff]  ;;  %v3870_v59 = vld [vmem:[%s17409_s7 + $0x2d0] sm:$0xff]  ;;  %v3888_v33 = vld [vmem:[%s17409_s7 + $0x360] sm:$0xff] }
 0xb21   : > { %10620 = vmatpush1.bf16.msra.mxu1 %v10619_v37  ;;  %v3838_v37 = vld [vmem:[%s17409_s7 + $0x1d0] sm:$0xff]  ;;  %10516 = vmatpush1.bf16.msra.mxu0 %v10515_v48  ;;  %v10653_v21 = vpack.c.bf16 %v3867_v24, %v3863_v44  ;;  %v10537_v48 = vpack.c.bf16 %v3889_v30, %v3885_v2  ;;  %v3909_v24 = vld [vmem:[%s17409_s7 + $0x408] sm:$0xff] }
 0xb22   : > { %10622 = vmatprep.subr.bf16.mxu1 %v10621_v36  ;;  %v10641_v36 = vpack.c.bf16 %v3843_v45, %v3839_v16  ;;  %10518 = vmatprep.subr.bf16.mxu0 %v10517_v22  ;;  %v10643_v6 = vpack.c.bf16 %v3842_v31, %v3838_v37  ;;  %v3883_v45 = vld [vmem:[%s17409_s7 + $0x338] sm:$0xff]  ;;  %v3897_v37 = vld [vmem:[%s17409_s7 + $0x3a8] sm:$0xff]  ;;  %v10659_v22 = vpack.c.bf16 %v3874_v35, %v3870_v59  ;;  %v14444_v35 = vld [vmem:[%s17408_s6] sm:$0xf] }
 0xb23   : > { %v10661_v26 = vpack.c.bf16 %v3883_v45, %v3879_v32  ;;  %v3887_v31 = vld [vmem:[%s17409_s7 + $0x358] sm:$0xff] }
 0xb25   : > { %10624 = vmatpush1.bf16.msra.mxu1 %v10623_v38  ;;  %v3852_v38 = vld [vmem:[%s17409_s7 + $0x240] sm:$0xff]  ;;  %10520 = vmatpush1.bf16.msra.mxu0 %v10519_v57  ;;  %v10539_v57 = vpack.c.bf16 %v3888_v33, %v3884_v39 }
 0xb26   : > { %10626 = vmatprep.subr.bf16.mxu1 %v10625_v13  ;;  %v3865_v13 = vld [vmem:[%s17409_s7 + $0x2a8] sm:$0xff]  ;;  %v10523_v9 = vpack.c.bf16 %v3856_v47, %v3852_v38  ;;  %10522 = vmatprep.subr.bf16.mxu0 %v10521_v51  ;;  %v10665_v38 = vpack.c.bf16 %v3891_v17, %v3887_v31  ;;  %v3886_v47 = vld [vmem:[%s17409_s7 + $0x350] sm:$0xff]  ;;  %v3908_v39 = vld [vmem:[%s17409_s7 + $0x400] sm:$0xff] }
 0xb27   : > { %v10525_v50 = vpack.c.bf16 %v3865_v13, %v3861_v41  ;;  %v10543_v41 = vpack.c.bf16 %v3896_v52, %v3892_v54  ;;  %v3895_v13 = vld [vmem:[%s17409_s7 + $0x398] sm:$0xff]  ;;  %v3912_v33 = vld [vmem:[%s17409_s7 + $0x420] sm:$0xff]  ;;  %v3921_v31 = vld [vmem:[%s17409_s7 + $0x468] sm:$0xff] }
 0xb28   : > { %v3923_v17 = vld [vmem:[%s17409_s7 + $0x478] sm:$0xff]  ;;  %v10551_v54 = vpack.c.bf16 %v3912_v33, %v3908_v39  ;;  %v3949_v39 = vld [vmem:[%s17409_s7 + $0x548] sm:$0xff] }
 0xb29   : > { %10628 = vmatpush1.bf16.msra.mxu1 %v10627_v12  ;;  %v3860_v12 = vld [vmem:[%s17409_s7 + $0x280] sm:$0xff]  ;;  %10524 = vmatpush1.bf16.msra.mxu0 %v10523_v9  ;;  %v3953_v33 = vld [vmem:[%s17409_s7 + $0x568] sm:$0xff] }
 0xb2a   : > { %10630 = vmatprep.subr.bf16.mxu1 %v10629_v34  ;;  %v10647_v34 = vpack.c.bf16 %v3850_v49, %v3846_v28  ;;  %v10527_v55 = vpack.c.bf16 %v3864_v42, %v3860_v12  ;;  %10526 = vmatprep.subr.bf16.mxu0 %v10525_v50  ;;  %v3894_v49 = vld [vmem:[%s17409_s7 + $0x390] sm:$0xff]  ;;  %v3905_v50 = vld [vmem:[%s17409_s7 + $0x3e8] sm:$0xff]  ;;  %v3903_v12 = vld [vmem:[%s17409_s7 + $0x3d8] sm:$0xff] }
 0xb2b   : > { %v10545_v42 = vpack.c.bf16 %v3905_v50, %v3901_v0  ;;  %v10673_v44 = vpack.c.bf16 %v3907_v4, %v3903_v12  ;;  %v3924_v12 = vld [vmem:[%s17409_s7 + $0x480] sm:$0xff] }
 0xb2d   : > { %10632 = vmatpush1.bf16.msra.mxu1 %v10631_v27  ;;  %v3868_v27 = vld [vmem:[%s17409_s7 + $0x2c0] sm:$0xff]  ;;  %10528 = vmatpush1.bf16.msra.mxu0 %v10527_v55  ;;  %v3906_v55 = vld [vmem:[%s17409_s7 + $0x3f0] sm:$0xff] }
 0xb2e   : > { %10634 = vmatprep.subr.bf16.mxu1 %v10633_v58  ;;  %v10651_v58 = vpack.c.bf16 %v3858_v63, %v3854_v43  ;;  %v10531_v18 = vpack.c.bf16 %v3872_v10, %v3868_v27  ;;  %10530 = vmatprep.subr.bf16.mxu0 %v10529_v53  ;;  %v10671_v43 = vpack.c.bf16 %v3898_v29, %v3894_v49  ;;  %v3902_v63 = vld [vmem:[%s17409_s7 + $0x3d0] sm:$0xff]  ;;  %v3913_v53 = vld [vmem:[%s17409_s7 + $0x428] sm:$0xff]  ;;  %v3911_v10 = vld [vmem:[%s17409_s7 + $0x418] sm:$0xff] }
 0xb2f   : > { %v10549_v27 = vpack.c.bf16 %v3913_v53, %v3909_v24  ;;  %v10675_v1 = vpack.c.bf16 %v3906_v55, %v3902_v63  ;;  %v3929_v49 = vld [vmem:[%s17409_s7 + $0x4a8] sm:$0xff]  ;;  %v3927_v29 = vld [vmem:[%s17409_s7 + $0x498] sm:$0xff] }
 0xb30   : > { %v3937_v63 = vld [vmem:[%s17409_s7 + $0x4e8] sm:$0xff]  ;;  %v3939_v55 = vld [vmem:[%s17409_s7 + $0x4f8] sm:$0xff] }
 0xb31   : > { %10636 = vmatpush1.bf16.msra.mxu1 %v10635_v60  ;;  %v3876_v60 = vld [vmem:[%s17409_s7 + $0x300] sm:$0xff]  ;;  %10532 = vmatpush1.bf16.msra.mxu0 %v10531_v18 }
 0xb32   : > { %10638 = vmatprep.subr.bf16.mxu1 %v10637_v14  ;;  %v10655_v14 = vpack.c.bf16 %v3866_v20, %v3862_v62  ;;  %v10535_v16 = vpack.c.bf16 %v3880_v56, %v3876_v60  ;;  %10534 = vmatprep.subr.bf16.mxu0 %v10533_v15 }
 0xb35   : > { %10640 = vmatpush1.bf16.msra.mxu1 %v10639_v5  ;;  %v3893_v5 = vld [vmem:[%s17409_s7 + $0x388] sm:$0xff]  ;;  %10536 = vmatpush1.bf16.msra.mxu0 %v10535_v16 }
 0xb36   : > { %10642 = vmatprep.subr.bf16.mxu1 %v10641_v36  ;;  %v3882_v36 = vld [vmem:[%s17409_s7 + $0x330] sm:$0xff]  ;;  %10538 = vmatprep.subr.bf16.mxu0 %v10537_v48  ;;  %v10541_v46 = vpack.c.bf16 %v3897_v37, %v3893_v5 }
 0xb37   : > { %v10663_v51 = vpack.c.bf16 %v3882_v36, %v3878_v11  ;;  %v3917_v11 = vld [vmem:[%s17409_s7 + $0x448] sm:$0xff] }
 0xb39   : > { %10644 = vmatpush1.bf16.msra.mxu1 %v10643_v6  ;;  %10540 = vmatpush1.bf16.msra.mxu0 %v10539_v57  ;;  %v3890_v6 = vld [vmem:[%s17409_s7 + $0x370] sm:$0xff]  ;;  %v3919_v57 = vld [vmem:[%s17409_s7 + $0x458] sm:$0xff] }
 0xb3a   : > { %10646 = vmatprep.subr.bf16.mxu1 %v10645_v25  ;;  %10542 = vmatprep.subr.bf16.mxu0 %v10541_v46  ;;  %v3899_v25 = vld [vmem:[%s17409_s7 + $0x3b8] sm:$0xff]  ;;  %v10667_v28 = vpack.c.bf16 %v3890_v6, %v3886_v47  ;;  %v10553_v6 = vpack.c.bf16 %v3921_v31, %v3917_v11  ;;  %v3948_v11 = vld [vmem:[%s17409_s7 + $0x540] sm:$0xff]  ;;  %v10569_v31 = vpack.c.bf16 %v3953_v33, %v3949_v39 }
 0xb3b   : > { %v10669_v9 = vpack.c.bf16 %v3899_v25, %v3895_v13  ;;  %v3918_v13 = vld [vmem:[%s17409_s7 + $0x450] sm:$0xff] }
 0xb3c   : > { %v3922_v25 = vld [vmem:[%s17409_s7 + $0x470] sm:$0xff] }
 0xb3d   : > { %10648 = vmatpush1.bf16.msra.mxu1 %v10647_v34  ;;  %10544 = vmatpush1.bf16.msra.mxu0 %v10543_v41  ;;  %v3904_v34 = vld [vmem:[%s17409_s7 + $0x3e0] sm:$0xff]  ;;  %v10681_v41 = vpack.c.bf16 %v3923_v17, %v3919_v57  ;;  %v10683_v50 = vpack.c.bf16 %v3922_v25, %v3918_v13  ;;  %v3950_v17 = vld [vmem:[%s17409_s7 + $0x550] sm:$0xff] }
 0xb3e   : > { %10650 = vmatprep.subr.bf16.mxu1 %v10649_v7  ;;  %v10547_v7 = vpack.c.bf16 %v3904_v34, %v3900_v40  ;;  %10546 = vmatprep.subr.bf16.mxu0 %v10545_v42  ;;  %v3928_v42 = vld [vmem:[%s17409_s7 + $0x4a0] sm:$0xff]  ;;  %v3926_v34 = vld [vmem:[%s17409_s7 + $0x490] sm:$0xff] }
 0xb3f   : > { %v10559_v24 = vpack.c.bf16 %v3928_v42, %v3924_v12  ;;  %v3960_v13 = vld [vmem:[%s17409_s7 + $0x5a0] sm:$0xff]  ;;  %v3967_v12 = vld [vmem:[%s17409_s7 + $0x5d8] sm:$0xff] }
 0xb40   : > { %v3971_v42 = vld [vmem:[%s17409_s7 + $0x5f8] sm:$0xff] }
 0xb41   : > { %10652 = vmatpush1.bf16.msra.mxu1 %v10651_v58  ;;  %10548 = vmatpush1.bf16.msra.mxu0 %v10547_v7  ;;  %v10677_v58 = vpack.c.bf16 %v3915_v61, %v3911_v10  ;;  %v3930_v7 = vld [vmem:[%s17409_s7 + $0x4b0] sm:$0xff]  ;;  %v3936_v10 = vld [vmem:[%s17409_s7 + $0x4e0] sm:$0xff] }
 0xb42   : > { %10654 = vmatprep.subr.bf16.mxu1 %v10653_v21  ;;  %10550 = vmatprep.subr.bf16.mxu0 %v10549_v27  ;;  %v10687_v53 = vpack.c.bf16 %v3930_v7, %v3926_v34  ;;  %v3932_v27 = vld [vmem:[%s17409_s7 + $0x4c0] sm:$0xff] }
 0xb45   : > { %10656 = vmatpush1.bf16.msra.mxu1 %v10655_v14  ;;  %v3592_v14 = vlaneseq }
 0xb46   : > { %10658 = vmatprep.subr.bf16.mxu1 %v10657_v8 }
 0xb47   : > { %v14436_v8 = vshrl.u32 %v3592_v14, 7  ;;  %v3942_v14 = vld [vmem:[%s17409_s7 + $0x510] sm:$0xff] }
 0xb49   : > { %10660 = vmatpush1.bf16.msra.mxu1 %v10659_v22  ;;  %v14439_v59 = vsub.s32 0, %v14436_v8  ;;  %v14447_v32 = vsub.s32 1, %v14436_v8  ;;  %v3910_v22 = vld [vmem:[%s17409_s7 + $0x410] sm:$0xff] }
 0xb4a   : > { %10662 = vmatprep.subr.bf16.mxu1 %v10661_v26  ;;  %v3914_v26 = vld [vmem:[%s17409_s7 + $0x430] sm:$0xff] }
 0xb4b   : > { %17624 = vst [vmem:[#allocation16_spill] sm:$0xff] %v14439_v59  ;;  %17625 = vst [vmem:[#allocation17_spill] sm:$0xff] %v14447_v32  ;;  %v14451_v16 = vrot.slane %v14444_v35, %v14439_v59  ;;  %v14455_v45 = vrot.slane %v14444_v35, %v14447_v32  ;;  %v10679_v52 = vpack.c.bf16 %v3914_v26, %v3910_v22 }
 0xb4d   : > { %10664 = vmatpush1.bf16.msra.mxu1 %v10663_v51  ;;  %v3916_v51 = vld [vmem:[%s17409_s7 + $0x440] sm:$0xff] }
 0xb4e   : > { %10666 = vmatprep.subr.bf16.mxu1 %v10665_v38  ;;  %v3920_v38 = vld [vmem:[%s17409_s7 + $0x460] sm:$0xff] }
 0xb4f   : > { %v10555_v0 = vpack.c.bf16 %v3920_v38, %v3916_v51  ;;  %v3959_v51 = vld [vmem:[%s17409_s7 + $0x598] sm:$0xff] }
 0xb50   : > { %v3963_v38 = vld [vmem:[%s17409_s7 + $0x5b8] sm:$0xff] }
 0xb51   : > { %10668 = vmatpush1.bf16.msra.mxu1 %v10667_v28  ;;  %v3925_v28 = vld [vmem:[%s17409_s7 + $0x488] sm:$0xff] }
 0xb52   : > { %10670 = vmatprep.subr.bf16.mxu1 %v10669_v9  ;;  %v3931_v9 = vld [vmem:[%s17409_s7 + $0x4b8] sm:$0xff]  ;;  %v10557_v4 = vpack.c.bf16 %v3929_v49, %v3925_v28  ;;  %v10701_v28 = vpack.c.bf16 %v3963_v38, %v3959_v51  ;;  %v3958_v49 = vld [vmem:[%s17409_s7 + $0x590] sm:$0xff] }
 0xb53   : > { %v10685_v40 = vpack.c.bf16 %v3931_v9, %v3927_v29  ;;  %v3962_v29 = vld [vmem:[%s17409_s7 + $0x5b0] sm:$0xff]  ;;  %v3965_v9 = vld [vmem:[%s17409_s7 + $0x5c8] sm:$0xff] }
 0xb54   : > { %v10703_v7 = vpack.c.bf16 %v3962_v29, %v3958_v49  ;;  %v3982_v38 = vld [vmem:[%s17409_s7 + $0x650] sm:$0xff]  ;;  %v3995_v49 = vld [vmem:[%s17409_s7 + $0x6b8] sm:$0xff] }
 0xb55   : > { %10672 = vmatpush1.bf16.msra.mxu1 %v10671_v43  ;;  %v3933_v43 = vld [vmem:[%s17409_s7 + $0x4c8] sm:$0xff] }
 0xb56   : > { %10674 = vmatprep.subr.bf16.mxu1 %v10673_v44  ;;  %v3935_v44 = vld [vmem:[%s17409_s7 + $0x4d8] sm:$0xff]  ;;  %v10561_v61 = vpack.c.bf16 %v3937_v63, %v3933_v43  ;;  %v3964_v43 = vld [vmem:[%s17409_s7 + $0x5c0] sm:$0xff] }
 0xb59   : > { %10676 = vmatpush1.bf16.msra.mxu1 %v10675_v1  ;;  %v10689_v1 = vpack.c.bf16 %v3939_v55, %v3935_v44  ;;  %v10705_v55 = vpack.c.bf16 %v3971_v42, %v3967_v12  ;;  %v3992_v12 = vld [vmem:[%s17409_s7 + $0x6a0] sm:$0xff] }
 0xb5a   : > { %10678 = vmatprep.subr.bf16.mxu1 %v10677_v58  ;;  %v3934_v58 = vld [vmem:[%s17409_s7 + $0x4d0] sm:$0xff] }
 0xb6f   : > { %v4379_v21 = vpop.permute.xlu1 %4378 }
 0xb70   : > { %4384 = vst.msk [vmem:[#allocation2 + $0x1] sm:$0xff] %vm17619_vm14, %v4379_v21  ;;  %v3938_v21 = vld [vmem:[%s17409_s7 + $0x4f0] sm:$0xff] }
 0xb77   : > { %v4402_v62 = vld [vmem:[#allocation2] sm:$0xff] }
 0xb78   : > { %4406 = vrot.lane.b32.xlu1 %v4402_v62, %s17620_s25  ;;  %4388 = vst.msk [vmem:[#allocation3] sm:$0xff] %vm17516_vm3, %v4402_v62  ;;  %v4438_v56 = vld [vmem:[#allocation2 + $0x1] sm:$0xff] }
 0xb7c   : > { %4394 = vrot.lane.b32.xlu1 %v4402_v62, %s17510_s15  ;;  %v3941_v62 = vld [vmem:[%s17409_s7 + $0x508] sm:$0xff] }
 0xb8c   : > { %v4381_v20 = vpop.permute.xlu0 %4380 }
 0xb8d   : > { %4385 = vst.msk [vmem:[#allocation2 + $0x9] sm:$0xff] %vm17621_vm1, %v4381_v20  ;;  %v3945_v20 = vld [vmem:[%s17409_s7 + $0x528] sm:$0xff]  ;;  %vm17628_vm1 = vcmask 1048064  }
 0xb8e   : > { %vm17629_vm14 = vmmov %vm17628_vm1 }
 0xb94   : > { %v4454_v3 = vld [vmem:[#allocation2 + $0x2] sm:$0xff]  ;;  %v4451_v60 = vld [vmem:[#allocation2 + $0xa] sm:$0xff] }
 0xb95   : > { %v4415_v18 = vld [vmem:[#allocation2 + $0x9] sm:$0xff]  ;;  %4458 = vrot.lane.b32.xlu1 %v4454_v3, %s17510_s15  ;;  %4453 = vst.msk [vmem:[#allocation3 + $0x40] sm:$0xff] %vm17516_vm3, %v4451_v60  ;;  %v3940_v60 = vld [vmem:[%s17409_s7 + $0x500] sm:$0xff] }
 0xb96   : > { %4420 = vrot.lane.b32.xlu0 %v4415_v18, %s17622_s16  ;;  %v4450_v19 = vld [vmem:[#allocation2 + $0x2] sm:$0xff]  ;;  %v4455_v30 = vld [vmem:[#allocation2 + $0xa] sm:$0xff] }
 0xb97   : > { %v4387_v15 = vld [vmem:[#allocation2 + $0x8] sm:$0xff]  ;;  %4452 = vst.msk [vmem:[#allocation3 + $0x18] sm:$0xff] %vm17516_vm3, %v4450_v19  ;;  %v10563_v19 = vpack.c.bf16 %v3936_v10, %v3932_v27 }
 0xb98   : > { %4389 = vst.msk [vmem:[#allocation3 + $0x28] sm:$0xff] %vm17516_vm3, %v4387_v15  ;;  %v4391_v2 = vld [vmem:[#allocation2 + $0x8] sm:$0xff]  ;;  %v10691_v15 = vpack.c.bf16 %v3938_v21, %v3934_v58 }
 0xb99   : > { %4442 = vrot.lane.b32.xlu1 %v4438_v56, %s17508_s27 }
 0xb9a   : > { %4432 = vrot.lane.b32.xlu0 %v4415_v18, %s17623_s26 }
 0xb9d   : > { %4396 = vrot.lane.b32.xlu1 %v4391_v2, %s17510_s15 }
 0xb9e   : > { %4418 = vrot.lane.b32.xlu0 %v4438_v56, %s17622_s16 }
 0xba1   : > { %4460 = vrot.lane.b32.xlu1 %v4455_v30, %s17510_s15  ;;  %s17658_s15 = smov 96  }
 0xba2   : > { %4430 = vrot.lane.b32.xlu0 %v4438_v56, %s17623_s26  ;;  %v3944_v56 = vld [vmem:[%s17409_s7 + $0x520] sm:$0xff] }
 0xba3   : > { %v10567_v22 = vpack.c.bf16 %v3944_v56, %v3940_v60  ;;  %v3974_v56 = vld [vmem:[%s17409_s7 + $0x610] sm:$0xff] }
 0xba5   : > { %4470 = vrot.lane.b32.xlu1 %v4454_v3, %s17620_s25  ;;  %v3943_v3 = vld [vmem:[%s17409_s7 + $0x518] sm:$0xff] }
 0xba6   : > { %4408 = vrot.lane.b32.xlu0 %v4391_v2, %s17620_s25  ;;  %v10565_v2 = vpack.c.bf16 %v3945_v20, %v3941_v62  ;;  %v3977_v62 = vld [vmem:[%s17409_s7 + $0x628] sm:$0xff]  ;;  %v3975_v20 = vld [vmem:[%s17409_s7 + $0x618] sm:$0xff] }
 0xbaa   : > { %4444 = vrot.lane.b32.xlu0 %v4415_v18, %s17508_s27  ;;  %v3947_v18 = vld [vmem:[%s17409_s7 + $0x538] sm:$0xff]  ;;  %s367_s27 = scalar_lea.vmem %s17411_s9, %s17514_s17  ;;  %s17655_s17 = smov 108  }
 0xbae   : > { %4472 = vrot.lane.b32.xlu0 %v4455_v30, %s17620_s25  ;;  %v10693_v30 = vpack.c.bf16 %v3947_v18, %v3943_v3  ;;  %v3979_v3 = vld [vmem:[%s17409_s7 + $0x638] sm:$0xff] }
 0xbaf   : > { %v10709_v33 = vpack.c.bf16 %v3979_v3, %v3975_v20  ;;  %v4009_v20 = vld [vmem:[%s17409_s7 + $0x728] sm:$0xff]  ;;  %v4007_v3 = vld [vmem:[%s17409_s7 + $0x718] sm:$0xff] }
 0xbce   : > { %v3684_v48 = vpop.f32.mrb[104].mxu1 }
 0xbcf   : > { %v3685_v5 = vadd.f32 %v3684_v48, %v14451_v16  ;;  %v3686_v37 = vpop.f32.mrb[105].mxu1  ;;  %v3946_v48 = vld [vmem:[%s17409_s7 + $0x530] sm:$0xff] }
 0xbd0   : > { %v3687_v36 = vadd.f32 %v3686_v37, %v14455_v45  ;;  %v3955_v37 = vld [vmem:[%s17409_s7 + $0x578] sm:$0xff]  ;;  %v10695_v26 = vpack.c.bf16 %v3946_v48, %v3942_v14 }
 0xbd1   : > { %v3772_v47 = vmax.f32 %v3685_v5, 0.0  ;;  %v3951_v5 = vld [vmem:[%s17409_s7 + $0x558] sm:$0xff] }
 0xbd2   : > { %v3773_v46 = vmax.f32 %v3687_v36, 0.0  ;;  %v3952_v36 = vld [vmem:[%s17409_s7 + $0x560] sm:$0xff]  ;;  %v10697_v57 = vpack.c.bf16 %v3955_v37, %v3951_v5  ;;  %v3985_v5 = vld [vmem:[%s17409_s7 + $0x668] sm:$0xff]  ;;  %v3983_v37 = vld [vmem:[%s17409_s7 + $0x658] sm:$0xff] }
 0xbd4   : > { %4122 = vmatprep.mubr.f32.mxu0 %v3773_v46  ;;  %4276 = vmatprep.mubr.f32.mxu1 %v3773_v46  ;;  %v3954_v46 = vld [vmem:[%s17409_s7 + $0x570] sm:$0xff] }
 0xbd5   : > { %4123 = vmatmul.mubr.f32.vlgmr.msra.gmra.mrb[108].mxu0 %v3772_v47  ;;  %4277 = vmatmul.mubr.f32.vlgmr.msra.gmra.mrb[112].mxu1 %v3772_v47  ;;  %v10571_v47 = vpack.c.bf16 %v3952_v36, %v3948_v11 }
 0xbd6   : > { %10552 = vmatpush1.bf16.msra.mxu0 %v10551_v54  ;;  %10680 = vmatpush1.bf16.msra.mxu1 %v10679_v52  ;;  %v3957_v54 = vld [vmem:[%s17409_s7 + $0x588] sm:$0xff] }
 0xbd7   : > { %10554 = vmatprep.subr.bf16.mxu0 %v10553_v6  ;;  %10682 = vmatprep.subr.bf16.mxu1 %v10681_v41  ;;  %v3961_v52 = vld [vmem:[%s17409_s7 + $0x5a8] sm:$0xff]  ;;  %v10699_v6 = vpack.c.bf16 %v3954_v46, %v3950_v17  ;;  %v3956_v41 = vld [vmem:[%s17409_s7 + $0x580] sm:$0xff] }
 0xbd8   : > { %v10573_v25 = vpack.c.bf16 %v3961_v52, %v3957_v54  ;;  %v10575_v34 = vpack.c.bf16 %v3960_v13, %v3956_v41  ;;  %v3984_v17 = vld [vmem:[%s17409_s7 + $0x660] sm:$0xff] }
 0xbda   : > { %10556 = vmatpush1.bf16.msra.mxu0 %v10555_v0  ;;  %10684 = vmatpush1.bf16.msra.mxu1 %v10683_v50  ;;  %v14619_v0 = vsub.s32 2, %v14436_v8  ;;  %v3969_v50 = vld [vmem:[%s17409_s7 + $0x5e8] sm:$0xff] }
 0xbdb   : > { %10558 = vmatprep.subr.bf16.mxu0 %v10557_v4  ;;  %10686 = vmatprep.subr.bf16.mxu1 %v10685_v40  ;;  %v14631_v4 = vsub.s32 3, %v14436_v8  ;;  %v10577_v44 = vpack.c.bf16 %v3969_v50, %v3965_v9  ;;  %v3968_v8 = vld [vmem:[%s17409_s7 + $0x5e0] sm:$0xff] }
 0xbdc   : > { %17626 = vst [vmem:[#allocation20_spill] sm:$0xff] %v14619_v0  ;;  %v3603_v10 = vrot.slane %v14444_v35, %v14619_v0  ;;  %v3988_v50 = vld [vmem:[%s17409_s7 + $0x680] sm:$0xff] }
 0xbdd   : > { %17627 = vst [vmem:[#allocation21_spill] sm:$0xff] %v14631_v4  ;;  %v14655_v21 = vrot.slane %v14444_v35, %v14631_v4  ;;  %v3972_v35 = vld [vmem:[%s17409_s7 + $0x600] sm:$0xff] }
 0xbde   : > { %10560 = vmatpush1.bf16.msra.mxu0 %v10559_v24  ;;  %10688 = vmatpush1.bf16.msra.mxu1 %v10687_v53  ;;  %v3966_v24 = vld [vmem:[%s17409_s7 + $0x5d0] sm:$0xff] }
 0xbdf   : > { %10562 = vmatprep.subr.bf16.mxu0 %v10561_v61  ;;  %10690 = vmatprep.subr.bf16.mxu1 %v10689_v1  ;;  %v3970_v53 = vld [vmem:[%s17409_s7 + $0x5f0] sm:$0xff]  ;;  %v3973_v61 = vld [vmem:[%s17409_s7 + $0x608] sm:$0xff] }
 0xbe0   : > { %v10707_v18 = vpack.c.bf16 %v3970_v53, %v3966_v24  ;;  %v10581_v39 = vpack.c.bf16 %v3977_v62, %v3973_v61  ;;  %v3996_v53 = vld [vmem:[%s17409_s7 + $0x6c0] sm:$0xff]  ;;  %v4005_v62 = vld [vmem:[%s17409_s7 + $0x708] sm:$0xff] }
 0xbe2   : > { %10564 = vmatpush1.bf16.msra.mxu0 %v10563_v19  ;;  %10692 = vmatpush1.bf16.msra.mxu1 %v10691_v15  ;;  %v3976_v19 = vld [vmem:[%s17409_s7 + $0x620] sm:$0xff] }
 0xbe3   : > { %10566 = vmatprep.subr.bf16.mxu0 %v10565_v2  ;;  %10694 = vmatprep.subr.bf16.mxu1 %v10693_v30  ;;  %v3978_v2 = vld [vmem:[%s17409_s7 + $0x630] sm:$0xff]  ;;  %v3981_v30 = vld [vmem:[%s17409_s7 + $0x648] sm:$0xff]  ;;  %v10583_v36 = vpack.c.bf16 %v3976_v19, %v3972_v35  ;;  %v4004_v35 = vld [vmem:[%s17409_s7 + $0x700] sm:$0xff] }
 0xbe4   : > { %v10585_v52 = vpack.c.bf16 %v3985_v5, %v3981_v30  ;;  %v4008_v19 = vld [vmem:[%s17409_s7 + $0x720] sm:$0xff]  ;;  %v4013_v30 = vld [vmem:[%s17409_s7 + $0x748] sm:$0xff] }
 0xbe5   : > { %v10599_v5 = vpack.c.bf16 %v4008_v19, %v4004_v35  ;;  %v8670_v19 = vld [vmem:[%s17559_s1 + $0x480] sm:$0xff] }
 0xbe6   : > { %10568 = vmatpush1.bf16.msra.mxu0 %v10567_v22  ;;  %10696 = vmatpush1.bf16.msra.mxu1 %v10695_v26  ;;  %v3987_v22 = vld [vmem:[%s17409_s7 + $0x678] sm:$0xff] }
 0xbe7   : > { %10570 = vmatprep.subr.bf16.mxu0 %v10569_v31  ;;  %10698 = vmatprep.subr.bf16.mxu1 %v10697_v57  ;;  %v10711_v31 = vpack.c.bf16 %v3978_v2, %v3974_v56  ;;  %v3980_v57 = vld [vmem:[%s17409_s7 + $0x640] sm:$0xff]  ;;  %v10713_v51 = vpack.c.bf16 %v3987_v22, %v3983_v37  ;;  %v4006_v56 = vld [vmem:[%s17409_s7 + $0x710] sm:$0xff] }
 0xbe8   : > { %v10587_v29 = vpack.c.bf16 %v3984_v17, %v3980_v57  ;;  %v4010_v2 = vld [vmem:[%s17409_s7 + $0x730] sm:$0xff]  ;;  %v4012_v22 = vld [vmem:[%s17409_s7 + $0x740] sm:$0xff]  ;;  %v4021_v17 = vld [vmem:[%s17409_s7 + $0x788] sm:$0xff] }
 0xbe9   : > { %v10727_v37 = vpack.c.bf16 %v4010_v2, %v4006_v56  ;;  %v4018_v57 = vld [vmem:[%s17409_s7 + $0x770] sm:$0xff]  ;;  %v8702_v56 = vld [vmem:[%s17559_s1 + $0x580] sm:$0xff]  ;;  %v8703_v2 = vld [vmem:[%s17559_s1 + $0x588] sm:$0xff] }
 0xbea   : > { %10572 = vmatpush1.bf16.msra.mxu0 %v10571_v47  ;;  %10700 = vmatpush1.bf16.msra.mxu1 %v10699_v6  ;;  %v4407_v40 = vpop.permute.xlu1 %4406  ;;  %v3986_v47 = vld [vmem:[%s17409_s7 + $0x670] sm:$0xff]  ;;  %v3989_v6 = vld [vmem:[%s17409_s7 + $0x688] sm:$0xff] }
 0xbeb   : > { %4412 = vst.msk [vmem:[#allocation3 + $0x8] sm:$0xff] %vm17516_vm3, %v4407_v40  ;;  %v3690_v63 = vpop.f32.mrb[106].mxu1  ;;  %10574 = vmatprep.subr.bf16.mxu0 %v10573_v25  ;;  %10702 = vmatprep.subr.bf16.mxu1 %v10701_v28  ;;  %v3993_v25 = vld [vmem:[%s17409_s7 + $0x6a8] sm:$0xff]  ;;  %v3991_v28 = vld [vmem:[%s17409_s7 + $0x698] sm:$0xff]  ;;  %v10715_v9 = vpack.c.bf16 %v3986_v47, %v3982_v38  ;;  %v4020_v47 = vld [vmem:[%s17409_s7 + $0x780] sm:$0xff] }
 0xbec   : > { %v3692_v27 = vpop.f32.mrb[107].mxu1  ;;  %v3691_v1 = vadd.f32 %v3690_v63, %v14451_v16  ;;  %v10589_v42 = vpack.c.bf16 %v3993_v25, %v3989_v6  ;;  %v10717_v40 = vpack.c.bf16 %v3995_v49, %v3991_v28  ;;  %v4001_v63 = vld [vmem:[%s17409_s7 + $0x6e8] sm:$0xff]  ;;  %v4024_v6 = vld [vmem:[%s17409_s7 + $0x7a0] sm:$0xff] }
 0xbed   : > { %v3693_v58 = vadd.f32 %v3692_v27, %v14455_v45  ;;  %v10579_v45 = vpack.c.bf16 %v3968_v8, %v3964_v43  ;;  %v3997_v43 = vld [vmem:[%s17409_s7 + $0x6c8] sm:$0xff]  ;;  %v10591_v8 = vpack.c.bf16 %v3992_v12, %v3988_v50  ;;  %v4000_v27 = vld [vmem:[%s17409_s7 + $0x6e0] sm:$0xff]  ;;  %v4026_v50 = vld [vmem:[%s17409_s7 + $0x7b0] sm:$0xff] }
 0xbee   : > { %10576 = vmatpush1.bf16.msra.mxu0 %v10575_v34  ;;  %10704 = vmatpush1.bf16.msra.mxu1 %v10703_v7  ;;  %v4395_v16 = vpop.permute.xlu1 %4394  ;;  %v3776_v26 = vmax.f32 %v3691_v1, 0.0  ;;  %v3990_v34 = vld [vmem:[%s17409_s7 + $0x690] sm:$0xff]  ;;  %v4029_v12 = vld [vmem:[%s17409_s7 + $0x7c8] sm:$0xff] }
 0xbef   : > { %v3777_v15 = vmax.f32 %v3693_v58, 0.0  ;;  %4400 = vst.msk [vmem:[#allocation3] sm:$0xff] %vm17628_vm1, %v4395_v16  ;;  %v3761_v60 = vpop.f32.mrb[108].mxu1  ;;  %10578 = vmatprep.subr.bf16.mxu0 %v10577_v44  ;;  %10706 = vmatprep.subr.bf16.mxu1 %v10705_v55  ;;  %v3994_v7 = vld [vmem:[%s17409_s7 + $0x6b0] sm:$0xff]  ;;  %v3999_v44 = vld [vmem:[%s17409_s7 + $0x6d8] sm:$0xff] }
 0xbf0   : > { %v14682_v14 = vadd.f32 %v3761_v60, %v3603_v10  ;;  %v3763_v48 = vpop.f32.mrb[109].mxu1  ;;  %v4003_v55 = vld [vmem:[%s17409_s7 + $0x6f8] sm:$0xff]  ;;  %v10719_v24 = vpack.c.bf16 %v3994_v7, %v3990_v34  ;;  %v3998_v1 = vld [vmem:[%s17409_s7 + $0x6d0] sm:$0xff]  ;;  %v10607_v7 = vpack.c.bf16 %v4024_v6, %v4020_v47 }
 0xbf1   : > { %v3764_v11 = vadd.f32 %v3763_v48, %v14655_v21  ;;  %4128 = vmatprep.mubr.f32.mxu0 %v3777_v15  ;;  %4282 = vmatprep.mubr.f32.mxu1 %v3777_v15  ;;  %v10721_v61 = vpack.c.bf16 %v4003_v55, %v3999_v44  ;;  %v4002_v58 = vld [vmem:[%s17409_s7 + $0x6f0] sm:$0xff]  ;;  %v4011_v16 = vld [vmem:[%s17409_s7 + $0x738] sm:$0xff]  ;;  %v10597_v15 = vpack.c.bf16 %v4009_v20, %v4005_v62  ;;  %v4017_v48 = vld [vmem:[%s17409_s7 + $0x768] sm:$0xff] }
 0xbf2   : > { %10580 = vmatpush1.bf16.msra.mxu0 %v10579_v45  ;;  %10708 = vmatpush1.bf16.msra.mxu1 %v10707_v18  ;;  %v10595_v45 = vpack.c.bf16 %v4000_v27, %v3996_v53  ;;  %v10723_v18 = vpack.c.bf16 %v4002_v58, %v3998_v1  ;;  %v10725_v60 = vpack.c.bf16 %v4011_v16, %v4007_v3  ;;  %v4035_v34 = vld [vmem:[%s17409_s7 + $0x7f8] sm:$0xff]  ;;  %v4032_v44 = vld [vmem:[%s17409_s7 + $0x7e0] sm:$0xff]  ;;  %v4030_v27 = vld [vmem:[%s17409_s7 + $0x7d0] sm:$0xff] }
 0xbf3   : > { %v3775_v46 = vmax.f32 %v3764_v11, 0.0  ;;  %4129 = vmatmul.mubr.f32.gmra.mrb[110].mxu0 %v3776_v26  ;;  %4283 = vmatmul.mubr.f32.gmra.mrb[114].mxu1 %v3776_v26  ;;  %v3767_v54 = vpop.f32.mrb[110].mxu1  ;;  %v4016_v26 = vld [vmem:[%s17409_s7 + $0x760] sm:$0xff]  ;;  %v10601_v11 = vpack.c.bf16 %v4017_v48, %v4013_v30  ;;  %v8687_v1 = vld [vmem:[%s17559_s1 + $0x508] sm:$0xff]  ;;  %v8688_v30 = vld [vmem:[%s17559_s1 + $0x510] sm:$0xff] }
 0xbf4   : > { %v14709_v41 = vadd.f32 %v3767_v54, %v3603_v10  ;;  %v14711_v13 = vpop.f32.mrb[111].mxu1  ;;  %10582 = vmatprep.subr.bf16.mxu0 %v10581_v39  ;;  %10710 = vmatprep.subr.bf16.mxu1 %v10709_v33  ;;  %v10593_v10 = vpack.c.bf16 %v4001_v63, %v3997_v43  ;;  %v4015_v39 = vld [vmem:[%s17409_s7 + $0x758] sm:$0xff]  ;;  %v4028_v63 = vld [vmem:[%s17409_s7 + $0x7c0] sm:$0xff]  ;;  %v8719_v62 = vld [vmem:[%s17559_s1 + $0x608] sm:$0xff] }
 0xbf5   : > { %4199 = vmatprep.mubr.f32.mxu0 %v3775_v46  ;;  %4353 = vmatprep.mubr.f32.mxu1 %v3775_v46  ;;  %v4019_v33 = vld [vmem:[%s17409_s7 + $0x778] sm:$0xff]  ;;  %v4025_v46 = vld [vmem:[%s17409_s7 + $0x7a8] sm:$0xff]  ;;  %v8718_v58 = vld [vmem:[%s17559_s1 + $0x600] sm:$0xff]  ;;  %v10611_v20 = vpack.c.bf16 %v4032_v44, %v4028_v63 }
 0xbf6   : > { %10584 = vmatpush1.bf16.msra.mxu0 %v10583_v36  ;;  %10712 = vmatpush1.bf16.msra.mxu1 %v10711_v31  ;;  %v10729_v36 = vpack.c.bf16 %v4019_v33, %v4015_v39  ;;  %v4014_v31 = vld [vmem:[%s17409_s7 + $0x750] sm:$0xff]  ;;  %v4023_v54 = vld [vmem:[%s17409_s7 + $0x798] sm:$0xff]  ;;  %v10605_v49 = vpack.c.bf16 %v4025_v46, %v4021_v17  ;;  %v10773_v35 = vpack.c.bf16 %v8719_v62, %v8718_v58  ;;  %v3774_v39 = vmax.f32 %v14682_v14, 0.0  ;;  %v8690_v46 = vld [vmem:[%s17559_s1 + $0x520] sm:$0xff] }
 0xbf7   : > { %10586 = vmatprep.subr.bf16.mxu0 %v10585_v52  ;;  %10714 = vmatprep.subr.bf16.mxu1 %v10713_v51  ;;  %v4027_v52 = vld [vmem:[%s17409_s7 + $0x7b8] sm:$0xff]  ;;  %v10603_v51 = vpack.c.bf16 %v4016_v26, %v4012_v22  ;;  %v10731_v38 = vpack.c.bf16 %v4018_v57, %v4014_v31  ;;  %v10775_v22 = vpack.c.bf16 %v8703_v2, %v8702_v56  ;;  %v8672_v26 = vld [vmem:[%s17559_s1 + $0x490] sm:$0xff]  ;;  %v3778_v47 = vmax.f32 %v14709_v41, 0.0  ;;  %v8694_v58 = vld [vmem:[%s17559_s1 + $0x540] sm:$0xff] }
 0xbf8   : > { %v8721_v48 = vld [vmem:[%s17559_s1 + $0x618] sm:$0xff]  ;;  %v8704_v57 = vld [vmem:[%s17559_s1 + $0x590] sm:$0xff]  ;;  %v8695_v62 = vld [vmem:[%s17559_s1 + $0x548] sm:$0xff] }
 0xbf9   : > { %v8705_v17 = vld [vmem:[%s17559_s1 + $0x598] sm:$0xff]  ;;  %v8724_v63 = vld [vmem:[%s17559_s1 + $0x630] sm:$0xff]  ;;  %v8710_v56 = vld [vmem:[%s17559_s1 + $0x5c0] sm:$0xff] }
 0xbfa   : > { %10588 = vmatpush1.bf16.msra.mxu0 %v10587_v29  ;;  %10716 = vmatpush1.bf16.msra.mxu1 %v10715_v9  ;;  %v10733_v29 = vpack.c.bf16 %v4027_v52, %v4023_v54  ;;  %v4022_v9 = vld [vmem:[%s17409_s7 + $0x790] sm:$0xff]  ;;  %v8691_v54 = vld [vmem:[%s17559_s1 + $0x528] sm:$0xff]  ;;  %v8722_v52 = vld [vmem:[%s17559_s1 + $0x620] sm:$0xff] }
 0xbfb   : > { %10590 = vmatprep.subr.bf16.mxu0 %v10589_v42  ;;  %10718 = vmatprep.subr.bf16.mxu1 %v10717_v40  ;;  %v4033_v42 = vld [vmem:[%s17409_s7 + $0x7e8] sm:$0xff]  ;;  %v4031_v40 = vld [vmem:[%s17409_s7 + $0x7d8] sm:$0xff]  ;;  %v10735_v43 = vpack.c.bf16 %v4026_v50, %v4022_v9  ;;  %v10779_v9 = vpack.c.bf16 %v8705_v17, %v8704_v57  ;;  %v10749_v41 = vpack.c.bf16 %v8691_v54, %v8690_v46  ;;  %v8730_v57 = vld [vmem:[%s17559_s1 + $0x660] sm:$0xff] }
 0xbfc   : > { %v10737_v53 = vpack.c.bf16 %v4035_v34, %v4031_v40  ;;  %v8675_v50 = vld [vmem:[%s17559_s1 + $0x4a8] sm:$0xff]  ;;  %v8692_v34 = vld [vmem:[%s17559_s1 + $0x530] sm:$0xff]  ;;  %v8725_v44 = vld [vmem:[%s17559_s1 + $0x638] sm:$0xff] }
 0xbfd   : > { %v8707_v40 = vld [vmem:[%s17559_s1 + $0x5a8] sm:$0xff] }
 0xbfe   : > { %10592 = vmatpush1.bf16.msra.mxu0 %v10591_v8  ;;  %10720 = vmatpush1.bf16.msra.mxu1 %v10719_v24  ;;  %v10609_v24 = vpack.c.bf16 %v4033_v42, %v4029_v12  ;;  %v8706_v12 = vld [vmem:[%s17559_s1 + $0x5a0] sm:$0xff]  ;;  %v8711_v2 = vld [vmem:[%s17559_s1 + $0x5c8] sm:$0xff] }
 0xbff   : > { %10594 = vmatprep.subr.bf16.mxu0 %v10593_v10  ;;  %10722 = vmatprep.subr.bf16.mxu1 %v10721_v61  ;;  %v4034_v10 = vld [vmem:[%s17409_s7 + $0x7f0] sm:$0xff]  ;;  %v8686_v61 = vld [vmem:[%s17559_s1 + $0x500] sm:$0xff]  ;;  %v8731_v17 = vld [vmem:[%s17559_s1 + $0x668] sm:$0xff] }
 0xc00   : > { %v10739_v3 = vpack.c.bf16 %v4034_v10, %v4030_v27  ;;  %v10785_v10 = vpack.c.bf16 %v8725_v44, %v8724_v63  ;;  %v8717_v63 = vld [vmem:[%s17559_s1 + $0x5f8] sm:$0xff]  ;;  %v8734_v44 = vld [vmem:[%s17559_s1 + $0x680] sm:$0xff] }
 0xc02   : > { %10596 = vmatpush1.bf16.msra.mxu0 %v10595_v45  ;;  %10724 = vmatpush1.bf16.msra.mxu1 %v10723_v18  ;;  %v10741_v18 = vpack.c.bf16 %v8687_v1, %v8686_v61  ;;  %v8708_v61 = vld [vmem:[%s17559_s1 + $0x5b0] sm:$0xff]  ;;  %v8709_v1 = vld [vmem:[%s17559_s1 + $0x5b8] sm:$0xff] }
 0xc03   : > { %10598 = vmatprep.subr.bf16.mxu0 %v10597_v15  ;;  %10726 = vmatprep.subr.bf16.mxu1 %v10725_v60  ;;  %v8671_v15 = vld [vmem:[%s17559_s1 + $0x488] sm:$0xff]  ;;  %v3770_v60 = vadd.f32 %v14711_v13, %v14655_v21  ;;  %v8689_v21 = vld [vmem:[%s17559_s1 + $0x518] sm:$0xff]  ;;  %v8720_v13 = vld [vmem:[%s17559_s1 + $0x610] sm:$0xff] }
 0xc04   : > { %v10745_v14 = vpack.c.bf16 %v8689_v21, %v8688_v30  ;;  %v10777_v31 = vpack.c.bf16 %v8721_v48, %v8720_v13  ;;  %v8696_v30 = vld [vmem:[%s17559_s1 + $0x550] sm:$0xff]  ;;  %v8697_v21 = vld [vmem:[%s17559_s1 + $0x558] sm:$0xff] }
 0xc05   : > { %v8728_v13 = vld [vmem:[%s17559_s1 + $0x650] sm:$0xff]  ;;  %v8729_v48 = vld [vmem:[%s17559_s1 + $0x658] sm:$0xff] }
 0xc06   : > { %10600 = vmatpush1.bf16.msra.mxu0 %v10599_v5  ;;  %10728 = vmatpush1.bf16.msra.mxu1 %v10727_v37  ;;  %v10743_v37 = vpack.c.bf16 %v8671_v15, %v8670_v19  ;;  %v8679_v19 = vld [vmem:[%s17559_s1 + $0x4c8] sm:$0xff]  ;;  %v10757_v15 = vpack.c.bf16 %v8695_v62, %v8694_v58  ;;  %v8738_v58 = vld [vmem:[%s17559_s1 + $0x6a0] sm:$0xff] }
 0xc07   : > { %v4459_v25 = vpop.permute.xlu1 %4458  ;;  %10602 = vmatprep.subr.bf16.mxu0 %v10601_v11  ;;  %10730 = vmatprep.subr.bf16.mxu1 %v10729_v36  ;;  %v8673_v11 = vld [vmem:[%s17559_s1 + $0x498] sm:$0xff]  ;;  %v3779_v36 = vmax.f32 %v3770_v60, 0.0 }
 0xc08   : > { %v14824_v28 = vpop.permute.xlu0 %4420  ;;  %4464 = vst.msk [vmem:[#allocation3 + $0x18] sm:$0xff] %vm17629_vm14, %v4459_v25  ;;  %vm17630_vm14 = vmmov %vm17628_vm1 }
 0xc0a   : > { %10604 = vmatpush1.bf16.msra.mxu0 %v10603_v51  ;;  %10732 = vmatpush1.bf16.msra.mxu1 %v10731_v38  ;;  %v8723_v51 = vld [vmem:[%s17559_s1 + $0x628] sm:$0xff]  ;;  %v8674_v38 = vld [vmem:[%s17559_s1 + $0x4a0] sm:$0xff] }
 0xc0b   : > { %v4443_v55 = vpop.permute.xlu1 %4442  ;;  %10606 = vmatprep.subr.bf16.mxu0 %v10605_v49  ;;  %10734 = vmatprep.subr.bf16.mxu1 %v10733_v29  ;;  %v10747_v49 = vpack.c.bf16 %v8673_v11, %v8672_v26  ;;  %v10781_v42 = vpack.c.bf16 %v8723_v51, %v8722_v52  ;;  %v10793_v26 = vpack.c.bf16 %v8729_v48, %v8728_v13  ;;  %v8712_v11 = vld [vmem:[%s17559_s1 + $0x5d0] sm:$0xff]  ;;  %v8682_v52 = vld [vmem:[%s17559_s1 + $0x4e0] sm:$0xff]  ;;  %v8683_v51 = vld [vmem:[%s17559_s1 + $0x4e8] sm:$0xff] }
 0xc0c   : > { %v4433_v8 = vpop.permute.xlu0 %4432 }
 0xc0d   : > { %4437 = vst.msk [vmem:[#allocation3 + $0x38] sm:$0xff] %vm17516_vm3, %v4433_v8  ;;  %v10751_v8 = vpack.c.bf16 %v8675_v50, %v8674_v38  ;;  %v8733_v50 = vld [vmem:[%s17559_s1 + $0x678] sm:$0xff] }
 0xc0e   : > { %10608 = vmatpush1.bf16.msra.mxu0 %v10607_v7  ;;  %10736 = vmatpush1.bf16.msra.mxu1 %v10735_v43  ;;  %v8693_v7 = vld [vmem:[%s17559_s1 + $0x538] sm:$0xff] }
 0xc0f   : > { %v4397_v45 = vpop.permute.xlu1 %4396  ;;  %10610 = vmatprep.subr.bf16.mxu0 %v10609_v24  ;;  %10738 = vmatprep.subr.bf16.mxu1 %v10737_v53  ;;  %v4481_v43 = vld [vmem:[#allocation3 + $0x18] sm:$0xff]  ;;  %v10783_v24 = vpack.c.bf16 %v8707_v40, %v8706_v12  ;;  %v8677_v53 = vld [vmem:[%s17559_s1 + $0x4b8] sm:$0xff]  ;;  %v10753_v27 = vpack.c.bf16 %v8693_v7, %v8692_v34  ;;  %v10767_v12 = vpack.c.bf16 %v8683_v51, %v8682_v52 }
 0xc10   : > { %v4419_v16 = vpop.permute.xlu0 %4418  ;;  %4401 = vst.msk [vmem:[#allocation3 + $0x28] sm:$0xff] %vm17630_vm14, %v4397_v45  ;;  %vm17631_vm14 = vmmov %vm17628_vm1  ;;  %v8685_v7 = vld [vmem:[%s17559_s1 + $0x4f8] sm:$0xff] }
 0xc11   : > { %4424 = vst.msk [vmem:[#allocation3 + $0x8] sm:$0xff] %vm17628_vm1, %v4419_v16 }
 0xc12   : > { %10612 = vmatpush1.bf16.msra.mxu0 %v10611_v20  ;;  %10740 = vmatpush1.bf16.msra.mxu1 %v10739_v3  ;;  %v8726_v20 = vld [vmem:[%s17559_s1 + $0x640] sm:$0xff]  ;;  %v8727_v3 = vld [vmem:[%s17559_s1 + $0x648] sm:$0xff] }
 0xc13   : > { %v4461_v5 = vpop.permute.xlu1 %4460  ;;  %10742 = vmatprep.subr.bf16.mxu0 %v10741_v18  ;;  %10774 = vmatprep.subr.bf16.mxu1 %v10773_v35  ;;  %v10787_v18 = vpack.c.bf16 %v8709_v1, %v8708_v61  ;;  %v8678_v35 = vld [vmem:[%s17559_s1 + $0x4c0] sm:$0xff]  ;;  %v10789_v60 = vpack.c.bf16 %v8727_v3, %v8726_v20  ;;  %v8739_v3 = vld [vmem:[%s17559_s1 + $0x6a8] sm:$0xff] }
 0xc14   : > { %v4431_v33 = vpop.permute.xlu0 %4430  ;;  %4465 = vst.msk [vmem:[#allocation3 + $0x40] sm:$0xff] %vm17628_vm1, %v4461_v5  ;;  %v8680_v5 = vld [vmem:[%s17559_s1 + $0x4d0] sm:$0xff] }
 0xc15   : > { %4436 = vst.msk [vmem:[#allocation3 + $0x10] sm:$0xff] %vm17516_vm3, %v4431_v33  ;;  %4200 = vmatmul.mubr.f32.vlgmr.msra.gmra.mrb[108].mxu0 %v3774_v39  ;;  %4354 = vmatmul.mubr.f32.vlgmr.msra.gmra.mrb[112].mxu1 %v3774_v39  ;;  %v10759_v39 = vpack.c.bf16 %v8679_v19, %v8678_v35  ;;  %v10791_v33 = vpack.c.bf16 %v8711_v2, %v8710_v56  ;;  %v8740_v19 = vld [vmem:[%s17559_s1 + $0x6b0] sm:$0xff]  ;;  %v4036_v2 = vld [vmem:[%s17410_s8] sm:$0xf] }
 0xc16   : > { %4448 = vst.msk [vmem:[#allocation3 + $0x10] sm:$0xff] %vm17631_vm14, %v4443_v55  ;;  %4205 = vmatprep.mubr.f32.mxu0 %v3779_v36  ;;  %4359 = vmatprep.mubr.f32.mxu1 %v3779_v36  ;;  %vm17632_vm14 = vmmov %vm17628_vm1  ;;  %v8713_v36 = vld [vmem:[%s17559_s1 + $0x5d8] sm:$0xff]  ;;  %v4045_v13 = vrot.slane %v4036_v2, %v14447_v32  ;;  %v4053_v48 = vrot.slane %v4036_v2, %v14631_v4 }
 0xc17   : > { %10744 = vmatpush3.bf16.msra.mxu0 %v10743_v37  ;;  %10776 = vmatpush3.bf16.msra.mxu1 %v10775_v22  ;;  %v4471_v25 = vpop.permute.xlu1 %4470  ;;  %v8681_v37 = vld [vmem:[%s17559_s1 + $0x4d8] sm:$0xff]  ;;  %v10761_v22 = vpack.c.bf16 %v8697_v21, %v8696_v30  ;;  %v10795_v54 = vpack.c.bf16 %v8713_v36, %v8712_v11  ;;  %v4041_v30 = vrot.slane %v4036_v2, %v14439_v59 }
 0xc18   : > { %v4409_v6 = vpop.permute.xlu0 %4408  ;;  %v4479_v29 = vld [vmem:[#allocation3 + $0x8] sm:$0xff]  ;;  %4476 = vst.msk [vmem:[#allocation3 + $0x20] sm:$0xff] %vm17516_vm3, %v4471_v25  ;;  %10746 = vmatprep.subr.bf16.mxu0 %v10745_v14  ;;  %10778 = vmatprep.subr.bf16.mxu1 %v10777_v31  ;;  %v8699_v31 = vld [vmem:[%s17559_s1 + $0x568] sm:$0xff]  ;;  %v10763_v46 = vpack.c.bf16 %v8681_v37, %v8680_v5  ;;  %v4049_v21 = vrot.slane %v4036_v2, %v14619_v0 }
 0xc19   : > { %4413 = vst.msk [vmem:[#allocation3 + $0x30] sm:$0xff] %vm17516_vm3, %v4409_v6  ;;  %4206 = vmatmul.mubr.f32.gmra.mrb[110].mxu0 %v3778_v47  ;;  %4360 = vmatmul.mubr.f32.gmra.mrb[114].mxu1 %v3778_v47  ;;  %v8698_v14 = vld [vmem:[%s17559_s1 + $0x560] sm:$0xff]  ;;  %v10797_v47 = vpack.c.bf16 %v8731_v17, %v8730_v57  ;;  %v8715_v25 = vld [vmem:[%s17559_s1 + $0x5e8] sm:$0xff] }
 0xc1a   : > { %4425 = vst.msk [vmem:[#allocation3 + $0x30] sm:$0xff] %vm17628_vm1, %v14824_v28  ;;  %4639 = vmatprep.mubr.f32.mxu0 %v4479_v29  ;;  %4714 = vmatprep.mubr.f32.mxu1 %v4481_v43  ;;  %v8676_v28 = vld [vmem:[%s17559_s1 + $0x4b0] sm:$0xff]  ;;  %v10765_v38 = vpack.c.bf16 %v8699_v31, %v8698_v14  ;;  %v8714_v6 = vld [vmem:[%s17559_s1 + $0x5e0] sm:$0xff]  ;;  %v8701_v29 = vld [vmem:[%s17559_s1 + $0x578] sm:$0xff]  ;;  %vm17634_vm1 = vcmask 556064  }
 0xc1b   : > { %10748 = vmatpush3.bf16.msra.mxu0 %v10747_v49  ;;  %10780 = vmatpush3.bf16.msra.mxu1 %v10779_v9  ;;  %v10755_v45 = vpack.c.bf16 %v8677_v53, %v8676_v28  ;;  %v8700_v49 = vld [vmem:[%s17559_s1 + $0x570] sm:$0xff]  ;;  %v4486_v20 = vld [vmem:[#allocation3 + $0x40] sm:$0xff] }
 0xc1c   : > { %v4445_v55 = vpop.permute.xlu0 %4444  ;;  %10750 = vmatprep.subr.bf16.mxu0 %v10749_v41  ;;  %10782 = vmatprep.subr.bf16.mxu1 %v10781_v42  ;;  %v8732_v9 = vld [vmem:[%s17559_s1 + $0x670] sm:$0xff]  ;;  %v10799_v41 = vpack.c.bf16 %v8715_v25, %v8714_v6  ;;  %v10769_v40 = vpack.c.bf16 %v8701_v29, %v8700_v49  ;;  %v8743_v6 = vld [vmem:[%s17404_s2 + $0x2] ss:$0 sm:$0xff] }
 0xc1d   : > { %4449 = vst.msk [vmem:[#allocation3 + $0x38] sm:$0xff] %vm17632_vm14, %v4445_v55  ;;  %v8684_v42 = vld [vmem:[%s17559_s1 + $0x4f0] sm:$0xff]  ;;  %v10801_v34 = vpack.c.bf16 %v8733_v50, %v8732_v9  ;;  %v8735_v55 = vld [vmem:[%s17559_s1 + $0x688] sm:$0xff]  ;;  %vm17635_vm14 = vmmov %vm17634_vm1 }
 0xc1e   : > { %v8716_v43 = vld [vmem:[%s17559_s1 + $0x5f0] sm:$0xff]  ;;  %v10805_v28 = vpack.c.bf16 %v8735_v55, %v8734_v44  ;;  %v4480_v61 = vld [vmem:[#allocation3 + $0x10] sm:$0xff] }
 0xc1f   : > { %10752 = vmatpush3.bf16.msra.mxu0 %v10751_v8  ;;  %10784 = vmatpush3.bf16.msra.mxu1 %v10783_v24  ;;  %v10771_v8 = vpack.c.bf16 %v8685_v7, %v8684_v42  ;;  %v10803_v24 = vpack.c.bf16 %v8717_v63, %v8716_v43  ;;  %v8736_v53 = vld [vmem:[%s17559_s1 + $0x690] sm:$0xff]  ;;  %v4482_v35 = vld [vmem:[#allocation3 + $0x20] sm:$0xff] }
 0xc20   : > { %v4473_v16 = vpop.permute.xlu0 %4472  ;;  %10754 = vmatprep.subr.bf16.mxu0 %v10753_v27  ;;  %10786 = vmatprep.subr.bf16.mxu1 %v10785_v10  ;;  %v8737_v27 = vld [vmem:[%s17559_s1 + $0x698] sm:$0xff] }
 0xc21   : > { %4477 = vst.msk [vmem:[#allocation3 + $0x48] sm:$0xff] %vm17516_vm3, %v4473_v16  ;;  %v4478_v10 = vld [vmem:[#allocation3] sm:$0xff]  ;;  %v10809_v1 = vpack.c.bf16 %v8737_v27, %v8736_v53  ;;  %v4484_v62 = vld [vmem:[#allocation3 + $0x30] sm:$0xff]  ;;  %v4483_v16 = vld [vmem:[#allocation3 + $0x28] sm:$0xff] }
 0xc23   : > { %10756 = vmatpush3.bf16.msra.mxu0 %v10755_v45  ;;  %10788 = vmatpush3.bf16.msra.mxu1 %v10787_v18  ;;  %v10813_v18 = vpack.c.bf16 %v8739_v3, %v8738_v58  ;;  %v8797_v3 = vld [vmem:[%s17559_s1 + $0x858] sm:$0xff] }
 0xc24   : > { %10758 = vmatprep.subr.bf16.mxu0 %v10757_v15  ;;  %10790 = vmatprep.subr.bf16.mxu1 %v10789_v60  ;;  %v4485_v45 = vld [vmem:[#allocation3 + $0x38] sm:$0xff]  ;;  %v8741_v15 = vld [vmem:[%s17559_s1 + $0x6b8] sm:$0xff] }
 0xc25   : > { %v10817_v60 = vpack.c.bf16 %v8741_v15, %v8740_v19  ;;  %v8762_v19 = vld [vmem:[%s17559_s1 + $0x740] sm:$0xff]  ;;  %v8763_v15 = vld [vmem:[%s17559_s1 + $0x748] sm:$0xff] }
 0xc27   : > { %10760 = vmatpush3.bf16.msra.mxu0 %v10759_v39  ;;  %10792 = vmatpush3.bf16.msra.mxu1 %v10791_v33 }
 0xc28   : > { %10762 = vmatprep.subr.bf16.mxu0 %v10761_v22  ;;  %10794 = vmatprep.subr.bf16.mxu1 %v10793_v26  ;;  %v4487_v56 = vld [vmem:[#allocation3 + $0x48] sm:$0xff] }
 0xc2b   : > { %10764 = vmatpush3.bf16.msra.mxu0 %v10763_v46  ;;  %10796 = vmatpush3.bf16.msra.mxu1 %v10795_v54 }
 0xc2c   : > { %10766 = vmatprep.subr.bf16.mxu0 %v10765_v38  ;;  %10798 = vmatprep.subr.bf16.mxu1 %v10797_v47 }
 0xc2f   : > { %10768 = vmatpush3.bf16.msra.mxu0 %v10767_v12  ;;  %10800 = vmatpush3.bf16.msra.mxu1 %v10799_v41 }
 0xc30   : > { %10770 = vmatprep.subr.bf16.mxu0 %v10769_v40  ;;  %10802 = vmatprep.subr.bf16.mxu1 %v10801_v34 }
 0xc33   : > { %10772 = vmatpush3.bf16.msra.mxu0 %v10771_v8  ;;  %10804 = vmatpush3.bf16.msra.mxu1 %v10803_v24 }
 0xc34   : > { %10806 = vmatprep.subr.bf16.mxu0 %v10805_v28 }
 0xc36   : > { %4640 = vmatmul.mubr.f32.vlgmr.msra.gmra.mrb[112].mxu0 %v4478_v10  ;;  %4715 = vmatmul.mubr.f32.vlgmr.msra.gmra.mrb[116].mxu1 %v4480_v61  ;;  %v8794_v10 = vld [vmem:[%s17559_s1 + $0x840] sm:$0xff]  ;;  %v8795_v61 = vld [vmem:[%s17559_s1 + $0x848] sm:$0xff] }
 0xc37   : > { %4644 = vmatprep.mubr.f32.mxu0 %v4484_v62  ;;  %4719 = vmatprep.mubr.f32.mxu1 %v4486_v20  ;;  %v10853_v58 = vpack.c.bf16 %v8795_v61, %v8794_v10  ;;  %v8779_v62 = vld [vmem:[%s17559_s1 + $0x7c8] sm:$0xff]  ;;  %v8796_v20 = vld [vmem:[%s17559_s1 + $0x850] sm:$0xff]  ;;  %v8770_v61 = vld [vmem:[%s17559_s1 + $0x780] sm:$0xff] }
 0xc38   : > { %10808 = vmatpush3.bf16.msra.mxu0 %v10805_v28 }
 0xc39   : > { %10810 = vmatprep.subr.bf16.mxu0 %v10809_v1  ;;  %10854 = vmatprep.subr.bf16.mxu1 %v10853_v58 }
 0xc3a   : > { %4645 = vmatmul.mubr.f32.gmra.mrb[114].mxu0 %v4483_v16  ;;  %4720 = vmatmul.mubr.f32.gmra.mrb[118].mxu1 %v4485_v45  ;;  %v10857_v45 = vpack.c.bf16 %v8797_v3, %v8796_v20  ;;  %v8755_v20 = vld [vmem:[%s17559_s1 + $0x708] sm:$0xff]  ;;  %v8806_v3 = vld [vmem:[%s17559_s1 + $0x8a0] sm:$0xff] }
 0xc3b   : > { %10075 = vmatprep.mubr.msk.f32.mxu0 %vm17516_vm3, %v4482_v35  ;;  %v8781_v35 = vld [vmem:[%s17559_s1 + $0x7d8] sm:$0xff] }
 0xc3c   : > { %10812 = vmatpush3.bf16.msra.mxu0 %v10809_v1  ;;  %v8778_v1 = vld [vmem:[%s17559_s1 + $0x7c0] sm:$0xff] }
 0xc3d   : > { %10814 = vmatprep.subr.bf16.mxu0 %v10813_v18  ;;  %v10855_v16 = vpack.c.bf16 %v8779_v62, %v8778_v1  ;;  %v8771_v1 = vld [vmem:[%s17559_s1 + $0x788] sm:$0xff]  ;;  %v8754_v62 = vld [vmem:[%s17559_s1 + $0x700] sm:$0xff] }
 0xc3e   : > { %v10837_v58 = vpack.c.bf16 %v8771_v1, %v8770_v61 }
 0xc3f   : > { %10856 = vmatpush3.bf16.msra.mxu1 %v10855_v16 }
 0xc40   : > { %10816 = vmatpush3.bf16.msra.mxu0 %v10813_v18  ;;  %v8780_v18 = vld [vmem:[%s17559_s1 + $0x7d0] sm:$0xff]  ;;  %10858 = vmatprep.subr.bf16.mxu1 %v10857_v45  ;;  %v10839_v45 = vpack.c.bf16 %v8755_v20, %v8754_v62  ;;  %v8815_v62 = vld [vmem:[%s17559_s1 + $0x8e8] sm:$0xff] }
 0xc41   : > { %10818 = vmatprep.subr.bf16.mxu0 %v10817_v60  ;;  %v10859_v2 = vpack.c.bf16 %v8781_v35, %v8780_v18  ;;  %v8807_v18 = vld [vmem:[%s17559_s1 + $0x8a8] sm:$0xff]  ;;  %v8790_v35 = vld [vmem:[%s17559_s1 + $0x820] sm:$0xff] }
 0xc43   : > { %10860 = vmatpush3.bf16.msra.mxu1 %v10859_v2  ;;  %v8772_v2 = vld [vmem:[%s17559_s1 + $0x790] sm:$0xff] }
 0xc44   : > { %10820 = vmatpush3.bf16.msra.mxu0 %v10817_v60  ;;  %v8746_v60 = vld [vmem:[%s17559_s1 + $0x6c0] sm:$0xff] }
 0xc47   : > { %10076 = vmatmul.mubr.msk.f32.vlgmr.msra.gmra.mrb[116].mxu0 %vm17516_vm3, %v4487_v56  ;;  %v8747_v56 = vld [vmem:[%s17559_s1 + $0x6c8] sm:$0xff] }
 0xce8   : > { %v4201_v39 = vpop.f32.mrb[108].mxu0  ;;  %v4355_v33 = vpop.f32.mrb[112].mxu1 }
 0xce9   : > { %v11317_v5 = vadd.f32 %v4201_v39, %v4041_v30  ;;  %v11321_v37 = vadd.f32 %v4355_v33, %v4049_v21  ;;  %v4203_v22 = vpop.f32.mrb[109].mxu0  ;;  %v4357_v26 = vpop.f32.mrb[113].mxu1  ;;  %v8782_v39 = vld [vmem:[%s17559_s1 + $0x7e0] sm:$0xff] }
 0xcea   : > { %v11318_v11 = vadd.f32 %v4203_v22, %v4045_v13  ;;  %v11322_v36 = vadd.f32 %v4357_v26, %v4053_v48  ;;  %v8765_v22 = vld [vmem:[%s17559_s1 + $0x758] sm:$0xff] }
 0xceb   : > { %4366 = vst [vmem:[%s367_s27] sm:$0xff] %v11317_v5  ;;  %4368 = vst [vmem:[%s367_s27 + $0x10] sm:$0xff] %v11321_v37  ;;  %v8783_v5 = vld [vmem:[%s17559_s1 + $0x7e8] sm:$0xff]  ;;  %v8764_v37 = vld [vmem:[%s17559_s1 + $0x750] sm:$0xff] }
 0xcec   : > { %4367 = vst [vmem:[%s367_s27 + $0x8] sm:$0xff] %v11318_v11  ;;  %4369 = vst [vmem:[%s367_s27 + $0x18] sm:$0xff] %v11322_v36  ;;  %v4207_v14 = vpop.f32.mrb[110].mxu0  ;;  %v4361_v31 = vpop.f32.mrb[114].mxu1  ;;  %v10825_v26 = vpack.c.bf16 %v8765_v22, %v8764_v37  ;;  %v8748_v11 = vld [vmem:[%s17559_s1 + $0x6d0] sm:$0xff]  ;;  %v8749_v36 = vld [vmem:[%s17559_s1 + $0x6d8] sm:$0xff] }
 0xced   : > { %v11319_v57 = vadd.f32 %v4207_v14, %v4041_v30  ;;  %v11323_v17 = vadd.f32 %v4361_v31, %v4049_v21  ;;  %v4209_v46 = vpop.f32.mrb[111].mxu0  ;;  %v4363_v54 = vpop.f32.mrb[115].mxu1  ;;  %v10821_v30 = vpack.c.bf16 %v8763_v15, %v8762_v19  ;;  %v10823_v21 = vpack.c.bf16 %v8747_v56, %v8746_v60  ;;  %v8800_v14 = vld [vmem:[%s17559_s1 + $0x870] sm:$0xff]  ;;  %v8791_v19 = vld [vmem:[%s17559_s1 + $0x828] sm:$0xff]  ;;  %v8793_v22 = vld [vmem:[%s17559_s1 + $0x838] sm:$0xff] }
 0xcee   : > { %v11320_v52 = vadd.f32 %v4209_v46, %v4045_v13  ;;  %v11324_v51 = vadd.f32 %v4363_v54, %v4053_v48  ;;  %v8798_v13 = vld [vmem:[%s17559_s1 + $0x860] sm:$0xff]  ;;  %v8799_v48 = vld [vmem:[%s17559_s1 + $0x868] sm:$0xff]  ;;  %v10827_v31 = vpack.c.bf16 %v8749_v36, %v8748_v11  ;;  %v10877_v60 = vpack.c.bf16 %v8807_v18, %v8806_v3  ;;  %v8792_v37 = vld [vmem:[%s17559_s1 + $0x830] sm:$0xff] }
 0xcef   : > { %4370 = vst [vmem:[%s367_s27 + $0x20] sm:$0xff] %v11319_v57  ;;  %4372 = vst [vmem:[%s367_s27 + $0x30] sm:$0xff] %v11323_v17  ;;  %v10861_v33 = vpack.c.bf16 %v8799_v48, %v8798_v13  ;;  %10822 = vmatprep.subr.bf16.mxu0 %v10821_v30  ;;  %v8801_v57 = vld [vmem:[%s17559_s1 + $0x878] sm:$0xff]  ;;  %v10863_v17 = vpack.c.bf16 %v8783_v5, %v8782_v39  ;;  %v8766_v46 = vld [vmem:[%s17559_s1 + $0x760] sm:$0xff]  ;;  %v10879_v56 = vpack.c.bf16 %v8791_v19, %v8790_v35 }
 0xcf0   : > { %4371 = vst [vmem:[%s367_s27 + $0x28] sm:$0xff] %v11320_v52  ;;  %4373 = vst [vmem:[%s367_s27 + $0x38] sm:$0xff] %v11324_v51  ;;  %10824 = vmatpush3.bf16.msra.mxu0 %v10823_v21  ;;  %v8767_v54 = vld [vmem:[%s17559_s1 + $0x768] sm:$0xff]  ;;  %v8750_v52 = vld [vmem:[%s17559_s1 + $0x6e0] sm:$0xff]  ;;  %v10865_v51 = vpack.c.bf16 %v8801_v57, %v8800_v14  ;;  %v10883_v11 = vpack.c.bf16 %v8793_v22, %v8792_v37  ;;  %s17651_s27 = smov 116  }
 0xcf1   : > { %10826 = vmatprep.subr.bf16.mxu0 %v10825_v26  ;;  %10862 = vmatprep.subr.bf16.mxu1 %v10861_v33  ;;  %v8773_v30 = vld [vmem:[%s17559_s1 + $0x798] sm:$0xff]  ;;  %v8756_v13 = vld [vmem:[%s17559_s1 + $0x710] sm:$0xff]  ;;  %v8774_v36 = vld [vmem:[%s17559_s1 + $0x7a0] sm:$0xff] }
 0xcf2   : > { %10864 = vmatpush3.bf16.msra.mxu1 %v10863_v17  ;;  %v10841_v21 = vpack.c.bf16 %v8773_v30, %v8772_v2  ;;  %v8757_v48 = vld [vmem:[%s17559_s1 + $0x718] sm:$0xff]  ;;  %v8808_v39 = vld [vmem:[%s17559_s1 + $0x8b0] sm:$0xff]  ;;  %v8775_v14 = vld [vmem:[%s17559_s1 + $0x7a8] sm:$0xff] }
 0xcf3   : > { %10866 = vmatprep.subr.bf16.mxu1 %v10865_v51  ;;  %v10843_v33 = vpack.c.bf16 %v8757_v48, %v8756_v13  ;;  %v8809_v5 = vld [vmem:[%s17559_s1 + $0x8b8] sm:$0xff]  ;;  %v8758_v57 = vld [vmem:[%s17559_s1 + $0x720] sm:$0xff]  ;;  %v8759_v17 = vld [vmem:[%s17559_s1 + $0x728] sm:$0xff] }
 0xcf4   : > { %10828 = vmatpush3.bf16.msra.mxu0 %v10827_v31  ;;  %v10881_v26 = vpack.c.bf16 %v8809_v5, %v8808_v39  ;;  %v10845_v31 = vpack.c.bf16 %v8775_v14, %v8774_v36  ;;  %v8816_v18 = vld [vmem:[%s17559_s1 + $0x8f0] sm:$0xff]  ;;  %v8817_v35 = vld [vmem:[%s17559_s1 + $0x8f8] sm:$0xff]  ;;  %v8822_v37 = vld [vmem:[%s17405_s3 + $0x4] sm:$0xf] }
 0xcf5   : > { %v8819_v14 = vld [vmem:[%s17404_s2 + $0x3] ss:$0 sm:$0xff] }
 0xd09   : > { %v9619_v38 = vpop.f32.mrb[112].mxu0  ;;  %v9657_v47 = vpop.f32.mrb[116].mxu1 }
 0xd0a   : > { %v9620_v25 = vpop.f32.mrb[113].mxu0  ;;  %v9658_v49 = vpop.f32.mrb[117].mxu1 }
 0xd0b   : > { %v9621_v29 = vadd.f32 %v9620_v25, %v9619_v38  ;;  %v9659_v9 = vadd.f32 %v9658_v49, %v9657_v47  ;;  %v8784_v38 = vld [vmem:[%s17559_s1 + $0x7f0] sm:$0xff]  ;;  %v8785_v47 = vld [vmem:[%s17559_s1 + $0x7f8] sm:$0xff]  ;;  %v8751_v25 = vld [vmem:[%s17559_s1 + $0x6e8] sm:$0xff] }
 0xd0c   : > { %v8802_v49 = vld [vmem:[%s17559_s1 + $0x880] sm:$0xff] }
 0xd0d   : > { %v4642_v50 = vadd.f32 %v9621_v29, %v8743_v6  ;;  %v9622_v12 = vpop.f32.mrb[114].mxu0  ;;  %v9660_v41 = vpop.f32.mrb[118].mxu1  ;;  %v8803_v29 = vld [vmem:[%s17559_s1 + $0x888] sm:$0xff] }
 0xd0e   : > { %v9623_v42 = vpop.f32.mrb[115].mxu0  ;;  %v9661_v40 = vpop.f32.mrb[119].mxu1 }
 0xd0f   : > { %v9624_v34 = vadd.f32 %v9623_v42, %v9622_v12  ;;  %v9662_v7 = vadd.f32 %v9661_v40, %v9660_v41  ;;  %v4717_v43 = vadd.f32 %v9659_v9, %v4642_v50  ;;  %v10831_v9 = vpack.c.bf16 %v8751_v25, %v8750_v52  ;;  %v8786_v41 = vld [vmem:[%s17559_s1 + $0x800] sm:$0xff]  ;;  %v8787_v42 = vld [vmem:[%s17559_s1 + $0x808] sm:$0xff]  ;;  %v8776_v25 = vld [vmem:[%s17559_s1 + $0x7b0] sm:$0xff] }
 0xd10   : > { %v10867_v50 = vpack.c.bf16 %v8785_v47, %v8784_v38  ;;  %v10869_v12 = vpack.c.bf16 %v8803_v29, %v8802_v49  ;;  %v10871_v40 = vpack.c.bf16 %v8787_v42, %v8786_v41  ;;  %v10847_v52 = vpack.c.bf16 %v8759_v17, %v8758_v57  ;;  %v8777_v49 = vld [vmem:[%s17559_s1 + $0x7b8] sm:$0xff]  ;;  %v8810_v41 = vld [vmem:[%s17559_s1 + $0x8c0] sm:$0xff]  ;;  %v8811_v42 = vld [vmem:[%s17559_s1 + $0x8c8] sm:$0xff] }
 0xd11   : > { %v4647_v63 = vadd.f32 %v9624_v34, %v8743_v6  ;;  %v10829_v6 = vpack.c.bf16 %v8767_v54, %v8766_v46  ;;  %v8768_v34 = vld [vmem:[%s17559_s1 + $0x770] sm:$0xff]  ;;  %v10849_v29 = vpack.c.bf16 %v8777_v49, %v8776_v25 }
 0xd12   : > { %10868 = vmatpush3.bf16.msra.mxu1 %v10867_v50  ;;  %v8761_v50 = vld [vmem:[%s17559_s1 + $0x738] sm:$0xff] }
 0xd13   : > { %v4722_v44 = vadd.f32 %v9662_v7, %v4647_v63  ;;  %10830 = vmatprep.subr.bf16.mxu0 %v10829_v6  ;;  %10870 = vmatprep.subr.bf16.mxu1 %v10869_v12  ;;  %v8769_v7 = vld [vmem:[%s17559_s1 + $0x778] sm:$0xff]  ;;  %v8752_v63 = vld [vmem:[%s17559_s1 + $0x6f0] sm:$0xff] }
 0xd14   : > { %10832 = vmatpush3.bf16.msra.mxu0 %v10831_v9  ;;  %v8760_v9 = vld [vmem:[%s17559_s1 + $0x730] sm:$0xff] }
 0xd15   : > { %v10851_v12 = vpack.c.bf16 %v8761_v50, %v8760_v9 }
 0xd16   : > { %10872 = vmatpush3.bf16.msra.mxu1 %v10871_v40  ;;  %v10885_v40 = vpack.c.bf16 %v8811_v42, %v8810_v41 }
 0xd1a   : > { %v10077_v55 = vpop.f32.mrb[116].mxu0 }
 0xd1b   : > { %v4797_v8 = vadd.f32 %v10077_v55, %v4722_v44  ;;  %v4791_v24 = vpop.f32.mrb[117].mxu0  ;;  %v8753_v44 = vld [vmem:[%s17559_s1 + $0x6f8] sm:$0xff]  ;;  %v8804_v55 = vld [vmem:[%s17559_s1 + $0x890] sm:$0xff] }
 0xd1c   : > { %v4792_v28 = vadd.f32 %v4791_v24, %v4717_v43  ;;  %v10833_v43 = vpack.c.bf16 %v8769_v7, %v8768_v34  ;;  %v8805_v24 = vld [vmem:[%s17559_s1 + $0x898] sm:$0xff]  ;;  %v17638_v34 = vmov 0.0|0.0  }
 0xd1d   : > { %v4801_v53 = vmax.f32 %v4797_v8, 0.0  ;;  %v10835_v8 = vpack.c.bf16 %v8753_v44, %v8752_v63 }
 0xd1e   : > { %v4800_v27 = vmax.f32 %v4792_v28, 0.0  ;;  %v8788_v28 = vld [vmem:[%s17559_s1 + $0x810] sm:$0xff]  ;;  %10834 = vmatprep.subr.bf16.mxu0 %v10833_v43 }
 0xd1f   : > { %4806 = vrot.lane.b32.xlu0 %v4801_v53, %s17633_s28  ;;  %v8789_v53 = vld [vmem:[%s17559_s1 + $0x818] sm:$0xff]  ;;  %10836 = vmatpush3.bf16.msra.mxu0 %v10835_v8 }
 0xd20   : > { %4804 = vrot.lane.b32.xlu1 %v4800_v27, %s17633_s28  ;;  %v10873_v27 = vpack.c.bf16 %v8805_v24, %v8804_v55  ;;  %v10875_v10 = vpack.c.bf16 %v8789_v53, %v8788_v28  ;;  %10838 = vmatprep.subr.bf16.mxu0 %v10837_v58  ;;  %v8812_v24 = vld [vmem:[%s17559_s1 + $0x8d0] sm:$0xff]  ;;  %v8813_v28 = vld [vmem:[%s17559_s1 + $0x8d8] sm:$0xff]  ;;  %v8814_v58 = vld [vmem:[%s17559_s1 + $0x8e0] sm:$0xff] }
 0xd21   : > { %v10893_v3 = vpack.c.bf16 %v8815_v62, %v8814_v58 }
 0xd22   : > { %10874 = vmatprep.subr.bf16.mxu1 %v10873_v27 }
 0xd23   : > { %10876 = vmatpush3.bf16.msra.mxu1 %v10875_v10  ;;  %10840 = vmatpush3.bf16.msra.mxu0 %v10839_v45  ;;  %v10889_v10 = vpack.c.bf16 %v8813_v28, %v8812_v24 }
 0xd24   : > { %10878 = vmatprep.subr.bf16.mxu1 %v10877_v60  ;;  %10842 = vmatprep.subr.bf16.mxu0 %v10841_v21  ;;  %v10897_v60 = vpack.c.bf16 %v8817_v35, %v8816_v18 }
 0xd27   : > { %10880 = vmatpush3.bf16.msra.mxu1 %v10879_v56  ;;  %10844 = vmatpush3.bf16.msra.mxu0 %v10843_v33 }
 0xd28   : > { %10882 = vmatprep.subr.bf16.mxu1 %v10881_v26  ;;  %10846 = vmatprep.subr.bf16.mxu0 %v10845_v31 }
 0xd2b   : > { %10884 = vmatpush3.bf16.msra.mxu1 %v10883_v11  ;;  %10848 = vmatpush3.bf16.msra.mxu0 %v10847_v52 }
 0xd2c   : > { %10850 = vmatprep.subr.bf16.mxu0 %v10849_v29  ;;  %10886 = vmatprep.subr.bf16.mxu1 %v10885_v40 }
 0xd2f   : > { %10852 = vmatpush3.bf16.msra.mxu0 %v10851_v12 }
 0xd30   : > { %10949 = vmatprep.subr.bf16.mxu0 %v17638_v34 }
 0xd91   : > { %v4807_v16 = vpop.permute.xlu0 %4806 }
 0xd92   : > { %4811 = vst.msk [vmem:[#allocation2 + $0x9] sm:$0xff] %vm17634_vm1, %v4807_v16  ;;  %v4805_v15 = vpop.permute.xlu1 %4804  ;;  %vm17639_vm1 = vcmask 1048064  }
 0xd93   : > { %4810 = vst.msk [vmem:[#allocation2 + $0x1] sm:$0xff] %vm17635_vm14, %v4805_v15  ;;  %vm17640_vm14 = vmmov %vm17639_vm1 }
 0xd94   : > { %vm17641_vm2 = vmmov %vm17639_vm1 }
 0xd99   : > { %v4841_v46 = vld [vmem:[#allocation2 + $0x9] sm:$0xff] }
 0xd9a   : > { %v4881_v54 = vld [vmem:[#allocation2 + $0xa] sm:$0xff]  ;;  %4846 = vrot.lane.b32.xlu0 %v4841_v46, %s17622_s16  ;;  %v4852_v51 = vld [vmem:[#allocation2 + $0x1] sm:$0xff] }
 0xd9b   : > { %v4880_v38 = vld [vmem:[#allocation2 + $0x2] sm:$0xff]  ;;  %4879 = vst.msk [vmem:[#allocation3 + $0x40] sm:$0xff] %vm17516_vm3, %v4881_v54  ;;  %4856 = vrot.lane.b32.xlu1 %v4852_v51, %s17623_s26 }
 0xd9c   : > { %v4828_v47 = vld [vmem:[#allocation2] sm:$0xff]  ;;  %v4829_v6 = vld [vmem:[#allocation2 + $0x8] sm:$0xff]  ;;  %4878 = vst.msk [vmem:[#allocation3 + $0x18] sm:$0xff] %vm17516_vm3, %v4880_v38 }
 0xd9d   : > { %4814 = vst.msk [vmem:[#allocation3] sm:$0xff] %vm17516_vm3, %v4828_v47  ;;  %4815 = vst.msk [vmem:[#allocation3 + $0x28] sm:$0xff] %vm17516_vm3, %v4829_v6 }
 0xd9e   : > { %4884 = vrot.lane.b32.xlu0 %v4880_v38, %s17636_s12 }
 0xd9f   : > { %4868 = vrot.lane.b32.xlu1 %v4852_v51, %s17637_s19 }
 0xda2   : > { %4832 = vrot.lane.b32.xlu0 %v4828_v47, %s17620_s25 }
 0xda3   : > { %4844 = vrot.lane.b32.xlu1 %v4852_v51, %s17622_s16  ;;  %s17657_s16 = smov 100  }
 0xda6   : > { %4820 = vrot.lane.b32.xlu0 %v4828_v47, %s17636_s12 }
 0xda7   : > { %4886 = vrot.lane.b32.xlu1 %v4881_v54, %s17636_s12 }
 0xdaa   : > { %4858 = vrot.lane.b32.xlu0 %v4841_v46, %s17623_s26 }
 0xdab   : > { %4834 = vrot.lane.b32.xlu1 %v4829_v6, %s17620_s25 }
 0xdae   : > { %4870 = vrot.lane.b32.xlu0 %v4841_v46, %s17637_s19 }
 0xdaf   : > { %4822 = vrot.lane.b32.xlu1 %v4829_v6, %s17636_s12 }
 0xdb2   : > { %4898 = vrot.lane.b32.xlu0 %v4881_v54, %s17620_s25 }
 0xdb3   : > { %4896 = vrot.lane.b32.xlu1 %v4880_v38, %s17620_s25 }
 0xe0c   : > { %v4847_v7 = vpop.permute.xlu0 %4846 }
 0xe0d   : > { %v4857_v43 = vpop.permute.xlu1 %4856 }
 0xe0e   : > { %4862 = vst.msk [vmem:[#allocation3 + $0x10] sm:$0xff] %vm17516_vm3, %v4857_v43 }
 0xe10   : > { %v4885_v63 = vpop.permute.xlu0 %4884 }
 0xe11   : > { %4890 = vst.msk [vmem:[#allocation3 + $0x18] sm:$0xff] %vm17639_vm1, %v4885_v63  ;;  %v4869_v44 = vpop.permute.xlu1 %4868 }
 0xe12   : > { %4874 = vst.msk [vmem:[#allocation3 + $0x10] sm:$0xff] %vm17640_vm14, %v4869_v44  ;;  %vm17642_vm14 = vmmov %vm17639_vm1 }
 0xe14   : > { %v4833_v55 = vpop.permute.xlu0 %4832 }
 0xe15   : > { %4838 = vst.msk [vmem:[#allocation3 + $0x8] sm:$0xff] %vm17516_vm3, %v4833_v55  ;;  %v4845_v8 = vpop.permute.xlu1 %4844 }
 0xe16   : > { %4850 = vst.msk [vmem:[#allocation3 + $0x8] sm:$0xff] %vm17641_vm2, %v4845_v8  ;;  %vm17643_vm2 = vmmov %vm17639_vm1 }
 0xe18   : > { %v4821_v53 = vpop.permute.xlu0 %4820  ;;  %v4907_v27 = vld [vmem:[#allocation3 + $0x18] sm:$0xff] }
 0xe19   : > { %4826 = vst.msk [vmem:[#allocation3] sm:$0xff] %vm17639_vm1, %v4821_v53  ;;  %5140 = vmatprep.mubr.f32.mxu1 %v4907_v27  ;;  %v4887_v61 = vpop.permute.xlu1 %4886  ;;  %v4906_v1 = vld [vmem:[#allocation3 + $0x10] sm:$0xff] }
 0xe1a   : > { %4891 = vst.msk [vmem:[#allocation3 + $0x40] sm:$0xff] %vm17642_vm14, %v4887_v61  ;;  %5141 = vmatmul.mubr.f32.vlgmr.msra.gmra.mrb[120].mxu1 %v4906_v1  ;;  %vm17644_vm14 = vmmov %vm17639_vm1 }
 0xe1b   : > { %10888 = vmatpush3.bf16.msra.mxu1 %v10885_v40 }
 0xe1c   : > { %v4859_v20 = vpop.permute.xlu0 %4858  ;;  %10890 = vmatprep.subr.bf16.mxu1 %v10889_v10 }
 0xe1d   : > { %4863 = vst.msk [vmem:[#allocation3 + $0x38] sm:$0xff] %vm17516_vm3, %v4859_v20  ;;  %v4835_v16 = vpop.permute.xlu1 %4834  ;;  %v4905_v45 = vld [vmem:[#allocation3 + $0x8] sm:$0xff] }
 0xe1e   : > { %4839 = vst.msk [vmem:[#allocation3 + $0x30] sm:$0xff] %vm17516_vm3, %v4835_v16  ;;  %5065 = vmatprep.mubr.f32.mxu0 %v4905_v45 }
 0xe1f   : > { %4851 = vst.msk [vmem:[#allocation3 + $0x30] sm:$0xff] %vm17643_vm2, %v4847_v7  ;;  %10892 = vmatpush3.bf16.msra.mxu1 %v10889_v10  ;;  %vm17645_vm2 = vcmask 1043456  }
 0xe20   : > { %v4871_v19 = vpop.permute.xlu0 %4870  ;;  %v4904_v15 = vld [vmem:[#allocation3] sm:$0xff]  ;;  %10894 = vmatprep.subr.bf16.mxu1 %v10893_v3 }
 0xe21   : > { %4875 = vst.msk [vmem:[#allocation3 + $0x38] sm:$0xff] %vm17639_vm1, %v4871_v19  ;;  %v4823_v56 = vpop.permute.xlu1 %4822  ;;  %5066 = vmatmul.mubr.f32.vlgmr.msra.gmra.mrb[118].mxu0 %v4904_v15  ;;  %v4912_v2 = vld [vmem:[#allocation3 + $0x40] sm:$0xff]  ;;  %vm17646_vm1 = vmmov %vm17645_vm2 }
 0xe22   : > { %4827 = vst.msk [vmem:[#allocation3 + $0x28] sm:$0xff] %vm17644_vm14, %v4823_v56  ;;  %5145 = vmatprep.mubr.f32.mxu1 %v4912_v2  ;;  %vm17649_vm14 = vcmask 31744  }
 0xe23   : > { %10896 = vmatpush3.bf16.msra.mxu1 %v10893_v3 }
 0xe24   : > { %v4899_v30 = vpop.permute.xlu0 %4898  ;;  %10898 = vmatprep.subr.bf16.mxu1 %v10897_v60 }
 0xe25   : > { %4903 = vst.msk [vmem:[#allocation3 + $0x48] sm:$0xff] %vm17516_vm3, %v4899_v30  ;;  %v4897_v21 = vpop.permute.xlu1 %4896 }
 0xe26   : > { %4902 = vst.msk [vmem:[#allocation3 + $0x20] sm:$0xff] %vm17516_vm3, %v4897_v21  ;;  %v4910_v13 = vld [vmem:[#allocation3 + $0x30] sm:$0xff] }
 0xe27   : > { %5070 = vmatprep.mubr.f32.mxu0 %v4910_v13  ;;  %10900 = vmatpush3.bf16.msra.mxu1 %v10897_v60 }
 0xe28   : > { %v4911_v48 = vld [vmem:[#allocation3 + $0x38] sm:$0xff]  ;;  %10097 = vmatprep.subr.msk.mxu1 %vm17645_vm2, %v8822_v37  ;;  %vm17650_vm2 = vmmov %vm17649_vm14 }
 0xe29   : > { %5146 = vmatmul.mubr.f32.gmra.mrb[122].mxu1 %v4911_v48  ;;  %v4909_v39 = vld [vmem:[#allocation3 + $0x28] sm:$0xff] }
 0xe2a   : > { %5071 = vmatmul.mubr.f32.gmra.mrb[120].mxu0 %v4909_v39 }
 0xe2c   : > { %v4913_v5 = vld [vmem:[#allocation3 + $0x48] sm:$0xff] }
 0xe2d   : > { %v4908_v33 = vld [vmem:[#allocation3 + $0x20] sm:$0xff] }
 0xe2e   : > { %10094 = vmatprep.mubr.msk.f32.mxu1 %vm17516_vm3, %v4908_v33 }
 0xe2f   : > { %10095 = vmatmul.mubr.msk.f32.vlgmr.msra.gmra.mrb[124].mxu1 %vm17516_vm3, %v4913_v5 }
 0xe30   : > { %10098 = vmatpush3.msk.msra.mxu1 %vm17646_vm1, %v8822_v37  ;;  %vm17652_vm1 = vmmov %vm17650_vm2 }
 0xe31   : > { %vm17668_vm3 = vmmov %vm17652_vm1 }
 0xe32   : > { %vm17669_vm4 = vmmov %vm17652_vm1 }
 0xe33   : > { %vm17670_vm5 = vmmov %vm17652_vm1 }
 0xe34   : > { %vm17671_vm6 = vmmov %vm17652_vm1 }
 0xe35   : > { %vm17675_vm0 = vmmov %vm17652_vm1 }
 0xeed   : > { %v9743_v22 = vpop.f32.mrb[120].mxu1 }
 0xeee   : > { %v9744_v26 = vpop.f32.mrb[121].mxu1 }
 0xeef   : > { %v9745_v11 = vadd.f32 %v9744_v26, %v9743_v22 }
 0xef4   : > { %v9705_v36 = vpop.f32.mrb[118].mxu0 }
 0xef5   : > { %v9706_v31 = vpop.f32.mrb[119].mxu0 }
 0xef6   : > { %v9707_v57 = vadd.f32 %v9706_v31, %v9705_v36 }
 0xef8   : > { %v5068_v17 = vadd.f32 %v9707_v57, %v8819_v14 }
 0xefa   : > { %v5143_v46 = vadd.f32 %v9745_v11, %v5068_v17 }
 0xefc   : > { %v9746_v54 = vpop.f32.mrb[122].mxu1 }
 0xefd   : > { %v9708_v52 = vpop.f32.mrb[120].mxu0  ;;  %v9747_v51 = vpop.f32.mrb[123].mxu1 }
 0xefe   : > { %v9748_v38 = vadd.f32 %v9747_v51, %v9746_v54  ;;  %v9709_v47 = vpop.f32.mrb[121].mxu0 }
 0xeff   : > { %v9710_v6 = vadd.f32 %v9709_v47, %v9708_v52 }
 0xf01   : > { %v5073_v25 = vadd.f32 %v9710_v6, %v8819_v14 }
 0xf02   : > { %v10096_v49 = vpop.f32.mrb[124].mxu1 }
 0xf03   : > { %v5148_v29 = vadd.f32 %v9748_v38, %v5073_v25  ;;  %v5217_v9 = vpop.f32.mrb[125].mxu1 }
 0xf04   : > { %v5218_v50 = vadd.f32 %v5217_v9, %v5143_v46 }
 0xf05   : > { %v5223_v12 = vadd.f32 %v10096_v49, %v5148_v29 }
 0xf06   : > { %v15370_v41 = vmax.f32 %v5218_v50, 0.0 }
 0xf07   : > { %v15372_v42 = vmax.f32 %v5223_v12, 0.0 }
 0xf08   : > { %17647 = vst [vmem:[#allocation22_spill] sm:$0xff] %v15370_v41  ;;  %5228 = vst.msk [vmem:[#allocation4] sm:$0xff] %vm17649_vm14, %v15370_v41  ;;  %5232 = vrot.lane.b32.xlu1 %v15370_v41, %s17623_s26 }
 0xf09   : > { %17648 = vst [vmem:[#allocation18_spill] sm:$0xff] %v15372_v42  ;;  %5229 = vst.msk [vmem:[#allocation4 + $0x8] sm:$0xff] %vm17650_vm2, %v15372_v42  ;;  %5234 = vrot.lane.b32.xlu0 %v15372_v42, %s17623_s26 }
 0xf0a   : > { %vm17653_vm14 = vmmov %vm17652_vm1 }
 0xf0b   : > { %vm17666_vm2 = vmmov %vm17652_vm1 }
 0xf0c   : > { %5240 = vrot.lane.b32.xlu1 %v15370_v41, %s17620_s25 }
 0xf0d   : > { %5242 = vrot.lane.b32.xlu0 %v15372_v42, %s17620_s25 }
 0xf0f   : > { %v5352_v40 = vld [vmem:[#allocation4] sm:$0xff] }
 0xf10   : > { %5248 = vrot.lane.b32.xlu1 %v15370_v41, %s17651_s27  ;;  %10099 = vmatprep.mubr.msk.f32.mxu1 %vm17652_vm1, %v5352_v40  ;;  %v5353_v7 = vld [vmem:[#allocation4 + $0x8] sm:$0xff] }
 0xf11   : > { %5250 = vrot.lane.b32.xlu0 %v15372_v42, %s17651_s27  ;;  %10100 = vmatmul.mubr.msk.f32.vlgmr.msra.gmra.mrb[126].mxu1 %vm17653_vm14, %v5353_v7  ;;  %s17663_s27 = smov 76   ;;  %vm17667_vm14 = vmmov %vm17652_vm1 }
 0xf14   : > { %5256 = vrot.lane.b32.xlu1 %v15370_v41, %s17654_s24 }
 0xf15   : > { %5258 = vrot.lane.b32.xlu0 %v15372_v42, %s17654_s24  ;;  %s17664_s24 = smov 72  }
 0xf18   : > { %5264 = vrot.lane.b32.xlu1 %v15370_v41, %s17655_s17 }
 0xf19   : > { %5266 = vrot.lane.b32.xlu0 %v15372_v42, %s17655_s17  ;;  %s17665_s17 = smov 68  }
 0xf1c   : > { %5272 = vrot.lane.b32.xlu1 %v15370_v41, %s17656_s22 }
 0xf1d   : > { %5274 = vrot.lane.b32.xlu0 %v15372_v42, %s17656_s22  ;;  %s17864_s22 = smov 48  }
 0xf20   : > { %5280 = vrot.lane.b32.xlu1 %v15370_v41, %s17657_s16 }
 0xf21   : > { %5282 = vrot.lane.b32.xlu0 %v15372_v42, %s17657_s16  ;;  %s17865_s16 = smov 52  }
 0xf24   : > { %5288 = vrot.lane.b32.xlu1 %v15370_v41, %s17658_s15 }
 0xf25   : > { %5290 = vrot.lane.b32.xlu0 %v15372_v42, %s17658_s15 }
 0xf28   : > { %5296 = vrot.lane.b32.xlu1 %v15370_v41, %s17659_s20 }
 0xf29   : > { %5298 = vrot.lane.b32.xlu0 %v15372_v42, %s17659_s20 }
 0xf2c   : > { %5304 = vrot.lane.b32.xlu1 %v15370_v41, %s17660_s23 }
 0xf2d   : > { %5306 = vrot.lane.b32.xlu0 %v15372_v42, %s17660_s23 }
 0xf30   : > { %5312 = vrot.lane.b32.xlu1 %v15370_v41, %s17661_s18 }
 0xf31   : > { %5314 = vrot.lane.b32.xlu0 %v15372_v42, %s17661_s18  ;;  %s17858_s18 = smov 12  }
 0xf34   : > { %5320 = vrot.lane.b32.xlu1 %v15370_v41, %s17662_s11 }
 0xf35   : > { %5322 = vrot.lane.b32.xlu0 %v15372_v42, %s17662_s11  ;;  %s17859_s11 = smov 16  }
 0xf38   : > { %5328 = vrot.lane.b32.xlu1 %v15370_v41, %s17663_s27 }
 0xf39   : > { %5330 = vrot.lane.b32.xlu0 %v15372_v42, %s17663_s27  ;;  %s17860_s27 = smov 20  }
 0xf3c   : > { %5336 = vrot.lane.b32.xlu1 %v15370_v41, %s17664_s24 }
 0xf3d   : > { %5338 = vrot.lane.b32.xlu0 %v15372_v42, %s17664_s24  ;;  %s17857_s24 = smov 8  }
 0xf40   : > { %5344 = vrot.lane.b32.xlu1 %v15370_v41, %s17665_s17 }
 0xf41   : > { %5346 = vrot.lane.b32.xlu0 %v15372_v42, %s17665_s17  ;;  %s17861_s17 = smov 28  }
 0xf7a   : > { %v5233_v43 = vpop.permute.xlu1 %5232 }
 0xf7b   : > { %5238 = vst.msk [vmem:[#allocation4 + $0x10] sm:$0xff] %vm17666_vm2, %v5233_v43  ;;  %v5235_v63 = vpop.permute.xlu0 %5234  ;;  %vm17672_vm2 = vmmov %vm17652_vm1 }
 0xf7c   : > { %5239 = vst.msk [vmem:[#allocation4 + $0x18] sm:$0xff] %vm17652_vm1, %v5235_v63 }
 0xf7e   : > { %v5241_v44 = vpop.permute.xlu1 %5240 }
 0xf7f   : > { %5246 = vst.msk [vmem:[#allocation4 + $0x20] sm:$0xff] %vm17667_vm14, %v5241_v44  ;;  %v5243_v55 = vpop.permute.xlu0 %5242  ;;  %vm17673_vm14 = vmmov %vm17652_vm1 }
 0xf80   : > { %5247 = vst.msk [vmem:[#allocation4 + $0x28] sm:$0xff] %vm17668_vm3, %v5243_v55  ;;  %vm17674_vm3 = vmmov %vm17652_vm1 }
 0xf82   : > { %v5249_v8 = vpop.permute.xlu1 %5248  ;;  %v5354_v24 = vld [vmem:[#allocation4 + $0x10] sm:$0xff] }
 0xf83   : > { %5254 = vst.msk [vmem:[#allocation4 + $0x30] sm:$0xff] %vm17669_vm4, %v5249_v8  ;;  %v5251_v28 = vpop.permute.xlu0 %5250  ;;  %10102 = vmatprep.mubr.msk.f32.mxu1 %vm17670_vm5, %v5354_v24  ;;  %v5355_v53 = vld [vmem:[#allocation4 + $0x18] sm:$0xff]  ;;  %vm17676_vm4 = vmmov %vm17675_vm0 }
 0xf84   : > { %5255 = vst.msk [vmem:[#allocation4 + $0x38] sm:$0xff] %vm17671_vm6, %v5251_v28  ;;  %10103 = vmatmul.mubr.msk.f32.gmra.mrb[128].mxu1 %vm17672_vm2, %v5355_v53  ;;  %vm17677_vm5 = vmmov %vm17675_vm0 }
 0xf85   : > { %vm17678_vm6 = vmmov %vm17675_vm0 }
 0xf86   : > { %v5257_v27 = vpop.permute.xlu1 %5256  ;;  %v5356_v10 = vld [vmem:[#allocation4 + $0x20] sm:$0xff]  ;;  %vm17679_vm2 = vmmov %vm17675_vm0 }
 0xf87   : > { %5262 = vst.msk [vmem:[#allocation4 + $0x40] sm:$0xff] %vm17652_vm1, %v5257_v27  ;;  %v5259_v61 = vpop.permute.xlu0 %5258  ;;  %10105 = vmatprep.mubr.msk.f32.mxu1 %vm17673_vm14, %v5356_v10  ;;  %v5357_v1 = vld [vmem:[#allocation4 + $0x28] sm:$0xff]  ;;  %vm17680_vm1 = vmmov %vm17675_vm0 }
 0xf88   : > { %5263 = vst.msk [vmem:[#allocation4 + $0x48] sm:$0xff] %vm17674_vm3, %v5259_v61  ;;  %10106 = vmatmul.mubr.msk.f32.gmra.mrb[130].mxu1 %vm17675_vm0, %v5357_v1  ;;  %vm17681_vm14 = vmmov %vm17675_vm0 }
 0xf89   : > { %vm17682_vm3 = vmmov %vm17675_vm0 }
 0xf8a   : > { %v5265_v58 = vpop.permute.xlu1 %5264  ;;  %v5358_v62 = vld [vmem:[#allocation4 + $0x30] sm:$0xff] }
 0xf8b   : > { %5270 = vst.msk [vmem:[#allocation4 + $0x50] sm:$0xff] %vm17676_vm4, %v5265_v58  ;;  %v5267_v20 = vpop.permute.xlu0 %5266  ;;  %10108 = vmatprep.mubr.msk.f32.mxu1 %vm17677_vm5, %v5358_v62  ;;  %v5359_v3 = vld [vmem:[#allocation4 + $0x38] sm:$0xff]  ;;  %vm17683_vm4 = vmmov %vm17675_vm0 }
 0xf8c   : > { %5271 = vst.msk [vmem:[#allocation4 + $0x58] sm:$0xff] %vm17678_vm6, %v5267_v20  ;;  %10109 = vmatmul.mubr.msk.f32.gmra.mrb[132].mxu1 %vm17679_vm2, %v5359_v3  ;;  %vm17684_vm5 = vmmov %vm17675_vm0 }
 0xf8d   : > { %vm17685_vm6 = vmmov %vm17675_vm0 }
 0xf8e   : > { %v5273_v16 = vpop.permute.xlu1 %5272  ;;  %v5360_v45 = vld [vmem:[#allocation4 + $0x40] sm:$0xff]  ;;  %vm17686_vm2 = vmmov %vm17675_vm0 }
 0xf8f   : > { %5278 = vst.msk [vmem:[#allocation4 + $0x60] sm:$0xff] %vm17680_vm1, %v5273_v16  ;;  %v5275_v18 = vpop.permute.xlu0 %5274  ;;  %10111 = vmatprep.mubr.msk.f32.mxu1 %vm17681_vm14, %v5360_v45  ;;  %v5361_v35 = vld [vmem:[#allocation4 + $0x48] sm:$0xff]  ;;  %vm17687_vm1 = vmmov %vm17675_vm0 }
 0xf90   : > { %5279 = vst.msk [vmem:[#allocation4 + $0x68] sm:$0xff] %vm17675_vm0, %v5275_v18  ;;  %10112 = vmatmul.mubr.msk.f32.gmra.mrb[134].mxu1 %vm17682_vm3, %v5361_v35  ;;  %vm17688_vm14 = vmmov %vm17675_vm0 }
 0xf91   : > { %vm17689_vm3 = vmmov %vm17675_vm0 }
 0xf92   : > { %v5281_v19 = vpop.permute.xlu1 %5280  ;;  %v5362_v15 = vld [vmem:[#allocation4 + $0x50] sm:$0xff] }
 0xf93   : > { %5286 = vst.msk [vmem:[#allocation4 + $0x70] sm:$0xff] %vm17683_vm4, %v5281_v19  ;;  %v5283_v60 = vpop.permute.xlu0 %5282  ;;  %10114 = vmatprep.mubr.msk.f32.mxu1 %vm17684_vm5, %v5362_v15  ;;  %v5363_v56 = vld [vmem:[#allocation4 + $0x58] sm:$0xff]  ;;  %vm17690_vm4 = vmmov %vm17675_vm0 }
 0xf94   : > { %5287 = vst.msk [vmem:[#allocation4 + $0x78] sm:$0xff] %vm17685_vm6, %v5283_v60  ;;  %10115 = vmatmul.mubr.msk.f32.gmra.mrb[136].mxu1 %vm17686_vm2, %v5363_v56  ;;  %vm17691_vm5 = vmmov %vm17675_vm0 }
 0xf95   : > { %vm17692_vm6 = vmmov %vm17675_vm0 }
 0xf96   : > { %v5289_v2 = vpop.permute.xlu1 %5288  ;;  %v5364_v30 = vld [vmem:[#allocation4 + $0x60] sm:$0xff]  ;;  %vm17693_vm2 = vmmov %vm17675_vm0 }
 0xf97   : > { %5294 = vst.msk [vmem:[#allocation4 + $0x80] sm:$0xff] %vm17687_vm1, %v5289_v2  ;;  %v5291_v21 = vpop.permute.xlu0 %5290  ;;  %10117 = vmatprep.mubr.msk.f32.mxu1 %vm17688_vm14, %v5364_v30  ;;  %v5365_v13 = vld [vmem:[#allocation4 + $0x68] sm:$0xff]  ;;  %vm17694_vm1 = vmmov %vm17675_vm0 }
 0xf98   : > { %5295 = vst.msk [vmem:[#allocation4 + $0x88] sm:$0xff] %vm17675_vm0, %v5291_v21  ;;  %10118 = vmatmul.mubr.msk.f32.gmra.mrb[138].mxu1 %vm17689_vm3, %v5365_v13  ;;  %vm17695_vm14 = vmmov %vm17675_vm0 }
 0xf99   : > { %vm17696_vm3 = vmmov %vm17675_vm0 }
 0xf9a   : > { %v5297_v48 = vpop.permute.xlu1 %5296  ;;  %v5366_v39 = vld [vmem:[#allocation4 + $0x70] sm:$0xff] }
 0xf9b   : > { %5302 = vst.msk [vmem:[#allocation4 + $0x90] sm:$0xff] %vm17690_vm4, %v5297_v48  ;;  %v5299_v33 = vpop.permute.xlu0 %5298  ;;  %10120 = vmatprep.mubr.msk.f32.mxu1 %vm17691_vm5, %v5366_v39  ;;  %v5367_v5 = vld [vmem:[#allocation4 + $0x78] sm:$0xff]  ;;  %vm17697_vm4 = vmmov %vm17675_vm0 }
 0xf9c   : > { %5303 = vst.msk [vmem:[#allocation4 + $0x98] sm:$0xff] %vm17692_vm6, %v5299_v33  ;;  %10121 = vmatmul.mubr.msk.f32.gmra.mrb[140].mxu1 %vm17693_vm2, %v5367_v5  ;;  %vm17698_vm5 = vmmov %vm17675_vm0 }
 0xf9d   : > { %vm17699_vm6 = vmmov %vm17675_vm0 }
 0xf9e   : > { %v5305_v37 = vpop.permute.xlu1 %5304  ;;  %v5368_v22 = vld [vmem:[#allocation4 + $0x80] sm:$0xff]  ;;  %vm17700_vm2 = vmmov %vm17675_vm0 }
 0xf9f   : > { %5310 = vst.msk [vmem:[#allocation4 + $0xa0] sm:$0xff] %vm17694_vm1, %v5305_v37  ;;  %v5307_v26 = vpop.permute.xlu0 %5306  ;;  %10123 = vmatprep.mubr.msk.f32.mxu1 %vm17695_vm14, %v5368_v22  ;;  %v5369_v11 = vld [vmem:[#allocation4 + $0x88] sm:$0xff]  ;;  %vm17701_vm1 = vmmov %vm17675_vm0 }
 0xfa0   : > { %5311 = vst.msk [vmem:[#allocation4 + $0xa8] sm:$0xff] %vm17675_vm0, %v5307_v26  ;;  %10124 = vmatmul.mubr.msk.f32.gmra.mrb[142].mxu1 %vm17696_vm3, %v5369_v11  ;;  %vm17702_vm14 = vmmov %vm17675_vm0 }
 0xfa1   : > { %vm17703_vm3 = vmmov %vm17675_vm0 }
 0xfa2   : > { %v5313_v36 = vpop.permute.xlu1 %5312  ;;  %v5370_v14 = vld [vmem:[#allocation4 + $0x90] sm:$0xff] }
 0xfa3   : > { %5318 = vst.msk [vmem:[#allocation4 + $0xb0] sm:$0xff] %vm17697_vm4, %v5313_v36  ;;  %v5315_v31 = vpop.permute.xlu0 %5314  ;;  %10126 = vmatprep.mubr.msk.f32.mxu1 %vm17698_vm5, %v5370_v14  ;;  %v5371_v57 = vld [vmem:[#allocation4 + $0x98] sm:$0xff]  ;;  %vm17704_vm4 = vmmov %vm17675_vm0 }
 0xfa4   : > { %5319 = vst.msk [vmem:[#allocation4 + $0xb8] sm:$0xff] %vm17699_vm6, %v5315_v31  ;;  %10127 = vmatmul.mubr.msk.f32.gmra.mrb[144].mxu1 %vm17700_vm2, %v5371_v57  ;;  %vm17705_vm5 = vmmov %vm17675_vm0 }
 0xfa5   : > { %vm17706_vm6 = vmmov %vm17675_vm0 }
 0xfa6   : > { %v5321_v17 = vpop.permute.xlu1 %5320  ;;  %v5372_v46 = vld [vmem:[#allocation4 + $0xa0] sm:$0xff]  ;;  %vm17707_vm2 = vmmov %vm17675_vm0 }
 0xfa7   : > { %5326 = vst.msk [vmem:[#allocation4 + $0xc0] sm:$0xff] %vm17701_vm1, %v5321_v17  ;;  %v5323_v54 = vpop.permute.xlu0 %5322  ;;  %10129 = vmatprep.mubr.msk.f32.mxu1 %vm17702_vm14, %v5372_v46  ;;  %v5373_v52 = vld [vmem:[#allocation4 + $0xa8] sm:$0xff]  ;;  %vm17708_vm1 = vmmov %vm17675_vm0 }
 0xfa8   : > { %5327 = vst.msk [vmem:[#allocation4 + $0xc8] sm:$0xff] %vm17675_vm0, %v5323_v54  ;;  %10130 = vmatmul.mubr.msk.f32.gmra.mrb[146].mxu1 %vm17703_vm3, %v5373_v52  ;;  %vm17709_vm14 = vmmov %vm17675_vm0 }
 0xfa9   : > { %vm17710_vm3 = vmmov %vm17675_vm0 }
 0xfaa   : > { %v5329_v51 = vpop.permute.xlu1 %5328  ;;  %v5374_v38 = vld [vmem:[#allocation4 + $0xb0] sm:$0xff] }
 0xfab   : > { %5334 = vst.msk [vmem:[#allocation4 + $0xd0] sm:$0xff] %vm17704_vm4, %v5329_v51  ;;  %v5331_v47 = vpop.permute.xlu0 %5330  ;;  %10132 = vmatprep.mubr.msk.f32.mxu1 %vm17705_vm5, %v5374_v38  ;;  %v5375_v6 = vld [vmem:[#allocation4 + $0xb8] sm:$0xff]  ;;  %vm17711_vm4 = vmmov %vm17675_vm0 }
 0xfac   : > { %5335 = vst.msk [vmem:[#allocation4 + $0xd8] sm:$0xff] %vm17706_vm6, %v5331_v47  ;;  %10133 = vmatmul.mubr.msk.f32.gmra.mrb[148].mxu1 %vm17707_vm2, %v5375_v6  ;;  %vm17712_vm5 = vmmov %vm17675_vm0 }
 0xfad   : > { %vm17713_vm6 = vmmov %vm17675_vm0 }
 0xfae   : > { %v5337_v25 = vpop.permute.xlu1 %5336  ;;  %v5376_v49 = vld [vmem:[#allocation4 + $0xc0] sm:$0xff]  ;;  %vm17714_vm2 = vmmov %vm17675_vm0 }
 0xfaf   : > { %5342 = vst.msk [vmem:[#allocation4 + $0xe0] sm:$0xff] %vm17708_vm1, %v5337_v25  ;;  %v5339_v29 = vpop.permute.xlu0 %5338  ;;  %10135 = vmatprep.mubr.msk.f32.mxu1 %vm17709_vm14, %v5376_v49  ;;  %v5377_v9 = vld [vmem:[#allocation4 + $0xc8] sm:$0xff]  ;;  %vm17715_vm1 = vmmov %vm17675_vm0 }
 0xfb0   : > { %5343 = vst.msk [vmem:[#allocation4 + $0xe8] sm:$0xff] %vm17675_vm0, %v5339_v29  ;;  %10136 = vmatmul.mubr.msk.f32.gmra.mrb[150].mxu1 %vm17710_vm3, %v5377_v9  ;;  %vm17716_vm14 = vmmov %vm17675_vm0 }
 0xfb1   : > { %vm17717_vm3 = vmmov %vm17675_vm0 }
 0xfb2   : > { %v5345_v50 = vpop.permute.xlu1 %5344  ;;  %v5378_v12 = vld [vmem:[#allocation4 + $0xd0] sm:$0xff] }
 0xfb3   : > { %5350 = vst.msk [vmem:[#allocation4 + $0xf0] sm:$0xff] %vm17711_vm4, %v5345_v50  ;;  %v5347_v40 = vpop.permute.xlu0 %5346  ;;  %10138 = vmatprep.mubr.msk.f32.mxu1 %vm17712_vm5, %v5378_v12  ;;  %v5379_v7 = vld [vmem:[#allocation4 + $0xd8] sm:$0xff]  ;;  %vm17718_vm4 = vmmov %vm17675_vm0 }
 0xfb4   : > { %5351 = vst.msk [vmem:[#allocation4 + $0xf8] sm:$0xff] %vm17713_vm6, %v5347_v40  ;;  %10139 = vmatmul.mubr.msk.f32.gmra.mrb[152].mxu1 %vm17714_vm2, %v5379_v7  ;;  %vm17720_vm5 = vmmov %vm17675_vm0 }
 0xfb5   : > { %vm17721_vm6 = vmmov %vm17675_vm0 }
 0xfb6   : > { %v5380_v43 = vld [vmem:[#allocation4 + $0xe0] sm:$0xff]  ;;  %vm17723_vm2 = vmmov %vm17675_vm0 }
 0xfb7   : > { %10141 = vmatprep.mubr.msk.f32.mxu1 %vm17715_vm1, %v5380_v43  ;;  %v5381_v63 = vld [vmem:[#allocation4 + $0xe8] sm:$0xff]  ;;  %vm17724_vm1 = vmmov %vm17675_vm0 }
 0xfb8   : > { %10142 = vmatmul.mubr.msk.f32.gmra.mrb[154].mxu1 %vm17716_vm14, %v5381_v63  ;;  %vm17725_vm14 = vmmov %vm17675_vm0 }
 0xfba   : > { %v5382_v44 = vld [vmem:[#allocation4 + $0xf0] sm:$0xff] }
 0xfbb   : > { %10144 = vmatprep.mubr.msk.f32.mxu1 %vm17675_vm0, %v5382_v44  ;;  %v5383_v55 = vld [vmem:[#allocation4 + $0xf8] sm:$0xff] }
 0xfbc   : > { %10145 = vmatmul.mubr.msk.f32.gmra.mrb[156].mxu1 %vm17717_vm3, %v5383_v55  ;;  %vm17726_vm3 = vmmov %vm17675_vm0 }
 0xfe4   : > { %v15500_v8 = vpop.f32.mrb[126].mxu1 }
 0xfe5   : > { %v15502_v24 = vpop.f32.mrb[127].mxu1 }
 0xfe6   : > { %v11630_v28 = vpack.i.bf16 %v15500_v8, %v15502_v24  ;;  %9824 = vmatprep.mubr.msk.f32.mxu1 %vm17718_vm4, %v15502_v24  ;;  %vm17727_vm4 = vmmov %vm17675_vm0 }
 0xfe8   : > { %11556 = vrot.lane.b32.xlu0 %v11630_v28, %s17623_s26 }
0x1057   : > { %v15509_v53 = vpop.f32.mrb[128].mxu1 }
0x1058   : > { %v15511_v27 = vpop.f32.mrb[129].mxu1 }
0x1059   : > { %v15515_v10 = vpack.i.bf16 %v15509_v53, %v15511_v27 }
0x105a   : > { %v11557_v50 = vpop.permute.xlu0 %11556 }
0x105b   : > { %11566 = vrot.lane.b32.xlu0 %v15515_v10, %s17623_s26  ;;  %v15519_v61 = vpop.f32.mrb[130].mxu1 }
0x105c   : > { %v15521_v1 = vpop.f32.mrb[131].mxu1 }
0x105d   : > { %v11640_v58 = vpack.i.bf16 %v15519_v61, %v15521_v1 }
0x105f   : > { %11576 = vrot.lane.b32.xlu0 %v11640_v58, %s17623_s26  ;;  %v15526_v62 = vpop.f32.mrb[132].mxu1 }
0x1060   : > { %v15528_v20 = vpop.f32.mrb[133].mxu1 }
0x1061   : > { %v11645_v3 = vpack.i.bf16 %v15526_v62, %v15528_v20 }
0x1063   : > { %11586 = vrot.lane.b32.xlu0 %v11645_v3, %s17623_s26  ;;  %v15533_v16 = vpop.f32.mrb[134].mxu1 }
0x1064   : > { %v15535_v45 = vpop.f32.mrb[135].mxu1 }
0x1065   : > { %v11650_v18 = vpack.i.bf16 %v15533_v16, %v15535_v45 }
0x1067   : > { %11596 = vrot.lane.b32.xlu0 %v11650_v18, %s17623_s26  ;;  %v15540_v35 = vpop.f32.mrb[136].mxu1 }
0x1068   : > { %v15542_v19 = vpop.f32.mrb[137].mxu1 }
0x1069   : > { %v11655_v15 = vpack.i.bf16 %v15540_v35, %v15542_v19 }
0x106b   : > { %11606 = vrot.lane.b32.xlu0 %v11655_v15, %s17623_s26  ;;  %v15547_v60 = vpop.f32.mrb[138].mxu1 }
0x106c   : > { %v15549_v56 = vpop.f32.mrb[139].mxu1 }
0x106d   : > { %v11660_v2 = vpack.i.bf16 %v15547_v60, %v15549_v56 }
0x106f   : > { %11616 = vrot.lane.b32.xlu0 %v11660_v2, %s17623_s26  ;;  %v15554_v30 = vpop.f32.mrb[140].mxu1 }
0x1070   : > { %v15556_v21 = vpop.f32.mrb[141].mxu1 }
0x1071   : > { %v11665_v13 = vpack.i.bf16 %v15554_v30, %v15556_v21 }
0x1073   : > { %11626 = vrot.lane.b32.xlu0 %v11665_v13, %s17623_s26  ;;  %v15561_v48 = vpop.f32.mrb[142].mxu1 }
0x1074   : > { %v15563_v39 = vpop.f32.mrb[143].mxu1 }
0x1075   : > { %v11670_v33 = vpack.i.bf16 %v15561_v48, %v15563_v39 }
0x1077   : > { %11631 = vrot.lane.b32.xlu0 %v11630_v28, %s17620_s25  ;;  %11551 = vrot.lane.b32.xlu1 %v11670_v33, %s17623_s26  ;;  %v15569_v5 = vpop.f32.mrb[144].mxu1  ;;  %v11559_v28 = vunpack.i.h.bf16 %v11557_v50 }
0x1078   : > { %v15571_v37 = vpop.f32.mrb[145].mxu1 }
0x1079   : > { %v11675_v22 = vpack.i.bf16 %v15569_v5, %v15571_v37 }
0x107b   : > { %11646 = vrot.lane.b32.xlu0 %v11645_v3, %s17620_s25  ;;  %11561 = vrot.lane.b32.xlu1 %v11675_v22, %s17623_s26  ;;  %v15577_v26 = vpop.f32.mrb[146].mxu1 }
0x107c   : > { %v15579_v11 = vpop.f32.mrb[147].mxu1 }
0x107d   : > { %v11680_v36 = vpack.i.bf16 %v15577_v26, %v15579_v11 }
0x107f   : > { %11661 = vrot.lane.b32.xlu0 %v11660_v2, %s17620_s25  ;;  %11571 = vrot.lane.b32.xlu1 %v11680_v36, %s17623_s26  ;;  %v15585_v14 = vpop.f32.mrb[148].mxu1 }
0x1080   : > { %v15587_v31 = vpop.f32.mrb[149].mxu1 }
0x1081   : > { %v11685_v57 = vpack.i.bf16 %v15585_v14, %v15587_v31 }
0x1083   : > { %11666 = vrot.lane.b32.xlu0 %v11665_v13, %s17620_s25  ;;  %11581 = vrot.lane.b32.xlu1 %v11685_v57, %s17623_s26  ;;  %v15593_v17 = vpop.f32.mrb[150].mxu1 }
0x1084   : > { %v15595_v46 = vpop.f32.mrb[151].mxu1 }
0x1085   : > { %v11690_v54 = vpack.i.bf16 %v15593_v17, %v15595_v46 }
0x1087   : > { %11671 = vrot.lane.b32.xlu0 %v11670_v33, %s17620_s25  ;;  %11591 = vrot.lane.b32.xlu1 %v11690_v54, %s17623_s26  ;;  %v15601_v52 = vpop.f32.mrb[152].mxu1 }
0x1088   : > { %v15603_v51 = vpop.f32.mrb[153].mxu1 }
0x1089   : > { %v15607_v38 = vpack.i.bf16 %v15601_v52, %v15603_v51 }
0x108b   : > { %11676 = vrot.lane.b32.xlu0 %v11675_v22, %s17620_s25  ;;  %11601 = vrot.lane.b32.xlu1 %v15607_v38, %s17623_s26  ;;  %v15612_v47 = vpop.f32.mrb[154].mxu1 }
0x108c   : > { %v15614_v6 = vpop.f32.mrb[155].mxu1 }
0x108d   : > { %v15618_v25 = vpack.i.bf16 %v15612_v47, %v15614_v6 }
0x108f   : > { %11686 = vrot.lane.b32.xlu0 %v11685_v57, %s17620_s25  ;;  %11611 = vrot.lane.b32.xlu1 %v15618_v25, %s17623_s26  ;;  %v15623_v49 = vpop.f32.mrb[156].mxu1 }
0x1090   : > { %v15625_v29 = vpop.f32.mrb[157].mxu1 }
0x1091   : > { %v15629_v9 = vpack.i.bf16 %v15623_v49, %v15625_v29 }
0x1093   : > { %11621 = vrot.lane.b32.xlu1 %v15629_v9, %s17623_s26  ;;  %s17863_s26 = smov 44  }
0x1097   : > { %11636 = vrot.lane.b32.xlu1 %v15515_v10, %s17620_s25  ;;  %v11558_v10 = vunpack.i.l.bf16 %v11557_v50 }
0x109b   : > { %11641 = vrot.lane.b32.xlu1 %v11640_v58, %s17620_s25 }
0x109f   : > { %11651 = vrot.lane.b32.xlu1 %v11650_v18, %s17620_s25 }
0x10a3   : > { %11656 = vrot.lane.b32.xlu1 %v11655_v15, %s17620_s25 }
0x10a7   : > { %11681 = vrot.lane.b32.xlu1 %v11680_v36, %s17620_s25  ;;  %v10904_v36 = vpack.c.bf16 %v11559_v28, %v11558_v10 }
0x10ab   : > { %11691 = vrot.lane.b32.xlu1 %v11690_v54, %s17620_s25 }
0x10cd   : > { %v11567_v12 = vpop.permute.xlu0 %11566 }
0x10ce   : > { %v11569_v32 = vunpack.i.h.bf16 %v11567_v12 }
0x10d1   : > { %v11577_v40 = vpop.permute.xlu0 %11576 }
0x10d5   : > { %v11587_v7 = vpop.permute.xlu0 %11586 }
0x10d9   : > { %v15640_v43 = vpop.permute.xlu0 %11596 }
0x10dd   : > { %v15642_v63 = vpop.permute.xlu0 %11606 }
0x10e1   : > { %v15644_v44 = vpop.permute.xlu0 %11616 }
0x10e5   : > { %v15646_v55 = vpop.permute.xlu0 %11626 }
0x10e9   : > { %v11632_v58 = vpop.permute.xlu0 %11631  ;;  %v11552_v3 = vpop.permute.xlu1 %11551 }
0x10ea   : > { %v11634_v18 = vunpack.i.h.bf16 %v11632_v58  ;;  %v11633_v15 = vunpack.i.l.bf16 %v11632_v58  ;;  %v11554_v2 = vunpack.i.h.bf16 %v11552_v3  ;;  %v11553_v13 = vunpack.i.l.bf16 %v11552_v3 }
0x10eb   : > { %v11568_v58 = vunpack.i.l.bf16 %v11567_v12 }
0x10ec   : > { %v10950_v33 = vpack.c.bf16 %v11634_v18, %v11633_v15  ;;  %v10901_v22 = vpack.c.bf16 %v11554_v2, %v11553_v13  ;;  %v11579_v2 = vunpack.i.h.bf16 %v11577_v40  ;;  %v11578_v13 = vunpack.i.l.bf16 %v11577_v40 }
0x10ed   : > { %v11562_v57 = vpop.permute.xlu1 %11561  ;;  %v10910_v28 = vpack.c.bf16 %v11569_v32, %v11568_v58  ;;  %v11589_v32 = vunpack.i.h.bf16 %v11587_v7 }
0x10ee   : > { %v11564_v54 = vunpack.i.h.bf16 %v11562_v57  ;;  %v11563_v0 = vunpack.i.l.bf16 %v11562_v57  ;;  %10903 = vmatprep.subr.msk.bf16.mxu1 %vm13022_vm7, %v10901_v22  ;;  %10951 = vmatpush1.bf16.msra.mxu0 %v10950_v33  ;;  %v10916_v22 = vpack.c.bf16 %v11579_v2, %v11578_v13  ;;  %v11588_v57 = vunpack.i.l.bf16 %v11587_v7 }
0x10ef   : > { %10906 = vmatpush3.bf16.xpose.msk.msra.mxu1 %vm13022_vm7, %v10904_v36  ;;  %10952 = vmatprep.subr.bf16.mxu0 %v17638_v34 }
0x10f0   : > { %v10907_v50 = vpack.c.bf16 %v11564_v54, %v11563_v0 }
0x10f1   : > { %v11572_v59 = vpop.permute.xlu1 %11571 }
0x10f2   : > { %v11574_v3 = vunpack.i.h.bf16 %v11572_v59  ;;  %v11573_v18 = vunpack.i.l.bf16 %v11572_v59  ;;  %10909 = vmatprep.subr.msk.bf16.mxu1 %vm13022_vm7, %v10907_v50 }
0x10f4   : > { %v10913_v15 = vpack.c.bf16 %v11574_v3, %v11573_v18  ;;  %v10922_v3 = vpack.c.bf16 %v11589_v32, %v11588_v57 }
0x10f5   : > { %v11582_v10 = vpop.permute.xlu1 %11581 }
0x10f6   : > { %v11584_v33 = vunpack.i.h.bf16 %v11582_v10  ;;  %v11583_v12 = vunpack.i.l.bf16 %v11582_v10  ;;  %v11598_v10 = vunpack.i.l.bf16 %v15640_v43 }
0x10f7   : > { %10912 = vmatpush3.bf16.xpose.msk.msra.mxu1 %vm13022_vm7, %v10910_v28  ;;  %v11599_v28 = vunpack.i.h.bf16 %v15640_v43 }
0x10f8   : > { %10915 = vmatprep.subr.msk.bf16.mxu1 %vm13022_vm7, %v10913_v15  ;;  %v10919_v59 = vpack.c.bf16 %v11584_v33, %v11583_v12 }
0x10f9   : > { %v11592_v0 = vpop.permute.xlu1 %11591 }
0x10fa   : > { %v11594_v50 = vunpack.i.h.bf16 %v11592_v0  ;;  %v11593_v58 = vunpack.i.l.bf16 %v11592_v0  ;;  %v10928_v0 = vpack.c.bf16 %v11599_v28, %v11598_v10 }
0x10fc   : > { %v10925_v40 = vpack.c.bf16 %v11594_v50, %v11593_v58 }
0x10fd   : > { %v11602_v36 = vpop.permute.xlu1 %11601 }
0x10fe   : > { %v11604_v2 = vunpack.i.h.bf16 %v11602_v36  ;;  %v11603_v13 = vunpack.i.l.bf16 %v11602_v36  ;;  %v11609_v36 = vunpack.i.h.bf16 %v15642_v63 }
0x10ff   : > { %10918 = vmatpush3.bf16.xpose.msk.msra.mxu1 %vm13022_vm7, %v10916_v22  ;;  %v11647_v22 = vpop.permute.xlu0 %11646 }
0x1100   : > { %10921 = vmatprep.subr.msk.bf16.mxu1 %vm13022_vm7, %v10919_v59  ;;  %v10931_v32 = vpack.c.bf16 %v11604_v2, %v11603_v13  ;;  %v11649_v58 = vunpack.i.h.bf16 %v11647_v22  ;;  %v11648_v43 = vunpack.i.l.bf16 %v11647_v22 }
0x1101   : > { %v11612_v54 = vpop.permute.xlu1 %11611 }
0x1102   : > { %v11614_v10 = vunpack.i.h.bf16 %v11612_v54  ;;  %v10959_v13 = vpack.c.bf16 %v11649_v58, %v11648_v43 }
0x1103   : > { %v11662_v2 = vpop.permute.xlu0 %11661 }
0x1105   : > { %v11622_v18 = vpop.permute.xlu1 %11621 }
0x1106   : > { %v11624_v58 = vunpack.i.h.bf16 %v11622_v18  ;;  %v11623_v43 = vunpack.i.l.bf16 %v11622_v18  ;;  %v11629_v18 = vunpack.i.h.bf16 %v15646_v55 }
0x1107   : > { %10924 = vmatpush3.bf16.xpose.msk.msra.mxu1 %vm13022_vm7, %v10922_v3 }
0x1108   : > { %10927 = vmatprep.subr.msk.bf16.mxu1 %vm13022_vm7, %v10925_v40  ;;  %v11608_v40 = vunpack.i.l.bf16 %v15642_v63 }
0x1109   : > { %v11637_v15 = vpop.permute.xlu1 %11636 }
0x110a   : > { %v11639_v7 = vunpack.i.h.bf16 %v11637_v15  ;;  %v11638_v33 = vunpack.i.l.bf16 %v11637_v15  ;;  %v11613_v15 = vunpack.i.l.bf16 %v11612_v54  ;;  %v11619_v54 = vunpack.i.h.bf16 %v15644_v44 }
0x110c   : > { %v10953_v12 = vpack.c.bf16 %v11639_v7, %v11638_v33  ;;  %v10937_v22 = vpack.c.bf16 %v11614_v10, %v11613_v15  ;;  %v10943_v10 = vpack.c.bf16 %v11624_v58, %v11623_v43 }
0x110d   : > { %v11642_v59 = vpop.permute.xlu1 %11641 }
0x110e   : > { %v11644_v57 = vunpack.i.h.bf16 %v11642_v59  ;;  %v11643_v50 = vunpack.i.l.bf16 %v11642_v59  ;;  %10954 = vmatpush1.bf16.msra.mxu0 %v10953_v12  ;;  %v10934_v12 = vpack.c.bf16 %v11609_v36, %v11608_v40  ;;  %v11663_v36 = vunpack.i.l.bf16 %v11662_v2 }
0x110f   : > { %10930 = vmatpush3.bf16.xpose.msk.msra.mxu1 %vm13022_vm7, %v10928_v0  ;;  %10955 = vmatprep.subr.bf16.mxu0 %v17638_v34 }
0x1110   : > { %v10956_v3 = vpack.c.bf16 %v11644_v57, %v11643_v50  ;;  %10933 = vmatprep.subr.msk.bf16.mxu1 %vm13022_vm7, %v10931_v32  ;;  %v11618_v57 = vunpack.i.l.bf16 %v15644_v44  ;;  %v11667_v50 = vpop.permute.xlu0 %11666 }
0x1111   : > { %v11652_v28 = vpop.permute.xlu1 %11651  ;;  %v11669_v44 = vunpack.i.h.bf16 %v11667_v50 }
0x1112   : > { %10957 = vmatpush1.bf16.msra.mxu0 %v10956_v3  ;;  %v11654_v7 = vunpack.i.h.bf16 %v11652_v28  ;;  %v11653_v33 = vunpack.i.l.bf16 %v11652_v28  ;;  %v11664_v3 = vunpack.i.h.bf16 %v11662_v2  ;;  %v10940_v28 = vpack.c.bf16 %v11619_v54, %v11618_v57 }
0x1113   : > { %10958 = vmatprep.subr.bf16.mxu0 %v17638_v34  ;;  %v11628_v2 = vunpack.i.l.bf16 %v15646_v55 }
0x1114   : > { %v10962_v63 = vpack.c.bf16 %v11654_v7, %v11653_v33  ;;  %v11672_v15 = vpop.permute.xlu0 %11671  ;;  %v11668_v7 = vunpack.i.l.bf16 %v11667_v50 }
0x1115   : > { %v11657_v0 = vpop.permute.xlu1 %11656 }
0x1116   : > { %10960 = vmatpush1.bf16.msra.mxu0 %v10959_v13  ;;  %v11659_v59 = vunpack.i.h.bf16 %v11657_v0  ;;  %v11658_v32 = vunpack.i.l.bf16 %v11657_v0  ;;  %v10968_v13 = vpack.c.bf16 %v11664_v3, %v11663_v36  ;;  %v10971_v33 = vpack.c.bf16 %v11669_v44, %v11668_v7 }
0x1117   : > { %10936 = vmatpush3.bf16.xpose.msk.msra.mxu1 %vm13022_vm7, %v10934_v12  ;;  %10961 = vmatprep.subr.bf16.mxu0 %v17638_v34  ;;  %v11674_v12 = vunpack.i.h.bf16 %v11672_v15  ;;  %v11673_v0 = vunpack.i.l.bf16 %v11672_v15 }
0x1118   : > { %10939 = vmatprep.subr.msk.bf16.mxu1 %vm13022_vm7, %v10937_v22  ;;  %v10965_v40 = vpack.c.bf16 %v11659_v59, %v11658_v32  ;;  %v10946_v22 = vpack.c.bf16 %v11629_v18, %v11628_v2 }
0x1119   : > { %v10974_v59 = vpack.c.bf16 %v11674_v12, %v11673_v0  ;;  %v11682_v57 = vpop.permute.xlu1 %11681 }
0x111a   : > { %10963 = vmatpush1.bf16.msra.mxu0 %v10962_v63  ;;  %v11677_v63 = vpop.permute.xlu0 %11676  ;;  %v11684_v50 = vunpack.i.h.bf16 %v11682_v57  ;;  %v11683_v58 = vunpack.i.l.bf16 %v11682_v57 }
0x111b   : > { %10964 = vmatprep.subr.bf16.mxu0 %v17638_v34  ;;  %v11679_v32 = vunpack.i.h.bf16 %v11677_v63  ;;  %v11678_v54 = vunpack.i.l.bf16 %v11677_v63 }
0x111c   : > { %v10980_v36 = vpack.c.bf16 %v11684_v50, %v11683_v58 }
0x111d   : > { %v10977_v55 = vpack.c.bf16 %v11679_v32, %v11678_v54 }
0x111e   : > { %10966 = vmatpush1.bf16.msra.mxu0 %v10965_v40  ;;  %v11687_v43 = vpop.permute.xlu0 %11686  ;;  %v11692_v40 = vpop.permute.xlu1 %11691 }
0x111f   : > { %10942 = vmatpush3.bf16.xpose.msk.msra.mxu1 %vm13022_vm7, %v10940_v28  ;;  %10967 = vmatprep.subr.bf16.mxu0 %v17638_v34  ;;  %v11689_v4 = vunpack.i.h.bf16 %v11687_v43  ;;  %v11688_v3 = vunpack.i.l.bf16 %v11687_v43  ;;  %v11694_v28 = vunpack.i.h.bf16 %v11692_v40 }
0x1120   : > { %10945 = vmatprep.subr.msk.bf16.mxu1 %vm13022_vm7, %v10943_v10  ;;  %v11693_v10 = vunpack.i.l.bf16 %v11692_v40 }
0x1122   : > { %10969 = vmatpush1.bf16.msra.mxu0 %v10968_v13  ;;  %v10986_v15 = vpack.c.bf16 %v11694_v28, %v11693_v10 }
0x1123   : > { %10970 = vmatprep.subr.bf16.mxu0 %v17638_v34 }
0x1126   : > { %10972 = vmatpush1.bf16.msra.mxu0 %v10971_v33 }
0x1127   : > { %10948 = vmatpush3.bf16.xpose.msk.msra.mxu1 %vm13022_vm7, %v10946_v22  ;;  %10973 = vmatprep.subr.bf16.mxu0 %v17638_v34  ;;  %vm17722_vm7 = vmmov %vm17675_vm0 }
0x112a   : > { %10975 = vmatpush1.bf16.msra.mxu0 %v10974_v59 }
0x112b   : > { %10976 = vmatprep.subr.bf16.mxu0 %v17638_v34 }
0x112e   : > { %9825 = vmatmul.mubr.msk.f32.vlgmr.msra.gmra.mrb[158].mxu1 %vm17720_vm5, %v15502_v24  ;;  %10978 = vmatpush1.bf16.msra.mxu0 %v10977_v55  ;;  %v10983_v24 = vpack.c.bf16 %v11689_v4, %v11688_v3  ;;  %vm17728_vm5 = vmmov %vm17675_vm0 }
0x112f   : > { %9826 = vmatprep.mubr.msk.f32.mxu1 %vm17721_vm6, %v15500_v8  ;;  %10979 = vmatprep.subr.bf16.mxu0 %v17638_v34  ;;  %vm17729_vm6 = vmmov %vm17675_vm0 }
0x1132   : > { %9827 = vmatmul.mubr.msk.f32.gmra.mrb[160].mxu1 %vm17722_vm7, %v15500_v8  ;;  %10981 = vmatpush1.bf16.msra.mxu0 %v10980_v36  ;;  %vm17730_vm7 = vmmov %vm17675_vm0 }
0x1133   : > { %9828 = vmatprep.mubr.msk.f32.mxu1 %vm17723_vm2, %v15511_v27  ;;  %10982 = vmatprep.subr.bf16.mxu0 %v17638_v34  ;;  %vm17731_vm2 = vmmov %vm17675_vm0 }
0x1136   : > { %9829 = vmatmul.mubr.msk.f32.gmra.mrb[162].mxu1 %vm17724_vm1, %v15511_v27  ;;  %10984 = vmatpush1.bf16.msra.mxu0 %v10983_v24  ;;  %vm17732_vm1 = vmmov %vm17675_vm0 }
0x1137   : > { %9830 = vmatprep.mubr.msk.f32.mxu1 %vm17725_vm14, %v15509_v53  ;;  %10985 = vmatprep.subr.bf16.mxu0 %v17638_v34  ;;  %vm17733_vm14 = vmmov %vm17675_vm0 }
0x113a   : > { %9831 = vmatmul.mubr.msk.f32.gmra.mrb[164].mxu1 %vm17675_vm0, %v15509_v53  ;;  %10987 = vmatpush1.bf16.msra.mxu0 %v10986_v15 }
0x113b   : > { %9832 = vmatprep.mubr.msk.f32.mxu1 %vm17726_vm3, %v15521_v1  ;;  %10988 = vmatprep.subr.bf16.mxu0 %v17638_v34  ;;  %vm17734_vm3 = vmmov %vm17675_vm0 }
0x113e   : > { %9833 = vmatmul.mubr.msk.f32.gmra.mrb[166].mxu1 %vm17727_vm4, %v15521_v1  ;;  %vm17735_vm4 = vmmov %vm17675_vm0 }
0x113f   : > { %9834 = vmatprep.mubr.msk.f32.mxu1 %vm17728_vm5, %v15519_v61  ;;  %vm17736_vm5 = vmmov %vm17675_vm0 }
0x1142   : > { %9835 = vmatmul.mubr.msk.f32.gmra.mrb[168].mxu1 %vm17729_vm6, %v15519_v61  ;;  %vm17737_vm6 = vmmov %vm17675_vm0 }
0x1143   : > { %9836 = vmatprep.mubr.msk.f32.mxu1 %vm17730_vm7, %v15528_v20  ;;  %vm17738_vm7 = vmmov %vm17675_vm0 }
0x1146   : > { %9837 = vmatmul.mubr.msk.f32.gmra.mrb[170].mxu1 %vm17731_vm2, %v15528_v20  ;;  %vm17739_vm2 = vmmov %vm17675_vm0 }
0x1147   : > { %9838 = vmatprep.mubr.msk.f32.mxu1 %vm17732_vm1, %v15526_v62  ;;  %vm17740_vm1 = vmmov %vm17675_vm0 }
0x114a   : > { %9839 = vmatmul.mubr.msk.f32.gmra.mrb[172].mxu1 %vm17733_vm14, %v15526_v62  ;;  %vm17741_vm14 = vmmov %vm17675_vm0 }
0x114b   : > { %9840 = vmatprep.mubr.msk.f32.mxu1 %vm17675_vm0, %v15535_v45 }
0x114e   : > { %9841 = vmatmul.mubr.msk.f32.gmra.mrb[174].mxu1 %vm17734_vm3, %v15535_v45  ;;  %vm17742_vm3 = vmmov %vm17675_vm0 }
0x114f   : > { %9842 = vmatprep.mubr.msk.f32.mxu1 %vm17735_vm4, %v15533_v16  ;;  %vm17743_vm4 = vmmov %vm17675_vm0 }
0x1152   : > { %9843 = vmatmul.mubr.msk.f32.gmra.mrb[176].mxu1 %vm17736_vm5, %v15533_v16  ;;  %vm17744_vm5 = vmmov %vm17675_vm0 }
0x1153   : > { %9844 = vmatprep.mubr.msk.f32.mxu1 %vm17737_vm6, %v15542_v19  ;;  %vm17745_vm6 = vmmov %vm17675_vm0 }
0x1156   : > { %9845 = vmatmul.mubr.msk.f32.gmra.mrb[178].mxu1 %vm17738_vm7, %v15542_v19  ;;  %vm17746_vm7 = vmmov %vm17675_vm0 }
0x1157   : > { %9846 = vmatprep.mubr.msk.f32.mxu1 %vm17739_vm2, %v15540_v35  ;;  %vm17747_vm2 = vmmov %vm17675_vm0 }
0x115a   : > { %9847 = vmatmul.mubr.msk.f32.gmra.mrb[180].mxu1 %vm17740_vm1, %v15540_v35  ;;  %vm17748_vm1 = vmmov %vm17675_vm0 }
0x115b   : > { %9848 = vmatprep.mubr.msk.f32.mxu1 %vm17741_vm14, %v15549_v56  ;;  %vm17749_vm14 = vmmov %vm17675_vm0 }
0x115e   : > { %9849 = vmatmul.mubr.msk.f32.gmra.mrb[182].mxu1 %vm17675_vm0, %v15549_v56 }
0x115f   : > { %9850 = vmatprep.mubr.msk.f32.mxu1 %vm17742_vm3, %v15547_v60  ;;  %vm17750_vm3 = vmmov %vm17675_vm0 }
0x1162   : > { %9851 = vmatmul.mubr.msk.f32.gmra.mrb[184].mxu1 %vm17743_vm4, %v15547_v60  ;;  %vm17751_vm4 = vmmov %vm17675_vm0 }
0x1163   : > { %9852 = vmatprep.mubr.msk.f32.mxu1 %vm17744_vm5, %v15556_v21  ;;  %vm17752_vm5 = vmmov %vm17675_vm0 }
0x1166   : > { %9853 = vmatmul.mubr.msk.f32.gmra.mrb[186].mxu1 %vm17745_vm6, %v15556_v21  ;;  %vm17753_vm6 = vmmov %vm17675_vm0 }
0x1167   : > { %9854 = vmatprep.mubr.msk.f32.mxu1 %vm17746_vm7, %v15554_v30  ;;  %vm17754_vm7 = vmmov %vm17675_vm0 }
0x116a   : > { %9855 = vmatmul.mubr.msk.f32.gmra.mrb[188].mxu1 %vm17747_vm2, %v15554_v30  ;;  %vm17755_vm2 = vmmov %vm17675_vm0 }
0x116b   : > { %9856 = vmatprep.mubr.msk.f32.mxu1 %vm17748_vm1, %v15563_v39  ;;  %vm17756_vm1 = vmmov %vm17675_vm0 }
0x116e   : > { %9857 = vmatmul.mubr.msk.f32.gmra.mrb[190].mxu1 %vm17749_vm14, %v15563_v39  ;;  %vm17757_vm14 = vmmov %vm17675_vm0 }
0x116f   : > { %9858 = vmatprep.mubr.msk.f32.mxu1 %vm17675_vm0, %v15561_v48 }
0x1172   : > { %9859 = vmatmul.mubr.msk.f32.gmra.mrb[192].mxu1 %vm17750_vm3, %v15561_v48  ;;  %vm17758_vm3 = vmmov %vm17675_vm0 }
0x1173   : > { %9860 = vmatprep.mubr.msk.f32.mxu1 %vm17751_vm4, %v15571_v37  ;;  %vm17759_vm4 = vmmov %vm17675_vm0 }
0x1176   : > { %9861 = vmatmul.mubr.msk.f32.gmra.mrb[194].mxu1 %vm17752_vm5, %v15571_v37  ;;  %vm17760_vm5 = vmmov %vm17675_vm0 }
0x1177   : > { %9862 = vmatprep.mubr.msk.f32.mxu1 %vm17753_vm6, %v15569_v5  ;;  %vm17761_vm6 = vmmov %vm17675_vm0 }
0x117a   : > { %9863 = vmatmul.mubr.msk.f32.gmra.mrb[196].mxu1 %vm17754_vm7, %v15569_v5  ;;  %vm17762_vm7 = vmmov %vm17675_vm0 }
0x117b   : > { %9864 = vmatprep.mubr.msk.f32.mxu1 %vm17755_vm2, %v15579_v11  ;;  %vm17763_vm2 = vmmov %vm17675_vm0 }
0x117e   : > { %9865 = vmatmul.mubr.msk.f32.gmra.mrb[198].mxu1 %vm17756_vm1, %v15579_v11  ;;  %vm17764_vm1 = vmmov %vm17675_vm0 }
0x117f   : > { %9866 = vmatprep.mubr.msk.f32.mxu1 %vm17757_vm14, %v15577_v26  ;;  %vm17765_vm14 = vmmov %vm17675_vm0 }
0x1182   : > { %9867 = vmatmul.mubr.msk.f32.gmra.mrb[200].mxu1 %vm17675_vm0, %v15577_v26 }
0x1183   : > { %9868 = vmatprep.mubr.msk.f32.mxu1 %vm17758_vm3, %v15587_v31  ;;  %vm17766_vm3 = vmmov %vm17675_vm0 }
0x1186   : > { %9869 = vmatmul.mubr.msk.f32.gmra.mrb[202].mxu1 %vm17759_vm4, %v15587_v31  ;;  %vm17767_vm4 = vmmov %vm17675_vm0 }
0x1187   : > { %9870 = vmatprep.mubr.msk.f32.mxu1 %vm17760_vm5, %v15585_v14  ;;  %vm17768_vm5 = vmmov %vm17675_vm0 }
0x118a   : > { %9871 = vmatmul.mubr.msk.f32.gmra.mrb[204].mxu1 %vm17761_vm6, %v15585_v14  ;;  %vm17769_vm6 = vmmov %vm17675_vm0 }
0x118b   : > { %9872 = vmatprep.mubr.msk.f32.mxu1 %vm17762_vm7, %v15595_v46  ;;  %vm17770_vm7 = vmmov %vm17675_vm0 }
0x118e   : > { %9873 = vmatmul.mubr.msk.f32.gmra.mrb[206].mxu1 %vm17763_vm2, %v15595_v46  ;;  %vm17771_vm2 = vmmov %vm17675_vm0 }
0x118f   : > { %9874 = vmatprep.mubr.msk.f32.mxu1 %vm17764_vm1, %v15593_v17  ;;  %vm17772_vm1 = vmmov %vm17675_vm0 }
0x1192   : > { %9875 = vmatmul.mubr.msk.f32.gmra.mrb[208].mxu1 %vm17765_vm14, %v15593_v17  ;;  %vm17773_vm14 = vmmov %vm17675_vm0 }
0x1193   : > { %9876 = vmatprep.mubr.msk.f32.mxu1 %vm17675_vm0, %v15603_v51 }
0x1196   : > { %9877 = vmatmul.mubr.msk.f32.gmra.mrb[210].mxu1 %vm17766_vm3, %v15603_v51  ;;  %vm17774_vm3 = vmmov %vm17675_vm0 }
0x1197   : > { %9878 = vmatprep.mubr.msk.f32.mxu1 %vm17767_vm4, %v15601_v52  ;;  %vm17775_vm4 = vmmov %vm17675_vm0 }
0x119a   : > { %9879 = vmatmul.mubr.msk.f32.gmra.mrb[212].mxu1 %vm17768_vm5, %v15601_v52  ;;  %vm17819_vm5 = vcmask 1043456  }
0x119b   : > { %9880 = vmatprep.mubr.msk.f32.mxu1 %vm17769_vm6, %v15614_v6  ;;  %vm17820_vm6 = vmmov %vm17819_vm5 }
0x119e   : > { %9881 = vmatmul.mubr.msk.f32.gmra.mrb[214].mxu1 %vm17770_vm7, %v15614_v6  ;;  %vm17827_vm7 = vmmov %vm17675_vm0 }
0x119f   : > { %9882 = vmatprep.mubr.msk.f32.mxu1 %vm17771_vm2, %v15612_v47  ;;  %vm17828_vm2 = vmmov %vm17675_vm0 }
0x11a2   : > { %9883 = vmatmul.mubr.msk.f32.gmra.mrb[216].mxu1 %vm17772_vm1, %v15612_v47  ;;  %vm17829_vm1 = vmmov %vm17675_vm0 }
0x11a3   : > { %9884 = vmatprep.mubr.msk.f32.mxu1 %vm17773_vm14, %v15625_v29  ;;  %vm17830_vm14 = vmmov %vm17675_vm0 }
0x11a6   : > { %9885 = vmatmul.mubr.msk.f32.gmra.mrb[218].mxu1 %vm17675_vm0, %v15625_v29 }
0x11a7   : > { %9886 = vmatprep.mubr.msk.f32.mxu1 %vm17774_vm3, %v15623_v49  ;;  %vm17831_vm3 = vmmov %vm17675_vm0 }
0x11aa   : > { %9887 = vmatmul.mubr.msk.f32.gmra.mrb[220].mxu1 %vm17775_vm4, %v15623_v49  ;;  %vm17832_vm4 = vmmov %vm17675_vm0 }
0x1201   : > { %v6000_v8 = vpop.f32.mrb[158].mxu1 }
0x1202   : > { %v15827_v53 = vmul.f32 0.5, %v6000_v8  ;;  %v6002_v27 = vpop.f32.mrb[159].mxu1 }
0x1203   : > { %v15829_v61 = vmul.f32 0.5, %v6002_v27 }
0x1205   : > { %v6255_v1 = vmax.f32 %v15827_v53, %v15829_v61  ;;  %v6006_v62 = vpop.f32.mrb[160].mxu1 }
0x1206   : > { %v15833_v20 = vmul.f32 0.5, %v6006_v62  ;;  %v6008_v16 = vpop.f32.mrb[161].mxu1 }
0x1207   : > { %v15835_v45 = vmul.f32 0.5, %v6008_v16  ;;  %6256 = vmax.xlane.f32.xlu1 %v6255_v1 }
0x1209   : > { %v6258_v35 = vmax.f32 %v15833_v20, %v15835_v45  ;;  %v6012_v19 = vpop.f32.mrb[162].mxu1 }
0x120a   : > { %v15839_v60 = vmul.f32 0.5, %v6012_v19  ;;  %v6014_v56 = vpop.f32.mrb[163].mxu1 }
0x120b   : > { %v15841_v30 = vmul.f32 0.5, %v6014_v56  ;;  %6259 = vmax.xlane.f32.xlu0 %v6258_v35 }
0x120d   : > { %v6261_v21 = vmax.f32 %v15839_v60, %v15841_v30  ;;  %v6018_v48 = vpop.f32.mrb[164].mxu1 }
0x120e   : > { %v15845_v39 = vmul.f32 0.5, %v6018_v48  ;;  %v6020_v5 = vpop.f32.mrb[165].mxu1 }
0x120f   : > { %v15847_v37 = vmul.f32 0.5, %v6020_v5  ;;  %6262 = vmax.xlane.f32.xlu0 %v6261_v21 }
0x1211   : > { %v6264_v26 = vmax.f32 %v15845_v39, %v15847_v37  ;;  %v6024_v11 = vpop.f32.mrb[166].mxu1 }
0x1212   : > { %v6026_v14 = vpop.f32.mrb[167].mxu1  ;;  %v15877_v28 = vmul.f32 0.5, %v6024_v11 }
0x1213   : > { %6265 = vmax.xlane.f32.xlu1 %v6264_v26  ;;  %v15879_v10 = vmul.f32 0.5, %v6026_v14 }
0x1215   : > { %v6030_v31 = vpop.f32.mrb[168].mxu1  ;;  %v6267_v27 = vmax.f32 %v15877_v28, %v15879_v10 }
0x1216   : > { %v15851_v17 = vmul.f32 0.5, %v6030_v31  ;;  %v6032_v46 = vpop.f32.mrb[169].mxu1 }
0x1217   : > { %v15853_v52 = vmul.f32 0.5, %v6032_v46 }
0x1219   : > { %v6270_v51 = vmax.f32 %v15851_v17, %v15853_v52  ;;  %v6036_v47 = vpop.f32.mrb[170].mxu1 }
0x121a   : > { %v6038_v6 = vpop.f32.mrb[171].mxu1  ;;  %v15883_v1 = vmul.f32 0.5, %v6036_v47 }
0x121b   : > { %6271 = vmax.xlane.f32.xlu1 %v6270_v51  ;;  %v15885_v62 = vmul.f32 0.5, %v6038_v6 }
0x121d   : > { %v6042_v49 = vpop.f32.mrb[172].mxu1  ;;  %v6273_v19 = vmax.f32 %v15883_v1, %v15885_v62 }
0x121e   : > { %v15857_v29 = vmul.f32 0.5, %v6042_v49  ;;  %v6044_v13 = vpop.f32.mrb[173].mxu1 }
0x121f   : > { %v15859_v44 = vmul.f32 0.5, %v6044_v13 }
0x1221   : > { %v6276_v7 = vmax.f32 %v15857_v29, %v15859_v44  ;;  %v6048_v18 = vpop.f32.mrb[174].mxu1 }
0x1222   : > { %v6050_v2 = vpop.f32.mrb[175].mxu1  ;;  %v15891_v56 = vmul.f32 0.5, %v6048_v18 }
0x1223   : > { %6277 = vmax.xlane.f32.xlu1 %v6276_v7  ;;  %v15893_v21 = vmul.f32 0.5, %v6050_v2 }
0x1225   : > { %11696 = vrot.lane.b32.xlu0 %v15607_v38, %s17620_s25  ;;  %v6054_v33 = vpop.f32.mrb[176].mxu1  ;;  %v6279_v26 = vmax.f32 %v15891_v56, %v15893_v21 }
0x1226   : > { %v15865_v12 = vmul.f32 0.5, %v6054_v33  ;;  %v6056_v0 = vpop.f32.mrb[177].mxu1 }
0x1227   : > { %v15867_v22 = vmul.f32 0.5, %v6056_v0 }
0x1229   : > { %v6282_v63 = vmax.f32 %v15865_v12, %v15867_v22  ;;  %v6060_v59 = vpop.f32.mrb[178].mxu1 }
0x122a   : > { %v6062_v32 = vpop.f32.mrb[179].mxu1  ;;  %v15897_v11 = vmul.f32 0.5, %v6060_v59 }
0x122b   : > { %6283 = vmax.xlane.f32.xlu1 %v6282_v63  ;;  %v15899_v14 = vmul.f32 0.5, %v6062_v32 }
0x122d   : > { %v6066_v54 = vpop.f32.mrb[180].mxu1  ;;  %v6285_v46 = vmax.f32 %v15897_v11, %v15899_v14 }
0x122e   : > { %v15871_v57 = vmul.f32 0.5, %v6066_v54  ;;  %v6068_v55 = vpop.f32.mrb[181].mxu1 }
0x122f   : > { %v15873_v50 = vmul.f32 0.5, %v6068_v55 }
0x1231   : > { %v6288_v38 = vmax.f32 %v15871_v57, %v15873_v50  ;;  %v6072_v58 = vpop.f32.mrb[182].mxu1 }
0x1232   : > { %v6074_v43 = vpop.f32.mrb[183].mxu1  ;;  %v15903_v51 = vmul.f32 0.5, %v6072_v58 }
0x1233   : > { %6289 = vmax.xlane.f32.xlu1 %v6288_v38  ;;  %v15905_v47 = vmul.f32 0.5, %v6074_v43 }
0x1235   : > { %v6078_v4 = vpop.f32.mrb[184].mxu1  ;;  %v6291_v13 = vmax.f32 %v15903_v51, %v15905_v47 }
0x1236   : > { %v6080_v3 = vpop.f32.mrb[185].mxu1 }
0x1239   : > { %v6084_v36 = vpop.f32.mrb[186].mxu1 }
0x123a   : > { %v6086_v40 = vpop.f32.mrb[187].mxu1 }
0x123d   : > { %v6090_v24 = vpop.f32.mrb[188].mxu1 }
0x123e   : > { %v6092_v15 = vpop.f32.mrb[189].mxu1  ;;  %v15909_v7 = vmul.f32 0.5, %v6090_v24 }
0x123f   : > { %v15911_v18 = vmul.f32 0.5, %v6092_v15  ;;  %v15921_v15 = vmul.f32 0.5, %v6078_v4 }
0x1241   : > { %v6096_v8 = vpop.f32.mrb[190].mxu1  ;;  %v6300_v0 = vmax.f32 %v15909_v7, %v15911_v18 }
0x1242   : > { %v6098_v16 = vpop.f32.mrb[191].mxu1  ;;  %v15933_v42 = vmul.f32 0.5, %v6096_v8 }
0x1243   : > { %v15935_v4 = vmul.f32 0.5, %v6098_v16 }
0x1244   : > { %6268 = vmax.xlane.f32.xlu0 %v6267_v27  ;;  %11701 = vrot.lane.b32.xlu1 %v15618_v25, %s17620_s25  ;;  %v15923_v27 = vmul.f32 0.5, %v6080_v3  ;;  %17778 = vst [vmem:[#allocation23_spill] sm:$0xff] %v15933_v42 }
0x1245   : > { %v6102_v35 = vpop.f32.mrb[192].mxu1  ;;  %17779 = vst [vmem:[#allocation10_spill] sm:$0xff] %v15935_v4 }
0x1246   : > { %v6104_v48 = vpop.f32.mrb[193].mxu1  ;;  %v15941_v23 = vmul.f32 0.5, %v6102_v35 }
0x1248   : > { %6274 = vmax.xlane.f32.xlu0 %v6273_v19  ;;  %17780 = vst [vmem:[#allocation9_spill] sm:$0xff] %v15941_v23 }
0x1249   : > { %v6108_v5 = vpop.f32.mrb[194].mxu1 }
0x124a   : > { %v6110_v31 = vpop.f32.mrb[195].mxu1  ;;  %v15915_v63 = vmul.f32 0.5, %v6108_v5 }
0x124b   : > { %v15917_v59 = vmul.f32 0.5, %v6110_v31  ;;  %v15927_v31 = vmul.f32 0.5, %v6084_v36  ;;  %v6303_v36 = vmax.f32 %v15933_v42, %v15935_v4 }
0x124c   : > { %6280 = vmax.xlane.f32.xlu0 %v6279_v26  ;;  %v6294_v26 = vmax.f32 %v15921_v15, %v15923_v27 }
0x124d   : > { %v6114_v25 = vpop.f32.mrb[196].mxu1  ;;  %17776 = vst [vmem:[#allocation19_spill] sm:$0xff] %v15917_v59  ;;  %v6309_v55 = vmax.f32 %v15915_v63, %v15917_v59 }
0x124e   : > { %v6116_v6 = vpop.f32.mrb[197].mxu1  ;;  %v15949_v16 = vmul.f32 0.5, %v6114_v25 }
0x1250   : > { %6286 = vmax.xlane.f32.xlu0 %v6285_v46  ;;  %v15929_v46 = vmul.f32 0.5, %v6086_v40  ;;  %v15943_v40 = vmul.f32 0.5, %v6104_v48  ;;  %17782 = vst [vmem:[#allocation13_spill] sm:$0xff] %v15949_v16 }
0x1251   : > { %v6120_v49 = vpop.f32.mrb[198].mxu1 }
0x1252   : > { %v6122_v2 = vpop.f32.mrb[199].mxu1  ;;  %17777 = vst [vmem:[#allocation24_spill] sm:$0xff] %v15929_v46  ;;  %17781 = vst [vmem:[#allocation11_spill] sm:$0xff] %v15943_v40  ;;  %v6306_v8 = vmax.f32 %v15941_v23, %v15943_v40 }
0x1253   : > { %v15963_v4 = vmul.f32 0.5, %v6122_v2 }
0x1254   : > { %6292 = vmax.xlane.f32.xlu0 %v6291_v13 }
0x1255   : > { %v6126_v33 = vpop.f32.mrb[200].mxu1  ;;  %17784 = vst [vmem:[#allocation15_spill] sm:$0xff] %v15963_v4 }
0x1256   : > { %v6128_v32 = vpop.f32.mrb[201].mxu1 }
0x1257   : > { %v15971_v23 = vmul.f32 0.5, %v6128_v32 }
0x1258   : > { %6301 = vmax.xlane.f32.xlu0 %v6300_v0 }
0x1259   : > { %v6132_v54 = vpop.f32.mrb[202].mxu1  ;;  %17785 = vst [vmem:[#allocation14_spill] sm:$0xff] %v15971_v23 }
0x125a   : > { %v6134_v38 = vpop.f32.mrb[203].mxu1 }
0x125b   : > { %v15977_v2 = vmul.f32 0.5, %v6134_v38 }
0x125c   : > { %6310 = vmax.xlane.f32.xlu0 %v6309_v55  ;;  %v6297_v55 = vmax.f32 %v15927_v31, %v15929_v46  ;;  %v15951_v46 = vmul.f32 0.5, %v6116_v6 }
0x125d   : > { %v6138_v58 = vpop.f32.mrb[204].mxu1 }
0x125e   : > { %v6140_v43 = vpop.f32.mrb[205].mxu1  ;;  %17783 = vst [vmem:[#allocation12_spill] sm:$0xff] %v15951_v46  ;;  %v6312_v48 = vmax.f32 %v15949_v16, %v15951_v46  ;;  %v15975_v46 = vmul.f32 0.5, %v6132_v54  ;;  %v15993_v38 = vmul.f32 0.5, %v6138_v58 }
0x1261   : > { %v6144_v24 = vpop.f32.mrb[206].mxu1 }
0x1262   : > { %v6146_v19 = vpop.f32.mrb[207].mxu1 }
0x1265   : > { %v6150_v5 = vpop.f32.mrb[208].mxu1 }
0x1266   : > { %v6152_v13 = vpop.f32.mrb[209].mxu1 }
0x1268   : > { %6295 = vmax.xlane.f32.xlu1 %v6294_v26 }
0x1269   : > { %v6156_v0 = vpop.f32.mrb[210].mxu1 }
0x126a   : > { %v6158_v3 = vpop.f32.mrb[211].mxu1 }
0x126c   : > { %6298 = vmax.xlane.f32.xlu1 %v6297_v55 }
0x126d   : > { %v15937_v41 = vpop.f32.mrb[212].mxu1 }
0x126e   : > { %v6164_v26 = vpop.f32.mrb[213].mxu1 }
0x1270   : > { %6304 = vmax.xlane.f32.xlu1 %v6303_v36  ;;  %v15961_v36 = vmul.f32 0.5, %v6120_v49 }
0x1271   : > { %v15945_v59 = vpop.f32.mrb[214].mxu1 }
0x1272   : > { %11706 = vrot.lane.b32.xlu0 %v15629_v9, %s17620_s25  ;;  %v15955_v55 = vpop.f32.mrb[215].mxu1  ;;  %v6315_v6 = vmax.f32 %v15961_v36, %v15963_v4  ;;  %v15969_v9 = vmul.f32 0.5, %v6126_v33  ;;  %s17862_s25 = smov 36  }
0x1274   : > { %6307 = vmax.xlane.f32.xlu1 %v6306_v8  ;;  %v6318_v49 = vmax.f32 %v15969_v9, %v15971_v23 }
0x1275   : > { %v15957_v35 = vpop.f32.mrb[216].mxu1 }
0x1276   : > { %v15965_v40 = vpop.f32.mrb[217].mxu1 }
0x1278   : > { %6313 = vmax.xlane.f32.xlu1 %v6312_v48  ;;  %v6321_v48 = vmax.f32 %v15975_v46, %v15977_v2 }
0x1279   : > { %v6180_v25 = vpop.f32.mrb[218].mxu1 }
0x127a   : > { %v6182_v8 = vpop.f32.mrb[219].mxu1  ;;  %v15981_v4 = vmul.f32 0.5, %v6180_v25 }
0x127b   : > { %v15983_v33 = vmul.f32 0.5, %v6182_v8  ;;  %v15999_v8 = vmul.f32 0.5, %v6144_v24  ;;  %v16013_v24 = vmul.f32 0.5, %v6158_v3 }
0x127c   : > { %6316 = vmax.xlane.f32.xlu1 %v6315_v6 }
0x127d   : > { %v6186_v42 = vpop.f32.mrb[220].mxu1  ;;  %17786 = vst [vmem:[#allocation6_spill] sm:$0xff] %v15983_v33  ;;  %v6345_v32 = vmax.f32 %v15981_v4, %v15983_v33 }
0x127e   : > { %v6188_v16 = vpop.f32.mrb[221].mxu1  ;;  %v15987_v6 = vmul.f32 0.5, %v6186_v42 }
0x127f   : > { %v15989_v23 = vmul.f32 0.5, %v6188_v16  ;;  %v16005_v16 = vmul.f32 0.5, %v6150_v5 }
0x1280   : > { %6319 = vmax.xlane.f32.xlu1 %v6318_v49  ;;  %17787 = vst [vmem:[#allocation7_spill] sm:$0xff] %v15987_v6  ;;  %v15995_v49 = vmul.f32 0.5, %v6140_v43 }
0x1281   : > { %17788 = vst [vmem:[#allocation8_spill] sm:$0xff] %v15989_v23  ;;  %v6348_v54 = vmax.f32 %v15987_v6, %v15989_v23  ;;  %v16011_v23 = vmul.f32 0.5, %v6156_v0  ;;  %v16024_v0 = vmul.f32 0.5, %v6164_v26 }
0x1282   : > { %v6324_v25 = vmax.f32 %v15993_v38, %v15995_v49 }
0x1284   : > { %6322 = vmax.xlane.f32.xlu1 %v6321_v48  ;;  %v16001_v48 = vmul.f32 0.5, %v6146_v19 }
0x1286   : > { %v6327_v42 = vmax.f32 %v15999_v8, %v16001_v48 }
0x1288   : > { %6346 = vmax.xlane.f32.xlu1 %v6345_v32  ;;  %v16007_v32 = vmul.f32 0.5, %v6152_v13 }
0x128a   : > { %v6330_v19 = vmax.f32 %v16005_v16, %v16007_v32 }
0x128c   : > { %6349 = vmax.xlane.f32.xlu1 %v6348_v54 }
0x1291   : > { %6325 = vmax.xlane.f32.xlu0 %v6324_v25 }
0x1294   : > { %v6257_v58 = vpop.xlane.xlu1 %6256 }
0x1295   : > { %v6351_v43 = vsub.f32 %v15827_v53, %v6257_v58  ;;  %v6352_v54 = vsub.f32 %v15829_v61, %v6257_v58  ;;  %6328 = vmax.xlane.f32.xlu0 %v6327_v42  ;;  %v6333_v53 = vmax.f32 %v16011_v23, %v16013_v24  ;;  %v16022_v61 = vmul.f32 0.5, %v15937_v41 }
0x1297   : > { %v6415_v25 = vmul.f32 1.442695, %v6351_v43  ;;  %v6417_v6 = vmul.f32 1.442695, %v6352_v54  ;;  %v6336_v41 = vmax.f32 %v16022_v61, %v16024_v0 }
0x1298   : > { %v6260_v33 = vpop.xlane.xlu0 %6259 }
0x1299   : > { %11902 = vpow2.f32 %v6415_v25  ;;  %v6353_v5 = vsub.f32 %v15833_v20, %v6260_v33  ;;  %v6354_v13 = vsub.f32 %v15835_v45, %v6260_v33  ;;  %6331 = vmax.xlane.f32.xlu0 %v6330_v19  ;;  %v16029_v45 = vmul.f32 0.5, %v15945_v59 }
0x129a   : > { %11904 = vpow2.f32 %v6417_v6  ;;  %v16032_v33 = vmul.f32 0.5, %v15955_v55 }
0x129b   : > { %v6419_v3 = vmul.f32 1.442695, %v6353_v5  ;;  %v6421_v42 = vmul.f32 1.442695, %v6354_v13  ;;  %v16043_v13 = vmul.f32 0.5, %v15957_v35 }
0x129c   : > { %v6263_v58 = vpop.xlane.xlu0 %6262  ;;  %v6339_v59 = vmax.f32 %v16029_v45, %v16032_v33 }
0x129d   : > { %11906 = vpow2.f32 %v6419_v3  ;;  %v6355_v43 = vsub.f32 %v15839_v60, %v6263_v58  ;;  %v6356_v20 = vsub.f32 %v15841_v30, %v6263_v58  ;;  %6334 = vmax.xlane.f32.xlu0 %v6333_v53  ;;  %v16046_v53 = vmul.f32 0.5, %v15965_v40 }
0x129e   : > { %11908 = vpow2.f32 %v6421_v42 }
0x129f   : > { %v6423_v26 = vmul.f32 1.442695, %v6355_v43  ;;  %v6425_v6 = vmul.f32 1.442695, %v6356_v20  ;;  %v6342_v40 = vmax.f32 %v16043_v13, %v16046_v53 }
0x12a0   : > { %v11697_v54 = vpop.permute.xlu0 %11696  ;;  %v6266_v19 = vpop.xlane.xlu1 %6265 }
0x12a1   : > { %11910 = vpow2.f32 %v6423_v26  ;;  %v11699_v25 = vunpack.i.h.bf16 %v11697_v54  ;;  %v11698_v60 = vunpack.i.l.bf16 %v11697_v54  ;;  %v6357_v30 = vsub.f32 %v15845_v39, %v6266_v19  ;;  %6337 = vmax.xlane.f32.xlu0 %v6336_v41 }
0x12a2   : > { %11912 = vpow2.f32 %v6425_v6  ;;  %v6358_v55 = vsub.f32 %v15847_v37, %v6266_v19 }
0x12a3   : > { %v16040_v5 = vpop.eup %11902  ;;  %v10989_v3 = vpack.c.bf16 %v11699_v25, %v11698_v60  ;;  %v6427_v42 = vmul.f32 1.442695, %v6357_v30 }
0x12a4   : > { %v16048_v58 = vpop.eup %11904  ;;  %v6429_v39 = vmul.f32 1.442695, %v6358_v55 }
0x12a5   : > { %11914 = vpow2.f32 %v6427_v42  ;;  %10990 = vmatpush1.bf16.msra.mxu0 %v10989_v3  ;;  %6340 = vmax.xlane.f32.xlu0 %v6339_v59  ;;  %v6543_v43 = vadd.f32 %v16048_v58, %v16040_v5 }
0x12a6   : > { %11916 = vpow2.f32 %v6429_v39  ;;  %10991 = vmatprep.subr.bf16.mxu0 %v17638_v34 }
0x12a7   : > { %v16053_v37 = vpop.eup %11906  ;;  %6544 = vadd.xlane.f32.xlu1 %v6543_v43 }
0x12a8   : > { %17789 = vst [vmem:[#allocation25_spill] sm:$0xff] %v16053_v37  ;;  %v16057_v35 = vpop.eup %11908  ;;  %v6272_v60 = vpop.xlane.xlu1 %6271 }
0x12a9   : > { %17790 = vst [vmem:[#allocation26_spill] sm:$0xff] %v16057_v35  ;;  %6343 = vmax.xlane.f32.xlu0 %v6342_v40  ;;  %v6546_v20 = vadd.f32 %v16057_v35, %v16053_v37  ;;  %v6361_v40 = vsub.f32 %v15851_v17, %v6272_v60 }
0x12ab   : > { %v16061_v41 = vpop.eup %11910  ;;  %6547 = vadd.xlane.f32.xlu1 %v6546_v20  ;;  %v6362_v20 = vsub.f32 %v15853_v52, %v6272_v60 }
0x12ac   : > { %17791 = vst [vmem:[#allocation27_spill] sm:$0xff] %v16061_v41  ;;  %v16063_v26 = vpop.eup %11912 }
0x12ad   : > { %17792 = vst [vmem:[#allocation28_spill] sm:$0xff] %v16063_v26  ;;  %v6549_v6 = vadd.f32 %v16063_v26, %v16061_v41  ;;  %v6437_v37 = vmul.f32 1.442695, %v6362_v20 }
0x12af   : > { %v16067_v54 = vpop.eup %11914  ;;  %6550 = vadd.xlane.f32.xlu1 %v6549_v6 }
0x12b0   : > { %17793 = vst [vmem:[#allocation29_spill] sm:$0xff] %v16067_v54  ;;  %v16069_v19 = vpop.eup %11916  ;;  %v6278_v30 = vpop.xlane.xlu1 %6277 }
0x12b1   : > { %17794 = vst [vmem:[#allocation30_spill] sm:$0xff] %v16069_v19  ;;  %v6552_v25 = vadd.f32 %v16069_v19, %v16067_v54  ;;  %v6435_v19 = vmul.f32 1.442695, %v6361_v40  ;;  %v6366_v52 = vsub.f32 %v15859_v44, %v6278_v30 }
0x12b3   : > { %6553 = vadd.xlane.f32.xlu1 %v6552_v25 }
0x12b8   : > { %v6284_v59 = vpop.xlane.xlu1 %6283 }
0x12b9   : > { %v6370_v44 = vsub.f32 %v15867_v22, %v6284_v59 }
0x12c0   : > { %v16073_v55 = vpop.xlane.xlu1 %6289 }
0x12c4   : > { %v11702_v3 = vpop.permute.xlu1 %11701 }
0x12c5   : > { %v11704_v42 = vunpack.i.h.bf16 %v11702_v3  ;;  %v11703_v39 = vunpack.i.l.bf16 %v11702_v3 }
0x12c7   : > { %v10992_v43 = vpack.c.bf16 %v11704_v42, %v11703_v39  ;;  %v6445_v39 = vmul.f32 1.442695, %v6366_v52 }
0x12c9   : > { %10993 = vmatpush1.bf16.msra.mxu0 %v10992_v43 }
0x12ca   : > { %10994 = vmatprep.subr.bf16.mxu0 %v17638_v34  ;;  %v6365_v34 = vsub.f32 %v15857_v29, %v6278_v30  ;;  %v6369_v29 = vsub.f32 %v15865_v12, %v6284_v59  ;;  %v6453_v12 = vmul.f32 1.442695, %v6370_v44 }
0x12cc   : > { %v6443_v60 = vmul.f32 1.442695, %v6365_v34  ;;  %v6451_v43 = vmul.f32 1.442695, %v6369_v29 }
0x12d1   : > { %v6269_v6 = vpop.xlane.xlu0 %6268 }
0x12d2   : > { %v6359_v54 = vsub.f32 %v15877_v28, %v6269_v6  ;;  %v6360_v25 = vsub.f32 %v15879_v10, %v6269_v6 }
0x12d4   : > { %v6431_v41 = vmul.f32 1.442695, %v6359_v54  ;;  %v6433_v26 = vmul.f32 1.442695, %v6360_v25 }
0x12d5   : > { %v6275_v35 = vpop.xlane.xlu0 %6274 }
0x12d6   : > { %11918 = vpow2.f32 %v6431_v41  ;;  %v6363_v3 = vsub.f32 %v15883_v1, %v6275_v35  ;;  %v6364_v42 = vsub.f32 %v15885_v62, %v6275_v35 }
0x12d7   : > { %11920 = vpow2.f32 %v6433_v26 }
0x12d8   : > { %11922 = vpow2.f32 %v6435_v19  ;;  %v6439_v17 = vmul.f32 1.442695, %v6363_v3  ;;  %v6441_v28 = vmul.f32 1.442695, %v6364_v42  ;;  %v6373_v3 = vsub.f32 %v15871_v57, %v16073_v55 }
0x12d9   : > { %11924 = vpow2.f32 %v6437_v37  ;;  %v6281_v10 = vpop.xlane.xlu0 %6280 }
0x12da   : > { %11926 = vpow2.f32 %v6439_v17  ;;  %v6367_v54 = vsub.f32 %v15891_v56, %v6281_v10  ;;  %v6368_v1 = vsub.f32 %v15893_v21, %v6281_v10  ;;  %v6459_v10 = vmul.f32 1.442695, %v6373_v3 }
0x12db   : > { %11928 = vpow2.f32 %v6441_v28 }
0x12dc   : > { %11930 = vpow2.f32 %v6443_v60  ;;  %v6447_v35 = vmul.f32 1.442695, %v6367_v54  ;;  %v6449_v26 = vmul.f32 1.442695, %v6368_v1 }
0x12dd   : > { %v6287_v41 = vpop.xlane.xlu0 %6286  ;;  %11932 = vpow2.f32 %v6445_v39 }
0x12de   : > { %11934 = vpow2.f32 %v6447_v35  ;;  %v6371_v40 = vsub.f32 %v15897_v11, %v6287_v41  ;;  %v6372_v20 = vsub.f32 %v15899_v14, %v6287_v41  ;;  %v6374_v11 = vsub.f32 %v15873_v50, %v16073_v55 }
0x12df   : > { %11936 = vpow2.f32 %v6449_v26 }
0x12e0   : > { %v16086_v62 = vpop.eup %11918  ;;  %11938 = vpow2.f32 %v6451_v43  ;;  %v6455_v42 = vmul.f32 1.442695, %v6371_v40  ;;  %v6457_v34 = vmul.f32 1.442695, %v6372_v20  ;;  %v6461_v60 = vmul.f32 1.442695, %v6374_v11 }
0x12e1   : > { %v16089_v37 = vpop.eup %11920  ;;  %v6293_v19 = vpop.xlane.xlu0 %6292  ;;  %11940 = vpow2.f32 %v6453_v12 }
0x12e2   : > { %v16092_v30 = vpop.eup %11922  ;;  %v6555_v56 = vadd.f32 %v16089_v37, %v16086_v62  ;;  %11942 = vpow2.f32 %v6455_v42  ;;  %v6375_v57 = vsub.f32 %v15903_v51, %v6293_v19  ;;  %v6376_v54 = vsub.f32 %v15905_v47, %v6293_v19 }
0x12e3   : > { %v16096_v21 = vpop.eup %11924  ;;  %11944 = vpow2.f32 %v6457_v34 }
0x12e4   : > { %6556 = vadd.xlane.f32.xlu1 %v6555_v56  ;;  %v16100_v22 = vpop.eup %11926  ;;  %v6558_v59 = vadd.f32 %v16096_v21, %v16092_v30  ;;  %11946 = vpow2.f32 %v6459_v10  ;;  %v6463_v35 = vmul.f32 1.442695, %v6375_v57  ;;  %v6465_v51 = vmul.f32 1.442695, %v6376_v54 }
0x12e5   : > { %v6302_v6 = vpop.xlane.xlu0 %6301  ;;  %v16104_v25 = vpop.eup %11928  ;;  %11948 = vpow2.f32 %v6461_v60 }
0x12e6   : > { %v16112_v17 = vpop.eup %11930  ;;  %v6561_v52 = vadd.f32 %v16104_v25, %v16100_v22  ;;  %v6381_v26 = vsub.f32 %v15909_v7, %v6302_v6  ;;  %11950 = vpow2.f32 %v6463_v35  ;;  %v6382_v43 = vsub.f32 %v15911_v18, %v6302_v6 }
0x12e7   : > { %v16116_v28 = vpop.eup %11932  ;;  %11952 = vpow2.f32 %v6465_v51 }
0x12e8   : > { %6559 = vadd.xlane.f32.xlu1 %v6558_v59  ;;  %v16120_v55 = vpop.eup %11934  ;;  %v6564_v41 = vadd.f32 %v16116_v28, %v16112_v17  ;;  %v6475_v40 = vmul.f32 1.442695, %v6381_v26  ;;  %v6477_v11 = vmul.f32 1.442695, %v6382_v43  ;;  %v17798_v26 = vld [vmem:[#allocation10_spill] sm:$0xff] }
0x12e9   : > { %v16110_v14 = vpop.xlane.xlu0 %6310  ;;  %v16124_v29 = vpop.eup %11936 }
0x12ea   : > { %v16127_v56 = vpop.eup %11938  ;;  %v6567_v47 = vadd.f32 %v16124_v29, %v16120_v55  ;;  %11954 = vpow2.f32 %v6475_v40  ;;  %v6387_v18 = vsub.f32 %v15915_v63, %v16110_v14 }
0x12eb   : > { %v16131_v19 = vpop.eup %11940 }
0x12ec   : > { %6562 = vadd.xlane.f32.xlu1 %v6561_v52  ;;  %v16134_v20 = vpop.eup %11942  ;;  %v6570_v3 = vadd.f32 %v16131_v19, %v16127_v56 }
0x12ed   : > { %v11707_v50 = vpop.permute.xlu0 %11706  ;;  %v16140_v42 = vpop.eup %11944 }
0x12ee   : > { %v11709_v39 = vunpack.i.h.bf16 %v11707_v50  ;;  %v11708_v1 = vunpack.i.l.bf16 %v11707_v50  ;;  %v16144_v10 = vpop.eup %11946  ;;  %v6573_v60 = vadd.f32 %v16140_v42, %v16134_v20  ;;  %v17796_v50 = vld [vmem:[#allocation19_spill] sm:$0xff] }
0x12ef   : > { %v16150_v54 = vpop.eup %11948 }
0x12f0   : > { %v10995_v44 = vpack.c.bf16 %v11709_v39, %v11708_v1  ;;  %6565 = vadd.xlane.f32.xlu1 %v6564_v41  ;;  %v6388_v39 = vsub.f32 %v17796_v50, %v16110_v14  ;;  %v6487_v41 = vmul.f32 1.442695, %v6387_v18  ;;  %v6576_v43 = vadd.f32 %v16150_v54, %v16144_v10 }
0x12f2   : > { %10996 = vmatpush1.bf16.msra.mxu0 %v10995_v44  ;;  %v16154_v44 = vpop.eup %11950 }
0x12f3   : > { %v16160_v40 = vpop.eup %11952 }
0x12f4   : > { %6568 = vadd.xlane.f32.xlu1 %v6567_v47  ;;  %v6579_v18 = vadd.f32 %v16160_v40, %v16154_v44 }
0x12f5   : > { %v6296_v12 = vpop.xlane.xlu1 %6295 }
0x12f6   : > { %v6377_v59 = vsub.f32 %v15921_v15, %v6296_v12  ;;  %v6378_v7 = vsub.f32 %v15923_v27, %v6296_v12  ;;  %v17795_v27 = vld [vmem:[#allocation24_spill] sm:$0xff]  ;;  %v6489_v12 = vmul.f32 1.442695, %v6388_v39 }
0x12f8   : > { %v6467_v34 = vmul.f32 1.442695, %v6377_v59  ;;  %v6469_v52 = vmul.f32 1.442695, %v6378_v7  ;;  %6571 = vadd.xlane.f32.xlu1 %v6570_v3  ;;  %v17799_v3 = vld [vmem:[#allocation9_spill] sm:$0xff] }
0x12f9   : > { %v6299_v6 = vpop.xlane.xlu1 %6298 }
0x12fa   : > { %11956 = vpow2.f32 %v6467_v34  ;;  %v6379_v15 = vsub.f32 %v15927_v31, %v6299_v6  ;;  %v6380_v57 = vsub.f32 %v17795_v27, %v6299_v6  ;;  %v17797_v31 = vld [vmem:[#allocation23_spill] sm:$0xff]  ;;  %v16166_v6 = vpop.eup %11954 }
0x12fb   : > { %11958 = vpow2.f32 %v6469_v52  ;;  %v17800_v34 = vld [vmem:[#allocation11_spill] sm:$0xff] }
0x12fc   : > { %11960 = vpow2.f32 %v6477_v11  ;;  %v6471_v1 = vmul.f32 1.442695, %v6379_v15  ;;  %v6473_v63 = vmul.f32 1.442695, %v6380_v57  ;;  %6574 = vadd.xlane.f32.xlu1 %v6573_v60 }
0x12fd   : > { %v6305_v35 = vpop.xlane.xlu1 %6304 }
0x12fe   : > { %11962 = vpow2.f32 %v6471_v1  ;;  %v6383_v51 = vsub.f32 %v17797_v31, %v6305_v35  ;;  %v6384_v47 = vsub.f32 %v17798_v26, %v6305_v35  ;;  %v17801_v1 = vld [vmem:[#allocation13_spill] sm:$0xff] }
0x12ff   : > { %11964 = vpow2.f32 %v6473_v63 }
0x1300   : > { %v6479_v14 = vmul.f32 1.442695, %v6383_v51  ;;  %v6481_v59 = vmul.f32 1.442695, %v6384_v47  ;;  %6577 = vadd.xlane.f32.xlu1 %v6576_v43  ;;  %11966 = vpow2.f32 %v6487_v41  ;;  %v17802_v41 = vld [vmem:[#allocation12_spill] sm:$0xff] }
0x1301   : > { %v6308_v7 = vpop.xlane.xlu1 %6307 }
0x1302   : > { %11968 = vpow2.f32 %v6479_v14  ;;  %v6385_v11 = vsub.f32 %v17799_v3, %v6308_v7  ;;  %v6386_v52 = vsub.f32 %v17800_v34, %v6308_v7  ;;  %v17803_v7 = vld [vmem:[#allocation15_spill] sm:$0xff] }
0x1303   : > { %11970 = vpow2.f32 %v6481_v59 }
0x1304   : > { %v16168_v15 = vpop.eup %11956  ;;  %11972 = vpow2.f32 %v6489_v12  ;;  %v6483_v27 = vmul.f32 1.442695, %v6385_v11  ;;  %v6485_v57 = vmul.f32 1.442695, %v6386_v52  ;;  %6580 = vadd.xlane.f32.xlu1 %v6579_v18 }
0x1305   : > { %v16170_v60 = vpop.eup %11958  ;;  %v6314_v50 = vpop.xlane.xlu1 %6313 }
0x1306   : > { %v16172_v39 = vpop.eup %11960  ;;  %11974 = vpow2.f32 %v6483_v27  ;;  %v6389_v63 = vsub.f32 %v17801_v1, %v6314_v50  ;;  %v6390_v35 = vsub.f32 %v17802_v41, %v6314_v50  ;;  %v6582_v31 = vadd.f32 %v16170_v60, %v16168_v15 }
0x1307   : > { %11976 = vpow2.f32 %v6485_v57  ;;  %v6588_v14 = vadd.f32 %v16172_v39, %v16166_v6 }
0x1308   : > { %v16178_v51 = vpop.eup %11962  ;;  %v6491_v26 = vmul.f32 1.442695, %v6389_v63  ;;  %v6493_v47 = vmul.f32 1.442695, %v6390_v35  ;;  %6583 = vadd.xlane.f32.xlu0 %v6582_v31  ;;  %v17804_v63 = vld [vmem:[#allocation14_spill] sm:$0xff] }
0x1309   : > { %v16180_v43 = vpop.eup %11964  ;;  %v6317_v12 = vpop.xlane.xlu1 %6316 }
0x130a   : > { %11978 = vpow2.f32 %v6491_v26  ;;  %v6391_v59 = vsub.f32 %v15961_v36, %v6317_v12  ;;  %v6392_v3 = vsub.f32 %v17803_v7, %v6317_v12  ;;  %v6585_v11 = vadd.f32 %v16180_v43, %v16178_v51  ;;  %v16188_v34 = vpop.eup %11966 }
0x130b   : > { %11980 = vpow2.f32 %v6493_v47 }
0x130c   : > { %v16190_v52 = vpop.eup %11968  ;;  %v6495_v18 = vmul.f32 1.442695, %v6391_v59  ;;  %v6497_v27 = vmul.f32 1.442695, %v6392_v3  ;;  %6589 = vadd.xlane.f32.xlu0 %v6588_v14  ;;  %6586 = vadd.xlane.f32.xlu1 %v6585_v11 }
0x130d   : > { %v16192_v57 = vpop.eup %11970  ;;  %v6320_v50 = vpop.xlane.xlu1 %6319 }
0x130e   : > { %v16194_v1 = vpop.eup %11972  ;;  %11982 = vpow2.f32 %v6495_v18  ;;  %v6393_v36 = vsub.f32 %v15969_v9, %v6320_v50  ;;  %v6394_v41 = vsub.f32 %v17804_v63, %v6320_v50  ;;  %v6591_v35 = vadd.f32 %v16192_v57, %v16190_v52 }
0x130f   : > { %11984 = vpow2.f32 %v6497_v27  ;;  %v6597_v59 = vadd.f32 %v16194_v1, %v16188_v34 }
0x1310   : > { %v16200_v31 = vpop.eup %11974  ;;  %v6499_v26 = vmul.f32 1.442695, %v6393_v36  ;;  %v6501_v47 = vmul.f32 1.442695, %v6394_v41  ;;  %6592 = vadd.xlane.f32.xlu1 %v6591_v35 }
0x1311   : > { %v16202_v12 = vpop.eup %11976  ;;  %v6323_v14 = vpop.xlane.xlu1 %6322 }
0x1312   : > { %11986 = vpow2.f32 %v6499_v26  ;;  %v6395_v9 = vsub.f32 %v15975_v46, %v6323_v14  ;;  %v6396_v7 = vsub.f32 %v15977_v2, %v6323_v14  ;;  %v6594_v3 = vadd.f32 %v16202_v12, %v16200_v31 }
0x1313   : > { %11988 = vpow2.f32 %v6501_v47 }
0x1314   : > { %v16210_v11 = vpop.eup %11978  ;;  %v6503_v18 = vmul.f32 1.442695, %v6395_v9  ;;  %v6505_v27 = vmul.f32 1.442695, %v6396_v7  ;;  %6595 = vadd.xlane.f32.xlu0 %v6594_v3  ;;  %6598 = vadd.xlane.f32.xlu1 %v6597_v59 }
0x1315   : > { %v16212_v50 = vpop.eup %11980 }
0x1316   : > { %11990 = vpow2.f32 %v6503_v18  ;;  %v6600_v36 = vadd.f32 %v16212_v50, %v16210_v11 }
0x1317   : > { %11992 = vpow2.f32 %v6505_v27 }
0x1318   : > { %v16216_v46 = vpop.eup %11982  ;;  %6601 = vadd.xlane.f32.xlu0 %v6600_v36 }
0x1319   : > { %17805 = vst [vmem:[#allocation24_spill] sm:$0xff] %v16216_v46  ;;  %v16218_v2 = vpop.eup %11984 }
0x131a   : > { %v6603_v63 = vadd.f32 %v16218_v2, %v16216_v46 }
0x131c   : > { %v16222_v41 = vpop.eup %11986  ;;  %6604 = vadd.xlane.f32.xlu1 %v6603_v63 }
0x131d   : > { %17806 = vst [vmem:[#allocation19_spill] sm:$0xff] %v16222_v41  ;;  %v16224_v35 = vpop.eup %11988 }
0x131e   : > { %17807 = vst [vmem:[#allocation23_spill] sm:$0xff] %v16224_v35  ;;  %v6326_v26 = vpop.xlane.xlu0 %6325  ;;  %v6606_v47 = vadd.f32 %v16224_v35, %v16222_v41  ;;  %v6347_v35 = vpop.xlane.xlu1 %6346 }
0x131f   : > { %v6397_v14 = vsub.f32 %v15993_v38, %v6326_v26  ;;  %v6398_v59 = vsub.f32 %v15995_v49, %v6326_v26 }
0x1320   : > { %v16230_v9 = vpop.eup %11990  ;;  %6607 = vadd.xlane.f32.xlu0 %v6606_v47 }
0x1321   : > { %17808 = vst [vmem:[#allocation10_spill] sm:$0xff] %v16230_v9  ;;  %v16232_v7 = vpop.eup %11992  ;;  %v6507_v3 = vmul.f32 1.442695, %v6397_v14  ;;  %v6509_v18 = vmul.f32 1.442695, %v6398_v59 }
0x1322   : > { %v6329_v27 = vpop.xlane.xlu0 %6328  ;;  %v6609_v36 = vadd.f32 %v16232_v7, %v16230_v9 }
0x1323   : > { %11994 = vpow2.f32 %v6507_v3  ;;  %v6399_v63 = vsub.f32 %v15999_v8, %v6329_v27  ;;  %v6400_v41 = vsub.f32 %v16001_v48, %v6329_v27  ;;  %v6411_v3 = vsub.f32 %v15981_v4, %v6347_v35 }
0x1324   : > { %11996 = vpow2.f32 %v6509_v18  ;;  %6610 = vadd.xlane.f32.xlu1 %v6609_v36 }
0x1325   : > { %v6511_v38 = vmul.f32 1.442695, %v6399_v63  ;;  %v6513_v49 = vmul.f32 1.442695, %v6400_v41  ;;  %v6535_v63 = vmul.f32 1.442695, %v6411_v3 }
0x1326   : > { %v6332_v26 = vpop.xlane.xlu0 %6331 }
0x1327   : > { %11998 = vpow2.f32 %v6511_v38  ;;  %v6401_v47 = vsub.f32 %v16005_v16, %v6332_v26  ;;  %v6402_v14 = vsub.f32 %v16007_v32, %v6332_v26  ;;  %v17809_v16 = vld [vmem:[#allocation6_spill] sm:$0xff] }
0x1328   : > { %12000 = vpow2.f32 %v6513_v49  ;;  %v6412_v32 = vsub.f32 %v17809_v16, %v6347_v35  ;;  %v6350_v49 = vpop.xlane.xlu1 %6349 }
0x1329   : > { %v6515_v59 = vmul.f32 1.442695, %v6401_v47  ;;  %v6517_v46 = vmul.f32 1.442695, %v6402_v14  ;;  %v17810_v14 = vld [vmem:[#allocation7_spill] sm:$0xff] }
0x132a   : > { %v6335_v9 = vpop.xlane.xlu0 %6334  ;;  %v6537_v35 = vmul.f32 1.442695, %v6412_v32 }
0x132b   : > { %12002 = vpow2.f32 %v6515_v59  ;;  %v6403_v8 = vsub.f32 %v16011_v23, %v6335_v9  ;;  %v6404_v48 = vsub.f32 %v16013_v24, %v6335_v9  ;;  %v6413_v59 = vsub.f32 %v17810_v14, %v6350_v49 }
0x132c   : > { %12004 = vpow2.f32 %v6517_v46 }
0x132d   : > { %v16243_v41 = vpop.eup %11994  ;;  %v6519_v18 = vmul.f32 1.442695, %v6403_v8  ;;  %v6521_v27 = vmul.f32 1.442695, %v6404_v48 }
0x132e   : > { %v16245_v36 = vpop.eup %11996  ;;  %v6338_v38 = vpop.xlane.xlu0 %6337 }
0x132f   : > { %12006 = vpow2.f32 %v6519_v18  ;;  %v6405_v4 = vsub.f32 %v16022_v61, %v6338_v38  ;;  %v6406_v26 = vsub.f32 %v16024_v0, %v6338_v38  ;;  %v6612_v23 = vadd.f32 %v16245_v36, %v16243_v41 }
0x1330   : > { %12008 = vpow2.f32 %v6521_v27 }
0x1331   : > { %v16252_v24 = vpop.eup %11998  ;;  %v6523_v46 = vmul.f32 1.442695, %v6405_v4  ;;  %v6525_v9 = vmul.f32 1.442695, %v6406_v26  ;;  %6613 = vadd.xlane.f32.xlu0 %v6612_v23  ;;  %12010 = vpow2.f32 %v6535_v63  ;;  %v17811_v63 = vld [vmem:[#allocation8_spill] sm:$0xff] }
0x1332   : > { %v16254_v47 = vpop.eup %12000  ;;  %v6341_v3 = vpop.xlane.xlu0 %6340  ;;  %v6414_v38 = vsub.f32 %v17811_v63, %v6350_v49  ;;  %v6539_v4 = vmul.f32 1.442695, %v6413_v59 }
0x1333   : > { %12012 = vpow2.f32 %v6523_v46  ;;  %v6407_v61 = vsub.f32 %v16029_v45, %v6341_v3  ;;  %v6408_v0 = vsub.f32 %v16032_v33, %v6341_v3  ;;  %v6615_v8 = vadd.f32 %v16254_v47, %v16252_v24 }
0x1334   : > { %12014 = vpow2.f32 %v6525_v9  ;;  %v6545_v48 = vpop.xlane.xlu1 %6544  ;;  %v6541_v49 = vmul.f32 1.442695, %v6414_v38 }
0x1335   : > { %v16261_v18 = vpop.eup %12002  ;;  %v6527_v27 = vmul.f32 1.442695, %v6407_v61  ;;  %v6529_v16 = vmul.f32 1.442695, %v6408_v0  ;;  %12016 = vrcp.f32 %v6545_v48  ;;  %6616 = vadd.xlane.f32.xlu1 %v6615_v8 }
0x1336   : > { %v16263_v32 = vpop.eup %12004  ;;  %12018 = vpow2.f32 %v6537_v35  ;;  %v6344_v45 = vpop.xlane.xlu0 %6343 }
0x1337   : > { %12020 = vpow2.f32 %v6527_v27  ;;  %v6409_v33 = vsub.f32 %v16043_v13, %v6344_v45  ;;  %v6410_v26 = vsub.f32 %v16046_v53, %v6344_v45  ;;  %v6618_v23 = vadd.f32 %v16263_v32, %v16261_v18 }
0x1338   : > { %12022 = vpow2.f32 %v6529_v16  ;;  %v6548_v46 = vpop.xlane.xlu1 %6547 }
0x1339   : > { %v16270_v9 = vpop.eup %12006  ;;  %v6531_v14 = vmul.f32 1.442695, %v6409_v33  ;;  %v6533_v3 = vmul.f32 1.442695, %v6410_v26  ;;  %12024 = vrcp.f32 %v6548_v46  ;;  %6619 = vadd.xlane.f32.xlu0 %v6618_v23  ;;  %v17812_v46 = vld [vmem:[#allocation26_spill] sm:$0xff] }
0x133a   : > { %v16272_v35 = vpop.eup %12008  ;;  %12026 = vpow2.f32 %v6539_v4 }
0x133b   : > { %12028 = vpow2.f32 %v6531_v14  ;;  %v6621_v13 = vadd.f32 %v16272_v35, %v16270_v9  ;;  %v16276_v53 = vpop.eup %12010 }
0x133c   : > { %12030 = vpow2.f32 %v6533_v3  ;;  %v6551_v59 = vpop.xlane.xlu1 %6550 }
0x133d   : > { %v16278_v61 = vpop.eup %12012  ;;  %12032 = vrcp.f32 %v6551_v59  ;;  %6622 = vadd.xlane.f32.xlu1 %v6621_v13 }
0x133e   : > { %v16280_v0 = vpop.eup %12014  ;;  %12034 = vpow2.f32 %v6541_v49 }
0x133f   : > { %v12017_v8 = vpop.eup %12016  ;;  %v6624_v48 = vadd.f32 %v16280_v0, %v16278_v61 }
0x1340   : > { %v16284_v27 = vpop.eup %12018  ;;  %v6671_v16 = vmul.f32 %v12017_v8, %v16040_v5  ;;  %v6554_v63 = vpop.xlane.xlu1 %6553  ;;  %v6672_v38 = vmul.f32 %v12017_v8, %v16048_v58  ;;  %v17813_v5 = vld [vmem:[#allocation25_spill] sm:$0xff] }
0x1341   : > { %v16288_v4 = vpop.eup %12020  ;;  %12036 = vrcp.f32 %v6554_v63  ;;  %6625 = vadd.xlane.f32.xlu0 %v6624_v48  ;;  %v6633_v8 = vadd.f32 %v16284_v27, %v16276_v53 }
0x1342   : > { %v16290_v45 = vpop.eup %12022  ;;  %6895 = vmatprep.mubr.f32.mxu0 %v6672_v38  ;;  %v17816_v38 = vld [vmem:[#allocation27_spill] sm:$0xff] }
0x1343   : > { %v12025_v33 = vpop.eup %12024  ;;  %6896 = vmatmul.mubr.f32.vlgmr.msra.gmra.mrb[122].mxu0 %v6671_v16  ;;  %v6627_v26 = vadd.f32 %v16290_v45, %v16288_v4  ;;  %v17815_v16 = vld [vmem:[#allocation28_spill] sm:$0xff] }
0x1344   : > { %v16294_v23 = vpop.eup %12026  ;;  %v6674_v14 = vmul.f32 %v12025_v33, %v17812_v46  ;;  %v6673_v3 = vmul.f32 %v12025_v33, %v17813_v5 }
0x1345   : > { %v16298_v49 = vpop.eup %12028  ;;  %6628 = vadd.xlane.f32.xlu1 %v6627_v26 }
0x1346   : > { %17814 = vst [vmem:[#allocation9_spill] sm:$0xff] %v16298_v49  ;;  %v16300_v58 = vpop.eup %12030  ;;  %6900 = vmatprep.mubr.f32.mxu0 %v6674_v14  ;;  %v17817_v14 = vld [vmem:[#allocation30_spill] sm:$0xff] }
0x1347   : > { %v12033_v13 = vpop.eup %12032  ;;  %6901 = vmatmul.mubr.f32.gmra.mrb[124].mxu0 %v6673_v3  ;;  %v6630_v59 = vadd.f32 %v16300_v58, %v16298_v49  ;;  %v17818_v3 = vld [vmem:[#allocation29_spill] sm:$0xff] }
0x1348   : > { %v16306_v48 = vpop.eup %12034  ;;  %v6676_v63 = vmul.f32 %v12033_v13, %v17815_v16  ;;  %v6675_v33 = vmul.f32 %v12033_v13, %v17816_v38  ;;  %v8920_v16 = vld [vmem:[%s17406_s4 + $0x4] sm:$0xf] }
0x1349   : > { %6631 = vadd.xlane.f32.xlu0 %v6630_v59  ;;  %6634 = vadd.xlane.f32.xlu1 %v6633_v8  ;;  %v6636_v46 = vadd.f32 %v16306_v48, %v16294_v23 }
0x134a   : > { %6905 = vmatprep.mubr.f32.mxu0 %v6676_v63  ;;  %10147 = vmatprep.subr.msk.mxu1 %vm17819_vm5, %v8920_v16  ;;  %vm17833_vm5 = vmmov %vm17675_vm0 }
0x134b   : > { %v12037_v26 = vpop.eup %12036  ;;  %6906 = vmatmul.mubr.f32.gmra.mrb[126].mxu0 %v6675_v33  ;;  %10148 = vmatpush3.msk.msra.mxu1 %vm17820_vm6, %v8920_v16  ;;  %vm17834_vm6 = vmmov %vm17675_vm0 }
0x134c   : > { %v6678_v5 = vmul.f32 %v12037_v26, %v17817_v14  ;;  %v6677_v49 = vmul.f32 %v12037_v26, %v17818_v3 }
0x134d   : > { %6637 = vadd.xlane.f32.xlu0 %v6636_v46 }
0x134e   : > { %6910 = vmatprep.mubr.f32.mxu0 %v6678_v5 }
0x134f   : > { %6911 = vmatmul.mubr.f32.gmra.mrb[128].mxu0 %v6677_v49 }
0x1371   : > { %v6557_v13 = vpop.xlane.xlu1 %6556 }
0x1372   : > { %12038 = vrcp.f32 %v6557_v13 }
0x1375   : > { %v6560_v59 = vpop.xlane.xlu1 %6559 }
0x1376   : > { %12040 = vrcp.f32 %v6560_v59 }
0x1379   : > { %v6563_v8 = vpop.xlane.xlu1 %6562 }
0x137a   : > { %12042 = vrcp.f32 %v6563_v8 }
0x137c   : > { %v12039_v63 = vpop.eup %12038 }
0x137d   : > { %v6566_v38 = vpop.xlane.xlu1 %6565  ;;  %v6680_v33 = vmul.f32 %v12039_v63, %v16089_v37  ;;  %v6679_v49 = vmul.f32 %v12039_v63, %v16086_v62 }
0x137e   : > { %12044 = vrcp.f32 %v6566_v38 }
0x137f   : > { %6915 = vmatprep.mubr.f32.mxu0 %v6680_v33 }
0x1380   : > { %v12041_v26 = vpop.eup %12040  ;;  %6916 = vmatmul.mubr.f32.gmra.mrb[130].mxu0 %v6679_v49 }
0x1381   : > { %v6569_v46 = vpop.xlane.xlu1 %6568  ;;  %v6682_v14 = vmul.f32 %v12041_v26, %v16096_v21  ;;  %v6681_v5 = vmul.f32 %v12041_v26, %v16092_v30 }
0x1382   : > { %12046 = vrcp.f32 %v6569_v46 }
0x1383   : > { %6920 = vmatprep.mubr.f32.mxu0 %v6682_v14 }
0x1384   : > { %v12043_v3 = vpop.eup %12042  ;;  %6921 = vmatmul.mubr.f32.gmra.mrb[132].mxu0 %v6681_v5 }
0x1385   : > { %v6572_v16 = vpop.xlane.xlu1 %6571  ;;  %v6684_v13 = vmul.f32 %v12043_v3, %v16104_v25  ;;  %v6683_v37 = vmul.f32 %v12043_v3, %v16100_v22 }
0x1386   : > { %12048 = vrcp.f32 %v6572_v16 }
0x1387   : > { %6925 = vmatprep.mubr.f32.mxu0 %v6684_v13 }
0x1388   : > { %v12045_v62 = vpop.eup %12044  ;;  %6926 = vmatmul.mubr.f32.gmra.mrb[134].mxu0 %v6683_v37 }
0x1389   : > { %v6575_v59 = vpop.xlane.xlu1 %6574  ;;  %v6686_v8 = vmul.f32 %v12045_v62, %v16116_v28  ;;  %v6685_v21 = vmul.f32 %v12045_v62, %v16112_v17 }
0x138a   : > { %12050 = vrcp.f32 %v6575_v59 }
0x138b   : > { %6930 = vmatprep.mubr.f32.mxu0 %v6686_v8 }
0x138c   : > { %v12047_v30 = vpop.eup %12046  ;;  %6931 = vmatmul.mubr.f32.gmra.mrb[136].mxu0 %v6685_v21 }
0x138d   : > { %v6578_v63 = vpop.xlane.xlu1 %6577  ;;  %v6688_v38 = vmul.f32 %v12047_v30, %v16124_v29  ;;  %v6687_v25 = vmul.f32 %v12047_v30, %v16120_v55 }
0x138e   : > { %12052 = vrcp.f32 %v6578_v63 }
0x138f   : > { %6935 = vmatprep.mubr.f32.mxu0 %v6688_v38 }
0x1390   : > { %v12049_v22 = vpop.eup %12048  ;;  %6936 = vmatmul.mubr.f32.gmra.mrb[138].mxu0 %v6687_v25 }
0x1391   : > { %v6581_v33 = vpop.xlane.xlu1 %6580  ;;  %v6690_v49 = vmul.f32 %v12049_v22, %v16131_v19  ;;  %v6689_v28 = vmul.f32 %v12049_v22, %v16127_v56 }
0x1392   : > { %12054 = vrcp.f32 %v6581_v33 }
0x1393   : > { %6940 = vmatprep.mubr.f32.mxu0 %v6690_v49 }
0x1394   : > { %v12051_v17 = vpop.eup %12050  ;;  %6941 = vmatmul.mubr.f32.gmra.mrb[140].mxu0 %v6689_v28 }
0x1395   : > { %v6584_v26 = vpop.xlane.xlu0 %6583  ;;  %v6692_v46 = vmul.f32 %v12051_v17, %v16140_v42  ;;  %v6691_v29 = vmul.f32 %v12051_v17, %v16134_v20 }
0x1396   : > { %12056 = vrcp.f32 %v6584_v26 }
0x1397   : > { %6945 = vmatprep.mubr.f32.mxu0 %v6692_v46 }
0x1398   : > { %v12053_v55 = vpop.eup %12052  ;;  %6946 = vmatmul.mubr.f32.gmra.mrb[142].mxu0 %v6691_v29 }
0x1399   : > { %v6590_v14 = vpop.xlane.xlu0 %6589  ;;  %v6587_v5 = vpop.xlane.xlu1 %6586  ;;  %v6694_v3 = vmul.f32 %v12053_v55, %v16150_v54  ;;  %v6693_v19 = vmul.f32 %v12053_v55, %v16144_v10  ;;  %v17822_v55 = vld [vmem:[#allocation23_spill] sm:$0xff] }
0x139a   : > { %12058 = vrcp.f32 %v6590_v14 }
0x139b   : > { %12060 = vrcp.f32 %v6587_v5  ;;  %6950 = vmatprep.mubr.f32.mxu0 %v6694_v3 }
0x139c   : > { %v12055_v56 = vpop.eup %12054  ;;  %6951 = vmatmul.mubr.f32.gmra.mrb[144].mxu0 %v6693_v19  ;;  %v17824_v19 = vld [vmem:[#allocation10_spill] sm:$0xff] }
0x139d   : > { %v6593_v16 = vpop.xlane.xlu1 %6592  ;;  %v6696_v42 = vmul.f32 %v12055_v56, %v16160_v40  ;;  %v6695_v20 = vmul.f32 %v12055_v56, %v16154_v44 }
0x139e   : > { %12062 = vrcp.f32 %v6593_v16 }
0x139f   : > { %6955 = vmatprep.mubr.f32.mxu0 %v6696_v42 }
0x13a0   : > { %v12057_v13 = vpop.eup %12056  ;;  %6956 = vmatmul.mubr.f32.gmra.mrb[146].mxu0 %v6695_v20 }
0x13a1   : > { %v6596_v37 = vpop.xlane.xlu0 %6595  ;;  %v6698_v62 = vmul.f32 %v12057_v13, %v16170_v60  ;;  %v6697_v54 = vmul.f32 %v12057_v13, %v16168_v15  ;;  %v6599_v59 = vpop.xlane.xlu1 %6598 }
0x13a2   : > { %12064 = vrcp.f32 %v6596_v37 }
0x13a3   : > { %6960 = vmatprep.mubr.f32.mxu0 %v6698_v62  ;;  %12066 = vrcp.f32 %v6599_v59 }
0x13a4   : > { %v12059_v10 = vpop.eup %12058  ;;  %6961 = vmatmul.mubr.f32.gmra.mrb[148].mxu0 %v6697_v54 }
0x13a5   : > { %v12061_v8 = vpop.eup %12060  ;;  %v6602_v44 = vpop.xlane.xlu0 %6601  ;;  %v6702_v30 = vmul.f32 %v12059_v10, %v16172_v39  ;;  %v6701_v15 = vmul.f32 %v12059_v10, %v16166_v6 }
0x13a6   : > { %v6700_v21 = vmul.f32 %v12061_v8, %v16180_v43  ;;  %v6699_v40 = vmul.f32 %v12061_v8, %v16178_v51  ;;  %12068 = vrcp.f32 %v6602_v44 }
0x13a8   : > { %6965 = vmatprep.mubr.f32.mxu0 %v6700_v21  ;;  %v12063_v63 = vpop.eup %12062 }
0x13a9   : > { %6966 = vmatmul.mubr.f32.gmra.mrb[150].mxu0 %v6699_v40  ;;  %v6605_v60 = vpop.xlane.xlu1 %6604  ;;  %v6704_v38 = vmul.f32 %v12063_v63, %v16192_v57  ;;  %v6703_v51 = vmul.f32 %v12063_v63, %v16190_v52 }
0x13aa   : > { %6970 = vmatprep.mubr.f32.mxu0 %v6702_v30  ;;  %12070 = vrcp.f32 %v6605_v60 }
0x13ac   : > { %v12065_v25 = vpop.eup %12064 }
0x13ad   : > { %6971 = vmatmul.mubr.f32.gmra.mrb[152].mxu0 %v6701_v15  ;;  %v6608_v43 = vpop.xlane.xlu0 %6607  ;;  %v6706_v22 = vmul.f32 %v12065_v25, %v16202_v12  ;;  %v12067_v33 = vpop.eup %12066  ;;  %v6705_v39 = vmul.f32 %v12065_v25, %v16200_v31  ;;  %v17825_v25 = vld [vmem:[#allocation9_spill] sm:$0xff] }
0x13ae   : > { %6975 = vmatprep.mubr.f32.mxu0 %v6704_v38  ;;  %12072 = vrcp.f32 %v6608_v43  ;;  %v6708_v6 = vmul.f32 %v12067_v33, %v16194_v1  ;;  %v6707_v57 = vmul.f32 %v12067_v33, %v16188_v34  ;;  %v17821_v1 = vld [vmem:[#allocation24_spill] sm:$0xff] }
0x13b0   : > { %v12069_v28 = vpop.eup %12068 }
0x13b1   : > { %6976 = vmatmul.mubr.f32.gmra.mrb[154].mxu0 %v6703_v51  ;;  %v6611_v49 = vpop.xlane.xlu1 %6610  ;;  %v6710_v52 = vmul.f32 %v12069_v28, %v16212_v50  ;;  %v6709_v12 = vmul.f32 %v12069_v28, %v16210_v11  ;;  %v17823_v50 = vld [vmem:[#allocation19_spill] sm:$0xff] }
0x13b2   : > { %6980 = vmatprep.mubr.f32.mxu0 %v6706_v22  ;;  %12074 = vrcp.f32 %v6611_v49  ;;  %v17826_v22 = vmov 0.0  }
0x13b4   : > { %v12071_v17 = vpop.eup %12070 }
0x13b5   : > { %6981 = vmatmul.mubr.f32.gmra.mrb[156].mxu0 %v6705_v39  ;;  %v6712_v26 = vmul.f32 %v12071_v17, %v16218_v2  ;;  %v6711_v29 = vmul.f32 %v12071_v17, %v17821_v1 }
0x13b6   : > { %6985 = vmatprep.mubr.f32.mxu0 %v6708_v6 }
0x13b8   : > { %v12073_v46 = vpop.eup %12072 }
0x13b9   : > { %6986 = vmatmul.mubr.f32.gmra.mrb[158].mxu0 %v6707_v57  ;;  %v6714_v14 = vmul.f32 %v12073_v46, %v17822_v55  ;;  %v6713_v3 = vmul.f32 %v12073_v46, %v17823_v50 }
0x13ba   : > { %6990 = vmatprep.mubr.f32.mxu0 %v6710_v52 }
0x13bc   : > { %v12075_v5 = vpop.eup %12074 }
0x13bd   : > { %6991 = vmatmul.mubr.f32.gmra.mrb[160].mxu0 %v6709_v12  ;;  %v6716_v11 = vmul.f32 %v12075_v5, %v16232_v7  ;;  %v6715_v56 = vmul.f32 %v12075_v5, %v17824_v19 }
0x13be   : > { %6995 = vmatprep.mubr.f32.mxu0 %v6712_v26  ;;  %v6614_v31 = vpop.xlane.xlu0 %6613 }
0x13bf   : > { %12076 = vrcp.f32 %v6614_v31 }
0x13c1   : > { %6996 = vmatmul.mubr.f32.gmra.mrb[162].mxu0 %v6711_v29 }
0x13c2   : > { %7000 = vmatprep.mubr.f32.mxu0 %v6714_v14  ;;  %v6617_v34 = vpop.xlane.xlu1 %6616 }
0x13c3   : > { %12078 = vrcp.f32 %v6617_v34 }
0x13c5   : > { %7001 = vmatmul.mubr.f32.gmra.mrb[164].mxu0 %v6713_v3 }
0x13c6   : > { %7005 = vmatprep.mubr.f32.mxu0 %v6716_v11  ;;  %v6620_v2 = vpop.xlane.xlu0 %6619 }
0x13c7   : > { %12080 = vrcp.f32 %v6620_v2 }
0x13c9   : > { %v12077_v16 = vpop.eup %12076  ;;  %7006 = vmatmul.mubr.f32.gmra.mrb[166].mxu0 %v6715_v56 }
0x13ca   : > { %v6623_v42 = vpop.xlane.xlu1 %6622  ;;  %v6718_v20 = vmul.f32 %v12077_v16, %v16245_v36  ;;  %v6717_v13 = vmul.f32 %v12077_v16, %v16243_v41 }
0x13cb   : > { %12082 = vrcp.f32 %v6623_v42 }
0x13cc   : > { %7010 = vmatprep.mubr.f32.mxu0 %v6718_v20 }
0x13cd   : > { %v12079_v37 = vpop.eup %12078  ;;  %7011 = vmatmul.mubr.f32.gmra.mrb[168].mxu0 %v6717_v13 }
0x13ce   : > { %v6626_v62 = vpop.xlane.xlu0 %6625  ;;  %v6720_v7 = vmul.f32 %v12079_v37, %v16254_v47  ;;  %v6719_v54 = vmul.f32 %v12079_v37, %v16252_v24 }
0x13cf   : > { %12084 = vrcp.f32 %v6626_v62 }
0x13d0   : > { %7015 = vmatprep.mubr.f32.mxu0 %v6720_v7 }
0x13d1   : > { %v12081_v10 = vpop.eup %12080  ;;  %7016 = vmatmul.mubr.f32.gmra.mrb[170].mxu0 %v6719_v54 }
0x13d2   : > { %v6629_v59 = vpop.xlane.xlu1 %6628  ;;  %v6722_v8 = vmul.f32 %v12081_v10, %v16263_v32  ;;  %v6721_v36 = vmul.f32 %v12081_v10, %v16261_v18 }
0x13d3   : > { %12086 = vrcp.f32 %v6629_v59 }
0x13d4   : > { %7020 = vmatprep.mubr.f32.mxu0 %v6722_v8 }
0x13d5   : > { %v12083_v41 = vpop.eup %12082  ;;  %7021 = vmatmul.mubr.f32.gmra.mrb[172].mxu0 %v6721_v36 }
0x13d6   : > { %v6632_v21 = vpop.xlane.xlu0 %6631  ;;  %v6635_v40 = vpop.xlane.xlu1 %6634  ;;  %v6724_v44 = vmul.f32 %v12083_v41, %v16272_v35  ;;  %v6723_v47 = vmul.f32 %v12083_v41, %v16270_v9 }
0x13d7   : > { %12088 = vrcp.f32 %v6632_v21 }
0x13d8   : > { %12090 = vrcp.f32 %v6635_v40  ;;  %7025 = vmatprep.mubr.f32.mxu0 %v6724_v44 }
0x13d9   : > { %v12085_v24 = vpop.eup %12084  ;;  %7026 = vmatmul.mubr.f32.gmra.mrb[174].mxu0 %v6723_v47 }
0x13da   : > { %v6638_v30 = vpop.xlane.xlu0 %6637  ;;  %v6726_v32 = vmul.f32 %v12085_v24, %v16280_v0  ;;  %v6725_v18 = vmul.f32 %v12085_v24, %v16278_v61 }
0x13db   : > { %12092 = vrcp.f32 %v6638_v30 }
0x13dc   : > { %7030 = vmatprep.mubr.f32.mxu0 %v6726_v32 }
0x13dd   : > { %v12087_v63 = vpop.eup %12086  ;;  %7031 = vmatmul.mubr.f32.gmra.mrb[176].mxu0 %v6725_v18 }
0x13de   : > { %v6728_v15 = vmul.f32 %v12087_v63, %v16290_v45  ;;  %v6727_v35 = vmul.f32 %v12087_v63, %v16288_v4 }
0x13e0   : > { %7035 = vmatprep.mubr.f32.mxu0 %v6728_v15 }
0x13e1   : > { %v12089_v9 = vpop.eup %12088  ;;  %7036 = vmatmul.mubr.f32.gmra.mrb[178].mxu0 %v6727_v35 }
0x13e2   : > { %v12091_v60 = vpop.eup %12090  ;;  %v6730_v38 = vmul.f32 %v12089_v9, %v16300_v58  ;;  %v6729_v51 = vmul.f32 %v12089_v9, %v17825_v25 }
0x13e3   : > { %v6732_v0 = vmul.f32 %v12091_v60, %v16284_v27  ;;  %v6731_v43 = vmul.f32 %v12091_v60, %v16276_v53 }
0x13e4   : > { %7040 = vmatprep.mubr.f32.mxu0 %v6730_v38 }
0x13e5   : > { %v12093_v61 = vpop.eup %12092  ;;  %7041 = vmatmul.mubr.f32.gmra.mrb[180].mxu0 %v6729_v51 }
0x13e6   : > { %7045 = vmatprep.mubr.f32.mxu0 %v6732_v0  ;;  %v6734_v45 = vmul.f32 %v12093_v61, %v16306_v48  ;;  %v6733_v4 = vmul.f32 %v12093_v61, %v16294_v23 }
0x13e9   : > { %7046 = vmatmul.mubr.f32.gmra.mrb[182].mxu0 %v6731_v43 }
0x13ea   : > { %7050 = vmatprep.mubr.f32.mxu0 %v6734_v45 }
0x13ed   : > { %7051 = vmatmul.mubr.f32.gmra.mrb[184].mxu0 %v6733_v4 }
0x13ee   : > { %7664 = vmatprep.mubr.f32.mxu0 %v17826_v22 }
0x1416   : > { %v6897_v58 = vpop.f32.mrb[122].mxu0 }
0x1417   : > { %v6899_v33 = vpop.f32.mrb[123].mxu0  ;;  %10149 = vmatprep.mubr.msk.f32.mxu1 %vm17827_vm7, %v6897_v58  ;;  %vm17835_vm7 = vmmov %vm17675_vm0 }
0x141a   : > { %v6902_v39 = vpop.f32.mrb[124].mxu0 }
0x141b   : > { %v6904_v27 = vpop.f32.mrb[125].mxu0  ;;  %10150 = vmatmul.mubr.msk.f32.vlgmr.msra.gmra.mrb[222].mxu1 %vm17828_vm2, %v6902_v39  ;;  %vm17836_vm2 = vmmov %vm17675_vm0 }
0x141e   : > { %v6907_v49 = vpop.f32.mrb[126].mxu0 }
0x141f   : > { %v6909_v6 = vpop.f32.mrb[127].mxu0  ;;  %10152 = vmatprep.mubr.msk.f32.mxu1 %vm17829_vm1, %v6907_v49  ;;  %vm17837_vm1 = vmmov %vm17675_vm0 }
0x1420   : > { %v8955_v6 = vld [vmem:[%s17407_s5 + $0x108] sm:$0xff] }
0x1422   : > { %v6912_v53 = vpop.f32.mrb[128].mxu0 }
0x1423   : > { %v6914_v48 = vpop.f32.mrb[129].mxu0  ;;  %10153 = vmatmul.mubr.msk.f32.gmra.mrb[224].mxu1 %vm17830_vm14, %v6912_v53  ;;  %vm17838_vm14 = vmmov %vm17675_vm0  ;;  %v8959_v53 = vld [vmem:[%s17407_s5 + $0x128] sm:$0xff] }
0x1424   : > { %v10997_v48 = vpack.c.bf16 %v8959_v53, %v8955_v6  ;;  %v8991_v6 = vld [vmem:[%s17409_s7 + $0x800] sm:$0xff] }
0x1425   : > { %v8995_v53 = vld [vmem:[%s17409_s7 + $0x820] sm:$0xff] }
0x1426   : > { %10998 = vmatprep.subr.bf16.mxu0 %v10997_v48  ;;  %v11031_v48 = vpack.c.bf16 %v8995_v53, %v8991_v6  ;;  %v9071_v53 = vld [vmem:[%s17409_s7 + $0xa80] sm:$0xff] }
0x1453   : > { %v6917_v23 = vpop.f32.mrb[130].mxu0 }
0x1454   : > { %v6919_v28 = vpop.f32.mrb[131].mxu0  ;;  %10155 = vmatprep.mubr.msk.f32.mxu1 %vm17675_vm0, %v6917_v23  ;;  %v8954_v23 = vld [vmem:[%s17407_s5 + $0x100] sm:$0xff] }
0x1455   : > { %v8958_v28 = vld [vmem:[%s17407_s5 + $0x120] sm:$0xff] }
0x1457   : > { %v6922_v57 = vpop.f32.mrb[132].mxu0 }
0x1458   : > { %v6924_v52 = vpop.f32.mrb[133].mxu0  ;;  %10156 = vmatmul.mubr.msk.f32.gmra.mrb[226].mxu1 %vm17831_vm3, %v6922_v57  ;;  %vm17839_vm3 = vmmov %vm17675_vm0  ;;  %v10999_v57 = vpack.c.bf16 %v8958_v28, %v8954_v23  ;;  %v9000_v23 = vld [vmem:[%s17409_s7 + $0x848] sm:$0xff] }
0x1459   : > { %v9004_v28 = vld [vmem:[%s17409_s7 + $0x868] sm:$0xff] }
0x145a   : > { %11000 = vmatpush1.bf16.msra.mxu0 %v10999_v57  ;;  %v11033_v57 = vpack.c.bf16 %v9004_v28, %v9000_v23  ;;  %v9080_v23 = vld [vmem:[%s17409_s7 + $0xac8] sm:$0xff] }
0x145b   : > { %v6927_v17 = vpop.f32.mrb[134].mxu0  ;;  %v9084_v28 = vld [vmem:[%s17409_s7 + $0xae8] sm:$0xff] }
0x145c   : > { %v6929_v12 = vpop.f32.mrb[135].mxu0  ;;  %10158 = vmatprep.mubr.msk.f32.mxu1 %vm17832_vm4, %v6927_v17  ;;  %vm17840_vm4 = vmmov %vm17675_vm0 }
0x145d   : > { %v8963_v12 = vld [vmem:[%s17407_s5 + $0x148] sm:$0xff] }
0x145f   : > { %v6932_v26 = vpop.f32.mrb[136].mxu0 }
0x1460   : > { %v6934_v46 = vpop.f32.mrb[137].mxu0  ;;  %10159 = vmatmul.mubr.msk.f32.gmra.mrb[228].mxu1 %vm17833_vm5, %v6932_v26  ;;  %vm17841_vm5 = vmmov %vm17675_vm0  ;;  %v8967_v26 = vld [vmem:[%s17407_s5 + $0x168] sm:$0xff] }
0x1461   : > { %v8962_v46 = vld [vmem:[%s17407_s5 + $0x140] sm:$0xff] }
0x1463   : > { %v6937_v31 = vpop.f32.mrb[138].mxu0 }
0x1464   : > { %v6939_v1 = vpop.f32.mrb[139].mxu0  ;;  %10161 = vmatprep.mubr.msk.f32.mxu1 %vm17834_vm6, %v6937_v31  ;;  %vm17842_vm6 = vmmov %vm17675_vm0 }
0x1465   : > { %v11001_v1 = vpack.c.bf16 %v8967_v26, %v8963_v12  ;;  %v9008_v26 = vld [vmem:[%s17409_s7 + $0x888] sm:$0xff] }
0x1467   : > { %v6942_v29 = vpop.f32.mrb[140].mxu0  ;;  %11002 = vmatprep.subr.bf16.mxu0 %v11001_v1  ;;  %v9007_v1 = vld [vmem:[%s17409_s7 + $0x880] sm:$0xff] }
0x1468   : > { %v6944_v55 = vpop.f32.mrb[141].mxu0  ;;  %10162 = vmatmul.mubr.msk.f32.gmra.mrb[230].mxu1 %vm17835_vm7, %v6942_v29  ;;  %vm17843_vm7 = vmmov %vm17675_vm0  ;;  %v8966_v29 = vld [vmem:[%s17407_s5 + $0x160] sm:$0xff] }
0x146b   : > { %v6947_v14 = vpop.f32.mrb[142].mxu0 }
0x146c   : > { %v6949_v5 = vpop.f32.mrb[143].mxu0  ;;  %10164 = vmatprep.mubr.msk.f32.mxu1 %vm17836_vm2, %v6947_v14  ;;  %vm17844_vm2 = vmmov %vm17675_vm0  ;;  %v11003_v14 = vpack.c.bf16 %v8966_v29, %v8962_v46  ;;  %v9012_v46 = vld [vmem:[%s17409_s7 + $0x8a8] sm:$0xff] }
0x146e   : > { %11004 = vmatpush1.bf16.msra.mxu0 %v11003_v14 }
0x146f   : > { %v6952_v34 = vpop.f32.mrb[144].mxu0 }
0x1470   : > { %v6954_v50 = vpop.f32.mrb[145].mxu0  ;;  %10165 = vmatmul.mubr.msk.f32.gmra.mrb[232].mxu1 %vm17837_vm1, %v6952_v34  ;;  %vm17845_vm1 = vmmov %vm17675_vm0 }
0x1473   : > { %v6957_v3 = vpop.f32.mrb[146].mxu0 }
0x1474   : > { %v6959_v11 = vpop.f32.mrb[147].mxu0  ;;  %10167 = vmatprep.mubr.msk.f32.mxu1 %vm17838_vm14, %v6957_v3  ;;  %vm17846_vm14 = vmmov %vm17675_vm0 }
0x1477   : > { %v6962_v2 = vpop.f32.mrb[148].mxu0 }
0x1478   : > { %v6964_v19 = vpop.f32.mrb[149].mxu0  ;;  %10168 = vmatmul.mubr.msk.f32.gmra.mrb[234].mxu1 %vm17675_vm0, %v6962_v2 }
0x1479   : > { %v8971_v19 = vld [vmem:[%s17407_s5 + $0x188] sm:$0xff] }
0x147c   : > { %v6967_v56 = vpop.f32.mrb[150].mxu0 }
0x147d   : > { %v6969_v16 = vpop.f32.mrb[151].mxu0  ;;  %10170 = vmatprep.mubr.msk.f32.mxu1 %vm17839_vm3, %v6967_v56  ;;  %vm17847_vm3 = vmmov %vm17675_vm0  ;;  %v8975_v56 = vld [vmem:[%s17407_s5 + $0x1a8] sm:$0xff] }
0x147e   : > { %v8970_v16 = vld [vmem:[%s17407_s5 + $0x180] sm:$0xff] }
0x1480   : > { %v6972_v42 = vpop.f32.mrb[152].mxu0 }
0x1481   : > { %v6974_v20 = vpop.f32.mrb[153].mxu0  ;;  %10171 = vmatmul.mubr.msk.f32.gmra.mrb[236].mxu1 %vm17840_vm4, %v6972_v42  ;;  %vm17848_vm4 = vmmov %vm17675_vm0  ;;  %v11005_v42 = vpack.c.bf16 %v8975_v56, %v8971_v19  ;;  %v9028_v19 = vld [vmem:[%s17409_s7 + $0x928] sm:$0xff] }
0x1482   : > { %v8974_v20 = vld [vmem:[%s17407_s5 + $0x1a0] sm:$0xff] }
0x1483   : > { %11006 = vmatprep.subr.bf16.mxu0 %v11005_v42  ;;  %v9023_v42 = vld [vmem:[%s17409_s7 + $0x900] sm:$0xff] }
0x1484   : > { %v6977_v13 = vpop.f32.mrb[154].mxu0 }
0x1485   : > { %v6979_v37 = vpop.f32.mrb[155].mxu0  ;;  %10173 = vmatprep.mubr.msk.f32.mxu1 %vm17841_vm5, %v6977_v13  ;;  %vm17849_vm5 = vmmov %vm17675_vm0  ;;  %v11007_v13 = vpack.c.bf16 %v8974_v20, %v8970_v16  ;;  %v9027_v20 = vld [vmem:[%s17409_s7 + $0x920] sm:$0xff] }
0x1487   : > { %11008 = vmatpush1.bf16.msra.mxu0 %v11007_v13  ;;  %v9032_v13 = vld [vmem:[%s17409_s7 + $0x948] sm:$0xff] }
0x1488   : > { %v6982_v62 = vpop.f32.mrb[156].mxu0 }
0x1489   : > { %v6984_v7 = vpop.f32.mrb[157].mxu0  ;;  %10174 = vmatmul.mubr.msk.f32.gmra.mrb[238].mxu1 %vm17842_vm6, %v6982_v62  ;;  %vm17850_vm6 = vmmov %vm17675_vm0 }
0x148c   : > { %v6987_v54 = vpop.f32.mrb[158].mxu0 }
0x148d   : > { %v6989_v10 = vpop.f32.mrb[159].mxu0  ;;  %10176 = vmatprep.mubr.msk.f32.mxu1 %vm17843_vm7, %v6987_v54  ;;  %vm17851_vm7 = vmmov %vm17675_vm0 }
0x1490   : > { %v6992_v59 = vpop.f32.mrb[160].mxu0 }
0x1491   : > { %v6994_v8 = vpop.f32.mrb[161].mxu0  ;;  %10177 = vmatmul.mubr.msk.f32.gmra.mrb[240].mxu1 %vm17844_vm2, %v6992_v59  ;;  %vm17852_vm2 = vmmov %vm17675_vm0 }
0x1494   : > { %v6997_v36 = vpop.f32.mrb[162].mxu0 }
0x1495   : > { %v6999_v41 = vpop.f32.mrb[163].mxu0  ;;  %10179 = vmatprep.mubr.msk.f32.mxu1 %vm17845_vm1, %v6997_v36  ;;  %vm17853_vm1 = vmmov %vm17675_vm0 }
0x1498   : > { %v7002_v21 = vpop.f32.mrb[164].mxu0 }
0x1499   : > { %v7004_v40 = vpop.f32.mrb[165].mxu0  ;;  %10180 = vmatmul.mubr.msk.f32.gmra.mrb[242].mxu1 %vm17846_vm14, %v7002_v21  ;;  %vm17854_vm14 = vmmov %vm17675_vm0  ;;  %v8979_v21 = vld [vmem:[%s17407_s5 + $0x1c8] sm:$0xff] }
0x149a   : > { %v8983_v40 = vld [vmem:[%s17407_s5 + $0x1e8] sm:$0xff] }
0x149c   : > { %v7007_v44 = vpop.f32.mrb[166].mxu0 }
0x149d   : > { %v7009_v47 = vpop.f32.mrb[167].mxu0  ;;  %10182 = vmatprep.mubr.msk.f32.mxu1 %vm17675_vm0, %v7007_v44  ;;  %v8978_v44 = vld [vmem:[%s17407_s5 + $0x1c0] sm:$0xff] }
0x149e   : > { %v11009_v47 = vpack.c.bf16 %v8983_v40, %v8979_v21  ;;  %v9039_v40 = vld [vmem:[%s17409_s7 + $0x980] sm:$0xff] }
0x14a0   : > { %v7012_v24 = vpop.f32.mrb[168].mxu0  ;;  %11010 = vmatprep.subr.bf16.mxu0 %v11009_v47  ;;  %v9048_v47 = vld [vmem:[%s17409_s7 + $0x9c8] sm:$0xff] }
0x14a1   : > { %v7014_v30 = vpop.f32.mrb[169].mxu0  ;;  %10183 = vmatmul.mubr.msk.f32.gmra.mrb[244].mxu1 %vm17847_vm3, %v7012_v24  ;;  %vm17855_vm3 = vmmov %vm17675_vm0  ;;  %v8982_v24 = vld [vmem:[%s17407_s5 + $0x1e0] sm:$0xff] }
0x14a2   : > { %v11011_v30 = vpack.c.bf16 %v8982_v24, %v8978_v44  ;;  %v9043_v44 = vld [vmem:[%s17409_s7 + $0x9a0] sm:$0xff]  ;;  %v9052_v24 = vld [vmem:[%s17409_s7 + $0x9e8] sm:$0xff] }
0x14a4   : > { %v7017_v32 = vpop.f32.mrb[170].mxu0  ;;  %11012 = vmatpush1.bf16.msra.mxu0 %v11011_v30 }
0x14a5   : > { %v7019_v18 = vpop.f32.mrb[171].mxu0  ;;  %10185 = vmatprep.mubr.msk.f32.mxu1 %vm17848_vm4, %v7017_v32  ;;  %vm17856_vm4 = vmmov %vm17675_vm0 }
0x14a8   : > { %v7022_v63 = vpop.f32.mrb[172].mxu0 }
0x14a9   : > { %v7024_v15 = vpop.f32.mrb[173].mxu0  ;;  %10186 = vmatmul.mubr.msk.f32.gmra.mrb[246].mxu1 %vm17849_vm5, %v7022_v63  ;;  %vm17866_vm5 = vcmask 261344  }
0x14ac   : > { %v7027_v35 = vpop.f32.mrb[174].mxu0 }
0x14ad   : > { %v7029_v9 = vpop.f32.mrb[175].mxu0  ;;  %10188 = vmatprep.mubr.msk.f32.mxu1 %vm17850_vm6, %v7027_v35  ;;  %vm17867_vm6 = vcmask 326944  }
0x14b0   : > { %v7032_v60 = vpop.f32.mrb[176].mxu0 }
0x14b1   : > { %v7034_v38 = vpop.f32.mrb[177].mxu0  ;;  %10189 = vmatmul.mubr.msk.f32.gmra.mrb[248].mxu1 %vm17851_vm7, %v7032_v60  ;;  %vm17868_vm7 = vcmask 359744  }
0x14b4   : > { %v7037_v25 = vpop.f32.mrb[178].mxu0 }
0x14b5   : > { %v7039_v51 = vpop.f32.mrb[179].mxu0  ;;  %10191 = vmatprep.mubr.msk.f32.mxu1 %vm17852_vm2, %v7037_v25  ;;  %vm17869_vm2 = vcmask 392544  }
0x14b8   : > { %v7042_v0 = vpop.f32.mrb[180].mxu0 }
0x14b9   : > { %v7044_v61 = vpop.f32.mrb[181].mxu0  ;;  %10192 = vmatmul.mubr.msk.f32.gmra.mrb[250].mxu1 %vm17853_vm1, %v7042_v0  ;;  %vm17870_vm1 = vcmask 425344  }
0x14ba   : > { %v8957_v61 = vld [vmem:[%s17407_s5 + $0x118] sm:$0xff] }
0x14bc   : > { %v7047_v43 = vpop.f32.mrb[182].mxu0 }
0x14bd   : > { %v7049_v45 = vpop.f32.mrb[183].mxu0  ;;  %10194 = vmatprep.mubr.msk.f32.mxu1 %vm17854_vm14, %v7047_v43  ;;  %v8961_v43 = vld [vmem:[%s17407_s5 + $0x138] sm:$0xff]  ;;  %vm17871_vm14 = vcmask 458144  }
0x14be   : > { %v11013_v45 = vpack.c.bf16 %v8961_v43, %v8957_v61  ;;  %v9068_v61 = vld [vmem:[%s17409_s7 + $0xa68] sm:$0xff] }
0x14c0   : > { %v7052_v4 = vpop.f32.mrb[184].mxu0  ;;  %11014 = vmatprep.subr.bf16.mxu0 %v11013_v45 }
0x14c1   : > { %v7054_v58 = vpop.f32.mrb[185].mxu0  ;;  %10195 = vmatmul.mubr.msk.f32.gmra.mrb[252].mxu1 %vm17675_vm0, %v7052_v4  ;;  %vm17872_vm0 = vcmask 490944  }
0x14ee   : > { %v10151_v33 = vpop.f32.mrb[222].mxu1 }
0x14ef   : > { %7383 = vst.msk [vmem:[#allocation5 + $0x8] sm:$0xff] %vm17855_vm3, %v10151_v33  ;;  %v7223_v39 = vpop.f32.mrb[223].mxu1  ;;  %vm17873_vm3 = vcmask 523744  }
0x14f0   : > { %7382 = vst.msk [vmem:[#allocation5] sm:$0xff] %vm17856_vm4, %v7223_v39  ;;  %v8992_v39 = vld [vmem:[%s17409_s7 + $0x808] sm:$0xff]  ;;  %vm17882_vm4 = vmmov %vm17872_vm0 }
0x14f6   : > { %v16410_v27 = vpop.f32.mrb[224].mxu1 }
0x14f7   : > { %v7233_v49 = vpop.f32.mrb[225].mxu1 }
0x14f8   : > { %7386 = vrot.lane.b32.xlu1 %v7233_v49, %s17633_s28 }
0x152b   : > { %v16425_v52 = vpop.f32.mrb[226].mxu1 }
0x152c   : > { %v7243_v17 = vpop.f32.mrb[227].mxu1 }
0x152d   : > { %7396 = vrot.lane.b32.xlu0 %v7243_v17, %s17857_s24  ;;  %v9003_v17 = vld [vmem:[%s17409_s7 + $0x860] sm:$0xff] }
0x1533   : > { %v10160_v31 = vpop.f32.mrb[228].mxu1 }
0x1534   : > { %v7253_v55 = vpop.f32.mrb[229].mxu1 }
0x1535   : > { %7406 = vrot.lane.b32.xlu1 %v7253_v55, %s17858_s18  ;;  %v9011_v55 = vld [vmem:[%s17409_s7 + $0x8a0] sm:$0xff] }
0x1536   : > { %v11039_v14 = vpack.c.bf16 %v9011_v55, %v9007_v1  ;;  %v9087_v55 = vld [vmem:[%s17409_s7 + $0xb00] sm:$0xff] }
0x153b   : > { %v10163_v5 = vpop.f32.mrb[230].mxu1 }
0x153c   : > { %v7263_v34 = vpop.f32.mrb[231].mxu1 }
0x153d   : > { %7416 = vrot.lane.b32.xlu1 %v7263_v34, %s17859_s11  ;;  %v9020_v34 = vld [vmem:[%s17409_s7 + $0x8e8] sm:$0xff] }
0x1543   : > { %v10166_v50 = vpop.f32.mrb[232].mxu1 }
0x1544   : > { %v7273_v3 = vpop.f32.mrb[233].mxu1 }
0x1545   : > { %7426 = vrot.lane.b32.xlu0 %v7273_v3, %s17860_s27  ;;  %v9015_v3 = vld [vmem:[%s17409_s7 + $0x8c0] sm:$0xff] }
0x154b   : > { %v10169_v11 = vpop.f32.mrb[234].mxu1 }
0x154c   : > { %v7283_v2 = vpop.f32.mrb[235].mxu1 }
0x154d   : > { %7436 = vrot.lane.b32.xlu1 %v7283_v2, %s17613_s29  ;;  %v9024_v2 = vld [vmem:[%s17409_s7 + $0x908] sm:$0xff] }
0x154e   : > { %v11045_v16 = vpack.c.bf16 %v9028_v19, %v9024_v2  ;;  %v9095_v2 = vld [vmem:[%s17409_s7 + $0xb40] sm:$0xff] }
0x154f   : > { %v9099_v19 = vld [vmem:[%s17409_s7 + $0xb60] sm:$0xff] }
0x1554   : > { %v10172_v37 = vpop.f32.mrb[236].mxu1 }
0x1555   : > { %v7293_v62 = vpop.f32.mrb[237].mxu1 }
0x1556   : > { %7446 = vrot.lane.b32.xlu0 %v7293_v62, %s17861_s17 }
0x155c   : > { %v10175_v7 = vpop.f32.mrb[238].mxu1 }
0x155d   : > { %v7303_v54 = vpop.f32.mrb[239].mxu1 }
0x155e   : > { %7456 = vrot.lane.b32.xlu1 %v7303_v54, %s17614_s21 }
0x1564   : > { %v10178_v10 = vpop.f32.mrb[240].mxu1 }
0x1565   : > { %v7313_v59 = vpop.f32.mrb[241].mxu1 }
0x1566   : > { %7466 = vrot.lane.b32.xlu0 %v7313_v59, %s17862_s25  ;;  %v9035_v59 = vld [vmem:[%s17409_s7 + $0x960] sm:$0xff] }
0x156a   : > { %v7387_v8 = vpop.permute.xlu1 %7386 }
0x156b   : > { %7392 = vst.msk [vmem:[#allocation5] sm:$0xff] %vm3397_vm8, %v7387_v8  ;;  %v9040_v8 = vld [vmem:[%s17409_s7 + $0x988] sm:$0xff] }
0x156c   : > { %v10181_v36 = vpop.f32.mrb[242].mxu1 }
0x156d   : > { %v7323_v41 = vpop.f32.mrb[243].mxu1 }
0x156e   : > { %7476 = vrot.lane.b32.xlu1 %v7323_v41, %s17615_s30 }
0x1574   : > { %v10184_v32 = vpop.f32.mrb[244].mxu1 }
0x1575   : > { %v7333_v18 = vpop.f32.mrb[245].mxu1 }
0x1576   : > { %7486 = vrot.lane.b32.xlu0 %v7333_v18, %s17863_s26  ;;  %v11057_v18 = vpack.c.bf16 %v9052_v24, %v9048_v47  ;;  %v8965_v47 = vld [vmem:[%s17407_s5 + $0x158] sm:$0xff] }
0x1577   : > { %v8969_v24 = vld [vmem:[%s17407_s5 + $0x178] sm:$0xff] }
0x157c   : > { %v10187_v63 = vpop.f32.mrb[246].mxu1 }
0x157d   : > { %v7343_v15 = vpop.f32.mrb[247].mxu1 }
0x157e   : > { %7496 = vrot.lane.b32.xlu1 %v7343_v15, %s17864_s22  ;;  %v9051_v15 = vld [vmem:[%s17409_s7 + $0x9e0] sm:$0xff] }
0x1584   : > { %v10190_v35 = vpop.f32.mrb[248].mxu1 }
0x1585   : > { %v7353_v9 = vpop.f32.mrb[249].mxu1 }
0x1586   : > { %7506 = vrot.lane.b32.xlu0 %v7353_v9, %s17865_s16  ;;  %v9060_v9 = vld [vmem:[%s17409_s7 + $0xa28] sm:$0xff] }
0x158c   : > { %v10193_v60 = vpop.f32.mrb[250].mxu1 }
0x158d   : > { %v7363_v38 = vpop.f32.mrb[251].mxu1 }
0x158e   : > { %7516 = vrot.lane.b32.xlu1 %v7363_v38, %s17637_s19 }
0x1592   : > { %7388 = vrot.lane.b32.xlu1 %v16410_v27, %s17633_s28  ;;  %v8996_v27 = vld [vmem:[%s17409_s7 + $0x828] sm:$0xff] }
0x1593   : > { %v11029_v49 = vpack.c.bf16 %v8996_v27, %v8992_v39  ;;  %v9072_v39 = vld [vmem:[%s17409_s7 + $0xa88] sm:$0xff] }
0x1594   : > { %v10196_v25 = vpop.f32.mrb[252].mxu1  ;;  %v9076_v27 = vld [vmem:[%s17409_s7 + $0xaa8] sm:$0xff] }
0x1595   : > { %v7373_v51 = vpop.f32.mrb[253].mxu1  ;;  %11030 = vmatprep.subr.bf16.mxu1 %v11029_v49  ;;  %v11069_v6 = vpack.c.bf16 %v9076_v27, %v9072_v39  ;;  %v8985_v39 = vld [vmem:[%s17407_s5 + $0x1f8] sm:$0xff] }
0x1596   : > { %7408 = vrot.lane.b32.xlu1 %v10160_v31, %s17858_s18  ;;  %7526 = vrot.lane.b32.xlu0 %v7373_v51, %s17636_s12  ;;  %v11037_v31 = vpack.c.bf16 %v9012_v46, %v9008_v26  ;;  %v9059_v51 = vld [vmem:[%s17409_s7 + $0xa20] sm:$0xff]  ;;  %v9088_v46 = vld [vmem:[%s17409_s7 + $0xb08] sm:$0xff] }
0x1597   : > { %11032 = vmatpush1.bf16.msra.mxu1 %v11031_v48  ;;  %v9075_v48 = vld [vmem:[%s17409_s7 + $0xaa0] sm:$0xff] }
0x1598   : > { %11034 = vmatprep.subr.bf16.mxu1 %v11033_v57  ;;  %v9083_v26 = vld [vmem:[%s17409_s7 + $0xae0] sm:$0xff] }
0x159a   : > { %7428 = vrot.lane.b32.xlu1 %v10166_v50, %s17860_s27  ;;  %7398 = vrot.lane.b32.xlu0 %v16425_v52, %s17857_s24  ;;  %v8999_v52 = vld [vmem:[%s17409_s7 + $0x840] sm:$0xff] }
0x159b   : > { %v11035_v12 = vpack.c.bf16 %v9003_v17, %v8999_v52  ;;  %v11071_v52 = vpack.c.bf16 %v9075_v48, %v9071_v53  ;;  %v11073_v17 = vpack.c.bf16 %v9084_v28, %v9080_v23  ;;  %v8980_v48 = vld [vmem:[%s17407_s5 + $0x1d0] sm:$0xff]  ;;  %v8994_v28 = vld [vmem:[%s17409_s7 + $0x818] sm:$0xff] }
0x159c   : > { %v8984_v23 = vld [vmem:[%s17407_s5 + $0x1f0] sm:$0xff] }
0x159d   : > { %11036 = vmatpush1.bf16.msra.mxu1 %v11035_v12  ;;  %v9079_v12 = vld [vmem:[%s17409_s7 + $0xac0] sm:$0xff] }
0x159e   : > { %7448 = vrot.lane.b32.xlu1 %v10172_v37, %s17861_s17  ;;  %7418 = vrot.lane.b32.xlu0 %v10163_v5, %s17859_s11  ;;  %v9016_v5 = vld [vmem:[%s17409_s7 + $0x8c8] sm:$0xff]  ;;  %v11075_v1 = vpack.c.bf16 %v9083_v26, %v9079_v12 }
0x159f   : > { %v7397_v0 = vpop.permute.xlu0 %7396  ;;  %11038 = vmatprep.subr.bf16.mxu1 %v11037_v31  ;;  %v11041_v50 = vpack.c.bf16 %v9020_v34, %v9016_v5  ;;  %v9036_v37 = vld [vmem:[%s17409_s7 + $0x968] sm:$0xff] }
0x15a0   : > { %7402 = vst.msk [vmem:[#allocation5] sm:$0xff] %vm3408_vm9, %v7397_v0  ;;  %v11049_v54 = vpack.c.bf16 %v9036_v37, %v9032_v13  ;;  %v9064_v0 = vld [vmem:[%s17409_s7 + $0xa48] sm:$0xff]  ;;  %v9103_v13 = vld [vmem:[%s17409_s7 + $0xb80] sm:$0xff] }
0x15a1   : > { %11040 = vmatpush1.bf16.msra.mxu1 %v11039_v14  ;;  %v9092_v31 = vld [vmem:[%s17409_s7 + $0xb28] sm:$0xff]  ;;  %v9091_v14 = vld [vmem:[%s17409_s7 + $0xb20] sm:$0xff] }
0x15a2   : > { %7468 = vrot.lane.b32.xlu1 %v10178_v10, %s17862_s25  ;;  %7438 = vrot.lane.b32.xlu0 %v10169_v11, %s17613_s29  ;;  %v9019_v11 = vld [vmem:[%s17409_s7 + $0x8e0] sm:$0xff]  ;;  %v9096_v5 = vld [vmem:[%s17409_s7 + $0xb48] sm:$0xff] }
0x15a3   : > { %v11043_v56 = vpack.c.bf16 %v9019_v11, %v9015_v3  ;;  %11042 = vmatprep.subr.bf16.mxu1 %v11041_v50  ;;  %v9031_v10 = vld [vmem:[%s17409_s7 + $0x940] sm:$0xff]  ;;  %v9100_v34 = vld [vmem:[%s17409_s7 + $0xb68] sm:$0xff]  ;;  %v11079_v3 = vpack.c.bf16 %v9091_v14, %v9087_v55  ;;  %v17884_v55 = vld [vmem:[#allocation18_spill] sm:$0xff] }
0x15a4   : > { %v11051_v41 = vpack.c.bf16 %v9035_v59, %v9031_v10  ;;  %v11081_v11 = vpack.c.bf16 %v9100_v34, %v9096_v5  ;;  %v9107_v37 = vld [vmem:[%s17409_s7 + $0xba0] sm:$0xff]  ;;  %v8993_v5 = vld [vmem:[%s17409_s7 + $0x810] sm:$0xff] }
0x15a5   : > { %11044 = vmatpush1.bf16.msra.mxu1 %v11043_v56  ;;  %v9104_v56 = vld [vmem:[%s17409_s7 + $0xb88] sm:$0xff]  ;;  %v8997_v34 = vld [vmem:[%s17409_s7 + $0x830] sm:$0xff] }
0x15a6   : > { %7488 = vrot.lane.b32.xlu1 %v10184_v32, %s17863_s26  ;;  %7458 = vrot.lane.b32.xlu0 %v10175_v7, %s17614_s21  ;;  %v11047_v7 = vpack.c.bf16 %v9027_v20, %v9023_v42  ;;  %v11055_v32 = vpack.c.bf16 %v9043_v44, %v9039_v40  ;;  %v11083_v42 = vpack.c.bf16 %v9099_v19, %v9095_v2  ;;  %v8956_v40 = vld [vmem:[%s17407_s5 + $0x110] sm:$0xff] }
0x15a7   : > { %v7407_v4 = vpop.permute.xlu1 %7406  ;;  %11046 = vmatprep.subr.bf16.mxu1 %v11045_v16  ;;  %v9108_v16 = vld [vmem:[%s17409_s7 + $0xba8] sm:$0xff]  ;;  %v8960_v44 = vld [vmem:[%s17407_s5 + $0x130] sm:$0xff] }
0x15a8   : > { %7412 = vst.msk [vmem:[#allocation5] sm:$0xff] %vm3419_vm10, %v7407_v4  ;;  %v11065_v4 = vpack.c.bf16 %v9068_v61, %v9064_v0  ;;  %v11085_v20 = vpack.c.bf16 %v9108_v16, %v9104_v56  ;;  %v9001_v19 = vld [vmem:[%s17409_s7 + $0x850] sm:$0xff]  ;;  %v9010_v16 = vld [vmem:[%s17409_s7 + $0x898] sm:$0xff] }
0x15a9   : > { %11048 = vmatpush1.bf16.msra.mxu1 %v11047_v7  ;;  %v11087_v7 = vpack.c.bf16 %v9107_v37, %v9103_v13  ;;  %v9005_v56 = vld [vmem:[%s17409_s7 + $0x870] sm:$0xff] }
0x15aa   : > { %7508 = vrot.lane.b32.xlu1 %v10190_v35, %s17865_s16  ;;  %7478 = vrot.lane.b32.xlu0 %v10181_v36, %s17615_s30  ;;  %v9044_v36 = vld [vmem:[%s17409_s7 + $0x9a8] sm:$0xff]  ;;  %v9009_v37 = vld [vmem:[%s17409_s7 + $0x890] sm:$0xff]  ;;  %s17892_s30 = sshll.u32 %s17894_s14, 6 }
0x15ab   : > { %11050 = vmatprep.subr.bf16.mxu1 %v11049_v54  ;;  %v11053_v21 = vpack.c.bf16 %v9044_v36, %v9040_v8  ;;  %v9056_v35 = vld [vmem:[%s17409_s7 + $0xa08] sm:$0xff]  ;;  %s372_s17 = scalar_lea.vmem %s17412_s10, %s17892_s30 }
0x15ac   : > { %v11061_v38 = vpack.c.bf16 %v9060_v9, %v9056_v35  ;;  %v11017_v9 = vpack.c.bf16 %v8969_v24, %v8965_v47  ;;  %v9029_v47 = vld [vmem:[%s17409_s7 + $0x930] sm:$0xff]  ;;  %v9034_v24 = vld [vmem:[%s17409_s7 + $0x958] sm:$0xff] }
0x15ad   : > { %11052 = vmatpush1.bf16.msra.mxu1 %v11051_v41 }
0x15ae   : > { %7528 = vrot.lane.b32.xlu1 %v10196_v25, %s17636_s12  ;;  %7498 = vrot.lane.b32.xlu0 %v10187_v63, %s17864_s22  ;;  %v9047_v63 = vld [vmem:[%s17409_s7 + $0x9c0] sm:$0xff] }
0x15af   : > { %v7417_v58 = vpop.permute.xlu1 %7416  ;;  %11054 = vmatprep.subr.bf16.mxu1 %v11053_v21  ;;  %v9055_v25 = vld [vmem:[%s17409_s7 + $0xa00] sm:$0xff] }
0x15b0   : > { %7422 = vst.msk [vmem:[#allocation5] sm:$0xff] %vm3430_vm11, %v7417_v58  ;;  %v11063_v45 = vpack.c.bf16 %v9059_v51, %v9055_v25  ;;  %v9063_v58 = vld [vmem:[%s17409_s7 + $0xa40] sm:$0xff]  ;;  %v8973_v25 = vld [vmem:[%s17407_s5 + $0x198] sm:$0xff] }
0x15b1   : > { %11056 = vmatpush1.bf16.msra.mxu1 %v11055_v32  ;;  %v8977_v51 = vld [vmem:[%s17407_s5 + $0x1b8] sm:$0xff] }
0x15b2   : > { %7518 = vrot.lane.b32.xlu0 %v10193_v60, %s17637_s19  ;;  %v11059_v60 = vpack.c.bf16 %v9051_v15, %v9047_v63  ;;  %11058 = vmatprep.subr.bf16.mxu1 %v11057_v18  ;;  %v11015_v63 = vpack.c.bf16 %v8960_v44, %v8956_v40  ;;  %v17874_v15 = vld [vmem:[#allocation22_spill] sm:$0xff]  ;;  %v9025_v44 = vld [vmem:[%s17409_s7 + $0x910] sm:$0xff] }
0x15b5   : > { %11060 = vmatpush1.bf16.msra.mxu1 %v11059_v60  ;;  %v8964_v60 = vld [vmem:[%s17407_s5 + $0x150] sm:$0xff] }
0x15b6   : > { %11062 = vmatprep.subr.bf16.mxu1 %v11061_v38  ;;  %v8968_v38 = vld [vmem:[%s17407_s5 + $0x170] sm:$0xff] }
0x15b7   : > { %v7427_v33 = vpop.permute.xlu0 %7426 }
0x15b8   : > { %7432 = vst.msk [vmem:[#allocation5] sm:$0xff] %vm3441_vm12, %v7427_v33  ;;  %v9067_v33 = vld [vmem:[%s17409_s7 + $0xa60] sm:$0xff] }
0x15b9   : > { %11064 = vmatpush1.bf16.msra.mxu1 %v11063_v45  ;;  %v11067_v49 = vpack.c.bf16 %v9067_v33, %v9063_v58  ;;  %v11021_v45 = vpack.c.bf16 %v8977_v51, %v8973_v25  ;;  %v8976_v58 = vld [vmem:[%s17407_s5 + $0x1b0] sm:$0xff]  ;;  %v8981_v33 = vld [vmem:[%s17407_s5 + $0x1d8] sm:$0xff] }
0x15ba   : > { %11066 = vmatprep.subr.bf16.mxu1 %v11065_v4  ;;  %v8972_v4 = vld [vmem:[%s17407_s5 + $0x190] sm:$0xff]  ;;  %v11025_v53 = vpack.c.bf16 %v8985_v39, %v8981_v33  ;;  %v9058_v33 = vld [vmem:[%s17409_s7 + $0xa18] sm:$0xff] }
0x15bb   : > { %v9041_v25 = vld [vmem:[%s17409_s7 + $0x990] sm:$0xff]  ;;  %v9062_v39 = vld [vmem:[%s17409_s7 + $0xa38] sm:$0xff] }
0x15bc   : > { %v9045_v51 = vld [vmem:[%s17409_s7 + $0x9b0] sm:$0xff] }
0x15bd   : > { %11068 = vmatpush1.bf16.msra.mxu1 %v11067_v49  ;;  %v11023_v49 = vpack.c.bf16 %v8976_v58, %v8972_v4  ;;  %v9049_v4 = vld [vmem:[%s17409_s7 + $0x9d0] sm:$0xff] }
0x15be   : > { %11070 = vmatprep.subr.bf16.mxu1 %v11069_v6  ;;  %v9053_v58 = vld [vmem:[%s17409_s7 + $0x9f0] sm:$0xff] }
0x15bf   : > { %v7437_v29 = vpop.permute.xlu1 %7436 }
0x15c0   : > { %7442 = vst.msk [vmem:[#allocation5] sm:$0xff] %vm3452_vm13, %v7437_v29  ;;  %v11077_v29 = vpack.c.bf16 %v9092_v31, %v9088_v46 }
0x15c1   : > { %11072 = vmatpush1.bf16.msra.mxu1 %v11071_v52 }
0x15c2   : > { %11074 = vmatprep.subr.bf16.mxu1 %v11073_v17  ;;  %v11027_v17 = vpack.c.bf16 %v8984_v23, %v8980_v48  ;;  %v9066_v48 = vld [vmem:[%s17409_s7 + $0xa58] sm:$0xff] }
0x15c3   : > { %v9070_v23 = vld [vmem:[%s17409_s7 + $0xa78] sm:$0xff] }
0x15c5   : > { %11076 = vmatpush1.bf16.msra.mxu1 %v11075_v1 }
0x15c6   : > { %11078 = vmatprep.subr.bf16.mxu1 %v11077_v29 }
0x15c8   : > { %v7447_v62 = vpop.permute.xlu0 %7446 }
0x15c9   : > { %7452 = vst.msk [vmem:[#allocation5] sm:$0xff] %vm17866_vm5, %v7447_v62  ;;  %11080 = vmatpush1.bf16.msra.mxu1 %v11079_v3  ;;  %v9006_v3 = vld [vmem:[%s17409_s7 + $0x878] sm:$0xff] }
0x15ca   : > { %11082 = vmatprep.subr.bf16.mxu1 %v11081_v11  ;;  %v11159_v11 = vpack.c.bf16 %v8997_v34, %v8993_v5 }
0x15cd   : > { %11084 = vmatpush1.bf16.msra.mxu1 %v11083_v42  ;;  %v9014_v42 = vld [vmem:[%s17409_s7 + $0x8b8] sm:$0xff] }
0x15ce   : > { %11086 = vmatprep.subr.bf16.mxu1 %v11085_v20  ;;  %v11163_v20 = vpack.c.bf16 %v9005_v56, %v9001_v19  ;;  %v11165_v13 = vpack.c.bf16 %v9014_v42, %v9010_v16  ;;  %v9089_v16 = vld [vmem:[%s17409_s7 + $0xb10] sm:$0xff] }
0x15cf   : > { %v9093_v42 = vld [vmem:[%s17409_s7 + $0xb30] sm:$0xff] }
0x15d0   : > { %v7457_v30 = vpop.permute.xlu1 %7456 }
0x15d1   : > { %7462 = vst.msk [vmem:[#allocation5] sm:$0xff] %vm3474_vm15, %v7457_v30  ;;  %11088 = vmatpush1.bf16.msra.mxu1 %v11087_v7  ;;  %v9018_v7 = vld [vmem:[%s17409_s7 + $0x8d8] sm:$0xff] }
0x15d8   : > { %v7467_v43 = vpop.permute.xlu0 %7466 }
0x15d9   : > { %7472 = vst.msk [vmem:[#allocation5] sm:$0xff] %vm17867_vm6, %v7467_v43  ;;  %v11019_v43 = vpack.c.bf16 %v8968_v38, %v8964_v60 }
0x15e0   : > { %v7477_v57 = vpop.permute.xlu1 %7476 }
0x15e1   : > { %7482 = vst.msk [vmem:[#allocation5] sm:$0xff] %vm17868_vm7, %v7477_v57  ;;  %v8998_v57 = vld [vmem:[%s17409_s7 + $0x838] sm:$0xff] }
0x15e2   : > { %v11157_v12 = vpack.c.bf16 %v8998_v57, %v8994_v28  ;;  %v11193_v57 = vpack.c.bf16 %v9070_v23, %v9066_v48  ;;  %v9121_v23 = vld [vmem:[%s17409_s7 + $0xc10] sm:$0xff] }
0x15e8   : > { %v7487_v50 = vpop.permute.xlu0 %7486 }
0x15e9   : > { %7492 = vst.msk [vmem:[#allocation5] sm:$0xff] %vm17869_vm2, %v7487_v50  ;;  %v9002_v50 = vld [vmem:[%s17409_s7 + $0x858] sm:$0xff] }
0x15ea   : > { %v11161_v2 = vpack.c.bf16 %v9006_v3, %v9002_v50  ;;  %v9081_v50 = vld [vmem:[%s17409_s7 + $0xad0] sm:$0xff] }
0x15eb   : > { %v9085_v3 = vld [vmem:[%s17409_s7 + $0xaf0] sm:$0xff] }
0x15ec   : > { %v11203_v19 = vpack.c.bf16 %v9085_v3, %v9081_v50  ;;  %v9129_v50 = vld [vmem:[%s17409_s7 + $0xc50] sm:$0xff] }
0x15ed   : > { %v9133_v3 = vld [vmem:[%s17409_s7 + $0xc70] sm:$0xff] }
0x15f0   : > { %v7497_v62 = vpop.permute.xlu1 %7496 }
0x15f1   : > { %7502 = vst.msk [vmem:[#allocation5] sm:$0xff] %vm17870_vm1, %v7497_v62  ;;  %v9013_v62 = vld [vmem:[%s17409_s7 + $0x8b0] sm:$0xff] }
0x15f8   : > { %v7507_v54 = vpop.permute.xlu0 %7506 }
0x15f9   : > { %7512 = vst.msk [vmem:[#allocation5] sm:$0xff] %vm17871_vm14, %v7507_v54  ;;  %v11167_v54 = vpack.c.bf16 %v9013_v62, %v9009_v37  ;;  %v11207_v37 = vpack.c.bf16 %v9093_v42, %v9089_v16  ;;  %v11227_v42 = vpack.c.bf16 %v9133_v3, %v9129_v50  ;;  %v9169_v3 = vld [vmem:[%s17409_s7 + $0xd90] sm:$0xff] }
0x1600   : > { %v7517_v10 = vpop.permute.xlu1 %7516 }
0x1601   : > { %7522 = vst.msk [vmem:[#allocation5] sm:$0xff] %vm17872_vm0, %v7517_v10 }
0x1604   : > { %v7389_v59 = vpop.permute.xlu1 %7388 }
0x1605   : > { %7393 = vst.msk [vmem:[#allocation5 + $0x8] sm:$0xff] %vm3397_vm8, %v7389_v59  ;;  %vm17875_vm8 = vcmask 523264   ;;  %v9017_v59 = vld [vmem:[%s17409_s7 + $0x8d0] sm:$0xff] }
0x1608   : > { %v7527_v8 = vpop.permute.xlu0 %7526  ;;  %v7409_v36 = vpop.permute.xlu1 %7408 }
0x1609   : > { %7532 = vst.msk [vmem:[#allocation5] sm:$0xff] %vm17873_vm3, %v7527_v8  ;;  %v9021_v8 = vld [vmem:[%s17409_s7 + $0x8f0] sm:$0xff] }
0x160c   : > { %v7399_v41 = vpop.permute.xlu0 %7398  ;;  %v7429_v21 = vpop.permute.xlu1 %7428 }
0x160d   : > { %7403 = vst.msk [vmem:[#allocation5 + $0x8] sm:$0xff] %vm3408_vm9, %v7399_v41  ;;  %vm17876_vm9 = vmmov %vm17866_vm5  ;;  %v9030_v41 = vld [vmem:[%s17409_s7 + $0x938] sm:$0xff] }
0x160e   : > { %7413 = vst.msk [vmem:[#allocation5 + $0x8] sm:$0xff] %vm3419_vm10, %v7409_v36  ;;  %vm17877_vm10 = vmmov %vm17867_vm6  ;;  %v9026_v36 = vld [vmem:[%s17409_s7 + $0x918] sm:$0xff] }
0x160f   : > { %vm17883_vm5 = vmmov %vm17873_vm3  ;;  %v11173_v40 = vpack.c.bf16 %v9030_v41, %v9026_v36  ;;  %v9109_v36 = vld [vmem:[%s17409_s7 + $0xbb0] sm:$0xff] }
0x1610   : > { %v7419_v30 = vpop.permute.xlu0 %7418  ;;  %v7449_v32 = vpop.permute.xlu1 %7448  ;;  %v7534_v18 = vld [vmem:[#allocation5] sm:$0xff]  ;;  %vm17885_vm6 = vmmov %vm17875_vm8 }
0x1611   : > { %7423 = vst.msk [vmem:[#allocation5 + $0x8] sm:$0xff] %vm3430_vm11, %v7419_v30  ;;  %v16712_v35 = vadd.f32 %v7534_v18, %v17874_v15  ;;  %vm17878_vm11 = vmmov %vm17868_vm7  ;;  %v9038_v30 = vld [vmem:[%s17409_s7 + $0x978] sm:$0xff]  ;;  %v9037_v15 = vld [vmem:[%s17409_s7 + $0x970] sm:$0xff] }
0x1612   : > { %7433 = vst.msk [vmem:[#allocation5 + $0x8] sm:$0xff] %vm3441_vm12, %v7429_v21  ;;  %vm17879_vm12 = vmmov %vm17869_vm2  ;;  %v11171_v21 = vpack.c.bf16 %v9021_v8, %v9017_v59  ;;  %v11177_v18 = vpack.c.bf16 %v9038_v30, %v9034_v24  ;;  %v9105_v8 = vld [vmem:[%s17409_s7 + $0xb90] sm:$0xff]  ;;  %v9118_v24 = vld [vmem:[%s17409_s7 + $0xbf8] sm:$0xff] }
0x1613   : > { %8987 = vmatmul.mubr.msk.f32.vlgmr.msra.gmra.mrb[186].mxu0 %vm17875_vm8, %v16712_v35  ;;  %vm17886_vm7 = vmmov %vm17885_vm6  ;;  %v9111_v30 = vld [vmem:[%s17409_s7 + $0xbc0] sm:$0xff] }
0x1614   : > { %v7439_v0 = vpop.permute.xlu0 %7438  ;;  %v7469_v61 = vpop.permute.xlu1 %7468  ;;  %11016 = vmatpush1.bf16.msra.mxu0 %v11015_v63  ;;  %7670 = vmatprep.mubr.f32.mxu0 %v17826_v22  ;;  %vm17887_vm2 = vmmov %vm17885_vm6  ;;  %v9033_v63 = vld [vmem:[%s17409_s7 + $0x950] sm:$0xff] }
0x1615   : > { %7443 = vst.msk [vmem:[#allocation5 + $0x8] sm:$0xff] %vm3452_vm13, %v7439_v0  ;;  %11018 = vmatprep.subr.bf16.mxu0 %v11017_v9  ;;  %vm17880_vm13 = vmmov %vm17870_vm1  ;;  %v9046_v9 = vld [vmem:[%s17409_s7 + $0x9b8] sm:$0xff]  ;;  %v11179_v60 = vpack.c.bf16 %v9037_v15, %v9033_v63  ;;  %v11215_v63 = vpack.c.bf16 %v9109_v36, %v9105_v8  ;;  %v9113_v15 = vld [vmem:[%s17409_s7 + $0xbd0] sm:$0xff] }
0x1616   : > { %7453 = vst.msk [vmem:[#allocation5 + $0x8] sm:$0xff] %vm17876_vm9, %v7449_v32  ;;  %v11175_v32 = vpack.c.bf16 %v9029_v47, %v9025_v44  ;;  %v9050_v0 = vld [vmem:[%s17409_s7 + $0x9d8] sm:$0xff] }
0x1617   : > { %v9114_v44 = vld [vmem:[%s17409_s7 + $0xbd8] sm:$0xff] }
0x1618   : > { %v7459_v27 = vpop.permute.xlu0 %7458  ;;  %11020 = vmatpush1.bf16.msra.mxu0 %v11019_v43  ;;  %v7489_v6 = vpop.permute.xlu1 %7488  ;;  %v11183_v43 = vpack.c.bf16 %v9045_v51, %v9041_v25  ;;  %v9122_v51 = vld [vmem:[%s17409_s7 + $0xc18] sm:$0xff] }
0x1619   : > { %7463 = vst.msk [vmem:[#allocation5 + $0x8] sm:$0xff] %vm3474_vm15, %v7459_v27  ;;  %11022 = vmatprep.subr.bf16.mxu0 %v11021_v45  ;;  %vm17881_vm15 = vmmov %vm17871_vm14  ;;  %v11187_v27 = vpack.c.bf16 %v9053_v58, %v9049_v4  ;;  %v17888_v4 = vld [vmem:[#allocation16_spill] sm:$0xff]  ;;  %v9150_v8 = vld [vmem:[%s17409_s7 + $0xcf8] sm:$0xff] }
0x161a   : > { %7473 = vst.msk [vmem:[#allocation5 + $0x8] sm:$0xff] %vm17877_vm10, %v7469_v61  ;;  %v9054_v61 = vld [vmem:[%s17409_s7 + $0x9f8] sm:$0xff] }
0x161b   : > { %v11185_v45 = vpack.c.bf16 %v9054_v61, %v9050_v0  ;;  %v9126_v0 = vld [vmem:[%s17409_s7 + $0xc38] sm:$0xff] }
0x161c   : > { %v7479_v52 = vpop.permute.xlu0 %7478  ;;  %11024 = vmatpush1.bf16.msra.mxu0 %v11023_v49  ;;  %v7509_v26 = vpop.permute.xlu1 %7508  ;;  %v11189_v49 = vpack.c.bf16 %v9062_v39, %v9058_v33  ;;  %v17889_v33 = vld [vmem:[#allocation17_spill] sm:$0xff] }
0x161d   : > { %7483 = vst.msk [vmem:[#allocation5 + $0x8] sm:$0xff] %vm17878_vm11, %v7479_v52  ;;  %11026 = vmatprep.subr.bf16.mxu0 %v11025_v53  ;;  %v9061_v53 = vld [vmem:[%s17409_s7 + $0xa30] sm:$0xff] }
0x161e   : > { %7493 = vst.msk [vmem:[#allocation5 + $0x8] sm:$0xff] %vm17879_vm12, %v7489_v6  ;;  %v9057_v6 = vld [vmem:[%s17409_s7 + $0xa10] sm:$0xff] }
0x161f   : > { %v11191_v28 = vpack.c.bf16 %v9061_v53, %v9057_v6  ;;  %v9065_v52 = vld [vmem:[%s17409_s7 + $0xa50] sm:$0xff]  ;;  %v9123_v6 = vld [vmem:[%s17409_s7 + $0xc20] sm:$0xff] }
0x1620   : > { %v7499_v46 = vpop.permute.xlu0 %7498  ;;  %11028 = vmatpush1.bf16.msra.mxu0 %v11027_v17  ;;  %v7529_v1 = vpop.permute.xlu1 %7528  ;;  %v9069_v17 = vld [vmem:[%s17409_s7 + $0xa70] sm:$0xff] }
0x1621   : > { %7503 = vst.msk [vmem:[#allocation5 + $0x8] sm:$0xff] %vm17880_vm13, %v7499_v46  ;;  %11158 = vmatprep.subr.bf16.mxu0 %v11157_v12  ;;  %v9074_v12 = vld [vmem:[%s17409_s7 + $0xa98] sm:$0xff]  ;;  %v11195_v46 = vpack.c.bf16 %v9069_v17, %v9065_v52  ;;  %v9132_v17 = vld [vmem:[%s17409_s7 + $0xc68] sm:$0xff] }
0x1622   : > { %7513 = vst.msk [vmem:[#allocation5 + $0x8] sm:$0xff] %vm17881_vm15, %v7509_v26  ;;  %v9078_v26 = vld [vmem:[%s17409_s7 + $0xab8] sm:$0xff] }
0x1624   : > { %v7519_v31 = vpop.permute.xlu0 %7518 }
0x1625   : > { %7523 = vst.msk [vmem:[#allocation5 + $0x8] sm:$0xff] %vm17882_vm4, %v7519_v31  ;;  %v11197_v31 = vpack.c.bf16 %v9078_v26, %v9074_v12  ;;  %v9130_v12 = vld [vmem:[%s17409_s7 + $0xc58] sm:$0xff] }
0x1626   : > { %7533 = vst.msk [vmem:[#allocation5 + $0x8] sm:$0xff] %vm17883_vm5, %v7529_v1  ;;  %v9073_v1 = vld [vmem:[%s17409_s7 + $0xa90] sm:$0xff]  ;;  %v9134_v26 = vld [vmem:[%s17409_s7 + $0xc78] sm:$0xff] }
0x162d   : > { %v7535_v29 = vld [vmem:[#allocation5 + $0x8] sm:$0xff] }
0x162e   : > { %v7537_v14 = vadd.f32 %v7535_v29, %v17884_v55  ;;  %v9077_v29 = vld [vmem:[%s17409_s7 + $0xab0] sm:$0xff]  ;;  %v9082_v55 = vld [vmem:[%s17409_s7 + $0xad8] sm:$0xff] }
0x162f   : > { %v11199_v5 = vpack.c.bf16 %v9077_v29, %v9073_v1  ;;  %v9127_v29 = vld [vmem:[%s17409_s7 + $0xc40] sm:$0xff] }
0x1630   : > { %8988 = vmatmul.mubr.msk.f32.gmra.mrb[188].mxu0 %vm17885_vm6, %v7537_v14 }
0x1631   : > { %7741 = vmatprep.mubr.f32.mxu0 %v17826_v22 }
0x1634   : > { %8989 = vmatmul.mubr.msk.f32.vlgmr.msra.gmra.mrb[190].mxu0 %vm17886_vm7, %v16712_v35  ;;  %v9042_v35 = vld [vmem:[%s17409_s7 + $0x998] sm:$0xff] }
0x1635   : > { %7747 = vmatprep.mubr.f32.mxu0 %v17826_v22  ;;  %11160 = vmatpush1.bf16.msra.mxu0 %v11159_v11  ;;  %v9022_v22 = vld [vmem:[%s17409_s7 + $0x8f8] sm:$0xff]  ;;  %v11181_v38 = vpack.c.bf16 %v9046_v9, %v9042_v35  ;;  %v11217_v35 = vpack.c.bf16 %v9118_v24, %v9114_v44  ;;  %v9117_v9 = vld [vmem:[%s17409_s7 + $0xbf0] sm:$0xff] }
0x1636   : > { %11162 = vmatprep.subr.bf16.mxu0 %v11161_v2  ;;  %v11169_v10 = vpack.c.bf16 %v9022_v22, %v9018_v7  ;;  %v9090_v11 = vld [vmem:[%s17409_s7 + $0xb18] sm:$0xff]  ;;  %v9097_v7 = vld [vmem:[%s17409_s7 + $0xb50] sm:$0xff]  ;;  %v11219_v61 = vpack.c.bf16 %v9117_v9, %v9113_v15 }
0x1637   : > { %v9094_v2 = vld [vmem:[%s17409_s7 + $0xb38] sm:$0xff]  ;;  %v9101_v22 = vld [vmem:[%s17409_s7 + $0xb70] sm:$0xff] }
0x1638   : > { %8990 = vmatmul.mubr.msk.f32.gmra.mrb[192].mxu0 %vm17887_vm2, %v7537_v14  ;;  %v9086_v14 = vld [vmem:[%s17409_s7 + $0xaf8] sm:$0xff]  ;;  %v11205_v56 = vpack.c.bf16 %v9094_v2, %v9090_v11  ;;  %v11211_v59 = vpack.c.bf16 %v9101_v22, %v9097_v7  ;;  %v9136_v11 = vld [vmem:[%s17409_s7 + $0xc88] sm:$0xff]  ;;  %v9137_v7 = vld [vmem:[%s17409_s7 + $0xc90] sm:$0xff] }
0x1639   : > { %11164 = vmatpush1.bf16.msra.mxu0 %v11163_v20  ;;  %v11201_v34 = vpack.c.bf16 %v9086_v14, %v9082_v55  ;;  %v9098_v20 = vld [vmem:[%s17409_s7 + $0xb58] sm:$0xff]  ;;  %v9131_v55 = vld [vmem:[%s17409_s7 + $0xc60] sm:$0xff]  ;;  %v9140_v2 = vld [vmem:[%s17409_s7 + $0xca8] sm:$0xff] }
0x163a   : > { %11166 = vmatprep.subr.bf16.mxu0 %v11165_v13  ;;  %v9102_v13 = vld [vmem:[%s17409_s7 + $0xb78] sm:$0xff]  ;;  %v11099_v16 = vpack.c.bf16 %v9131_v55, %v9127_v29  ;;  %v9141_v22 = vld [vmem:[%s17409_s7 + $0xcb0] sm:$0xff] }
0x163b   : > { %v11209_v62 = vpack.c.bf16 %v9102_v13, %v9098_v20  ;;  %v9135_v20 = vld [vmem:[%s17409_s7 + $0xc80] sm:$0xff]  ;;  %v9145_v24 = vld [vmem:[%s17409_s7 + $0xcd0] sm:$0xff]  ;;  %v9158_v15 = vld [vmem:[%s17409_s7 + $0xd38] sm:$0xff] }
0x163c   : > { %v9139_v13 = vld [vmem:[%s17409_s7 + $0xca0] sm:$0xff] }
0x163d   : > { %11168 = vmatpush1.bf16.msra.mxu0 %v11167_v54  ;;  %v9106_v54 = vld [vmem:[%s17409_s7 + $0xb98] sm:$0xff]  ;;  %v11103_v36 = vpack.c.bf16 %v9139_v13, %v9135_v20  ;;  %v9175_v13 = vld [vmem:[%s17409_s7 + $0xdc0] sm:$0xff] }
0x163e   : > { %11170 = vmatprep.subr.bf16.mxu0 %v11169_v10  ;;  %v9110_v10 = vld [vmem:[%s17409_s7 + $0xbb8] sm:$0xff] }
0x163f   : > { %v11213_v41 = vpack.c.bf16 %v9110_v10, %v9106_v54  ;;  %v9144_v54 = vld [vmem:[%s17409_s7 + $0xcc8] sm:$0xff] }
0x1640   : > { %v9148_v10 = vld [vmem:[%s17409_s7 + $0xce8] sm:$0xff] }
0x1641   : > { %11172 = vmatpush1.bf16.msra.mxu0 %v11171_v21  ;;  %v9112_v21 = vld [vmem:[%s17409_s7 + $0xbc8] sm:$0xff]  ;;  %v11105_v44 = vpack.c.bf16 %v9148_v10, %v9144_v54  ;;  %v9177_v54 = vld [vmem:[%s17409_s7 + $0xdd0] sm:$0xff] }
0x1642   : > { %11174 = vmatprep.subr.bf16.mxu0 %v11173_v40  ;;  %v9116_v40 = vld [vmem:[%s17409_s7 + $0xbe8] sm:$0xff]  ;;  %v9181_v10 = vld [vmem:[%s17409_s7 + $0xdf0] sm:$0xff] }
0x1643   : > { %v11089_v47 = vpack.c.bf16 %v9116_v40, %v9112_v21  ;;  %v9143_v21 = vld [vmem:[%s17409_s7 + $0xcc0] sm:$0xff] }
0x1644   : > { %v9147_v40 = vld [vmem:[%s17409_s7 + $0xce0] sm:$0xff] }
0x1645   : > { %11176 = vmatpush1.bf16.msra.mxu0 %v11175_v32  ;;  %v9115_v32 = vld [vmem:[%s17409_s7 + $0xbe0] sm:$0xff]  ;;  %11090 = vmatprep.subr.bf16.mxu1 %v11089_v47 }
0x1646   : > { %11178 = vmatprep.subr.bf16.mxu0 %v11177_v18  ;;  %v11091_v18 = vpack.c.bf16 %v9115_v32, %v9111_v30  ;;  %v9149_v30 = vld [vmem:[%s17409_s7 + $0xcf0] sm:$0xff]  ;;  %v9152_v32 = vld [vmem:[%s17409_s7 + $0xd08] sm:$0xff] }
0x1647   : > { %v11235_v9 = vpack.c.bf16 %v9149_v30, %v9145_v24  ;;  %v9190_v24 = vld [vmem:[%s17409_s7 + $0xe38] sm:$0xff]  ;;  %v9183_v30 = vld [vmem:[%s17409_s7 + $0xe00] sm:$0xff] }
0x1648   : > { %11092 = vmatpush1.bf16.msra.mxu1 %v11091_v18  ;;  %v9156_v18 = vld [vmem:[%s17409_s7 + $0xd28] sm:$0xff] }
0x1649   : > { %11180 = vmatpush1.bf16.msra.mxu0 %v11179_v60  ;;  %v9120_v60 = vld [vmem:[%s17409_s7 + $0xc08] sm:$0xff] }
0x164a   : > { %11182 = vmatprep.subr.bf16.mxu0 %v11181_v38  ;;  %v9124_v38 = vld [vmem:[%s17409_s7 + $0xc28] sm:$0xff] }
0x164b   : > { %v11093_v25 = vpack.c.bf16 %v9124_v38, %v9120_v60  ;;  %v9151_v60 = vld [vmem:[%s17409_s7 + $0xd00] sm:$0xff] }
0x164c   : > { %v9155_v38 = vld [vmem:[%s17409_s7 + $0xd20] sm:$0xff] }
0x164d   : > { %11184 = vmatpush1.bf16.msra.mxu0 %v11183_v43  ;;  %11094 = vmatprep.subr.bf16.mxu1 %v11093_v25  ;;  %v11221_v43 = vpack.c.bf16 %v9126_v0, %v9122_v51  ;;  %v11109_v25 = vpack.c.bf16 %v9156_v18, %v9152_v32  ;;  %v9153_v0 = vld [vmem:[%s17409_s7 + $0xd10] sm:$0xff]  ;;  %v9187_v32 = vld [vmem:[%s17409_s7 + $0xe20] sm:$0xff] }
0x164e   : > { %11186 = vmatprep.subr.bf16.mxu0 %v11185_v45  ;;  %v16984_v45 = vld [vmem:[%s17408_s6 + $0x4] sm:$0xf] }
0x164f   : > { %v16988_v58 = vrot.slane %v16984_v45, %v17888_v4  ;;  %v16992_v39 = vrot.slane %v16984_v45, %v17889_v33 }
0x1651   : > { %11188 = vmatpush1.bf16.msra.mxu0 %v11187_v27 }
0x1652   : > { %11190 = vmatprep.subr.bf16.mxu0 %v11189_v49  ;;  %v9119_v49 = vld [vmem:[%s17409_s7 + $0xc00] sm:$0xff] }
0x1655   : > { %11192 = vmatpush1.bf16.msra.mxu0 %v11191_v28  ;;  %v9125_v28 = vld [vmem:[%s17409_s7 + $0xc30] sm:$0xff] }
0x1656   : > { %11194 = vmatprep.subr.bf16.mxu0 %v11193_v57  ;;  %v9128_v57 = vld [vmem:[%s17409_s7 + $0xc48] sm:$0xff]  ;;  %v11223_v1 = vpack.c.bf16 %v9125_v28, %v9121_v23  ;;  %v9159_v23 = vld [vmem:[%s17409_s7 + $0xd40] sm:$0xff] }
0x1657   : > { %v9163_v28 = vld [vmem:[%s17409_s7 + $0xd60] sm:$0xff] }
0x1658   : > { %v11115_v29 = vpack.c.bf16 %v9163_v28, %v9159_v23 }
0x1659   : > { %11196 = vmatpush1.bf16.msra.mxu0 %v11195_v46 }
0x165a   : > { %11198 = vmatprep.subr.bf16.mxu0 %v11197_v31  ;;  %v11095_v31 = vpack.c.bf16 %v9123_v6, %v9119_v49  ;;  %v9162_v49 = vld [vmem:[%s17409_s7 + $0xd58] sm:$0xff] }
0x165b   : > { %v9166_v6 = vld [vmem:[%s17409_s7 + $0xd78] sm:$0xff] }
0x165d   : > { %11200 = vmatpush1.bf16.msra.mxu0 %v11199_v5  ;;  %v11097_v5 = vpack.c.bf16 %v9132_v17, %v9128_v57  ;;  %v9161_v17 = vld [vmem:[%s17409_s7 + $0xd50] sm:$0xff] }
0x165e   : > { %11202 = vmatprep.subr.bf16.mxu0 %v11201_v34  ;;  %v11225_v34 = vpack.c.bf16 %v9134_v26, %v9130_v12  ;;  %v9165_v12 = vld [vmem:[%s17409_s7 + $0xd70] sm:$0xff]  ;;  %v9168_v26 = vld [vmem:[%s17409_s7 + $0xd88] sm:$0xff] }
0x165f   : > { %v11243_v55 = vpack.c.bf16 %v9165_v12, %v9161_v17  ;;  %v9193_v17 = vld [vmem:[%s17409_s7 + $0xe50] sm:$0xff] }
0x1660   : > { %v9197_v12 = vld [vmem:[%s17409_s7 + $0xe70] sm:$0xff] }
0x1661   : > { %11204 = vmatpush1.bf16.msra.mxu0 %v11203_v19  ;;  %v9138_v19 = vld [vmem:[%s17409_s7 + $0xc98] sm:$0xff] }
0x1662   : > { %11206 = vmatprep.subr.bf16.mxu0 %v11205_v56  ;;  %v9142_v56 = vld [vmem:[%s17409_s7 + $0xcb8] sm:$0xff] }
0x1665   : > { %11208 = vmatpush1.bf16.msra.mxu0 %v11207_v37  ;;  %v11101_v37 = vpack.c.bf16 %v9140_v2, %v9136_v11  ;;  %v9173_v11 = vld [vmem:[%s17409_s7 + $0xdb0] sm:$0xff]  ;;  %v9176_v2 = vld [vmem:[%s17409_s7 + $0xdc8] sm:$0xff] }
0x1666   : > { %11210 = vmatprep.subr.bf16.mxu0 %v11209_v62  ;;  %v11229_v62 = vpack.c.bf16 %v9142_v56, %v9138_v19  ;;  %v9180_v19 = vld [vmem:[%s17409_s7 + $0xde8] sm:$0xff]  ;;  %v9178_v56 = vld [vmem:[%s17409_s7 + $0xdd8] sm:$0xff]  ;;  %v11247_v20 = vpack.c.bf16 %v9173_v11, %v9169_v3  ;;  %v9201_v11 = vld [vmem:[%s17409_s7 + $0xe90] sm:$0xff] }
0x1669   : > { %11212 = vmatpush1.bf16.msra.mxu0 %v11211_v59  ;;  %v9146_v59 = vld [vmem:[%s17409_s7 + $0xcd8] sm:$0xff] }
0x166a   : > { %11214 = vmatprep.subr.bf16.mxu0 %v11213_v41  ;;  %v11231_v41 = vpack.c.bf16 %v9141_v22, %v9137_v7  ;;  %v11233_v47 = vpack.c.bf16 %v9150_v8, %v9146_v59  ;;  %v9179_v22 = vld [vmem:[%s17409_s7 + $0xde0] sm:$0xff]  ;;  %v9184_v8 = vld [vmem:[%s17409_s7 + $0xe08] sm:$0xff] }
0x166d   : > { %11216 = vmatpush1.bf16.msra.mxu0 %v11215_v63  ;;  %v9154_v63 = vld [vmem:[%s17409_s7 + $0xd18] sm:$0xff] }
0x166e   : > { %11218 = vmatprep.subr.bf16.mxu0 %v11217_v35  ;;  %v11107_v35 = vpack.c.bf16 %v9147_v40, %v9143_v21  ;;  %v11237_v51 = vpack.c.bf16 %v9158_v15, %v9154_v63  ;;  %v17890_v21 = vld [vmem:[#allocation21_spill] sm:$0xff] }
0x166f   : > { %v17183_v40 = vrot.slane %v16984_v45, %v17890_v21  ;;  %v9185_v15 = vld [vmem:[%s17409_s7 + $0xe10] sm:$0xff] }
0x1671   : > { %11220 = vmatpush1.bf16.msra.mxu0 %v11219_v61  ;;  %v9157_v61 = vld [vmem:[%s17409_s7 + $0xd30] sm:$0xff] }
0x1672   : > { %11222 = vmatprep.subr.bf16.mxu0 %v11221_v43  ;;  %v9160_v43 = vld [vmem:[%s17409_s7 + $0xd48] sm:$0xff] }
0x16e6   : > { %v7666_v27 = vpop.f32.mrb[186].mxu0 }
0x16e7   : > { %v7667_v53 = vadd.f32 %v7666_v27, %v16988_v58  ;;  %v7668_v48 = vpop.f32.mrb[187].mxu0  ;;  %v9164_v27 = vld [vmem:[%s17409_s7 + $0xd68] sm:$0xff] }
0x16e8   : > { %v7669_v52 = vadd.f32 %v7668_v48, %v16992_v39  ;;  %v11239_v48 = vpack.c.bf16 %v9157_v61, %v9153_v0  ;;  %v11113_v57 = vpack.c.bf16 %v9164_v27, %v9160_v43  ;;  %v9194_v0 = vld [vmem:[%s17409_s7 + $0xe58] sm:$0xff] }
0x16e9   : > { %v7754_v14 = vmax.f32 %v7667_v53, 0.0  ;;  %v11111_v53 = vpack.c.bf16 %v9155_v38, %v9151_v60  ;;  %v9198_v61 = vld [vmem:[%s17409_s7 + $0xe78] sm:$0xff] }
0x16ea   : > { %v7755_v46 = vmax.f32 %v7669_v52, 0.0  ;;  %v11241_v52 = vpack.c.bf16 %v9166_v6, %v9162_v49  ;;  %v11127_v49 = vpack.c.bf16 %v9187_v32, %v9183_v30  ;;  %v9217_v32 = vld [vmem:[%s17409_s7 + $0xf10] sm:$0xff] }
0x16ec   : > { %8106 = vmatprep.mubr.f32.mxu1 %v7755_v46  ;;  %8260 = vmatprep.mubr.f32.mxu0 %v7755_v46  ;;  %v9172_v46 = vld [vmem:[%s17409_s7 + $0xda8] sm:$0xff] }
0x16ed   : > { %8107 = vmatmul.mubr.f32.vlgmr.msra.gmra.mrb[254].mxu1 %v7754_v14  ;;  %8261 = vmatmul.mubr.f32.vlgmr.msra.gmra.mrb[194].mxu0 %v7754_v14  ;;  %v9167_v14 = vld [vmem:[%s17409_s7 + $0xd80] sm:$0xff] }
0x16ee   : > { %11096 = vmatpush1.bf16.msra.mxu1 %v11095_v31  ;;  %11224 = vmatpush1.bf16.msra.mxu0 %v11223_v1  ;;  %v9170_v31 = vld [vmem:[%s17409_s7 + $0xd98] sm:$0xff] }
0x16ef   : > { %11098 = vmatprep.subr.bf16.mxu1 %v11097_v5  ;;  %11226 = vmatprep.subr.bf16.mxu0 %v11225_v34  ;;  %v9174_v1 = vld [vmem:[%s17409_s7 + $0xdb8] sm:$0xff]  ;;  %v9171_v5 = vld [vmem:[%s17409_s7 + $0xda0] sm:$0xff]  ;;  %v11117_v34 = vpack.c.bf16 %v9172_v46, %v9168_v26  ;;  %v9200_v26 = vld [vmem:[%s17409_s7 + $0xe88] sm:$0xff] }
0x16f0   : > { %v11245_v50 = vpack.c.bf16 %v9174_v1, %v9170_v31  ;;  %v9204_v31 = vld [vmem:[%s17409_s7 + $0xea8] sm:$0xff]  ;;  %v9202_v1 = vld [vmem:[%s17409_s7 + $0xe98] sm:$0xff] }
0x16f2   : > { %11100 = vmatpush1.bf16.msra.mxu1 %v11099_v16  ;;  %11228 = vmatpush1.bf16.msra.mxu0 %v11227_v42  ;;  %v9182_v16 = vld [vmem:[%s17409_s7 + $0xdf8] sm:$0xff]  ;;  %v11119_v42 = vpack.c.bf16 %v9171_v5, %v9167_v14  ;;  %v11259_v14 = vpack.c.bf16 %v9197_v12, %v9193_v17  ;;  %v9199_v5 = vld [vmem:[%s17409_s7 + $0xe80] sm:$0xff] }
0x16f3   : > { %11102 = vmatprep.subr.bf16.mxu1 %v11101_v37  ;;  %11230 = vmatprep.subr.bf16.mxu0 %v11229_v62  ;;  %v11121_v62 = vpack.c.bf16 %v9180_v19, %v9176_v2  ;;  %v11249_v7 = vpack.c.bf16 %v9182_v16, %v9178_v56  ;;  %v9205_v2 = vld [vmem:[%s17409_s7 + $0xeb0] sm:$0xff]  ;;  %v9208_v19 = vld [vmem:[%s17409_s7 + $0xec8] sm:$0xff]  ;;  %v9210_v16 = vld [vmem:[%s17409_s7 + $0xed8] sm:$0xff] }
0x16f4   : > { %v9212_v56 = vld [vmem:[%s17409_s7 + $0xee8] sm:$0xff]  ;;  %v9231_v17 = vld [vmem:[%s17409_s7 + $0xf80] sm:$0xff] }
0x16f5   : > { %v9235_v12 = vld [vmem:[%s17409_s7 + $0xfa0] sm:$0xff] }
0x16f6   : > { %11104 = vmatpush1.bf16.msra.mxu1 %v11103_v36  ;;  %11232 = vmatpush1.bf16.msra.mxu0 %v11231_v41 }
0x16f7   : > { %11106 = vmatprep.subr.bf16.mxu1 %v11105_v44  ;;  %11234 = vmatprep.subr.bf16.mxu0 %v11233_v47  ;;  %v9188_v44 = vld [vmem:[%s17409_s7 + $0xe28] sm:$0xff]  ;;  %v9186_v47 = vld [vmem:[%s17409_s7 + $0xe18] sm:$0xff] }
0x16f8   : > { %v11125_v38 = vpack.c.bf16 %v9188_v44, %v9184_v8  ;;  %v9220_v8 = vld [vmem:[%s17409_s7 + $0xf28] sm:$0xff] }
0x16fa   : > { %11108 = vmatpush1.bf16.msra.mxu1 %v11107_v35  ;;  %11236 = vmatpush1.bf16.msra.mxu0 %v11235_v9  ;;  %v9189_v35 = vld [vmem:[%s17409_s7 + $0xe30] sm:$0xff]  ;;  %v9192_v9 = vld [vmem:[%s17409_s7 + $0xe48] sm:$0xff] }
0x16fb   : > { %11110 = vmatprep.subr.bf16.mxu1 %v11109_v25  ;;  %11238 = vmatprep.subr.bf16.mxu0 %v11237_v51  ;;  %v11253_v25 = vpack.c.bf16 %v9190_v24, %v9186_v47  ;;  %v9196_v51 = vld [vmem:[%s17409_s7 + $0xe68] sm:$0xff]  ;;  %v11255_v6 = vpack.c.bf16 %v9189_v35, %v9185_v15  ;;  %v9215_v24 = vld [vmem:[%s17409_s7 + $0xf00] sm:$0xff] }
0x16fc   : > { %v9224_v15 = vld [vmem:[%s17409_s7 + $0xf48] sm:$0xff] }
0x16fd   : > { %v9228_v35 = vld [vmem:[%s17409_s7 + $0xf68] sm:$0xff] }
0x16fe   : > { %11112 = vmatpush1.bf16.msra.mxu1 %v11111_v53  ;;  %11240 = vmatpush1.bf16.msra.mxu0 %v11239_v48  ;;  %v9191_v53 = vld [vmem:[%s17409_s7 + $0xe40] sm:$0xff] }
0x16ff   : > { %11114 = vmatprep.subr.bf16.mxu1 %v11113_v57  ;;  %11242 = vmatprep.subr.bf16.mxu0 %v11241_v52  ;;  %v9195_v48 = vld [vmem:[%s17409_s7 + $0xe60] sm:$0xff]  ;;  %v11129_v57 = vpack.c.bf16 %v9196_v51, %v9192_v9  ;;  %v11257_v52 = vpack.c.bf16 %v9198_v61, %v9194_v0  ;;  %v9226_v9 = vld [vmem:[%s17409_s7 + $0xf58] sm:$0xff]  ;;  %v11145_v61 = vpack.c.bf16 %v9228_v35, %v9224_v15 }
0x1700   : > { %v9223_v51 = vld [vmem:[%s17409_s7 + $0xf40] sm:$0xff] }
0x1701   : > { %v9227_v0 = vld [vmem:[%s17409_s7 + $0xf60] sm:$0xff] }
0x1702   : > { %11116 = vmatpush1.bf16.msra.mxu1 %v11115_v29  ;;  %11244 = vmatpush1.bf16.msra.mxu0 %v11243_v55  ;;  %v9206_v29 = vld [vmem:[%s17409_s7 + $0xeb8] sm:$0xff]  ;;  %v11131_v55 = vpack.c.bf16 %v9195_v48, %v9191_v53  ;;  %v9236_v53 = vld [vmem:[%s17409_s7 + $0xfa8] sm:$0xff] }
0x1703   : > { %v7672_v37 = vpop.f32.mrb[188].mxu0  ;;  %11118 = vmatprep.subr.bf16.mxu1 %v11117_v34  ;;  %11246 = vmatprep.subr.bf16.mxu0 %v11245_v50  ;;  %v9203_v34 = vld [vmem:[%s17409_s7 + $0xea0] sm:$0xff]  ;;  %v11133_v50 = vpack.c.bf16 %v9204_v31, %v9200_v26  ;;  %v11261_v3 = vpack.c.bf16 %v9206_v29, %v9202_v1  ;;  %v9234_v48 = vld [vmem:[%s17409_s7 + $0xf98] sm:$0xff]  ;;  %v9233_v1 = vld [vmem:[%s17409_s7 + $0xf90] sm:$0xff] }
0x1704   : > { %v7674_v59 = vpop.f32.mrb[189].mxu0  ;;  %v7673_v36 = vadd.f32 %v7672_v37, %v16988_v58  ;;  %v11123_v58 = vpack.c.bf16 %v9179_v22, %v9175_v13  ;;  %v11263_v13 = vpack.c.bf16 %v9205_v2, %v9201_v11  ;;  %v9207_v37 = vld [vmem:[%s17409_s7 + $0xec0] sm:$0xff]  ;;  %v9237_v29 = vld [vmem:[%s17409_s7 + $0xfb0] sm:$0xff]  ;;  %v17891_v2 = vld [vmem:[#allocation20_spill] sm:$0xff] }
0x1705   : > { %v7675_v41 = vadd.f32 %v7674_v59, %v16992_v39  ;;  %v11251_v39 = vpack.c.bf16 %v9181_v10, %v9177_v54  ;;  %v9209_v54 = vld [vmem:[%s17409_s7 + $0xed0] sm:$0xff]  ;;  %v9216_v59 = vld [vmem:[%s17409_s7 + $0xf08] sm:$0xff]  ;;  %v9239_v11 = vld [vmem:[%s17409_s7 + $0xfc0] sm:$0xff] }
0x1706   : > { %11120 = vmatpush1.bf16.msra.mxu1 %v11119_v42  ;;  %11248 = vmatpush1.bf16.msra.mxu0 %v11247_v20  ;;  %v7758_v43 = vmax.f32 %v7673_v36, 0.0  ;;  %v9214_v42 = vld [vmem:[%s17409_s7 + $0xef8] sm:$0xff]  ;;  %v11135_v20 = vpack.c.bf16 %v9203_v34, %v9199_v5  ;;  %v9213_v10 = vld [vmem:[%s17409_s7 + $0xef0] sm:$0xff] }
0x1707   : > { %v7759_v18 = vmax.f32 %v7675_v41, 0.0  ;;  %v17200_v63 = vpop.f32.mrb[190].mxu0  ;;  %11122 = vmatprep.subr.bf16.mxu1 %v11121_v62  ;;  %11250 = vmatprep.subr.bf16.mxu0 %v11249_v7  ;;  %v9211_v62 = vld [vmem:[%s17409_s7 + $0xee0] sm:$0xff]  ;;  %v11137_v7 = vpack.c.bf16 %v9212_v56, %v9208_v19  ;;  %v11265_v22 = vpack.c.bf16 %v9214_v42, %v9210_v16  ;;  %v9218_v36 = vld [vmem:[%s17409_s7 + $0xf18] sm:$0xff]  ;;  %v11267_v47 = vpack.c.bf16 %v9213_v10, %v9209_v54 }
0x1708   : > { %v7745_v60 = vpop.f32.mrb[191].mxu0  ;;  %v9222_v41 = vld [vmem:[%s17409_s7 + $0xf38] sm:$0xff]  ;;  %v11139_v44 = vpack.c.bf16 %v9211_v62, %v9207_v37  ;;  %v7585_v19 = vrot.slane %v16984_v45, %v17891_v2  ;;  %v9243_v42 = vld [vmem:[%s17409_s7 + $0xfe0] sm:$0xff] }
0x1709   : > { %v7746_v27 = vadd.f32 %v7745_v60, %v17183_v40  ;;  %8112 = vmatprep.mubr.f32.mxu1 %v7759_v18  ;;  %8266 = vmatprep.mubr.f32.mxu0 %v7759_v18  ;;  %v11269_v30 = vpack.c.bf16 %v9222_v41, %v9218_v36  ;;  %v9221_v18 = vld [vmem:[%s17409_s7 + $0xf30] sm:$0xff]  ;;  %v9230_v60 = vld [vmem:[%s17409_s7 + $0xf78] sm:$0xff]  ;;  %v11155_v37 = vpack.c.bf16 %v9243_v42, %v9239_v11 }
0x170a   : > { %11124 = vmatpush1.bf16.msra.mxu1 %v11123_v58  ;;  %11252 = vmatpush1.bf16.msra.mxu0 %v11251_v39  ;;  %v9219_v58 = vld [vmem:[%s17409_s7 + $0xf20] sm:$0xff]  ;;  %v11141_v39 = vpack.c.bf16 %v9220_v8, %v9216_v59  ;;  %v9242_v5 = vld [vmem:[%s17409_s7 + $0xfd8] sm:$0xff]  ;;  %v7744_v62 = vadd.f32 %v17200_v63, %v7585_v19 }
0x170b   : > { %v7757_v23 = vmax.f32 %v7746_v27, 0.0  ;;  %8113 = vmatmul.mubr.f32.gmra.mrb[0].mxu1 %v7758_v43  ;;  %8267 = vmatmul.mubr.f32.gmra.mrb[196].mxu0 %v7758_v43  ;;  %v17227_v28 = vpop.f32.mrb[192].mxu0  ;;  %v11273_v43 = vpack.c.bf16 %v9230_v60, %v9226_v9  ;;  %v9225_v27 = vld [vmem:[%s17409_s7 + $0xf50] sm:$0xff]  ;;  %v9246_v34 = vld [vmem:[%s17409_s7 + $0xff8] sm:$0xff]  ;;  %v9247_v63 = vld [vmem:[%s17410_s8 + $0x4] sm:$0xf] }
0x170c   : > { %v17238_v46 = vpop.f32.mrb[193].mxu0  ;;  %11126 = vmatprep.subr.bf16.mxu1 %v11125_v38  ;;  %11254 = vmatprep.subr.bf16.mxu0 %v11253_v25  ;;  %v11143_v38 = vpack.c.bf16 %v9219_v58, %v9215_v24  ;;  %v11271_v25 = vpack.c.bf16 %v9221_v18, %v9217_v32  ;;  %v11281_v16 = vpack.c.bf16 %v9246_v34, %v9242_v5 }
0x170d   : > { %8183 = vmatprep.mubr.f32.mxu1 %v7757_v23  ;;  %8337 = vmatprep.mubr.f32.mxu0 %v7757_v23  ;;  %v9238_v23 = vld [vmem:[%s17409_s7 + $0xfb8] sm:$0xff]  ;;  %v7750_v54 = vadd.f32 %v17227_v28, %v7585_v19  ;;  %v8029_v8 = vrot.slane %v9247_v63, %v17889_v33  ;;  %v8037_v28 = vrot.slane %v9247_v63, %v17890_v21 }
0x170e   : > { %11128 = vmatpush1.bf16.msra.mxu1 %v11127_v49  ;;  %11256 = vmatpush1.bf16.msra.mxu0 %v11255_v6  ;;  %v9229_v49 = vld [vmem:[%s17409_s7 + $0xf70] sm:$0xff]  ;;  %v9232_v6 = vld [vmem:[%s17409_s7 + $0xf88] sm:$0xff]  ;;  %v11277_v31 = vpack.c.bf16 %v9238_v23, %v9234_v48 }
0x170f   : > { %11130 = vmatprep.subr.bf16.mxu1 %v11129_v57  ;;  %11258 = vmatprep.subr.bf16.mxu0 %v11257_v52  ;;  %v11147_v57 = vpack.c.bf16 %v9227_v0, %v9223_v51  ;;  %v11275_v52 = vpack.c.bf16 %v9229_v49, %v9225_v27  ;;  %v11149_v26 = vpack.c.bf16 %v9236_v53, %v9232_v6  ;;  %v7760_v59 = vmax.f32 %v7750_v54, 0.0 }
0x1712   : > { %11132 = vmatpush1.bf16.msra.mxu1 %v11131_v55  ;;  %11260 = vmatpush1.bf16.msra.mxu0 %v11259_v14  ;;  %v9240_v55 = vld [vmem:[%s17409_s7 + $0xfc8] sm:$0xff] }
0x1713   : > { %11134 = vmatprep.subr.bf16.mxu1 %v11133_v50  ;;  %11262 = vmatprep.subr.bf16.mxu0 %v11261_v3  ;;  %v9244_v14 = vld [vmem:[%s17409_s7 + $0xfe8] sm:$0xff]  ;;  %v11151_v50 = vpack.c.bf16 %v9235_v12, %v9231_v17  ;;  %v11279_v3 = vpack.c.bf16 %v9237_v29, %v9233_v1 }
0x1714   : > { %v11153_v56 = vpack.c.bf16 %v9244_v14, %v9240_v55 }
0x1716   : > { %11136 = vmatpush1.bf16.msra.mxu1 %v11135_v20  ;;  %11264 = vmatpush1.bf16.msra.mxu0 %v11263_v13  ;;  %v9241_v20 = vld [vmem:[%s17409_s7 + $0xfd0] sm:$0xff] }
0x1717   : > { %11138 = vmatprep.subr.bf16.mxu1 %v11137_v7  ;;  %11266 = vmatprep.subr.bf16.mxu0 %v11265_v22  ;;  %v9245_v13 = vld [vmem:[%s17409_s7 + $0xff0] sm:$0xff]  ;;  %v7752_v7 = vadd.f32 %v17238_v46, %v17183_v40  ;;  %v7756_v22 = vmax.f32 %v7744_v62, 0.0  ;;  %v8025_v40 = vrot.slane %v9247_v63, %v17888_v4  ;;  %v8033_v46 = vrot.slane %v9247_v63, %v17891_v2 }
0x1718   : > { %v11283_v45 = vpack.c.bf16 %v9245_v13, %v9241_v20 }
0x1719   : > { %v7761_v10 = vmax.f32 %v7752_v7, 0.0 }
0x171a   : > { %11140 = vmatpush1.bf16.msra.mxu1 %v11139_v44  ;;  %11268 = vmatpush1.bf16.msra.mxu0 %v11267_v47 }
0x171b   : > { %11142 = vmatprep.subr.bf16.mxu1 %v11141_v39  ;;  %11270 = vmatprep.subr.bf16.mxu0 %v11269_v30 }
0x171e   : > { %11144 = vmatpush1.bf16.msra.mxu1 %v11143_v38  ;;  %11272 = vmatpush1.bf16.msra.mxu0 %v11271_v25 }
0x171f   : > { %11146 = vmatprep.subr.bf16.mxu1 %v11145_v61  ;;  %11274 = vmatprep.subr.bf16.mxu0 %v11273_v43 }
0x1722   : > { %11148 = vmatpush1.bf16.msra.mxu1 %v11147_v57  ;;  %11276 = vmatpush1.bf16.msra.mxu0 %v11275_v52 }
0x1723   : > { %11150 = vmatprep.subr.bf16.mxu1 %v11149_v26  ;;  %11278 = vmatprep.subr.bf16.mxu0 %v11277_v31 }
0x1726   : > { %11152 = vmatpush1.bf16.msra.mxu1 %v11151_v50  ;;  %11280 = vmatpush1.bf16.msra.mxu0 %v11279_v3 }
0x1727   : > { %11154 = vmatprep.subr.bf16.mxu1 %v11153_v56  ;;  %11282 = vmatprep.subr.bf16.mxu0 %v11281_v16 }
0x172a   : > { %11156 = vmatpush1.bf16.msra.mxu1 %v11155_v37  ;;  %11284 = vmatpush1.bf16.msra.mxu0 %v11283_v45 }
0x172d   : > { %8184 = vmatmul.mubr.f32.vlgmr.msra.gmra.mrb[254].mxu1 %v7756_v22  ;;  %8338 = vmatmul.mubr.f32.vlgmr.msra.gmra.mrb[194].mxu0 %v7756_v22 }
0x172e   : > { %8189 = vmatprep.mubr.f32.mxu1 %v7761_v10  ;;  %8343 = vmatprep.mubr.f32.mxu0 %v7761_v10 }
0x1731   : > { %8190 = vmatmul.mubr.f32.gmra.mrb[0].mxu1 %v7760_v59  ;;  %8344 = vmatmul.mubr.f32.gmra.mrb[196].mxu0 %v7760_v59 }
0x1800   : > { %v8185_v36 = vpop.f32.mrb[254].mxu1  ;;  %v8339_v41 = vpop.f32.mrb[194].mxu0 }
0x1801   : > { %v11325_v44 = vadd.f32 %v8185_v36, %v8025_v40  ;;  %v11329_v47 = vadd.f32 %v8339_v41, %v8033_v46  ;;  %v8187_v24 = vpop.f32.mrb[255].mxu1  ;;  %v8341_v58 = vpop.f32.mrb[195].mxu0 }
0x1802   : > { %v11326_v39 = vadd.f32 %v8187_v24, %v8029_v8  ;;  %v11330_v30 = vadd.f32 %v8341_v58, %v8037_v28 }
0x1803   : > { %8350 = vst [vmem:[%s372_s17] sm:$0xff] %v11325_v44  ;;  %8352 = vst [vmem:[%s372_s17 + $0x10] sm:$0xff] %v11329_v47 }
0x1804   : > { %8351 = vst [vmem:[%s372_s17 + $0x8] sm:$0xff] %v11326_v39  ;;  %8353 = vst [vmem:[%s372_s17 + $0x18] sm:$0xff] %v11330_v30  ;;  %v8191_v4 = vpop.f32.mrb[0].mxu1  ;;  %v8345_v33 = vpop.f32.mrb[196].mxu0 }
0x1805   : > { %v11327_v21 = vadd.f32 %v8191_v4, %v8025_v40  ;;  %v11331_v32 = vadd.f32 %v8345_v33, %v8033_v46  ;;  %v8193_v18 = vpop.f32.mrb[1].mxu1  ;;  %v8347_v15 = vpop.f32.mrb[197].mxu0 }
0x1806   : > { %v11328_v35 = vadd.f32 %v8193_v18, %v8029_v8  ;;  %v11332_v9 = vadd.f32 %v8347_v15, %v8037_v28 }
0x1807   : > { %8354 = vst [vmem:[%s372_s17 + $0x20] sm:$0xff] %v11327_v21  ;;  %8356 = vst [vmem:[%s372_s17 + $0x30] sm:$0xff] %v11331_v32 }
0x1808   : > { %8355 = vst [vmem:[%s372_s17 + $0x28] sm:$0xff] %v11328_v35  ;;  %8357 = vst [vmem:[%s372_s17 + $0x38] sm:$0xff] %v11332_v9 }
0x1809 PF: > { %s21_s13 = sadd.s32 1, %s12102_s13  }
0x180a   : > { %p18_p4 = scmp.ge.s32.totalorder %s21_s13, 4  }
0x180c   :  { %20 = sbr.rel (!%p18_p4) target bundleno = 3 (0x3), region = 110 }

</bundles_post_ra>
